<compile_context>
chip_gen: v7x
topology: tpu7x:2x2x1
jax: 0.10.0
libtpu: 0.0.40
codegen_flags: <defaults>
</compile_context>

<pallas_src>
import functools

import jax
import jax.numpy as jnp
from jax import lax
from jax.experimental import pallas as pl
from jax.experimental.pallas import tpu as pltpu


def _deconv_subpixel_kernel(a_ref, b_ref, bias_ref, o_ref, *, n_phase, c_pad):
    # a_ref:    (n_phase, tm, K)       bf16  per-phase im2col tiles (K = 8*Cin)
    # b_ref:    (n_phase, K, c_pad)    bf16  per-phase 2x2x2 effective kernels
    # bias_ref: (1, n_phase * c_pad)   f32
    # o_ref:    (tm, n_phase * c_pad)  f32   lane-dense output tile (multiple of 128)
    for p in range(n_phase):
        acc = jnp.dot(a_ref[p], b_ref[p], preferred_element_type=jnp.float32)
        acc = acc + bias_ref[:, p * c_pad:(p + 1) * c_pad]
        o_ref[:, p * c_pad:(p + 1) * c_pad] = jnp.maximum(acc, 0.0).astype(o_ref.dtype)


def _round_up(a, b):
    return ((a + b - 1) // b) * b


def deconv3d_block(x, weight, bias, *, kernel=4, stride=2, padding=1, tm=512):
    """ConvTranspose3d(kernel=4, stride=2, padding=1, bias=True) followed by ReLU.

    x:      (N, Cin, D, H, W)     float32
    weight: (Cin, Cout, k, k, k)  float32  (PyTorch ConvTranspose3d layout)
    bias:   (Cout,)               float32
    returns (N, Cout, 2D, 2H, 2W) float32
    """
    if not (kernel == 4 and stride == 2 and padding == 1):
        # TODO(synk): sub-pixel decomposition below is specialized to the module
        # defaults (kernel=4, stride=2, padding=1) used by Deconv3D_Block.
        raise NotImplementedError("deconv3d_block supports kernel=4, stride=2, padding=1")

    N, Cin, D, H, W = x.shape
    Cout = weight.shape[1]
    Dout, Hout, Wout = 2 * D, 2 * H, 2 * W
    M = N * D * H * W
    n_phase = 8                       # stride**3 output parity classes
    K = 8 * Cin                       # 2x2x2 effective taps per phase
    c_pad = _round_up(Cout, 16)       # n_phase * c_pad is a multiple of 128

    # ---- glue: per-phase im2col (only the nonzero taps; no zero dilation) ----
    xt = jnp.transpose(x, (0, 2, 3, 4, 1))                      # (N, D, H, W, Cin)
    xp = jnp.pad(xt, ((0, 0), (1, 1), (1, 1), (1, 1), (0, 0)))  # halo of 1

    # 27 distinct shifted views of the padded input (lazy; XLA fuses the copies)
    shift = {}
    for sd in range(3):
        for sh in range(3):
            for sw in range(3):
                shift[(sd, sh, sw)] = xp[:, sd:sd + D, sh:sh + H, sw:sw + W, :]

    a_phases, b_phases = [], []
    for rd in range(2):
        for rh in range(2):
            for rw in range(2):
                taps_a, taps_b = [], []
                for jd in range(2):
                    for jh in range(2):
                        for jw in range(2):
                            taps_a.append(shift[(rd + jd, rh + jh, rw + jw)])
                            taps_b.append(weight[:, :,
                                                 3 - 2 * jd - rd,
                                                 3 - 2 * jh - rh,
                                                 3 - 2 * jw - rw])     # (Cin, Cout)
                a_p = jnp.stack(taps_a, axis=-2).reshape(M, K)          # (M, 8*Cin)
                b_p = jnp.stack(taps_b, axis=0).reshape(K, Cout)        # (8*Cin, Cout)
                a_phases.append(a_p)
                b_phases.append(b_p)

    A = jnp.stack(a_phases, axis=0).astype(jnp.bfloat16)                # (8, M, K)
    B = jnp.stack(b_phases, axis=0)                                     # (8, K, Cout)
    B = jnp.pad(B, ((0, 0), (0, 0), (0, c_pad - Cout))).astype(jnp.bfloat16)
    bias_row = jnp.tile(jnp.pad(bias, (0, c_pad - Cout)), n_phase)[None, :]  # (1, 8*c_pad)

    # ---- M tiling: >=2 parallel grid steps, double-buffered blocks fit VMEM ----
    vmem_a_budget = 8 * 1024 * 1024                       # per A-block buffer
    tm_cap = max(8, vmem_a_budget // (n_phase * K * 2))   # bf16 A block
    tm_eff = min(tm, tm_cap)
    if M >= 16:
        tm_eff = min(tm_eff, max(8, (((M + 1) // 2) // 8) * 8))  # keep >= 2 grid steps
    tm_eff = max(8, (tm_eff // 8) * 8)
    Mp = _round_up(M, tm_eff)
    if Mp != M:
        A = jnp.pad(A, ((0, 0), (0, Mp - M), (0, 0)))

    out_cols = n_phase * c_pad
    grid = (Mp // tm_eff,)
    flops = 2 * Mp * K * c_pad * n_phase
    bytes_accessed = A.size * 2 + B.size * 2 + bias_row.size * 4 + Mp * out_cols * 4

    out = pl.pallas_call(
        functools.partial(_deconv_subpixel_kernel, n_phase=n_phase, c_pad=c_pad),
        out_shape=jax.ShapeDtypeStruct((Mp, out_cols), jnp.float32),
        grid_spec=pltpu.PrefetchScalarGridSpec(
            num_scalar_prefetch=0,
            grid=grid,
            in_specs=[
                pl.BlockSpec((n_phase, tm_eff, K), lambda i: (0, i, 0)),
                pl.BlockSpec((n_phase, K, c_pad), lambda i: (0, 0, 0)),
                pl.BlockSpec((1, out_cols), lambda i: (0, 0)),
            ],
            out_specs=pl.BlockSpec((tm_eff, out_cols), lambda i: (i, 0)),
        ),
        compiler_params=pltpu.CompilerParams(
            dimension_semantics=("parallel",),
            vmem_limit_bytes=48 * 1024 * 1024,
        ),
        cost_estimate=pl.CostEstimate(
            flops=flops, transcendentals=0, bytes_accessed=bytes_accessed),
    )(A, B, bias_row)

    # ---- depth-to-space (pixel shuffle) + channels-first, one pass over output ----
    out = out[:M].reshape(N, D, H, W, 2, 2, 2, c_pad)[..., :Cout]
    out = out.transpose(0, 7, 1, 4, 2, 5, 3, 6)   # (N, Cout, D, rd, H, rh, W, rw)
    return out.reshape(N, Cout, Dout, Hout, Wout)


if __name__ == "__main__":
    key = jax.random.PRNGKey(0)
    kx, kw_, kb = jax.random.split(key, 3)

    N, Cin, Cout, D = 2, 4, 8, 8
    x = jax.random.normal(kx, (N, Cin, D, D, D), jnp.float32)
    weight = jax.random.normal(kw_, (Cin, Cout, 4, 4, 4), jnp.float32) * 0.1
    bias = jax.random.normal(kb, (Cout,), jnp.float32) * 0.1

    out = jax.jit(deconv3d_block)(x, weight, bias)
    out = jax.block_until_ready(out)
    assert out.shape == (N, Cout, 2 * D, 2 * D, 2 * D), out.shape

    # independent reference via XLA's dilated conv (same math as ConvTranspose3d)
    pd = 4 - 1 - 1
    w_conv = jnp.flip(weight, (2, 3, 4)).transpose(1, 0, 2, 3, 4)  # (Cout, Cin, k,k,k)
    ref = lax.conv_general_dilated(
        x, w_conv,
        window_strides=(1, 1, 1),
        padding=[(pd, pd)] * 3,
        lhs_dilation=(2, 2, 2),
        dimension_numbers=("NCDHW", "OIDHW", "NCDHW"),
        precision=lax.Precision.HIGHEST)
    ref = jnp.maximum(ref + bias[None, :, None, None, None], 0.0)

    err = float(jnp.max(jnp.abs(out - ref)))
    # kernel matmuls run in bf16 (f32 accumulation) -> allow ~1e-2-level deviation
    assert err < 5e-2, f"max abs err {err}"
    print("KERNEL_OK")
</pallas_src>

<mosaic_0001>
module attributes {stable_mosaic.version = 11 : i64} {
  func.func @_deconv_subpixel_kernel(%arg0: i32, %arg1: memref<8x512x32xbf16, #tpu.memory_space<vmem>>, %arg2: memref<8x32x16xbf16, #tpu.memory_space<vmem>>, %arg3: memref<1x128xf32, #tpu.memory_space<vmem>>, %arg4: memref<512x128xf32, #tpu.memory_space<vmem>>) attributes {dimension_semantics = [#tpu.dimension_semantics<parallel>], iteration_bounds = array<i64: 2>, scalar_prefetch = 0 : i64, scratch_operands = 0 : i64, tpu.core_type = #tpu.core_type<tc>, window_params = [{transform_indices = @transform_0, window_bounds = array<i64: 8, 512, 32>}, {pipeline_mode = #tpu.pipeline_mode<synchronous>, transform_indices = @transform_1, window_bounds = array<i64: 8, 32, 16>}, {pipeline_mode = #tpu.pipeline_mode<synchronous>, transform_indices = @transform_2, window_bounds = array<i64: 1, 128>}, {transform_indices = @transform_3, window_bounds = array<i64: 512, 128>}]} {
    %c0 = arith.constant 0 : index
    %c0_0 = arith.constant 0 : index
    %c0_1 = arith.constant 0 : index
    %0 = vector.load %arg1[%c0, %c0_0, %c0_1] : memref<8x512x32xbf16, #tpu.memory_space<vmem>>, vector<1x512x32xbf16>
    %1 = vector.shape_cast %0 : vector<1x512x32xbf16> to vector<512x32xbf16>
    %c0_2 = arith.constant 0 : index
    %c0_3 = arith.constant 0 : index
    %c0_4 = arith.constant 0 : index
    %2 = vector.load %arg2[%c0_2, %c0_3, %c0_4] : memref<8x32x16xbf16, #tpu.memory_space<vmem>>, vector<1x32x16xbf16>
    %3 = vector.shape_cast %2 : vector<1x32x16xbf16> to vector<32x16xbf16>
    %cst = arith.constant dense<0.000000e+00> : vector<512x16xf32>
    %4 = tpu.matmul %1, %3, %cst {dimension_numbers = #tpu.dot_dimension_numbers<[1], [0], [0], [1], [0, 0, 1, 1], [], []>} : vector<512x32xbf16>, vector<32x16xbf16>, vector<512x16xf32> -> vector<512x16xf32>
    %c0_5 = arith.constant 0 : index
    %c0_6 = arith.constant 0 : index
    %5 = vector.load %arg3[%c0_5, %c0_6] : memref<1x128xf32, #tpu.memory_space<vmem>>, vector<1x16xf32>
    %6 = vector.broadcast %5 : vector<1x16xf32> to vector<512x16xf32>
    %7 = arith.addf %4, %6 : vector<512x16xf32>
    %cst_7 = arith.constant 0.000000e+00 : f32
    %8 = vector.broadcast %cst_7 : f32 to vector<512x16xf32>
    %9 = arith.maximumf %7, %8 : vector<512x16xf32>
    %c0_8 = arith.constant 0 : index
    %c0_9 = arith.constant 0 : index
    %10 = vector.load %arg4[%c0_8, %c0_9] : memref<512x128xf32, #tpu.memory_space<vmem>>, vector<512x16xf32>
    tpu.vector_store %arg4[%c0_8, %c0_9], %9 {strides = array<i32>} : memref<512x128xf32, #tpu.memory_space<vmem>>, vector<512x16xf32>,
    %c1 = arith.constant 1 : index
    %c0_10 = arith.constant 0 : index
    %c0_11 = arith.constant 0 : index
    %11 = vector.load %arg1[%c1, %c0_10, %c0_11] : memref<8x512x32xbf16, #tpu.memory_space<vmem>>, vector<1x512x32xbf16>
    %12 = vector.shape_cast %11 : vector<1x512x32xbf16> to vector<512x32xbf16>
    %c1_12 = arith.constant 1 : index
    %c0_13 = arith.constant 0 : index
    %c0_14 = arith.constant 0 : index
    %13 = vector.load %arg2[%c1_12, %c0_13, %c0_14] : memref<8x32x16xbf16, #tpu.memory_space<vmem>>, vector<1x32x16xbf16>
    %14 = vector.shape_cast %13 : vector<1x32x16xbf16> to vector<32x16xbf16>
    %cst_15 = arith.constant dense<0.000000e+00> : vector<512x16xf32>
    %15 = tpu.matmul %12, %14, %cst_15 {dimension_numbers = #tpu.dot_dimension_numbers<[1], [0], [0], [1], [0, 0, 1, 1], [], []>} : vector<512x32xbf16>, vector<32x16xbf16>, vector<512x16xf32> -> vector<512x16xf32>
    %c0_16 = arith.constant 0 : index
    %c16 = arith.constant 16 : index
    %16 = vector.load %arg3[%c0_16, %c16] : memref<1x128xf32, #tpu.memory_space<vmem>>, vector<1x16xf32>
    %17 = vector.broadcast %16 : vector<1x16xf32> to vector<512x16xf32>
    %18 = arith.addf %15, %17 : vector<512x16xf32>
    %cst_17 = arith.constant 0.000000e+00 : f32
    %19 = vector.broadcast %cst_17 : f32 to vector<512x16xf32>
    %20 = arith.maximumf %18, %19 : vector<512x16xf32>
    %c0_18 = arith.constant 0 : index
    %c16_19 = arith.constant 16 : index
    %21 = vector.load %arg4[%c0_18, %c16_19] : memref<512x128xf32, #tpu.memory_space<vmem>>, vector<512x16xf32>
    tpu.vector_store %arg4[%c0_18, %c16_19], %20 {strides = array<i32>} : memref<512x128xf32, #tpu.memory_space<vmem>>, vector<512x16xf32>,
    %c2 = arith.constant 2 : index
    %c0_20 = arith.constant 0 : index
    %c0_21 = arith.constant 0 : index
    %22 = vector.load %arg1[%c2, %c0_20, %c0_21] : memref<8x512x32xbf16, #tpu.memory_space<vmem>>, vector<1x512x32xbf16>
    %23 = vector.shape_cast %22 : vector<1x512x32xbf16> to vector<512x32xbf16>
    %c2_22 = arith.constant 2 : index
    %c0_23 = arith.constant 0 : index
    %c0_24 = arith.constant 0 : index
    %24 = vector.load %arg2[%c2_22, %c0_23, %c0_24] : memref<8x32x16xbf16, #tpu.memory_space<vmem>>, vector<1x32x16xbf16>
    %25 = vector.shape_cast %24 : vector<1x32x16xbf16> to vector<32x16xbf16>
    %cst_25 = arith.constant dense<0.000000e+00> : vector<512x16xf32>
    %26 = tpu.matmul %23, %25, %cst_25 {dimension_numbers = #tpu.dot_dimension_numbers<[1], [0], [0], [1], [0, 0, 1, 1], [], []>} : vector<512x32xbf16>, vector<32x16xbf16>, vector<512x16xf32> -> vector<512x16xf32>
    %c0_26 = arith.constant 0 : index
    %c32 = arith.constant 32 : index
    %27 = vector.load %arg3[%c0_26, %c32] : memref<1x128xf32, #tpu.memory_space<vmem>>, vector<1x16xf32>
    %28 = vector.broadcast %27 : vector<1x16xf32> to vector<512x16xf32>
    %29 = arith.addf %26, %28 : vector<512x16xf32>
    %cst_27 = arith.constant 0.000000e+00 : f32
    %30 = vector.broadcast %cst_27 : f32 to vector<512x16xf32>
    %31 = arith.maximumf %29, %30 : vector<512x16xf32>
    %c0_28 = arith.constant 0 : index
    %c32_29 = arith.constant 32 : index
    %32 = vector.load %arg4[%c0_28, %c32_29] : memref<512x128xf32, #tpu.memory_space<vmem>>, vector<512x16xf32>
    tpu.vector_store %arg4[%c0_28, %c32_29], %31 {strides = array<i32>} : memref<512x128xf32, #tpu.memory_space<vmem>>, vector<512x16xf32>,
    %c3 = arith.constant 3 : index
    %c0_30 = arith.constant 0 : index
    %c0_31 = arith.constant 0 : index
    %33 = vector.load %arg1[%c3, %c0_30, %c0_31] : memref<8x512x32xbf16, #tpu.memory_space<vmem>>, vector<1x512x32xbf16>
    %34 = vector.shape_cast %33 : vector<1x512x32xbf16> to vector<512x32xbf16>
    %c3_32 = arith.constant 3 : index
    %c0_33 = arith.constant 0 : index
    %c0_34 = arith.constant 0 : index
    %35 = vector.load %arg2[%c3_32, %c0_33, %c0_34] : memref<8x32x16xbf16, #tpu.memory_space<vmem>>, vector<1x32x16xbf16>
    %36 = vector.shape_cast %35 : vector<1x32x16xbf16> to vector<32x16xbf16>
    %cst_35 = arith.constant dense<0.000000e+00> : vector<512x16xf32>
    %37 = tpu.matmul %34, %36, %cst_35 {dimension_numbers = #tpu.dot_dimension_numbers<[1], [0], [0], [1], [0, 0, 1, 1], [], []>} : vector<512x32xbf16>, vector<32x16xbf16>, vector<512x16xf32> -> vector<512x16xf32>
    %c0_36 = arith.constant 0 : index
    %c48 = arith.constant 48 : index
    %38 = vector.load %arg3[%c0_36, %c48] : memref<1x128xf32, #tpu.memory_space<vmem>>, vector<1x16xf32>
    %39 = vector.broadcast %38 : vector<1x16xf32> to vector<512x16xf32>
    %40 = arith.addf %37, %39 : vector<512x16xf32>
    %cst_37 = arith.constant 0.000000e+00 : f32
    %41 = vector.broadcast %cst_37 : f32 to vector<512x16xf32>
    %42 = arith.maximumf %40, %41 : vector<512x16xf32>
    %c0_38 = arith.constant 0 : index
    %c48_39 = arith.constant 48 : index
    %43 = vector.load %arg4[%c0_38, %c48_39] : memref<512x128xf32, #tpu.memory_space<vmem>>, vector<512x16xf32>
    tpu.vector_store %arg4[%c0_38, %c48_39], %42 {strides = array<i32>} : memref<512x128xf32, #tpu.memory_space<vmem>>, vector<512x16xf32>,
    %c4 = arith.constant 4 : index
    %c0_40 = arith.constant 0 : index
    %c0_41 = arith.constant 0 : index
    %44 = vector.load %arg1[%c4, %c0_40, %c0_41] : memref<8x512x32xbf16, #tpu.memory_space<vmem>>, vector<1x512x32xbf16>
    %45 = vector.shape_cast %44 : vector<1x512x32xbf16> to vector<512x32xbf16>
    %c4_42 = arith.constant 4 : index
    %c0_43 = arith.constant 0 : index
    %c0_44 = arith.constant 0 : index
    %46 = vector.load %arg2[%c4_42, %c0_43, %c0_44] : memref<8x32x16xbf16, #tpu.memory_space<vmem>>, vector<1x32x16xbf16>
    %47 = vector.shape_cast %46 : vector<1x32x16xbf16> to vector<32x16xbf16>
    %cst_45 = arith.constant dense<0.000000e+00> : vector<512x16xf32>
    %48 = tpu.matmul %45, %47, %cst_45 {dimension_numbers = #tpu.dot_dimension_numbers<[1], [0], [0], [1], [0, 0, 1, 1], [], []>} : vector<512x32xbf16>, vector<32x16xbf16>, vector<512x16xf32> -> vector<512x16xf32>
    %c0_46 = arith.constant 0 : index
    %c64 = arith.constant 64 : index
    %49 = vector.load %arg3[%c0_46, %c64] : memref<1x128xf32, #tpu.memory_space<vmem>>, vector<1x16xf32>
    %50 = vector.broadcast %49 : vector<1x16xf32> to vector<512x16xf32>
    %51 = arith.addf %48, %50 : vector<512x16xf32>
    %cst_47 = arith.constant 0.000000e+00 : f32
    %52 = vector.broadcast %cst_47 : f32 to vector<512x16xf32>
    %53 = arith.maximumf %51, %52 : vector<512x16xf32>
    %c0_48 = arith.constant 0 : index
    %c64_49 = arith.constant 64 : index
    %54 = vector.load %arg4[%c0_48, %c64_49] : memref<512x128xf32, #tpu.memory_space<vmem>>, vector<512x16xf32>
    tpu.vector_store %arg4[%c0_48, %c64_49], %53 {strides = array<i32>} : memref<512x128xf32, #tpu.memory_space<vmem>>, vector<512x16xf32>,
    %c5 = arith.constant 5 : index
    %c0_50 = arith.constant 0 : index
    %c0_51 = arith.constant 0 : index
    %55 = vector.load %arg1[%c5, %c0_50, %c0_51] : memref<8x512x32xbf16, #tpu.memory_space<vmem>>, vector<1x512x32xbf16>
    %56 = vector.shape_cast %55 : vector<1x512x32xbf16> to vector<512x32xbf16>
    %c5_52 = arith.constant 5 : index
    %c0_53 = arith.constant 0 : index
    %c0_54 = arith.constant 0 : index
    %57 = vector.load %arg2[%c5_52, %c0_53, %c0_54] : memref<8x32x16xbf16, #tpu.memory_space<vmem>>, vector<1x32x16xbf16>
    %58 = vector.shape_cast %57 : vector<1x32x16xbf16> to vector<32x16xbf16>
    %cst_55 = arith.constant dense<0.000000e+00> : vector<512x16xf32>
    %59 = tpu.matmul %56, %58, %cst_55 {dimension_numbers = #tpu.dot_dimension_numbers<[1], [0], [0], [1], [0, 0, 1, 1], [], []>} : vector<512x32xbf16>, vector<32x16xbf16>, vector<512x16xf32> -> vector<512x16xf32>
    %c0_56 = arith.constant 0 : index
    %c80 = arith.constant 80 : index
    %60 = vector.load %arg3[%c0_56, %c80] : memref<1x128xf32, #tpu.memory_space<vmem>>, vector<1x16xf32>
    %61 = vector.broadcast %60 : vector<1x16xf32> to vector<512x16xf32>
    %62 = arith.addf %59, %61 : vector<512x16xf32>
    %cst_57 = arith.constant 0.000000e+00 : f32
    %63 = vector.broadcast %cst_57 : f32 to vector<512x16xf32>
    %64 = arith.maximumf %62, %63 : vector<512x16xf32>
    %c0_58 = arith.constant 0 : index
    %c80_59 = arith.constant 80 : index
    %65 = vector.load %arg4[%c0_58, %c80_59] : memref<512x128xf32, #tpu.memory_space<vmem>>, vector<512x16xf32>
    tpu.vector_store %arg4[%c0_58, %c80_59], %64 {strides = array<i32>} : memref<512x128xf32, #tpu.memory_space<vmem>>, vector<512x16xf32>,
    %c6 = arith.constant 6 : index
    %c0_60 = arith.constant 0 : index
    %c0_61 = arith.constant 0 : index
    %66 = vector.load %arg1[%c6, %c0_60, %c0_61] : memref<8x512x32xbf16, #tpu.memory_space<vmem>>, vector<1x512x32xbf16>
    %67 = vector.shape_cast %66 : vector<1x512x32xbf16> to vector<512x32xbf16>
    %c6_62 = arith.constant 6 : index
    %c0_63 = arith.constant 0 : index
    %c0_64 = arith.constant 0 : index
    %68 = vector.load %arg2[%c6_62, %c0_63, %c0_64] : memref<8x32x16xbf16, #tpu.memory_space<vmem>>, vector<1x32x16xbf16>
    %69 = vector.shape_cast %68 : vector<1x32x16xbf16> to vector<32x16xbf16>
    %cst_65 = arith.constant dense<0.000000e+00> : vector<512x16xf32>
    %70 = tpu.matmul %67, %69, %cst_65 {dimension_numbers = #tpu.dot_dimension_numbers<[1], [0], [0], [1], [0, 0, 1, 1], [], []>} : vector<512x32xbf16>, vector<32x16xbf16>, vector<512x16xf32> -> vector<512x16xf32>
    %c0_66 = arith.constant 0 : index
    %c96 = arith.constant 96 : index
    %71 = vector.load %arg3[%c0_66, %c96] : memref<1x128xf32, #tpu.memory_space<vmem>>, vector<1x16xf32>
    %72 = vector.broadcast %71 : vector<1x16xf32> to vector<512x16xf32>
    %73 = arith.addf %70, %72 : vector<512x16xf32>
    %cst_67 = arith.constant 0.000000e+00 : f32
    %74 = vector.broadcast %cst_67 : f32 to vector<512x16xf32>
    %75 = arith.maximumf %73, %74 : vector<512x16xf32>
    %c0_68 = arith.constant 0 : index
    %c96_69 = arith.constant 96 : index
    %76 = vector.load %arg4[%c0_68, %c96_69] : memref<512x128xf32, #tpu.memory_space<vmem>>, vector<512x16xf32>
    tpu.vector_store %arg4[%c0_68, %c96_69], %75 {strides = array<i32>} : memref<512x128xf32, #tpu.memory_space<vmem>>, vector<512x16xf32>,
    %c7 = arith.constant 7 : index
    %c0_70 = arith.constant 0 : index
    %c0_71 = arith.constant 0 : index
    %77 = vector.load %arg1[%c7, %c0_70, %c0_71] : memref<8x512x32xbf16, #tpu.memory_space<vmem>>, vector<1x512x32xbf16>
    %78 = vector.shape_cast %77 : vector<1x512x32xbf16> to vector<512x32xbf16>
    %c7_72 = arith.constant 7 : index
    %c0_73 = arith.constant 0 : index
    %c0_74 = arith.constant 0 : index
    %79 = vector.load %arg2[%c7_72, %c0_73, %c0_74] : memref<8x32x16xbf16, #tpu.memory_space<vmem>>, vector<1x32x16xbf16>
    %80 = vector.shape_cast %79 : vector<1x32x16xbf16> to vector<32x16xbf16>
    %cst_75 = arith.constant dense<0.000000e+00> : vector<512x16xf32>
    %81 = tpu.matmul %78, %80, %cst_75 {dimension_numbers = #tpu.dot_dimension_numbers<[1], [0], [0], [1], [0, 0, 1, 1], [], []>} : vector<512x32xbf16>, vector<32x16xbf16>, vector<512x16xf32> -> vector<512x16xf32>
    %c0_76 = arith.constant 0 : index
    %c112 = arith.constant 112 : index
    %82 = vector.load %arg3[%c0_76, %c112] : memref<1x128xf32, #tpu.memory_space<vmem>>, vector<1x16xf32>
    %83 = vector.broadcast %82 : vector<1x16xf32> to vector<512x16xf32>
    %84 = arith.addf %81, %83 : vector<512x16xf32>
    %cst_77 = arith.constant 0.000000e+00 : f32
    %85 = vector.broadcast %cst_77 : f32 to vector<512x16xf32>
    %86 = arith.maximumf %84, %85 : vector<512x16xf32>
    %c0_78 = arith.constant 0 : index
    %c112_79 = arith.constant 112 : index
    %87 = vector.load %arg4[%c0_78, %c112_79] : memref<512x128xf32, #tpu.memory_space<vmem>>, vector<512x16xf32>
    tpu.vector_store %arg4[%c0_78, %c112_79], %86 {strides = array<i32>} : memref<512x128xf32, #tpu.memory_space<vmem>>, vector<512x16xf32>,
    return
  }
  func.func @transform_0(%arg0: i32) -> (i32, i32, i32) {
    %c0_i32 = arith.constant 0 : i32
    %c0_i32_0 = arith.constant 0 : i32
    %c0_i32_1 = arith.constant 0 : i32
    return %c0_i32, %arg0, %c0_i32_0 : i32, i32, i32
  }
  func.func @transform_1(%arg0: i32) -> (i32, i32, i32) {
    %c0_i32 = arith.constant 0 : i32
    %c0_i32_0 = arith.constant 0 : i32
    %c0_i32_1 = arith.constant 0 : i32
    %c0_i32_2 = arith.constant 0 : i32
    return %c0_i32, %c0_i32_0, %c0_i32_1 : i32, i32, i32
  }
  func.func @transform_2(%arg0: i32) -> (i32, i32) {
    %c0_i32 = arith.constant 0 : i32
    %c0_i32_0 = arith.constant 0 : i32
    %c0_i32_1 = arith.constant 0 : i32
    return %c0_i32, %c0_i32_0 : i32, i32
  }
  func.func @transform_3(%arg0: i32) -> (i32, i32) {
    %c0_i32 = arith.constant 0 : i32
    %c0_i32_0 = arith.constant 0 : i32
    return %arg0, %c0_i32 : i32, i32
  }
}

</mosaic_0001>

<bundles_post_ra>
// kernel: tile.8
= control target key start
LH: loop header
LB: loop body
LE: loop exit
PB: predicated region body
PF: predicated region fallthrough
CT: control target
= control target key end

     0   :  { %s22_s0 = inlined_call_operand.vmem [shape: f32[16], index: 0, kind: input, shape index: {}]   ;;  %s23_s1 = inlined_call_operand.vmem [shape: f32[8,16], index: 1, kind: output, shape index: {}]  }
   0x1   :  { %v4_v0 = vld [vmem:[%s22_s0] ss:$0 sm:$0xff] }
   0x2   :  { %5 = vst [vmem:[%s23_s1] sm:$0xff] %v4_v0 }

// kernel: tile.9
= control target key start
LH: loop header
LB: loop body
LE: loop exit
PB: predicated region body
PF: predicated region fallthrough
CT: control target
= control target key end

     0   :  { %s67_s10 = smov 112   ;;  %s68_s11 = smov 80   ;;  %vm3_vm0 = vcmask 130048   ;;  %vm9_vm1 = vcmask 1048448   ;;  %vm15_vm2 = vcmask 917248   ;;  %vm21_vm3 = vcmask 786048   ;;  %s111_s0 = inlined_call_operand.vmem [shape: f32[8,16], index: 0, kind: input, shape index: {}]   ;;  %s112_s1 = inlined_call_operand.vmem [shape: f32[1,128], index: 1, kind: output, shape index: {}]  }
   0x1   :  { %v53_v0 = vld [vmem:[%s111_s0 + $0x7] sm:$0x1]   ;;  %v55_v1 = vld [vmem:[%s111_s0 + $0x5] sm:$0x1]   ;;  %v54_v2 = vld [vmem:[%s111_s0 + $0x6] sm:$0x1]  }
   0x2   :  { %7 = vrot.lane.b32.xlu0 %v53_v0, %s67_s10  ;;  %19 = vrot.lane.b32.xlu1 %v55_v1, %s68_s11  ;;  %v56_v3 = vld [vmem:[%s111_s0 + $0x4] sm:$0x1]   ;;  %v2_v4 = vld [vmem:[%s111_s0] sm:$0x1]   ;;  %s69_s18 = smov 96   ;;  %s70_s19 = smov 64  }
   0x3   :  { %4 = vst.msk [vmem:[#allocation0] sm:$0x1] %vm3_vm0, %v2_v4   ;;  %v57_v5 = vld [vmem:[%s111_s0 + $0x3] sm:$0x1]   ;;  %v58_v6 = vld [vmem:[%s111_s0 + $0x2] sm:$0x1]  }
   0x4   :  { %s71_s24 = smov 48   ;;  %s72_s25 = smov 32   ;;  %v59_v7 = vld [vmem:[%s111_s0 + $0x1] sm:$0x1]   ;;  %vm27_vm4 = vcmask 654848   ;;  %vm33_vm5 = vcmask 523648  }
   0x5   :  { %s73_s0 = smov 16   ;;  %vm39_vm6 = vcmask 392448   ;;  %vm45_vm7 = vcmask 261248  }
   0x6   :  { %13 = vrot.lane.b32.xlu0 %v54_v2, %s69_s18  ;;  %25 = vrot.lane.b32.xlu1 %v56_v3, %s70_s19 }
   0xa   :  { %31 = vrot.lane.b32.xlu0 %v57_v5, %s71_s24  ;;  %37 = vrot.lane.b32.xlu1 %v58_v6, %s72_s25 }
   0xe   :  { %43 = vrot.lane.b32.xlu0 %v59_v7, %s73_s0 }
  0x74   :  { %v8_v8 = vpop.permute.xlu0 %7   ;;  %v20_v9 = vpop.permute.xlu1 %19  }
  0x75   :  { %10 = vst.msk [vmem:[#allocation0] sm:$0x1] %vm9_vm1, %v8_v8  }
  0x78   :  { %v14_v10 = vpop.permute.xlu0 %13   ;;  %v26_v11 = vpop.permute.xlu1 %25  }
  0x79   :  { %16 = vst.msk [vmem:[#allocation0] sm:$0x1] %vm15_vm2, %v14_v10  }
  0x7a   :  { %22 = vst.msk [vmem:[#allocation0] sm:$0x1] %vm21_vm3, %v20_v9  }
  0x7b   :  { %28 = vst.msk [vmem:[#allocation0] sm:$0x1] %vm27_vm4, %v26_v11  }
  0x7c   :  { %v32_v12 = vpop.permute.xlu0 %31   ;;  %v38_v13 = vpop.permute.xlu1 %37  }
  0x7d   :  { %34 = vst.msk [vmem:[#allocation0] sm:$0x1] %vm33_vm5, %v32_v12  }
  0x7e   :  { %40 = vst.msk [vmem:[#allocation0] sm:$0x1] %vm39_vm6, %v38_v13  }
  0x80   :  { %v44_v14 = vpop.permute.xlu0 %43  }
  0x81   :  { %46 = vst.msk [vmem:[#allocation0] sm:$0x1] %vm45_vm7, %v44_v14  }
  0x88   :  { %v50_v15 = vld [vmem:[#allocation0] sm:$0x1] }
  0x89   :  { %52 = vst [vmem:[%s112_s1] sm:$0x1] %v50_v15 }

// kernel: deconv3d_block.1
= control target key start
LH: loop header
LB: loop body
LE: loop exit
PB: predicated region body
PF: predicated region fallthrough
CT: control target
= control target key end

     0   :  { %s14515_s12 = smov 0   ;;  %s14517_s13 = smov 0   ;;  %s18784_s0 = inlined_call_operand.vmem [shape: bf16[8,1024,32], index: 0, kind: input, shape index: {}]   ;;  %s18785_s1 = inlined_call_operand.vmem [shape: bf16[8,32,16], index: 1, kind: input, shape index: {}]   ;;  %s18786_s2 = inlined_call_operand.vmem [shape: f32[1,128], index: 2, kind: input, shape index: {}]   ;;  %s18787_s3 = inlined_call_operand.vmem [shape: f32[1024,128], index: 3, kind: output, shape index: {}]  }
   0x1   :  { %s14519_s14 = smov 0  }
   0x2 LB: > { %s12317_s15 = sadd.s32 4294967295, %s14486_s14   ;;  %s14532_s16 = sadd.s32 1, %s14486_s14   ;;  %s14486_s14 = sphi %s14519_s14, %s19040_s14   ;;  %s14482_s13 = sphi %s14517_s13, %s19039_s13   ;;  %s14478_s12 = sphi %s14515_s12, %s19038_s12  }
   0x3   : > { %s17_s17 = ssub.s32 %s14486_s14, %s14532_s16  ;;  %s20_s18 = sadd.s32 1, %s14482_s13 }
   0x4   : > { %p18_p0 = scmp.eq.s32.totalorder %s17_s17, 0  ;;  %p27_p1 = scmp.ne.s32.totalorder %s14482_s13, %s14478_s12 }
   0x5   : > { %p28_p2 = scmp.eq.s32.totalorder %s14486_s14, 0  ;;  %p12320_p4 = scmp.ge.s32.totalorder %s14486_s14, 2 }
   0x6   : > { %s14541_s19 = scalar_select %p18_p0, %s14482_s13, %s20_s18  }
   0x7   : > { %p29_p3 = por %p28_p2, %p27_p1  ;;  %127 = sbr.rel (%p12320_p4) target bundleno = 146 (0x92), region = 24 }
   0xe   : > { %130 = sbr.rel (!%p29_p3) target bundleno = 146 (0x92), region = 28  ;;  %s132_s20 = sand.u32 (%p29_p3), 1, %s14482_s13  }
   0xf   : > { %s13342_s21 = sshll.u32 (%p29_p3), %s14486_s14, 8  ;;  %s12321_s22 = sshll.u32 (%p29_p3), %s132_s20, 11 }
  0x10   : > { %s14549_s25 = scalar_lea.vmem (%p29_p3), %s18784_s0, %s13342_s21  ;;  %s14554_s26 = scalar_lea.vmem (%p29_p3), [#allocation2], %s12321_s22 }
  0x11   : > { %v153_v0 = vld [vmem:[%s14549_s25] sm:$0xff] (%p29_p3)   ;;  %v157_v1 = vld [vmem:[%s14549_s25 + $0x8] sm:$0xff] (%p29_p3)   ;;  %v161_v2 = vld [vmem:[%s14549_s25 + $0x10] sm:$0xff] (%p29_p3)  }
  0x12   : > { %154 = vst [vmem:[%s14554_s26] sm:$0xff] (%p29_p3), %v153_v0   ;;  %158 = vst [vmem:[%s14554_s26 + $0x8] sm:$0xff] (%p29_p3), %v157_v1   ;;  %v165_v3 = vld [vmem:[%s14549_s25 + $0x18] sm:$0xff] (%p29_p3)   ;;  %v169_v4 = vld [vmem:[%s14549_s25 + $0x20] sm:$0xff] (%p29_p3)  }
  0x13   : > { %162 = vst [vmem:[%s14554_s26 + $0x10] sm:$0xff] (%p29_p3), %v161_v2   ;;  %v173_v5 = vld [vmem:[%s14549_s25 + $0x28] sm:$0xff] (%p29_p3)   ;;  %166 = vst [vmem:[%s14554_s26 + $0x18] sm:$0xff] (%p29_p3), %v165_v3   ;;  %v177_v6 = vld [vmem:[%s14549_s25 + $0x30] sm:$0xff] (%p29_p3)  }
  0x14   : > { %170 = vst [vmem:[%s14554_s26 + $0x20] sm:$0xff] (%p29_p3), %v169_v4   ;;  %174 = vst [vmem:[%s14554_s26 + $0x28] sm:$0xff] (%p29_p3), %v173_v5   ;;  %v181_v7 = vld [vmem:[%s14549_s25 + $0x38] sm:$0xff] (%p29_p3)   ;;  %v185_v8 = vld [vmem:[%s14549_s25 + $0x40] sm:$0xff] (%p29_p3)  }
  0x15   : > { %178 = vst [vmem:[%s14554_s26 + $0x30] sm:$0xff] %v177_v6   ;;  %182 = vst [vmem:[%s14554_s26 + $0x38] sm:$0xff] %v181_v7   ;;  %v189_v9 = vld [vmem:[%s14549_s25 + $0x48] sm:$0xff]   ;;  %v193_v10 = vld [vmem:[%s14549_s25 + $0x50] sm:$0xff]  }
  0x16   : > { %186 = vst [vmem:[%s14554_s26 + $0x40] sm:$0xff] %v185_v8   ;;  %v197_v11 = vld [vmem:[%s14549_s25 + $0x58] sm:$0xff]   ;;  %190 = vst [vmem:[%s14554_s26 + $0x48] sm:$0xff] %v189_v9   ;;  %v201_v12 = vld [vmem:[%s14549_s25 + $0x60] sm:$0xff]  }
  0x17   : > { %194 = vst [vmem:[%s14554_s26 + $0x50] sm:$0xff] %v193_v10   ;;  %198 = vst [vmem:[%s14554_s26 + $0x58] sm:$0xff] %v197_v11   ;;  %v205_v13 = vld [vmem:[%s14549_s25 + $0x68] sm:$0xff]   ;;  %v209_v14 = vld [vmem:[%s14549_s25 + $0x70] sm:$0xff]  }
  0x18   : > { %202 = vst [vmem:[%s14554_s26 + $0x60] sm:$0xff] %v201_v12   ;;  %206 = vst [vmem:[%s14554_s26 + $0x68] sm:$0xff] %v205_v13   ;;  %v213_v15 = vld [vmem:[%s14549_s25 + $0x78] sm:$0xff]   ;;  %v217_v16 = vld [vmem:[%s14549_s25 + $0x80] sm:$0xff]  }
  0x19   : > { %210 = vst [vmem:[%s14554_s26 + $0x70] sm:$0xff] %v209_v14   ;;  %v221_v17 = vld [vmem:[%s14549_s25 + $0x88] sm:$0xff]   ;;  %214 = vst [vmem:[%s14554_s26 + $0x78] sm:$0xff] %v213_v15   ;;  %v225_v18 = vld [vmem:[%s14549_s25 + $0x90] sm:$0xff]  }
  0x1a   : > { %218 = vst [vmem:[%s14554_s26 + $0x80] sm:$0xff] %v217_v16   ;;  %222 = vst [vmem:[%s14554_s26 + $0x88] sm:$0xff] %v221_v17   ;;  %v229_v19 = vld [vmem:[%s14549_s25 + $0x98] sm:$0xff]   ;;  %v233_v20 = vld [vmem:[%s14549_s25 + $0xa0] sm:$0xff]  }
  0x1b   : > { %226 = vst [vmem:[%s14554_s26 + $0x90] sm:$0xff] %v225_v18   ;;  %230 = vst [vmem:[%s14554_s26 + $0x98] sm:$0xff] %v229_v19   ;;  %v237_v21 = vld [vmem:[%s14549_s25 + $0xa8] sm:$0xff]   ;;  %v241_v22 = vld [vmem:[%s14549_s25 + $0xb0] sm:$0xff]  }
  0x1c   : > { %234 = vst [vmem:[%s14554_s26 + $0xa0] sm:$0xff] %v233_v20   ;;  %v245_v23 = vld [vmem:[%s14549_s25 + $0xb8] sm:$0xff]   ;;  %238 = vst [vmem:[%s14554_s26 + $0xa8] sm:$0xff] %v237_v21   ;;  %v249_v24 = vld [vmem:[%s14549_s25 + $0xc0] sm:$0xff]  }
  0x1d   : > { %242 = vst [vmem:[%s14554_s26 + $0xb0] sm:$0xff] %v241_v22   ;;  %246 = vst [vmem:[%s14554_s26 + $0xb8] sm:$0xff] %v245_v23   ;;  %v253_v25 = vld [vmem:[%s14549_s25 + $0xc8] sm:$0xff]   ;;  %v257_v26 = vld [vmem:[%s14549_s25 + $0xd0] sm:$0xff]  }
  0x1e   : > { %250 = vst [vmem:[%s14554_s26 + $0xc0] sm:$0xff] %v249_v24   ;;  %254 = vst [vmem:[%s14554_s26 + $0xc8] sm:$0xff] %v253_v25   ;;  %v261_v27 = vld [vmem:[%s14549_s25 + $0xd8] sm:$0xff]   ;;  %v265_v28 = vld [vmem:[%s14549_s25 + $0xe0] sm:$0xff]  }
  0x1f   : > { %258 = vst [vmem:[%s14554_s26 + $0xd0] sm:$0xff] %v257_v26   ;;  %v269_v29 = vld [vmem:[%s14549_s25 + $0xe8] sm:$0xff]   ;;  %262 = vst [vmem:[%s14554_s26 + $0xd8] sm:$0xff] %v261_v27   ;;  %v273_v30 = vld [vmem:[%s14549_s25 + $0xf0] sm:$0xff]  }
  0x20   : > { %266 = vst [vmem:[%s14554_s26 + $0xe0] sm:$0xff] %v265_v28   ;;  %270 = vst [vmem:[%s14554_s26 + $0xe8] sm:$0xff] %v269_v29   ;;  %v277_v31 = vld [vmem:[%s14549_s25 + $0xf8] sm:$0xff]   ;;  %v281_v32 = vld [vmem:[%s14549_s25 + $0x200] sm:$0xff]  }
  0x21   : > { %274 = vst [vmem:[%s14554_s26 + $0xf0] sm:$0xff] %v273_v30   ;;  %278 = vst [vmem:[%s14554_s26 + $0xf8] sm:$0xff] %v277_v31   ;;  %v285_v33 = vld [vmem:[%s14549_s25 + $0x208] sm:$0xff]   ;;  %v289_v34 = vld [vmem:[%s14549_s25 + $0x210] sm:$0xff]  }
  0x22   : > { %282 = vst [vmem:[%s14554_s26 + $0x100] sm:$0xff] %v281_v32   ;;  %v293_v35 = vld [vmem:[%s14549_s25 + $0x218] sm:$0xff]   ;;  %286 = vst [vmem:[%s14554_s26 + $0x108] sm:$0xff] %v285_v33   ;;  %v297_v36 = vld [vmem:[%s14549_s25 + $0x220] sm:$0xff]  }
  0x23   : > { %290 = vst [vmem:[%s14554_s26 + $0x110] sm:$0xff] %v289_v34   ;;  %294 = vst [vmem:[%s14554_s26 + $0x118] sm:$0xff] %v293_v35   ;;  %v301_v37 = vld [vmem:[%s14549_s25 + $0x228] sm:$0xff]   ;;  %v305_v38 = vld [vmem:[%s14549_s25 + $0x230] sm:$0xff]  }
  0x24   : > { %298 = vst [vmem:[%s14554_s26 + $0x120] sm:$0xff] %v297_v36   ;;  %302 = vst [vmem:[%s14554_s26 + $0x128] sm:$0xff] %v301_v37   ;;  %v309_v39 = vld [vmem:[%s14549_s25 + $0x238] sm:$0xff]   ;;  %v313_v40 = vld [vmem:[%s14549_s25 + $0x240] sm:$0xff]  }
  0x25   : > { %306 = vst [vmem:[%s14554_s26 + $0x130] sm:$0xff] %v305_v38   ;;  %v317_v41 = vld [vmem:[%s14549_s25 + $0x248] sm:$0xff]   ;;  %310 = vst [vmem:[%s14554_s26 + $0x138] sm:$0xff] %v309_v39   ;;  %v321_v42 = vld [vmem:[%s14549_s25 + $0x250] sm:$0xff]  }
  0x26   : > { %314 = vst [vmem:[%s14554_s26 + $0x140] sm:$0xff] %v313_v40   ;;  %318 = vst [vmem:[%s14554_s26 + $0x148] sm:$0xff] %v317_v41   ;;  %v325_v43 = vld [vmem:[%s14549_s25 + $0x258] sm:$0xff]   ;;  %v329_v44 = vld [vmem:[%s14549_s25 + $0x260] sm:$0xff]  }
  0x27   : > { %322 = vst [vmem:[%s14554_s26 + $0x150] sm:$0xff] %v321_v42   ;;  %326 = vst [vmem:[%s14554_s26 + $0x158] sm:$0xff] %v325_v43   ;;  %v333_v45 = vld [vmem:[%s14549_s25 + $0x268] sm:$0xff]   ;;  %v337_v46 = vld [vmem:[%s14549_s25 + $0x270] sm:$0xff]  }
  0x28   : > { %330 = vst [vmem:[%s14554_s26 + $0x160] sm:$0xff] %v329_v44   ;;  %v341_v47 = vld [vmem:[%s14549_s25 + $0x278] sm:$0xff]   ;;  %334 = vst [vmem:[%s14554_s26 + $0x168] sm:$0xff] %v333_v45   ;;  %v345_v48 = vld [vmem:[%s14549_s25 + $0x280] sm:$0xff]  }
  0x29   : > { %338 = vst [vmem:[%s14554_s26 + $0x170] sm:$0xff] %v337_v46   ;;  %342 = vst [vmem:[%s14554_s26 + $0x178] sm:$0xff] %v341_v47   ;;  %v349_v49 = vld [vmem:[%s14549_s25 + $0x288] sm:$0xff]   ;;  %v353_v50 = vld [vmem:[%s14549_s25 + $0x290] sm:$0xff]  }
  0x2a   : > { %346 = vst [vmem:[%s14554_s26 + $0x180] sm:$0xff] %v345_v48   ;;  %350 = vst [vmem:[%s14554_s26 + $0x188] sm:$0xff] %v349_v49   ;;  %v357_v51 = vld [vmem:[%s14549_s25 + $0x298] sm:$0xff]   ;;  %v361_v52 = vld [vmem:[%s14549_s25 + $0x2a0] sm:$0xff]  }
  0x2b   : > { %354 = vst [vmem:[%s14554_s26 + $0x190] sm:$0xff] %v353_v50   ;;  %v365_v53 = vld [vmem:[%s14549_s25 + $0x2a8] sm:$0xff]   ;;  %358 = vst [vmem:[%s14554_s26 + $0x198] sm:$0xff] %v357_v51   ;;  %v369_v54 = vld [vmem:[%s14549_s25 + $0x2b0] sm:$0xff]  }
  0x2c   : > { %362 = vst [vmem:[%s14554_s26 + $0x1a0] sm:$0xff] %v361_v52   ;;  %366 = vst [vmem:[%s14554_s26 + $0x1a8] sm:$0xff] %v365_v53   ;;  %v373_v55 = vld [vmem:[%s14549_s25 + $0x2b8] sm:$0xff]   ;;  %v377_v56 = vld [vmem:[%s14549_s25 + $0x2c0] sm:$0xff]  }
  0x2d   : > { %370 = vst [vmem:[%s14554_s26 + $0x1b0] sm:$0xff] %v369_v54   ;;  %374 = vst [vmem:[%s14554_s26 + $0x1b8] sm:$0xff] %v373_v55   ;;  %v381_v57 = vld [vmem:[%s14549_s25 + $0x2c8] sm:$0xff]   ;;  %v385_v58 = vld [vmem:[%s14549_s25 + $0x2d0] sm:$0xff]  }
  0x2e   : > { %378 = vst [vmem:[%s14554_s26 + $0x1c0] sm:$0xff] %v377_v56   ;;  %v389_v59 = vld [vmem:[%s14549_s25 + $0x2d8] sm:$0xff]   ;;  %382 = vst [vmem:[%s14554_s26 + $0x1c8] sm:$0xff] %v381_v57   ;;  %v393_v60 = vld [vmem:[%s14549_s25 + $0x2e0] sm:$0xff]  }
  0x2f   : > { %386 = vst [vmem:[%s14554_s26 + $0x1d0] sm:$0xff] %v385_v58   ;;  %390 = vst [vmem:[%s14554_s26 + $0x1d8] sm:$0xff] %v389_v59   ;;  %v397_v61 = vld [vmem:[%s14549_s25 + $0x2e8] sm:$0xff]   ;;  %v401_v62 = vld [vmem:[%s14549_s25 + $0x2f0] sm:$0xff]  }
  0x30   : > { %394 = vst [vmem:[%s14554_s26 + $0x1e0] sm:$0xff] %v393_v60   ;;  %398 = vst [vmem:[%s14554_s26 + $0x1e8] sm:$0xff] %v397_v61   ;;  %v405_v63 = vld [vmem:[%s14549_s25 + $0x2f8] sm:$0xff]   ;;  %v409_v0 = vld [vmem:[%s14549_s25 + $0x400] sm:$0xff]  }
  0x31   : > { %402 = vst [vmem:[%s14554_s26 + $0x1f0] sm:$0xff] %v401_v62   ;;  %v413_v1 = vld [vmem:[%s14549_s25 + $0x408] sm:$0xff]   ;;  %406 = vst [vmem:[%s14554_s26 + $0x1f8] sm:$0xff] %v405_v63   ;;  %v417_v2 = vld [vmem:[%s14549_s25 + $0x410] sm:$0xff]  }
  0x32   : > { %410 = vst [vmem:[%s14554_s26 + $0x200] sm:$0xff] %v409_v0   ;;  %414 = vst [vmem:[%s14554_s26 + $0x208] sm:$0xff] %v413_v1   ;;  %v421_v3 = vld [vmem:[%s14549_s25 + $0x418] sm:$0xff]   ;;  %v425_v4 = vld [vmem:[%s14549_s25 + $0x420] sm:$0xff]  }
  0x33   : > { %418 = vst [vmem:[%s14554_s26 + $0x210] sm:$0xff] %v417_v2   ;;  %422 = vst [vmem:[%s14554_s26 + $0x218] sm:$0xff] %v421_v3   ;;  %v429_v5 = vld [vmem:[%s14549_s25 + $0x428] sm:$0xff]   ;;  %v433_v6 = vld [vmem:[%s14549_s25 + $0x430] sm:$0xff]  }
  0x34   : > { %426 = vst [vmem:[%s14554_s26 + $0x220] sm:$0xff] %v425_v4   ;;  %v437_v7 = vld [vmem:[%s14549_s25 + $0x438] sm:$0xff]   ;;  %430 = vst [vmem:[%s14554_s26 + $0x228] sm:$0xff] %v429_v5   ;;  %v441_v8 = vld [vmem:[%s14549_s25 + $0x440] sm:$0xff]  }
  0x35   : > { %434 = vst [vmem:[%s14554_s26 + $0x230] sm:$0xff] %v433_v6   ;;  %438 = vst [vmem:[%s14554_s26 + $0x238] sm:$0xff] %v437_v7   ;;  %v445_v9 = vld [vmem:[%s14549_s25 + $0x448] sm:$0xff]   ;;  %v449_v10 = vld [vmem:[%s14549_s25 + $0x450] sm:$0xff]  }
  0x36   : > { %442 = vst [vmem:[%s14554_s26 + $0x240] sm:$0xff] %v441_v8   ;;  %446 = vst [vmem:[%s14554_s26 + $0x248] sm:$0xff] %v445_v9   ;;  %v453_v11 = vld [vmem:[%s14549_s25 + $0x458] sm:$0xff]   ;;  %v457_v12 = vld [vmem:[%s14549_s25 + $0x460] sm:$0xff]  }
  0x37   : > { %450 = vst [vmem:[%s14554_s26 + $0x250] sm:$0xff] %v449_v10   ;;  %v461_v13 = vld [vmem:[%s14549_s25 + $0x468] sm:$0xff]   ;;  %454 = vst [vmem:[%s14554_s26 + $0x258] sm:$0xff] %v453_v11   ;;  %v465_v14 = vld [vmem:[%s14549_s25 + $0x470] sm:$0xff]  }
  0x38   : > { %458 = vst [vmem:[%s14554_s26 + $0x260] sm:$0xff] %v457_v12   ;;  %462 = vst [vmem:[%s14554_s26 + $0x268] sm:$0xff] %v461_v13   ;;  %v469_v15 = vld [vmem:[%s14549_s25 + $0x478] sm:$0xff]   ;;  %v473_v16 = vld [vmem:[%s14549_s25 + $0x480] sm:$0xff]  }
  0x39   : > { %466 = vst [vmem:[%s14554_s26 + $0x270] sm:$0xff] %v465_v14   ;;  %470 = vst [vmem:[%s14554_s26 + $0x278] sm:$0xff] %v469_v15   ;;  %v477_v17 = vld [vmem:[%s14549_s25 + $0x488] sm:$0xff]   ;;  %v481_v18 = vld [vmem:[%s14549_s25 + $0x490] sm:$0xff]  }
  0x3a   : > { %474 = vst [vmem:[%s14554_s26 + $0x280] sm:$0xff] %v473_v16   ;;  %v485_v19 = vld [vmem:[%s14549_s25 + $0x498] sm:$0xff]   ;;  %478 = vst [vmem:[%s14554_s26 + $0x288] sm:$0xff] %v477_v17   ;;  %v489_v20 = vld [vmem:[%s14549_s25 + $0x4a0] sm:$0xff]  }
  0x3b   : > { %482 = vst [vmem:[%s14554_s26 + $0x290] sm:$0xff] %v481_v18   ;;  %486 = vst [vmem:[%s14554_s26 + $0x298] sm:$0xff] %v485_v19   ;;  %v493_v21 = vld [vmem:[%s14549_s25 + $0x4a8] sm:$0xff]   ;;  %v497_v22 = vld [vmem:[%s14549_s25 + $0x4b0] sm:$0xff]  }
  0x3c   : > { %490 = vst [vmem:[%s14554_s26 + $0x2a0] sm:$0xff] %v489_v20   ;;  %494 = vst [vmem:[%s14554_s26 + $0x2a8] sm:$0xff] %v493_v21   ;;  %v501_v23 = vld [vmem:[%s14549_s25 + $0x4b8] sm:$0xff]   ;;  %v505_v24 = vld [vmem:[%s14549_s25 + $0x4c0] sm:$0xff]  }
  0x3d   : > { %498 = vst [vmem:[%s14554_s26 + $0x2b0] sm:$0xff] %v497_v22   ;;  %v509_v25 = vld [vmem:[%s14549_s25 + $0x4c8] sm:$0xff]   ;;  %502 = vst [vmem:[%s14554_s26 + $0x2b8] sm:$0xff] %v501_v23   ;;  %v513_v26 = vld [vmem:[%s14549_s25 + $0x4d0] sm:$0xff]  }
  0x3e   : > { %506 = vst [vmem:[%s14554_s26 + $0x2c0] sm:$0xff] %v505_v24   ;;  %510 = vst [vmem:[%s14554_s26 + $0x2c8] sm:$0xff] %v509_v25   ;;  %v517_v27 = vld [vmem:[%s14549_s25 + $0x4d8] sm:$0xff]   ;;  %v521_v28 = vld [vmem:[%s14549_s25 + $0x4e0] sm:$0xff]  }
  0x3f   : > { %514 = vst [vmem:[%s14554_s26 + $0x2d0] sm:$0xff] %v513_v26   ;;  %518 = vst [vmem:[%s14554_s26 + $0x2d8] sm:$0xff] %v517_v27   ;;  %v525_v29 = vld [vmem:[%s14549_s25 + $0x4e8] sm:$0xff]   ;;  %v529_v30 = vld [vmem:[%s14549_s25 + $0x4f0] sm:$0xff]  }
  0x40   : > { %522 = vst [vmem:[%s14554_s26 + $0x2e0] sm:$0xff] %v521_v28   ;;  %v533_v31 = vld [vmem:[%s14549_s25 + $0x4f8] sm:$0xff]   ;;  %526 = vst [vmem:[%s14554_s26 + $0x2e8] sm:$0xff] %v525_v29   ;;  %v537_v32 = vld [vmem:[%s14549_s25 + $0x600] sm:$0xff]  }
  0x41   : > { %530 = vst [vmem:[%s14554_s26 + $0x2f0] sm:$0xff] %v529_v30   ;;  %534 = vst [vmem:[%s14554_s26 + $0x2f8] sm:$0xff] %v533_v31   ;;  %v541_v33 = vld [vmem:[%s14549_s25 + $0x608] sm:$0xff]   ;;  %v545_v34 = vld [vmem:[%s14549_s25 + $0x610] sm:$0xff]  }
  0x42   : > { %538 = vst [vmem:[%s14554_s26 + $0x300] sm:$0xff] %v537_v32   ;;  %542 = vst [vmem:[%s14554_s26 + $0x308] sm:$0xff] %v541_v33   ;;  %v549_v35 = vld [vmem:[%s14549_s25 + $0x618] sm:$0xff]   ;;  %v553_v36 = vld [vmem:[%s14549_s25 + $0x620] sm:$0xff]  }
  0x43   : > { %546 = vst [vmem:[%s14554_s26 + $0x310] sm:$0xff] %v545_v34   ;;  %v557_v37 = vld [vmem:[%s14549_s25 + $0x628] sm:$0xff]   ;;  %550 = vst [vmem:[%s14554_s26 + $0x318] sm:$0xff] %v549_v35   ;;  %v561_v38 = vld [vmem:[%s14549_s25 + $0x630] sm:$0xff]  }
  0x44   : > { %554 = vst [vmem:[%s14554_s26 + $0x320] sm:$0xff] %v553_v36   ;;  %558 = vst [vmem:[%s14554_s26 + $0x328] sm:$0xff] %v557_v37   ;;  %v565_v39 = vld [vmem:[%s14549_s25 + $0x638] sm:$0xff]   ;;  %v569_v40 = vld [vmem:[%s14549_s25 + $0x640] sm:$0xff]  }
  0x45   : > { %562 = vst [vmem:[%s14554_s26 + $0x330] sm:$0xff] %v561_v38   ;;  %566 = vst [vmem:[%s14554_s26 + $0x338] sm:$0xff] %v565_v39   ;;  %v573_v41 = vld [vmem:[%s14549_s25 + $0x648] sm:$0xff]   ;;  %v577_v42 = vld [vmem:[%s14549_s25 + $0x650] sm:$0xff]  }
  0x46   : > { %570 = vst [vmem:[%s14554_s26 + $0x340] sm:$0xff] %v569_v40   ;;  %v581_v43 = vld [vmem:[%s14549_s25 + $0x658] sm:$0xff]   ;;  %574 = vst [vmem:[%s14554_s26 + $0x348] sm:$0xff] %v573_v41   ;;  %v585_v44 = vld [vmem:[%s14549_s25 + $0x660] sm:$0xff]  }
  0x47   : > { %578 = vst [vmem:[%s14554_s26 + $0x350] sm:$0xff] %v577_v42   ;;  %582 = vst [vmem:[%s14554_s26 + $0x358] sm:$0xff] %v581_v43   ;;  %v589_v45 = vld [vmem:[%s14549_s25 + $0x668] sm:$0xff]   ;;  %v593_v46 = vld [vmem:[%s14549_s25 + $0x670] sm:$0xff]  }
  0x48   : > { %586 = vst [vmem:[%s14554_s26 + $0x360] sm:$0xff] %v585_v44   ;;  %590 = vst [vmem:[%s14554_s26 + $0x368] sm:$0xff] %v589_v45   ;;  %v597_v47 = vld [vmem:[%s14549_s25 + $0x678] sm:$0xff]   ;;  %v601_v48 = vld [vmem:[%s14549_s25 + $0x680] sm:$0xff]  }
  0x49   : > { %594 = vst [vmem:[%s14554_s26 + $0x370] sm:$0xff] %v593_v46   ;;  %v605_v49 = vld [vmem:[%s14549_s25 + $0x688] sm:$0xff]   ;;  %598 = vst [vmem:[%s14554_s26 + $0x378] sm:$0xff] %v597_v47   ;;  %v609_v50 = vld [vmem:[%s14549_s25 + $0x690] sm:$0xff]  }
  0x4a   : > { %602 = vst [vmem:[%s14554_s26 + $0x380] sm:$0xff] %v601_v48   ;;  %606 = vst [vmem:[%s14554_s26 + $0x388] sm:$0xff] %v605_v49   ;;  %v613_v51 = vld [vmem:[%s14549_s25 + $0x698] sm:$0xff]   ;;  %v617_v52 = vld [vmem:[%s14549_s25 + $0x6a0] sm:$0xff]  }
  0x4b   : > { %610 = vst [vmem:[%s14554_s26 + $0x390] sm:$0xff] %v609_v50   ;;  %614 = vst [vmem:[%s14554_s26 + $0x398] sm:$0xff] %v613_v51   ;;  %v621_v53 = vld [vmem:[%s14549_s25 + $0x6a8] sm:$0xff]   ;;  %v625_v54 = vld [vmem:[%s14549_s25 + $0x6b0] sm:$0xff]  }
  0x4c   : > { %618 = vst [vmem:[%s14554_s26 + $0x3a0] sm:$0xff] %v617_v52   ;;  %v629_v55 = vld [vmem:[%s14549_s25 + $0x6b8] sm:$0xff]   ;;  %622 = vst [vmem:[%s14554_s26 + $0x3a8] sm:$0xff] %v621_v53   ;;  %v633_v56 = vld [vmem:[%s14549_s25 + $0x6c0] sm:$0xff]  }
  0x4d   : > { %626 = vst [vmem:[%s14554_s26 + $0x3b0] sm:$0xff] %v625_v54   ;;  %630 = vst [vmem:[%s14554_s26 + $0x3b8] sm:$0xff] %v629_v55   ;;  %v637_v57 = vld [vmem:[%s14549_s25 + $0x6c8] sm:$0xff]   ;;  %v641_v58 = vld [vmem:[%s14549_s25 + $0x6d0] sm:$0xff]  }
  0x4e   : > { %634 = vst [vmem:[%s14554_s26 + $0x3c0] sm:$0xff] %v633_v56   ;;  %638 = vst [vmem:[%s14554_s26 + $0x3c8] sm:$0xff] %v637_v57   ;;  %v645_v59 = vld [vmem:[%s14549_s25 + $0x6d8] sm:$0xff]   ;;  %v649_v60 = vld [vmem:[%s14549_s25 + $0x6e0] sm:$0xff]  }
  0x4f   : > { %642 = vst [vmem:[%s14554_s26 + $0x3d0] sm:$0xff] %v641_v58   ;;  %v653_v61 = vld [vmem:[%s14549_s25 + $0x6e8] sm:$0xff]   ;;  %646 = vst [vmem:[%s14554_s26 + $0x3d8] sm:$0xff] %v645_v59   ;;  %v657_v62 = vld [vmem:[%s14549_s25 + $0x6f0] sm:$0xff]  }
  0x50   : > { %650 = vst [vmem:[%s14554_s26 + $0x3e0] sm:$0xff] %v649_v60   ;;  %654 = vst [vmem:[%s14554_s26 + $0x3e8] sm:$0xff] %v653_v61   ;;  %v661_v63 = vld [vmem:[%s14549_s25 + $0x6f8] sm:$0xff]   ;;  %v665_v0 = vld [vmem:[%s14549_s25 + $0x800] sm:$0xff]  }
  0x51   : > { %658 = vst [vmem:[%s14554_s26 + $0x3f0] sm:$0xff] %v657_v62   ;;  %662 = vst [vmem:[%s14554_s26 + $0x3f8] sm:$0xff] %v661_v63   ;;  %v669_v1 = vld [vmem:[%s14549_s25 + $0x808] sm:$0xff]   ;;  %v673_v2 = vld [vmem:[%s14549_s25 + $0x810] sm:$0xff]  }
  0x52   : > { %666 = vst [vmem:[%s14554_s26 + $0x400] sm:$0xff] %v665_v0   ;;  %v677_v3 = vld [vmem:[%s14549_s25 + $0x818] sm:$0xff]   ;;  %670 = vst [vmem:[%s14554_s26 + $0x408] sm:$0xff] %v669_v1   ;;  %v681_v4 = vld [vmem:[%s14549_s25 + $0x820] sm:$0xff]  }
  0x53   : > { %674 = vst [vmem:[%s14554_s26 + $0x410] sm:$0xff] %v673_v2   ;;  %678 = vst [vmem:[%s14554_s26 + $0x418] sm:$0xff] %v677_v3   ;;  %v685_v5 = vld [vmem:[%s14549_s25 + $0x828] sm:$0xff]   ;;  %v689_v6 = vld [vmem:[%s14549_s25 + $0x830] sm:$0xff]  }
  0x54   : > { %682 = vst [vmem:[%s14554_s26 + $0x420] sm:$0xff] %v681_v4   ;;  %686 = vst [vmem:[%s14554_s26 + $0x428] sm:$0xff] %v685_v5   ;;  %v693_v7 = vld [vmem:[%s14549_s25 + $0x838] sm:$0xff]   ;;  %v697_v8 = vld [vmem:[%s14549_s25 + $0x840] sm:$0xff]  }
  0x55   : > { %690 = vst [vmem:[%s14554_s26 + $0x430] sm:$0xff] %v689_v6   ;;  %v701_v9 = vld [vmem:[%s14549_s25 + $0x848] sm:$0xff]   ;;  %694 = vst [vmem:[%s14554_s26 + $0x438] sm:$0xff] %v693_v7   ;;  %v705_v10 = vld [vmem:[%s14549_s25 + $0x850] sm:$0xff]  }
  0x56   : > { %698 = vst [vmem:[%s14554_s26 + $0x440] sm:$0xff] %v697_v8   ;;  %702 = vst [vmem:[%s14554_s26 + $0x448] sm:$0xff] %v701_v9   ;;  %v709_v11 = vld [vmem:[%s14549_s25 + $0x858] sm:$0xff]   ;;  %v713_v12 = vld [vmem:[%s14549_s25 + $0x860] sm:$0xff]  }
  0x57   : > { %706 = vst [vmem:[%s14554_s26 + $0x450] sm:$0xff] %v705_v10   ;;  %710 = vst [vmem:[%s14554_s26 + $0x458] sm:$0xff] %v709_v11   ;;  %v717_v13 = vld [vmem:[%s14549_s25 + $0x868] sm:$0xff]   ;;  %v721_v14 = vld [vmem:[%s14549_s25 + $0x870] sm:$0xff]  }
  0x58   : > { %714 = vst [vmem:[%s14554_s26 + $0x460] sm:$0xff] %v713_v12   ;;  %v725_v15 = vld [vmem:[%s14549_s25 + $0x878] sm:$0xff]   ;;  %718 = vst [vmem:[%s14554_s26 + $0x468] sm:$0xff] %v717_v13   ;;  %v729_v16 = vld [vmem:[%s14549_s25 + $0x880] sm:$0xff]  }
  0x59   : > { %722 = vst [vmem:[%s14554_s26 + $0x470] sm:$0xff] %v721_v14   ;;  %726 = vst [vmem:[%s14554_s26 + $0x478] sm:$0xff] %v725_v15   ;;  %v733_v17 = vld [vmem:[%s14549_s25 + $0x888] sm:$0xff]   ;;  %v737_v18 = vld [vmem:[%s14549_s25 + $0x890] sm:$0xff]  }
  0x5a   : > { %730 = vst [vmem:[%s14554_s26 + $0x480] sm:$0xff] %v729_v16   ;;  %734 = vst [vmem:[%s14554_s26 + $0x488] sm:$0xff] %v733_v17   ;;  %v741_v19 = vld [vmem:[%s14549_s25 + $0x898] sm:$0xff]   ;;  %v745_v20 = vld [vmem:[%s14549_s25 + $0x8a0] sm:$0xff]  }
  0x5b   : > { %738 = vst [vmem:[%s14554_s26 + $0x490] sm:$0xff] %v737_v18   ;;  %v749_v21 = vld [vmem:[%s14549_s25 + $0x8a8] sm:$0xff]   ;;  %742 = vst [vmem:[%s14554_s26 + $0x498] sm:$0xff] %v741_v19   ;;  %v753_v22 = vld [vmem:[%s14549_s25 + $0x8b0] sm:$0xff]  }
  0x5c   : > { %746 = vst [vmem:[%s14554_s26 + $0x4a0] sm:$0xff] %v745_v20   ;;  %750 = vst [vmem:[%s14554_s26 + $0x4a8] sm:$0xff] %v749_v21   ;;  %v757_v23 = vld [vmem:[%s14549_s25 + $0x8b8] sm:$0xff]   ;;  %v761_v24 = vld [vmem:[%s14549_s25 + $0x8c0] sm:$0xff]  }
  0x5d   : > { %754 = vst [vmem:[%s14554_s26 + $0x4b0] sm:$0xff] %v753_v22   ;;  %758 = vst [vmem:[%s14554_s26 + $0x4b8] sm:$0xff] %v757_v23   ;;  %v765_v25 = vld [vmem:[%s14549_s25 + $0x8c8] sm:$0xff]   ;;  %v769_v26 = vld [vmem:[%s14549_s25 + $0x8d0] sm:$0xff]  }
  0x5e   : > { %762 = vst [vmem:[%s14554_s26 + $0x4c0] sm:$0xff] %v761_v24   ;;  %v773_v27 = vld [vmem:[%s14549_s25 + $0x8d8] sm:$0xff]   ;;  %766 = vst [vmem:[%s14554_s26 + $0x4c8] sm:$0xff] %v765_v25   ;;  %v777_v28 = vld [vmem:[%s14549_s25 + $0x8e0] sm:$0xff]  }
  0x5f   : > { %770 = vst [vmem:[%s14554_s26 + $0x4d0] sm:$0xff] %v769_v26   ;;  %774 = vst [vmem:[%s14554_s26 + $0x4d8] sm:$0xff] %v773_v27   ;;  %v781_v29 = vld [vmem:[%s14549_s25 + $0x8e8] sm:$0xff]   ;;  %v785_v30 = vld [vmem:[%s14549_s25 + $0x8f0] sm:$0xff]  }
  0x60   : > { %778 = vst [vmem:[%s14554_s26 + $0x4e0] sm:$0xff] %v777_v28   ;;  %782 = vst [vmem:[%s14554_s26 + $0x4e8] sm:$0xff] %v781_v29   ;;  %v789_v31 = vld [vmem:[%s14549_s25 + $0x8f8] sm:$0xff]   ;;  %v793_v32 = vld [vmem:[%s14549_s25 + $0xa00] sm:$0xff]  }
  0x61   : > { %786 = vst [vmem:[%s14554_s26 + $0x4f0] sm:$0xff] %v785_v30   ;;  %v797_v33 = vld [vmem:[%s14549_s25 + $0xa08] sm:$0xff]   ;;  %790 = vst [vmem:[%s14554_s26 + $0x4f8] sm:$0xff] %v789_v31   ;;  %v801_v34 = vld [vmem:[%s14549_s25 + $0xa10] sm:$0xff]  }
  0x62   : > { %794 = vst [vmem:[%s14554_s26 + $0x500] sm:$0xff] %v793_v32   ;;  %798 = vst [vmem:[%s14554_s26 + $0x508] sm:$0xff] %v797_v33   ;;  %v805_v35 = vld [vmem:[%s14549_s25 + $0xa18] sm:$0xff]   ;;  %v809_v36 = vld [vmem:[%s14549_s25 + $0xa20] sm:$0xff]  }
  0x63   : > { %802 = vst [vmem:[%s14554_s26 + $0x510] sm:$0xff] %v801_v34   ;;  %806 = vst [vmem:[%s14554_s26 + $0x518] sm:$0xff] %v805_v35   ;;  %v813_v37 = vld [vmem:[%s14549_s25 + $0xa28] sm:$0xff]   ;;  %v817_v38 = vld [vmem:[%s14549_s25 + $0xa30] sm:$0xff]  }
  0x64   : > { %810 = vst [vmem:[%s14554_s26 + $0x520] sm:$0xff] %v809_v36   ;;  %v821_v39 = vld [vmem:[%s14549_s25 + $0xa38] sm:$0xff]   ;;  %814 = vst [vmem:[%s14554_s26 + $0x528] sm:$0xff] %v813_v37   ;;  %v825_v40 = vld [vmem:[%s14549_s25 + $0xa40] sm:$0xff]  }
  0x65   : > { %818 = vst [vmem:[%s14554_s26 + $0x530] sm:$0xff] %v817_v38   ;;  %822 = vst [vmem:[%s14554_s26 + $0x538] sm:$0xff] %v821_v39   ;;  %v829_v41 = vld [vmem:[%s14549_s25 + $0xa48] sm:$0xff]   ;;  %v833_v42 = vld [vmem:[%s14549_s25 + $0xa50] sm:$0xff]  }
  0x66   : > { %826 = vst [vmem:[%s14554_s26 + $0x540] sm:$0xff] %v825_v40   ;;  %830 = vst [vmem:[%s14554_s26 + $0x548] sm:$0xff] %v829_v41   ;;  %v837_v43 = vld [vmem:[%s14549_s25 + $0xa58] sm:$0xff]   ;;  %v841_v44 = vld [vmem:[%s14549_s25 + $0xa60] sm:$0xff]  }
  0x67   : > { %834 = vst [vmem:[%s14554_s26 + $0x550] sm:$0xff] %v833_v42   ;;  %v845_v45 = vld [vmem:[%s14549_s25 + $0xa68] sm:$0xff]   ;;  %838 = vst [vmem:[%s14554_s26 + $0x558] sm:$0xff] %v837_v43   ;;  %v849_v46 = vld [vmem:[%s14549_s25 + $0xa70] sm:$0xff]  }
  0x68   : > { %842 = vst [vmem:[%s14554_s26 + $0x560] sm:$0xff] %v841_v44   ;;  %846 = vst [vmem:[%s14554_s26 + $0x568] sm:$0xff] %v845_v45   ;;  %v853_v47 = vld [vmem:[%s14549_s25 + $0xa78] sm:$0xff]   ;;  %v857_v48 = vld [vmem:[%s14549_s25 + $0xa80] sm:$0xff]  }
  0x69   : > { %850 = vst [vmem:[%s14554_s26 + $0x570] sm:$0xff] %v849_v46   ;;  %854 = vst [vmem:[%s14554_s26 + $0x578] sm:$0xff] %v853_v47   ;;  %v861_v49 = vld [vmem:[%s14549_s25 + $0xa88] sm:$0xff]   ;;  %v865_v50 = vld [vmem:[%s14549_s25 + $0xa90] sm:$0xff]  }
  0x6a   : > { %858 = vst [vmem:[%s14554_s26 + $0x580] sm:$0xff] %v857_v48   ;;  %v869_v51 = vld [vmem:[%s14549_s25 + $0xa98] sm:$0xff]   ;;  %862 = vst [vmem:[%s14554_s26 + $0x588] sm:$0xff] %v861_v49   ;;  %v873_v52 = vld [vmem:[%s14549_s25 + $0xaa0] sm:$0xff]  }
  0x6b   : > { %866 = vst [vmem:[%s14554_s26 + $0x590] sm:$0xff] %v865_v50   ;;  %870 = vst [vmem:[%s14554_s26 + $0x598] sm:$0xff] %v869_v51   ;;  %v877_v53 = vld [vmem:[%s14549_s25 + $0xaa8] sm:$0xff]   ;;  %v881_v54 = vld [vmem:[%s14549_s25 + $0xab0] sm:$0xff]  }
  0x6c   : > { %874 = vst [vmem:[%s14554_s26 + $0x5a0] sm:$0xff] %v873_v52   ;;  %878 = vst [vmem:[%s14554_s26 + $0x5a8] sm:$0xff] %v877_v53   ;;  %v885_v55 = vld [vmem:[%s14549_s25 + $0xab8] sm:$0xff]   ;;  %v889_v56 = vld [vmem:[%s14549_s25 + $0xac0] sm:$0xff]  }
  0x6d   : > { %882 = vst [vmem:[%s14554_s26 + $0x5b0] sm:$0xff] %v881_v54   ;;  %v893_v57 = vld [vmem:[%s14549_s25 + $0xac8] sm:$0xff]   ;;  %886 = vst [vmem:[%s14554_s26 + $0x5b8] sm:$0xff] %v885_v55   ;;  %v897_v58 = vld [vmem:[%s14549_s25 + $0xad0] sm:$0xff]  }
  0x6e   : > { %890 = vst [vmem:[%s14554_s26 + $0x5c0] sm:$0xff] %v889_v56   ;;  %894 = vst [vmem:[%s14554_s26 + $0x5c8] sm:$0xff] %v893_v57   ;;  %v901_v59 = vld [vmem:[%s14549_s25 + $0xad8] sm:$0xff]   ;;  %v905_v60 = vld [vmem:[%s14549_s25 + $0xae0] sm:$0xff]  }
  0x6f   : > { %898 = vst [vmem:[%s14554_s26 + $0x5d0] sm:$0xff] %v897_v58   ;;  %902 = vst [vmem:[%s14554_s26 + $0x5d8] sm:$0xff] %v901_v59   ;;  %v909_v61 = vld [vmem:[%s14549_s25 + $0xae8] sm:$0xff]   ;;  %v913_v62 = vld [vmem:[%s14549_s25 + $0xaf0] sm:$0xff]  }
  0x70   : > { %906 = vst [vmem:[%s14554_s26 + $0x5e0] sm:$0xff] %v905_v60   ;;  %v917_v63 = vld [vmem:[%s14549_s25 + $0xaf8] sm:$0xff]   ;;  %910 = vst [vmem:[%s14554_s26 + $0x5e8] sm:$0xff] %v909_v61   ;;  %v921_v0 = vld [vmem:[%s14549_s25 + $0xc00] sm:$0xff]  }
  0x71   : > { %914 = vst [vmem:[%s14554_s26 + $0x5f0] sm:$0xff] %v913_v62   ;;  %918 = vst [vmem:[%s14554_s26 + $0x5f8] sm:$0xff] %v917_v63   ;;  %v925_v1 = vld [vmem:[%s14549_s25 + $0xc08] sm:$0xff]   ;;  %v929_v2 = vld [vmem:[%s14549_s25 + $0xc10] sm:$0xff]  }
  0x72   : > { %922 = vst [vmem:[%s14554_s26 + $0x600] sm:$0xff] %v921_v0   ;;  %926 = vst [vmem:[%s14554_s26 + $0x608] sm:$0xff] %v925_v1   ;;  %v933_v3 = vld [vmem:[%s14549_s25 + $0xc18] sm:$0xff]   ;;  %v937_v4 = vld [vmem:[%s14549_s25 + $0xc20] sm:$0xff]  }
  0x73   : > { %930 = vst [vmem:[%s14554_s26 + $0x610] sm:$0xff] %v929_v2   ;;  %v941_v5 = vld [vmem:[%s14549_s25 + $0xc28] sm:$0xff]   ;;  %934 = vst [vmem:[%s14554_s26 + $0x618] sm:$0xff] %v933_v3   ;;  %v945_v6 = vld [vmem:[%s14549_s25 + $0xc30] sm:$0xff]  }
  0x74   : > { %938 = vst [vmem:[%s14554_s26 + $0x620] sm:$0xff] %v937_v4   ;;  %942 = vst [vmem:[%s14554_s26 + $0x628] sm:$0xff] %v941_v5   ;;  %v949_v7 = vld [vmem:[%s14549_s25 + $0xc38] sm:$0xff]   ;;  %v953_v8 = vld [vmem:[%s14549_s25 + $0xc40] sm:$0xff]  }
  0x75   : > { %946 = vst [vmem:[%s14554_s26 + $0x630] sm:$0xff] %v945_v6   ;;  %950 = vst [vmem:[%s14554_s26 + $0x638] sm:$0xff] %v949_v7   ;;  %v957_v9 = vld [vmem:[%s14549_s25 + $0xc48] sm:$0xff]   ;;  %v961_v10 = vld [vmem:[%s14549_s25 + $0xc50] sm:$0xff]  }
  0x76   : > { %954 = vst [vmem:[%s14554_s26 + $0x640] sm:$0xff] %v953_v8   ;;  %v965_v11 = vld [vmem:[%s14549_s25 + $0xc58] sm:$0xff]   ;;  %958 = vst [vmem:[%s14554_s26 + $0x648] sm:$0xff] %v957_v9   ;;  %v969_v12 = vld [vmem:[%s14549_s25 + $0xc60] sm:$0xff]  }
  0x77   : > { %962 = vst [vmem:[%s14554_s26 + $0x650] sm:$0xff] %v961_v10   ;;  %966 = vst [vmem:[%s14554_s26 + $0x658] sm:$0xff] %v965_v11   ;;  %v973_v13 = vld [vmem:[%s14549_s25 + $0xc68] sm:$0xff]   ;;  %v977_v14 = vld [vmem:[%s14549_s25 + $0xc70] sm:$0xff]  }
  0x78   : > { %970 = vst [vmem:[%s14554_s26 + $0x660] sm:$0xff] %v969_v12   ;;  %974 = vst [vmem:[%s14554_s26 + $0x668] sm:$0xff] %v973_v13   ;;  %v981_v15 = vld [vmem:[%s14549_s25 + $0xc78] sm:$0xff]   ;;  %v985_v16 = vld [vmem:[%s14549_s25 + $0xc80] sm:$0xff]  }
  0x79   : > { %978 = vst [vmem:[%s14554_s26 + $0x670] sm:$0xff] %v977_v14   ;;  %v989_v17 = vld [vmem:[%s14549_s25 + $0xc88] sm:$0xff]   ;;  %982 = vst [vmem:[%s14554_s26 + $0x678] sm:$0xff] %v981_v15   ;;  %v993_v18 = vld [vmem:[%s14549_s25 + $0xc90] sm:$0xff]  }
  0x7a   : > { %986 = vst [vmem:[%s14554_s26 + $0x680] sm:$0xff] %v985_v16   ;;  %990 = vst [vmem:[%s14554_s26 + $0x688] sm:$0xff] %v989_v17   ;;  %v997_v19 = vld [vmem:[%s14549_s25 + $0xc98] sm:$0xff]   ;;  %v1001_v20 = vld [vmem:[%s14549_s25 + $0xca0] sm:$0xff]  }
  0x7b   : > { %994 = vst [vmem:[%s14554_s26 + $0x690] sm:$0xff] %v993_v18   ;;  %998 = vst [vmem:[%s14554_s26 + $0x698] sm:$0xff] %v997_v19   ;;  %v1005_v21 = vld [vmem:[%s14549_s25 + $0xca8] sm:$0xff]   ;;  %v1009_v22 = vld [vmem:[%s14549_s25 + $0xcb0] sm:$0xff]  }
  0x7c   : > { %1002 = vst [vmem:[%s14554_s26 + $0x6a0] sm:$0xff] %v1001_v20   ;;  %v1013_v23 = vld [vmem:[%s14549_s25 + $0xcb8] sm:$0xff]   ;;  %1006 = vst [vmem:[%s14554_s26 + $0x6a8] sm:$0xff] %v1005_v21   ;;  %v1017_v24 = vld [vmem:[%s14549_s25 + $0xcc0] sm:$0xff]  }
  0x7d   : > { %1010 = vst [vmem:[%s14554_s26 + $0x6b0] sm:$0xff] %v1009_v22   ;;  %1014 = vst [vmem:[%s14554_s26 + $0x6b8] sm:$0xff] %v1013_v23   ;;  %v1021_v25 = vld [vmem:[%s14549_s25 + $0xcc8] sm:$0xff]   ;;  %v1025_v26 = vld [vmem:[%s14549_s25 + $0xcd0] sm:$0xff]  }
  0x7e   : > { %1018 = vst [vmem:[%s14554_s26 + $0x6c0] sm:$0xff] %v1017_v24   ;;  %1022 = vst [vmem:[%s14554_s26 + $0x6c8] sm:$0xff] %v1021_v25   ;;  %v1029_v27 = vld [vmem:[%s14549_s25 + $0xcd8] sm:$0xff]   ;;  %v1033_v28 = vld [vmem:[%s14549_s25 + $0xce0] sm:$0xff]  }
  0x7f   : > { %1026 = vst [vmem:[%s14554_s26 + $0x6d0] sm:$0xff] %v1025_v26   ;;  %v1037_v29 = vld [vmem:[%s14549_s25 + $0xce8] sm:$0xff]   ;;  %1030 = vst [vmem:[%s14554_s26 + $0x6d8] sm:$0xff] %v1029_v27   ;;  %v1041_v30 = vld [vmem:[%s14549_s25 + $0xcf0] sm:$0xff]  }
  0x80   : > { %1034 = vst [vmem:[%s14554_s26 + $0x6e0] sm:$0xff] %v1033_v28   ;;  %1038 = vst [vmem:[%s14554_s26 + $0x6e8] sm:$0xff] %v1037_v29   ;;  %v1045_v31 = vld [vmem:[%s14549_s25 + $0xcf8] sm:$0xff]   ;;  %v1049_v32 = vld [vmem:[%s14549_s25 + $0xe00] sm:$0xff]  }
  0x81   : > { %1042 = vst [vmem:[%s14554_s26 + $0x6f0] sm:$0xff] %v1041_v30   ;;  %1046 = vst [vmem:[%s14554_s26 + $0x6f8] sm:$0xff] %v1045_v31   ;;  %v1053_v33 = vld [vmem:[%s14549_s25 + $0xe08] sm:$0xff]   ;;  %v1057_v34 = vld [vmem:[%s14549_s25 + $0xe10] sm:$0xff]  }
  0x82   : > { %1050 = vst [vmem:[%s14554_s26 + $0x700] sm:$0xff] %v1049_v32   ;;  %v1061_v35 = vld [vmem:[%s14549_s25 + $0xe18] sm:$0xff]   ;;  %1054 = vst [vmem:[%s14554_s26 + $0x708] sm:$0xff] %v1053_v33   ;;  %v1065_v36 = vld [vmem:[%s14549_s25 + $0xe20] sm:$0xff]  }
  0x83   : > { %1058 = vst [vmem:[%s14554_s26 + $0x710] sm:$0xff] %v1057_v34   ;;  %1062 = vst [vmem:[%s14554_s26 + $0x718] sm:$0xff] %v1061_v35   ;;  %v1069_v37 = vld [vmem:[%s14549_s25 + $0xe28] sm:$0xff]   ;;  %v1073_v38 = vld [vmem:[%s14549_s25 + $0xe30] sm:$0xff]  }
  0x84   : > { %1066 = vst [vmem:[%s14554_s26 + $0x720] sm:$0xff] %v1065_v36   ;;  %1070 = vst [vmem:[%s14554_s26 + $0x728] sm:$0xff] %v1069_v37   ;;  %v1077_v39 = vld [vmem:[%s14549_s25 + $0xe38] sm:$0xff]   ;;  %v1081_v40 = vld [vmem:[%s14549_s25 + $0xe40] sm:$0xff]  }
  0x85   : > { %1074 = vst [vmem:[%s14554_s26 + $0x730] sm:$0xff] %v1073_v38   ;;  %v1085_v41 = vld [vmem:[%s14549_s25 + $0xe48] sm:$0xff]   ;;  %1078 = vst [vmem:[%s14554_s26 + $0x738] sm:$0xff] %v1077_v39   ;;  %v1089_v42 = vld [vmem:[%s14549_s25 + $0xe50] sm:$0xff]  }
  0x86   : > { %1082 = vst [vmem:[%s14554_s26 + $0x740] sm:$0xff] %v1081_v40   ;;  %1086 = vst [vmem:[%s14554_s26 + $0x748] sm:$0xff] %v1085_v41   ;;  %v1093_v43 = vld [vmem:[%s14549_s25 + $0xe58] sm:$0xff]   ;;  %v1097_v44 = vld [vmem:[%s14549_s25 + $0xe60] sm:$0xff]  }
  0x87   : > { %1090 = vst [vmem:[%s14554_s26 + $0x750] sm:$0xff] %v1089_v42   ;;  %1094 = vst [vmem:[%s14554_s26 + $0x758] sm:$0xff] %v1093_v43   ;;  %v1101_v45 = vld [vmem:[%s14549_s25 + $0xe68] sm:$0xff]   ;;  %v1105_v46 = vld [vmem:[%s14549_s25 + $0xe70] sm:$0xff]  }
  0x88   : > { %1098 = vst [vmem:[%s14554_s26 + $0x760] sm:$0xff] %v1097_v44   ;;  %v1109_v47 = vld [vmem:[%s14549_s25 + $0xe78] sm:$0xff]   ;;  %1102 = vst [vmem:[%s14554_s26 + $0x768] sm:$0xff] %v1101_v45   ;;  %v1113_v48 = vld [vmem:[%s14549_s25 + $0xe80] sm:$0xff]  }
  0x89   : > { %1106 = vst [vmem:[%s14554_s26 + $0x770] sm:$0xff] %v1105_v46   ;;  %1110 = vst [vmem:[%s14554_s26 + $0x778] sm:$0xff] %v1109_v47   ;;  %v1117_v49 = vld [vmem:[%s14549_s25 + $0xe88] sm:$0xff]   ;;  %v1121_v50 = vld [vmem:[%s14549_s25 + $0xe90] sm:$0xff]  }
  0x8a   : > { %1114 = vst [vmem:[%s14554_s26 + $0x780] sm:$0xff] %v1113_v48   ;;  %1118 = vst [vmem:[%s14554_s26 + $0x788] sm:$0xff] %v1117_v49   ;;  %v1125_v51 = vld [vmem:[%s14549_s25 + $0xe98] sm:$0xff]   ;;  %v1129_v52 = vld [vmem:[%s14549_s25 + $0xea0] sm:$0xff]  }
  0x8b   : > { %1122 = vst [vmem:[%s14554_s26 + $0x790] sm:$0xff] %v1121_v50   ;;  %v1133_v53 = vld [vmem:[%s14549_s25 + $0xea8] sm:$0xff]   ;;  %1126 = vst [vmem:[%s14554_s26 + $0x798] sm:$0xff] %v1125_v51   ;;  %v1137_v54 = vld [vmem:[%s14549_s25 + $0xeb0] sm:$0xff]  }
  0x8c   : > { %1130 = vst [vmem:[%s14554_s26 + $0x7a0] sm:$0xff] %v1129_v52   ;;  %1134 = vst [vmem:[%s14554_s26 + $0x7a8] sm:$0xff] %v1133_v53   ;;  %v1141_v55 = vld [vmem:[%s14549_s25 + $0xeb8] sm:$0xff]   ;;  %v1145_v56 = vld [vmem:[%s14549_s25 + $0xec0] sm:$0xff]  }
  0x8d   : > { %1138 = vst [vmem:[%s14554_s26 + $0x7b0] sm:$0xff] %v1137_v54   ;;  %1142 = vst [vmem:[%s14554_s26 + $0x7b8] sm:$0xff] %v1141_v55   ;;  %v1149_v57 = vld [vmem:[%s14549_s25 + $0xec8] sm:$0xff]   ;;  %v1153_v58 = vld [vmem:[%s14549_s25 + $0xed0] sm:$0xff]  }
  0x8e   : > { %1146 = vst [vmem:[%s14554_s26 + $0x7c0] sm:$0xff] %v1145_v56   ;;  %v1157_v59 = vld [vmem:[%s14549_s25 + $0xed8] sm:$0xff]   ;;  %1150 = vst [vmem:[%s14554_s26 + $0x7c8] sm:$0xff] %v1149_v57   ;;  %v1161_v60 = vld [vmem:[%s14549_s25 + $0xee0] sm:$0xff]  }
  0x8f   : > { %1154 = vst [vmem:[%s14554_s26 + $0x7d0] sm:$0xff] %v1153_v58   ;;  %1158 = vst [vmem:[%s14554_s26 + $0x7d8] sm:$0xff] %v1157_v59   ;;  %v1165_v61 = vld [vmem:[%s14549_s25 + $0xee8] sm:$0xff]   ;;  %v1169_v62 = vld [vmem:[%s14549_s25 + $0xef0] sm:$0xff]  }
  0x90   : > { %1162 = vst [vmem:[%s14554_s26 + $0x7e0] sm:$0xff] %v1161_v60   ;;  %1166 = vst [vmem:[%s14554_s26 + $0x7e8] sm:$0xff] %v1165_v61   ;;  %v1173_v63 = vld [vmem:[%s14549_s25 + $0xef8] sm:$0xff]  }
  0x91   : > { %1170 = vst [vmem:[%s14554_s26 + $0x7f0] sm:$0xff] %v1169_v62   ;;  %1174 = vst [vmem:[%s14554_s26 + $0x7f8] sm:$0xff] %v1173_v63  }
  0x92 PF: > { %p12324_p5 = scmp.ge.s32.totalorder %s14486_s14, 1  ;;  %p4300_p6 = scmp.lt.s32.totalorder %s14486_s14, 3 }
  0x94   : > { %p4301_p7 = pnand %p12324_p5, %p4300_p6 }
  0x96   : > { %4304 = sbr.rel (%p4301_p7) target bundleno = 1630 (0x65e), region = 80 }
  0x9d   : > { %v14190_v0 = vld [vmem:[%s18785_s1] sm:$0xff]   ;;  %s4307_s29 = sand.u32 1, %s14478_s12   ;;  %v14191_v1 = vld [vmem:[%s18785_s1 + $0x10] sm:$0xff]   ;;  %v14192_v2 = vld [vmem:[%s18785_s1 + $0x8] sm:$0xff]   ;;  %vm4585_vm0 = vcmask 261120   ;;  %s14488_s26 = smov 112  }
  0x9e   : > { %s12325_s5 = sshll.u32 %s4307_s29, 11  ;;  %13615 = vmatprep.subr.bf16.mxu0 %v14190_v0  ;;  %13683 = vmatprep.subr.bf16.mxu1 %v14191_v1  ;;  %v14193_v3 = vld [vmem:[%s18785_s1 + $0x18] sm:$0xff]   ;;  %v14198_v8 = vld [vmem:[%s18785_s1 + $0x30] sm:$0xff]   ;;  %v14199_v9 = vld [vmem:[%s18785_s1 + $0x20] sm:$0xff]   ;;  %s14489_s27 = smov 96   ;;  %vm5035_vm1 = vcmask 130048  }
  0x9f   : > { %13616 = vmatpush3.bf16.msra.mxu0 %v14190_v0  ;;  %13684 = vmatpush3.bf16.msra.mxu1 %v14191_v1  ;;  %s15080_s10 = scalar_lea.vmem [#allocation2], %s12325_s5  ;;  %v14232_v28 = vld [vmem:[%s18785_s1 + $0x38] sm:$0xff]   ;;  %v14233_v29 = vld [vmem:[%s18785_s1 + $0x28] sm:$0xff]   ;;  %v12463_v38 = vld [vmem:[%s18786_s2] ss:$0 sm:$0xff]  ;;  %s14490_s28 = smov 80  }
  0xa0   : > { %13617 = vmatprep.subr.bf16.mxu0 %v14192_v2  ;;  %v14194_v4 = vld [vmem:[%s15080_s10] sm:$0xff]   ;;  %13685 = vmatprep.subr.bf16.mxu1 %v14193_v3  ;;  %v14196_v6 = vld [vmem:[%s15080_s10 + $0x8] sm:$0xff]   ;;  %v14200_v10 = vld [vmem:[%s15080_s10 + $0x10] sm:$0xff]   ;;  %s14491_s29 = smov 64   ;;  %s14492_s30 = smov 48   ;;  %vm6056_vm2 = vcmask 261248  }
  0xa1   : > { %v14195_v5 = vld [vmem:[%s15080_s10 + $0x100] sm:$0xff]   ;;  %13619 = vmatprep.mubr.msk.bf16.mxu0 %vm4585_vm0, %v14194_v4  ;;  %v14197_v7 = vld [vmem:[%s15080_s10 + $0x108] sm:$0xff]   ;;  %v14201_v11 = vld [vmem:[%s15080_s10 + $0x110] sm:$0xff]   ;;  %5348 = vrot.lane.b32.xlu0 %v12463_v38, %s14488_s26  ;;  %s12326_s17 = sshll.u32 %s12317_s15, 6  ;;  %s14493_s23 = smov 16   ;;  %vm7077_vm3 = vcmask 392448  }
  0xa2   : > { %13687 = vmatprep.mubr.msk.bf16.mxu1 %vm4585_vm0, %v14195_v5  ;;  %v14202_v12 = vld [vmem:[%s15080_s10 + $0x18] sm:$0xff]   ;;  %v14204_v14 = vld [vmem:[%s15080_s10 + $0x20] sm:$0xff]   ;;  %v14206_v16 = vld [vmem:[%s15080_s10 + $0x28] sm:$0xff]   ;;  %6369 = vrot.lane.b32.xlu1 %v12463_v38, %s14489_s27  ;;  %p4332_p8 = scmp.lt.s32.totalorder %s12326_s17, 127  ;;  %s14494_s4 = smov 32   ;;  %vm8098_vm4 = vcmask 523648  }
  0xa3   : > { %13618 = vmatpush3.bf16.msra.mxu0 %v14192_v2  ;;  %13686 = vmatpush3.bf16.msra.mxu1 %v14193_v3  ;;  %v14203_v13 = vld [vmem:[%s15080_s10 + $0x118] sm:$0xff]   ;;  %v14205_v15 = vld [vmem:[%s15080_s10 + $0x120] sm:$0xff]   ;;  %v14207_v17 = vld [vmem:[%s15080_s10 + $0x128] sm:$0xff]   ;;  %vm9119_vm5 = vcmask 654848   ;;  %vm10140_vm6 = vcmask 786048   ;;  %vm11161_vm7 = vcmask 917248  }
  0xa4   : > { %13819 = vmatprep.subr.bf16.mxu1 %v14198_v8  ;;  %13751 = vmatprep.subr.bf16.mxu0 %v14199_v9  ;;  %v14208_v18 = vld [vmem:[%s15080_s10 + $0x30] sm:$0xff]   ;;  %v14210_v20 = vld [vmem:[%s15080_s10 + $0x38] sm:$0xff]   ;;  %v14212_v22 = vld [vmem:[%s15080_s10 + $0x40] sm:$0xff]   ;;  %s19042_s17 = smov (!%p4332_p8, %s12326_s17), 127  ;;  %vm12182_vm8 = vcmask 1048448  }
  0xa5   : > { %v14209_v19 = vld [vmem:[%s15080_s10 + $0x130] sm:$0xff]   ;;  %v14211_v21 = vld [vmem:[%s15080_s10 + $0x138] sm:$0xff]   ;;  %v14213_v23 = vld [vmem:[%s15080_s10 + $0x140] sm:$0xff]   ;;  %7390 = vrot.lane.b32.xlu0 %v12463_v38, %s14490_s28  ;;  %s12327_s14 = sshll.u32 %s19042_s17, 3 }
  0xa6   : > { %13620 = vmatmul.mubr.msk.bf16.vlgmr.msra.gmra.mrb[0].mxu0 %vm4585_vm0, %v14196_v6  ;;  %13688 = vmatmul.mubr.msk.bf16.vlgmr.msra.gmra.mrb[0].mxu1 %vm4585_vm0, %v14197_v7  ;;  %v14214_v24 = vld [vmem:[%s15080_s10 + $0x48] sm:$0xff]   ;;  %v14216_v26 = vld [vmem:[%s15080_s10 + $0x50] sm:$0xff]   ;;  %v14218_v30 = vld [vmem:[%s15080_s10 + $0x58] sm:$0xff]   ;;  %s15350_s22 = scalar_lea.vmem %s18787_s3, %s12327_s14 }
  0xa7   : > { %13820 = vmatpush3.bf16.msra.mxu1 %v14198_v8  ;;  %13623 = vmatprep.mubr.msk.bf16.mxu0 %vm4585_vm0, %v14200_v10  ;;  %v14215_v25 = vld [vmem:[%s15080_s10 + $0x148] sm:$0xff]   ;;  %v14217_v27 = vld [vmem:[%s15080_s10 + $0x150] sm:$0xff]   ;;  %v14219_v31 = vld [vmem:[%s15080_s10 + $0x158] sm:$0xff]  }
  0xa8   : > { %13691 = vmatprep.mubr.msk.bf16.mxu1 %vm4585_vm0, %v14201_v11  ;;  %13752 = vmatpush3.bf16.msra.mxu0 %v14199_v9  ;;  %v14220_v32 = vld [vmem:[%s15080_s10 + $0x60] sm:$0xff]   ;;  %v14222_v34 = vld [vmem:[%s15080_s10 + $0x68] sm:$0xff]   ;;  %v14224_v36 = vld [vmem:[%s15080_s10 + $0x70] sm:$0xff]  }
  0xa9   : > { %13821 = vmatprep.subr.bf16.mxu1 %v14232_v28  ;;  %13753 = vmatprep.subr.bf16.mxu0 %v14233_v29  ;;  %v14221_v33 = vld [vmem:[%s15080_s10 + $0x160] sm:$0xff]   ;;  %v14223_v35 = vld [vmem:[%s15080_s10 + $0x168] sm:$0xff]   ;;  %v14225_v37 = vld [vmem:[%s15080_s10 + $0x170] sm:$0xff]  }
  0xaa   : > { %v14226_v39 = vld [vmem:[%s15080_s10 + $0x78] sm:$0xff]   ;;  %v14228_v41 = vld [vmem:[%s15080_s10 + $0x80] sm:$0xff]   ;;  %v14230_v43 = vld [vmem:[%s15080_s10 + $0x88] sm:$0xff]   ;;  %8411 = vrot.lane.b32.xlu1 %v12463_v38, %s14491_s29 }
  0xab   : > { %13822 = vmatpush3.bf16.msra.mxu1 %v14232_v28  ;;  %v14227_v40 = vld [vmem:[%s15080_s10 + $0x178] sm:$0xff]   ;;  %v14229_v42 = vld [vmem:[%s15080_s10 + $0x180] sm:$0xff]   ;;  %v14231_v44 = vld [vmem:[%s15080_s10 + $0x188] sm:$0xff]   ;;  %9432 = vrot.lane.b32.xlu0 %v12463_v38, %s14492_s30 }
  0xac   : > { %13754 = vmatpush3.bf16.msra.mxu0 %v14233_v29  ;;  %v14234_v45 = vld [vmem:[%s15080_s10 + $0x90] sm:$0xff]   ;;  %v14236_v47 = vld [vmem:[%s15080_s10 + $0x98] sm:$0xff]   ;;  %v14238_v49 = vld [vmem:[%s15080_s10 + $0xa0] sm:$0xff]  }
  0xad   : > { %v14235_v46 = vld [vmem:[%s15080_s10 + $0x190] sm:$0xff]   ;;  %v14237_v48 = vld [vmem:[%s15080_s10 + $0x198] sm:$0xff]   ;;  %v14239_v50 = vld [vmem:[%s15080_s10 + $0x1a0] sm:$0xff]  }
  0xae   : > { %13624 = vmatmul.mubr.msk.bf16.gmra.mrb[4].mxu0 %vm4585_vm0, %v14202_v12  ;;  %13692 = vmatmul.mubr.msk.bf16.gmra.mrb[4].mxu1 %vm4585_vm0, %v14203_v13  ;;  %v14240_v51 = vld [vmem:[%s15080_s10 + $0xa8] sm:$0xff]   ;;  %v14242_v53 = vld [vmem:[%s15080_s10 + $0xb0] sm:$0xff]   ;;  %v14244_v55 = vld [vmem:[%s15080_s10 + $0xb8] sm:$0xff]  }
  0xaf   : > { %13627 = vmatprep.mubr.msk.bf16.mxu0 %vm4585_vm0, %v14204_v14  ;;  %13695 = vmatprep.mubr.msk.bf16.mxu1 %vm4585_vm0, %v14205_v15  ;;  %v14241_v52 = vld [vmem:[%s15080_s10 + $0x1a8] sm:$0xff]   ;;  %v14243_v54 = vld [vmem:[%s15080_s10 + $0x1b0] sm:$0xff]   ;;  %v14245_v56 = vld [vmem:[%s15080_s10 + $0x1b8] sm:$0xff]  }
  0xb0   : > { %v14246_v57 = vld [vmem:[%s15080_s10 + $0xc0] sm:$0xff]   ;;  %v14248_v59 = vld [vmem:[%s15080_s10 + $0xc8] sm:$0xff]   ;;  %v14250_v61 = vld [vmem:[%s15080_s10 + $0xd0] sm:$0xff]  }
  0xb1   : > { %v14247_v58 = vld [vmem:[%s15080_s10 + $0x1c0] sm:$0xff]   ;;  %v14249_v60 = vld [vmem:[%s15080_s10 + $0x1c8] sm:$0xff]   ;;  %v14251_v62 = vld [vmem:[%s15080_s10 + $0x1d0] sm:$0xff]  }
  0xb2   : > { %v14252_v63 = vld [vmem:[%s15080_s10 + $0xd8] sm:$0xff]   ;;  %v14254_v1 = vld [vmem:[%s15080_s10 + $0xe0] sm:$0xff]   ;;  %v14256_v3 = vld [vmem:[%s15080_s10 + $0xe8] sm:$0xff]  }
  0xb3   : > { %v14253_v0 = vld [vmem:[%s15080_s10 + $0x1d8] sm:$0xff]   ;;  %v14255_v2 = vld [vmem:[%s15080_s10 + $0x1e0] sm:$0xff]   ;;  %v14257_v4 = vld [vmem:[%s15080_s10 + $0x1e8] sm:$0xff]  }
  0xb4   : > { %v14258_v5 = vld [vmem:[%s15080_s10 + $0xf0] sm:$0xff]   ;;  %v14260_v7 = vld [vmem:[%s15080_s10 + $0xf8] sm:$0xff]   ;;  %v14262_v9 = vld [vmem:[%s15080_s10 + $0x200] sm:$0xff]  }
  0xb5   : > { %v14259_v6 = vld [vmem:[%s15080_s10 + $0x1f0] sm:$0xff]   ;;  %v14261_v8 = vld [vmem:[%s15080_s10 + $0x1f8] sm:$0xff]   ;;  %v14263_v10 = vld [vmem:[%s15080_s10 + $0x300] sm:$0xff]  }
  0xb6   : > { %13628 = vmatmul.mubr.msk.bf16.gmra.mrb[8].mxu0 %vm4585_vm0, %v14206_v16  ;;  %13696 = vmatmul.mubr.msk.bf16.gmra.mrb[8].mxu1 %vm4585_vm0, %v14207_v17  ;;  %v14264_v11 = vld [vmem:[%s15080_s10 + $0x208] sm:$0xff]   ;;  %v14266_v13 = vld [vmem:[%s15080_s10 + $0x210] sm:$0xff]   ;;  %v14327_v16 = vld [vmem:[%s18785_s1 + $0x40] sm:$0xff]  }
  0xb7   : > { %13631 = vmatprep.mubr.msk.bf16.mxu0 %vm4585_vm0, %v14208_v18  ;;  %13699 = vmatprep.mubr.msk.bf16.mxu1 %vm4585_vm0, %v14209_v19  ;;  %v14265_v12 = vld [vmem:[%s15080_s10 + $0x308] sm:$0xff]   ;;  %v14267_v14 = vld [vmem:[%s15080_s10 + $0x310] sm:$0xff]   ;;  %v14328_v17 = vld [vmem:[%s18785_s1 + $0x58] sm:$0xff]  }
  0xb8   : > { %v14325_v15 = vld [vmem:[%s18785_s1 + $0x50] sm:$0xff]   ;;  %13887 = vmatprep.subr.bf16.mxu0 %v14327_v16  ;;  %v14329_v18 = vld [vmem:[%s18785_s1 + $0x48] sm:$0xff]   ;;  %v14268_v19 = vld [vmem:[%s15080_s10 + $0x218] sm:$0xff]  }
  0xb9   : > { %13955 = vmatprep.subr.bf16.mxu1 %v14325_v15  ;;  %v14277_v28 = vld [vmem:[%s15080_s10 + $0x338] sm:$0xff]   ;;  %v14278_v29 = vld [vmem:[%s15080_s10 + $0x240] sm:$0xff]  }
  0xba   : > { %v14287_v38 = vld [vmem:[%s15080_s10 + $0x360] sm:$0xff]  }
  0xbe   : > { %13632 = vmatmul.mubr.msk.bf16.gmra.mrb[12].mxu0 %vm4585_vm0, %v14210_v20  ;;  %13700 = vmatmul.mubr.msk.bf16.gmra.mrb[12].mxu1 %vm4585_vm0, %v14211_v21  ;;  %v14269_v20 = vld [vmem:[%s15080_s10 + $0x318] sm:$0xff]   ;;  %v14270_v21 = vld [vmem:[%s15080_s10 + $0x220] sm:$0xff]  }
  0xbf   : > { %13635 = vmatprep.mubr.msk.bf16.mxu0 %vm4585_vm0, %v14212_v22  ;;  %13703 = vmatprep.mubr.msk.bf16.mxu1 %vm4585_vm0, %v14213_v23  ;;  %v14271_v22 = vld [vmem:[%s15080_s10 + $0x320] sm:$0xff]   ;;  %v14272_v23 = vld [vmem:[%s15080_s10 + $0x228] sm:$0xff]  }
  0xc6   : > { %13636 = vmatmul.mubr.msk.bf16.gmra.mrb[16].mxu0 %vm4585_vm0, %v14214_v24  ;;  %13704 = vmatmul.mubr.msk.bf16.gmra.mrb[16].mxu1 %vm4585_vm0, %v14215_v25  ;;  %v14273_v24 = vld [vmem:[%s15080_s10 + $0x328] sm:$0xff]   ;;  %v14274_v25 = vld [vmem:[%s15080_s10 + $0x230] sm:$0xff]  }
  0xc7   : > { %13639 = vmatprep.mubr.msk.bf16.mxu0 %vm4585_vm0, %v14216_v26  ;;  %13707 = vmatprep.mubr.msk.bf16.mxu1 %vm4585_vm0, %v14217_v27  ;;  %v14275_v26 = vld [vmem:[%s15080_s10 + $0x330] sm:$0xff]   ;;  %v14276_v27 = vld [vmem:[%s15080_s10 + $0x238] sm:$0xff]  }
  0xce   : > { %13640 = vmatmul.mubr.msk.bf16.gmra.mrb[20].mxu0 %vm4585_vm0, %v14218_v30  ;;  %13708 = vmatmul.mubr.msk.bf16.gmra.mrb[20].mxu1 %vm4585_vm0, %v14219_v31  ;;  %v14279_v30 = vld [vmem:[%s15080_s10 + $0x340] sm:$0xff]   ;;  %v14280_v31 = vld [vmem:[%s15080_s10 + $0x248] sm:$0xff]  }
  0xcf   : > { %13643 = vmatprep.mubr.msk.bf16.mxu0 %vm4585_vm0, %v14220_v32  ;;  %13711 = vmatprep.mubr.msk.bf16.mxu1 %vm4585_vm0, %v14221_v33  ;;  %v14281_v32 = vld [vmem:[%s15080_s10 + $0x348] sm:$0xff]   ;;  %v14282_v33 = vld [vmem:[%s15080_s10 + $0x250] sm:$0xff]  }
  0xd6   : > { %13644 = vmatmul.mubr.msk.bf16.gmra.mrb[24].mxu0 %vm4585_vm0, %v14222_v34  ;;  %13712 = vmatmul.mubr.msk.bf16.gmra.mrb[24].mxu1 %vm4585_vm0, %v14223_v35  ;;  %v14283_v34 = vld [vmem:[%s15080_s10 + $0x350] sm:$0xff]   ;;  %v14284_v35 = vld [vmem:[%s15080_s10 + $0x258] sm:$0xff]  }
  0xd7   : > { %13647 = vmatprep.mubr.msk.bf16.mxu0 %vm4585_vm0, %v14224_v36  ;;  %13715 = vmatprep.mubr.msk.bf16.mxu1 %vm4585_vm0, %v14225_v37  ;;  %v14285_v36 = vld [vmem:[%s15080_s10 + $0x358] sm:$0xff]   ;;  %v14286_v37 = vld [vmem:[%s15080_s10 + $0x260] sm:$0xff]  }
  0xde   : > { %13648 = vmatmul.mubr.msk.bf16.gmra.mrb[28].mxu0 %vm4585_vm0, %v14226_v39  ;;  %13716 = vmatmul.mubr.msk.bf16.gmra.mrb[28].mxu1 %vm4585_vm0, %v14227_v40  ;;  %v14288_v39 = vld [vmem:[%s15080_s10 + $0x268] sm:$0xff]  }
  0xdf   : > { %13651 = vmatprep.mubr.msk.bf16.mxu0 %vm4585_vm0, %v14228_v41  ;;  %13719 = vmatprep.mubr.msk.bf16.mxu1 %vm4585_vm0, %v14229_v42  ;;  %v14289_v40 = vld [vmem:[%s15080_s10 + $0x368] sm:$0xff]   ;;  %v14290_v41 = vld [vmem:[%s15080_s10 + $0x270] sm:$0xff]  }
  0xe0   : > { %v14291_v42 = vld [vmem:[%s15080_s10 + $0x370] sm:$0xff]  }
  0xe6   : > { %13652 = vmatmul.mubr.msk.bf16.gmra.mrb[32].mxu0 %vm4585_vm0, %v14230_v43  ;;  %13720 = vmatmul.mubr.msk.bf16.gmra.mrb[32].mxu1 %vm4585_vm0, %v14231_v44  ;;  %v14292_v43 = vld [vmem:[%s15080_s10 + $0x278] sm:$0xff]  }
  0xe7   : > { %13655 = vmatprep.mubr.msk.bf16.mxu0 %vm4585_vm0, %v14234_v45  ;;  %13723 = vmatprep.mubr.msk.bf16.mxu1 %vm4585_vm0, %v14235_v46  ;;  %v14293_v44 = vld [vmem:[%s15080_s10 + $0x378] sm:$0xff]   ;;  %v14294_v45 = vld [vmem:[%s15080_s10 + $0x280] sm:$0xff]  }
  0xe8   : > { %v14295_v46 = vld [vmem:[%s15080_s10 + $0x380] sm:$0xff]  }
  0xee   : > { %13656 = vmatmul.mubr.msk.bf16.gmra.mrb[36].mxu0 %vm4585_vm0, %v14236_v47  ;;  %13724 = vmatmul.mubr.msk.bf16.gmra.mrb[36].mxu1 %vm4585_vm0, %v14237_v48  ;;  %v14296_v47 = vld [vmem:[%s15080_s10 + $0x288] sm:$0xff]  }
  0xef   : > { %13659 = vmatprep.mubr.msk.bf16.mxu0 %vm4585_vm0, %v14238_v49  ;;  %13727 = vmatprep.mubr.msk.bf16.mxu1 %vm4585_vm0, %v14239_v50  ;;  %v14297_v48 = vld [vmem:[%s15080_s10 + $0x388] sm:$0xff]   ;;  %v14298_v49 = vld [vmem:[%s15080_s10 + $0x290] sm:$0xff]  }
  0xf0   : > { %v14299_v50 = vld [vmem:[%s15080_s10 + $0x390] sm:$0xff]  }
  0xf6   : > { %13660 = vmatmul.mubr.msk.bf16.gmra.mrb[40].mxu0 %vm4585_vm0, %v14240_v51  ;;  %13728 = vmatmul.mubr.msk.bf16.gmra.mrb[40].mxu1 %vm4585_vm0, %v14241_v52  ;;  %v14300_v51 = vld [vmem:[%s15080_s10 + $0x298] sm:$0xff]  }
  0xf7   : > { %13663 = vmatprep.mubr.msk.bf16.mxu0 %vm4585_vm0, %v14242_v53  ;;  %13731 = vmatprep.mubr.msk.bf16.mxu1 %vm4585_vm0, %v14243_v54  ;;  %v14301_v52 = vld [vmem:[%s15080_s10 + $0x398] sm:$0xff]   ;;  %v14302_v53 = vld [vmem:[%s15080_s10 + $0x2a0] sm:$0xff]  }
  0xf8   : > { %v14303_v54 = vld [vmem:[%s15080_s10 + $0x3a0] sm:$0xff]  }
  0xfe   : > { %13664 = vmatmul.mubr.msk.bf16.gmra.mrb[44].mxu0 %vm4585_vm0, %v14244_v55  ;;  %13732 = vmatmul.mubr.msk.bf16.gmra.mrb[44].mxu1 %vm4585_vm0, %v14245_v56  ;;  %v14304_v55 = vld [vmem:[%s15080_s10 + $0x2a8] sm:$0xff]  }
  0xff   : > { %13667 = vmatprep.mubr.msk.bf16.mxu0 %vm4585_vm0, %v14246_v57  ;;  %13735 = vmatprep.mubr.msk.bf16.mxu1 %vm4585_vm0, %v14247_v58  ;;  %v14305_v56 = vld [vmem:[%s15080_s10 + $0x3a8] sm:$0xff]   ;;  %v14306_v57 = vld [vmem:[%s15080_s10 + $0x2b0] sm:$0xff]  }
 0x100   : > { %v14307_v58 = vld [vmem:[%s15080_s10 + $0x3b0] sm:$0xff]  }
 0x106   : > { %13668 = vmatmul.mubr.msk.bf16.gmra.mrb[48].mxu0 %vm4585_vm0, %v14248_v59  ;;  %13736 = vmatmul.mubr.msk.bf16.gmra.mrb[48].mxu1 %vm4585_vm0, %v14249_v60 }
 0x107   : > { %13671 = vmatprep.mubr.msk.bf16.mxu0 %vm4585_vm0, %v14250_v61  ;;  %13739 = vmatprep.mubr.msk.bf16.mxu1 %vm4585_vm0, %v14251_v62  ;;  %v14308_v61 = vld [vmem:[%s15080_s10 + $0x3b8] sm:$0xff]  }
 0x108   : > { %v14309_v62 = vld [vmem:[%s15080_s10 + $0x2b8] sm:$0xff]  }
 0x10e   : > { %13672 = vmatmul.mubr.msk.bf16.gmra.mrb[52].mxu0 %vm4585_vm0, %v14252_v63  ;;  %13740 = vmatmul.mubr.msk.bf16.gmra.mrb[52].mxu1 %vm4585_vm0, %v14253_v0  ;;  %v15343_v0 = vld [vmem:[%s18786_s2] ss:$0 sm:$0xff] }
 0x10f   : > { %13675 = vmatprep.mubr.msk.bf16.mxu0 %vm4585_vm0, %v14254_v1  ;;  %13743 = vmatprep.mubr.msk.bf16.mxu1 %vm4585_vm0, %v14255_v2 }
 0x113   : > { %v15335_v59 = vpop.permute.xlu0 %5348 }
 0x116   : > { %13676 = vmatmul.mubr.msk.bf16.gmra.mrb[56].mxu0 %vm4585_vm0, %v14256_v3  ;;  %13744 = vmatmul.mubr.msk.bf16.gmra.mrb[56].mxu1 %vm4585_vm0, %v14257_v4 }
 0x117   : > { %13679 = vmatprep.mubr.msk.bf16.mxu0 %vm4585_vm0, %v14258_v5  ;;  %13747 = vmatprep.mubr.msk.bf16.mxu1 %vm4585_vm0, %v14259_v6 }
 0x11e   : > { %13680 = vmatmul.mubr.msk.bf16.gmra.mrb[60].mxu0 %vm4585_vm0, %v14260_v7  ;;  %13748 = vmatmul.mubr.msk.bf16.gmra.mrb[60].mxu1 %vm4585_vm0, %v14261_v8 }
 0x11f   : > { %13755 = vmatprep.mubr.msk.bf16.mxu0 %vm4585_vm0, %v14262_v9  ;;  %13823 = vmatprep.mubr.msk.bf16.mxu1 %vm4585_vm0, %v14263_v10 }
 0x126   : > { %13756 = vmatmul.mubr.msk.bf16.vlgmr.msra.gmra.mrb[64].mxu0 %vm4585_vm0, %v14264_v11  ;;  %13824 = vmatmul.mubr.msk.bf16.vlgmr.msra.gmra.mrb[64].mxu1 %vm4585_vm0, %v14265_v12  ;;  %v14310_v12 = vld [vmem:[%s15080_s10 + $0x2c0] sm:$0xff]  }
 0x127   : > { %13759 = vmatprep.mubr.msk.bf16.mxu0 %vm4585_vm0, %v14266_v13  ;;  %13827 = vmatprep.mubr.msk.bf16.mxu1 %vm4585_vm0, %v14267_v14 }
 0x128   : > { %13888 = vmatpush3.bf16.msra.mxu0 %v14327_v16  ;;  %13956 = vmatpush3.bf16.msra.mxu1 %v14325_v15 }
 0x129   : > { %13957 = vmatprep.subr.bf16.mxu1 %v14328_v17  ;;  %13889 = vmatprep.subr.bf16.mxu0 %v14329_v18 }
 0x12c   : > { %13890 = vmatpush3.bf16.msra.mxu0 %v14329_v18  ;;  %13958 = vmatpush3.bf16.msra.mxu1 %v14328_v17  ;;  %v14311_v18 = vld [vmem:[%s15080_s10 + $0x3c0] sm:$0xff]  }
 0x12e   : > { %13760 = vmatmul.mubr.msk.bf16.gmra.mrb[68].mxu0 %vm4585_vm0, %v14268_v19  ;;  %13828 = vmatmul.mubr.msk.bf16.gmra.mrb[68].mxu1 %vm4585_vm0, %v14269_v20 }
 0x12f   : > { %13763 = vmatprep.mubr.msk.bf16.mxu0 %vm4585_vm0, %v14270_v21  ;;  %13831 = vmatprep.mubr.msk.bf16.mxu1 %vm4585_vm0, %v14271_v22 }
 0x136   : > { %13764 = vmatmul.mubr.msk.bf16.gmra.mrb[72].mxu0 %vm4585_vm0, %v14272_v23  ;;  %13832 = vmatmul.mubr.msk.bf16.gmra.mrb[72].mxu1 %vm4585_vm0, %v14273_v24  ;;  %v14313_v24 = vld [vmem:[%s15080_s10 + $0x2c8] sm:$0xff]  }
 0x137   : > { %13767 = vmatprep.mubr.msk.bf16.mxu0 %vm4585_vm0, %v14274_v25  ;;  %13835 = vmatprep.mubr.msk.bf16.mxu1 %vm4585_vm0, %v14275_v26 }
 0x13e   : > { %13768 = vmatmul.mubr.msk.bf16.gmra.mrb[76].mxu0 %vm4585_vm0, %v14276_v27  ;;  %13836 = vmatmul.mubr.msk.bf16.gmra.mrb[76].mxu1 %vm4585_vm0, %v14277_v28  ;;  %v14312_v27 = vld [vmem:[%s15080_s10 + $0x3c8] sm:$0xff]  }
 0x13f   : > { %13771 = vmatprep.mubr.msk.bf16.mxu0 %vm4585_vm0, %v14278_v29  ;;  %13839 = vmatprep.mubr.msk.bf16.mxu1 %vm4585_vm0, %v14279_v30 }
 0x146   : > { %13772 = vmatmul.mubr.msk.bf16.gmra.mrb[80].mxu0 %vm4585_vm0, %v14280_v31  ;;  %13840 = vmatmul.mubr.msk.bf16.gmra.mrb[80].mxu1 %vm4585_vm0, %v14281_v32  ;;  %v14314_v31 = vld [vmem:[%s15080_s10 + $0x2d0] sm:$0xff]  }
 0x147   : > { %13775 = vmatprep.mubr.msk.bf16.mxu0 %vm4585_vm0, %v14282_v33  ;;  %13843 = vmatprep.mubr.msk.bf16.mxu1 %vm4585_vm0, %v14283_v34 }
 0x14e   : > { %13776 = vmatmul.mubr.msk.bf16.gmra.mrb[84].mxu0 %vm4585_vm0, %v14284_v35  ;;  %13844 = vmatmul.mubr.msk.bf16.gmra.mrb[84].mxu1 %vm4585_vm0, %v14285_v36 }
 0x14f   : > { %13779 = vmatprep.mubr.msk.bf16.mxu0 %vm4585_vm0, %v14286_v37  ;;  %13847 = vmatprep.mubr.msk.bf16.mxu1 %vm4585_vm0, %v14287_v38 }
 0x156   : > { %13780 = vmatmul.mubr.msk.bf16.gmra.mrb[88].mxu0 %vm4585_vm0, %v14288_v39  ;;  %13848 = vmatmul.mubr.msk.bf16.gmra.mrb[88].mxu1 %vm4585_vm0, %v14289_v40 }
 0x157   : > { %13783 = vmatprep.mubr.msk.bf16.mxu0 %vm4585_vm0, %v14290_v41  ;;  %13851 = vmatprep.mubr.msk.bf16.mxu1 %vm4585_vm0, %v14291_v42  ;;  %v14315_v41 = vld [vmem:[%s15080_s10 + $0x3d0] sm:$0xff]  }
 0x15e   : > { %13784 = vmatmul.mubr.msk.bf16.gmra.mrb[92].mxu0 %vm4585_vm0, %v14292_v43  ;;  %13852 = vmatmul.mubr.msk.bf16.gmra.mrb[92].mxu1 %vm4585_vm0, %v14293_v44 }
 0x15f   : > { %13787 = vmatprep.mubr.msk.bf16.mxu0 %vm4585_vm0, %v14294_v45  ;;  %13855 = vmatprep.mubr.msk.bf16.mxu1 %vm4585_vm0, %v14295_v46 }
 0x166   : > { %13788 = vmatmul.mubr.msk.bf16.gmra.mrb[96].mxu0 %vm4585_vm0, %v14296_v47  ;;  %13856 = vmatmul.mubr.msk.bf16.gmra.mrb[96].mxu1 %vm4585_vm0, %v14297_v48 }
 0x167   : > { %13791 = vmatprep.mubr.msk.bf16.mxu0 %vm4585_vm0, %v14298_v49  ;;  %13859 = vmatprep.mubr.msk.bf16.mxu1 %vm4585_vm0, %v14299_v50 }
 0x16e   : > { %13792 = vmatmul.mubr.msk.bf16.gmra.mrb[100].mxu0 %vm4585_vm0, %v14300_v51  ;;  %13860 = vmatmul.mubr.msk.bf16.gmra.mrb[100].mxu1 %vm4585_vm0, %v14301_v52  ;;  %v14317_v52 = vld [vmem:[%s15080_s10 + $0x2d8] sm:$0xff]  }
 0x16f   : > { %13795 = vmatprep.mubr.msk.bf16.mxu0 %vm4585_vm0, %v14302_v53  ;;  %13863 = vmatprep.mubr.msk.bf16.mxu1 %vm4585_vm0, %v14303_v54 }
 0x176   : > { %13796 = vmatmul.mubr.msk.bf16.gmra.mrb[104].mxu0 %vm4585_vm0, %v14304_v55  ;;  %13864 = vmatmul.mubr.msk.bf16.gmra.mrb[104].mxu1 %vm4585_vm0, %v14305_v56  ;;  %v14316_v55 = vld [vmem:[%s15080_s10 + $0x3d8] sm:$0xff]  }
 0x177   : > { %13799 = vmatprep.mubr.msk.bf16.mxu0 %vm4585_vm0, %v14306_v57  ;;  %13867 = vmatprep.mubr.msk.bf16.mxu1 %vm4585_vm0, %v14307_v58 }
 0x179   : > { %v13621_v60 = vpop.f32.mrb[0].mxu0  ;;  %v13689_v63 = vpop.f32.mrb[0].mxu1 }
 0x17a   : > { %v4725_v1 = vadd.f32 %v15343_v0, %v13621_v60  ;;  %v4716_v2 = vpop.f32.mrb[1].mxu0  ;;  %v5490_v3 = vadd.f32 %v13689_v63, %v15335_v59  ;;  %v5481_v4 = vpop.f32.mrb[1].mxu1  ;;  %v14318_v60 = vld [vmem:[%s15080_s10 + $0x2e0] sm:$0xff]  }
 0x17b   : > { %v4717_v5 = vadd.f32 %v15343_v0, %v4716_v2  ;;  %v13622_v6 = vpop.f32.mrb[2].mxu0  ;;  %v5482_v7 = vadd.f32 %v5481_v4, %v15335_v59  ;;  %v13690_v8 = vpop.f32.mrb[2].mxu1 }
 0x17c   : > { %v4973_v9 = vmax.f32 %v4725_v1, 0.0  ;;  %v4728_v10 = vadd.f32 %v15343_v0, %v13622_v6  ;;  %v4719_v11 = vpop.f32.mrb[3].mxu0  ;;  %v5738_v13 = vmax.f32 %v5490_v3, 0.0  ;;  %v5493_v14 = vadd.f32 %v13690_v8, %v15335_v59  ;;  %v5484_v15 = vpop.f32.mrb[3].mxu1 }
 0x17d   : > { %v4971_v16 = vmax.f32 %v4717_v5, 0.0  ;;  %v4720_v17 = vadd.f32 %v15343_v0, %v4719_v11  ;;  %v5736_v19 = vmax.f32 %v5482_v7, 0.0  ;;  %v5485_v20 = vadd.f32 %v5484_v15, %v15335_v59  ;;  %v14319_v7 = vld [vmem:[%s15080_s10 + $0x3e0] sm:$0xff]  }
 0x17e   : > { %5038 = vst.msk [vmem:[%s15350_s22 + $0x10] sm:$0xff] %vm5035_vm1, %v4973_v9  ;;  %13800 = vmatmul.mubr.msk.bf16.gmra.mrb[108].mxu0 %vm4585_vm0, %v14309_v62  ;;  %v4974_v21 = vmax.f32 %v4728_v10, 0.0  ;;  %13868 = vmatmul.mubr.msk.bf16.gmra.mrb[108].mxu1 %vm4585_vm0, %v14308_v61  ;;  %v5739_v25 = vmax.f32 %v5493_v14, 0.0 }
 0x17f   : > { %5868 = vrot.lane.b32.xlu1 %v5738_v13, %s14493_s23  ;;  %5036 = vst.msk [vmem:[%s15350_s22] sm:$0xff] %vm5035_vm1, %v4971_v16  ;;  %v4972_v22 = vmax.f32 %v4720_v17, 0.0  ;;  %v5737_v23 = vmax.f32 %v5485_v20, 0.0  ;;  %5864 = vrot.lane.b32.xlu0 %v5736_v19, %s14493_s23 }
 0x180   : > { %5039 = vst.msk [vmem:[%s15350_s22 + $0x18] sm:$0xff] %vm5035_vm1, %v4974_v21  ;;  %13803 = vmatprep.mubr.msk.bf16.mxu0 %vm4585_vm0, %v14310_v12  ;;  %13871 = vmatprep.mubr.msk.bf16.mxu1 %vm4585_vm0, %v14311_v18  ;;  %v14321_v18 = vld [vmem:[%s15080_s10 + $0x2e8] sm:$0xff]  }
 0x181   : > { %5037 = vst.msk [vmem:[%s15350_s22 + $0x8] sm:$0xff] %vm5035_vm1, %v4972_v22  ;;  %v13625_v26 = vpop.f32.mrb[4].mxu0  ;;  %v13693_v28 = vpop.f32.mrb[4].mxu1  ;;  %v14320_v21 = vld [vmem:[%s15080_s10 + $0x3e8] sm:$0xff]  }
 0x182   : > { %v4741_v29 = vadd.f32 %v15343_v0, %v13625_v26  ;;  %v4732_v30 = vpop.f32.mrb[5].mxu0  ;;  %v5506_v32 = vadd.f32 %v13693_v28, %v15335_v59  ;;  %v5497_v33 = vpop.f32.mrb[5].mxu1 }
 0x183   : > { %5866 = vrot.lane.b32.xlu1 %v5737_v23, %s14493_s23  ;;  %v4733_v34 = vadd.f32 %v15343_v0, %v4732_v30  ;;  %v13626_v35 = vpop.f32.mrb[6].mxu0  ;;  %v5498_v36 = vadd.f32 %v5497_v33, %v15335_v59  ;;  %v13694_v37 = vpop.f32.mrb[6].mxu1  ;;  %5870 = vrot.lane.b32.xlu0 %v5739_v25, %s14493_s23  ;;  %v14322_v25 = vld [vmem:[%s15080_s10 + $0x2f0] sm:$0xff]  }
 0x184   : > { %v4977_v38 = vmax.f32 %v4741_v29, 0.0  ;;  %v4744_v39 = vadd.f32 %v15343_v0, %v13626_v35  ;;  %v4735_v40 = vpop.f32.mrb[7].mxu0  ;;  %v5742_v42 = vmax.f32 %v5506_v32, 0.0  ;;  %v5509_v43 = vadd.f32 %v13694_v37, %v15335_v59  ;;  %v5500_v44 = vpop.f32.mrb[7].mxu1  ;;  %v14323_v35 = vld [vmem:[%s15080_s10 + $0x3f0] sm:$0xff]  }
 0x185   : > { %v4975_v45 = vmax.f32 %v4733_v34, 0.0  ;;  %v4736_v46 = vadd.f32 %v15343_v0, %v4735_v40  ;;  %v5501_v47 = vadd.f32 %v5500_v44, %v15335_v59  ;;  %v5740_v51 = vmax.f32 %v5498_v36, 0.0 }
 0x186   : > { %5042 = vst.msk [vmem:[%s15350_s22 + $0x30] sm:$0xff] %vm5035_vm1, %v4977_v38  ;;  %13804 = vmatmul.mubr.msk.bf16.gmra.mrb[112].mxu0 %vm4585_vm0, %v14313_v24  ;;  %v4978_v48 = vmax.f32 %v4744_v39, 0.0  ;;  %v5743_v49 = vmax.f32 %v5509_v43, 0.0  ;;  %13872 = vmatmul.mubr.msk.bf16.gmra.mrb[112].mxu1 %vm4585_vm0, %v14312_v27 }
 0x187   : > { %5876 = vrot.lane.b32.xlu1 %v5742_v42, %s14493_s23  ;;  %5040 = vst.msk [vmem:[%s15350_s22 + $0x20] sm:$0xff] %vm5035_vm1, %v4975_v45  ;;  %v4976_v50 = vmax.f32 %v4736_v46, 0.0  ;;  %13807 = vmatprep.mubr.msk.bf16.mxu0 %vm4585_vm0, %v14314_v31  ;;  %v5741_v53 = vmax.f32 %v5501_v47, 0.0  ;;  %v14326_v46 = vld [vmem:[%s15080_s10 + $0x2f8] sm:$0xff]  }
 0x188   : > { %5043 = vst.msk [vmem:[%s15350_s22 + $0x38] sm:$0xff] %vm5035_vm1, %v4978_v48  ;;  %13875 = vmatprep.mubr.msk.bf16.mxu1 %vm4585_vm0, %v14315_v41  ;;  %5878 = vrot.lane.b32.xlu0 %v5743_v49, %s14493_s23  ;;  %v14324_v49 = vld [vmem:[%s15080_s10 + $0x3f8] sm:$0xff]  }
 0x189   : > { %5041 = vst.msk [vmem:[%s15350_s22 + $0x28] sm:$0xff] %vm5035_vm1, %v4976_v50  ;;  %v13629_v54 = vpop.f32.mrb[8].mxu0  ;;  %v13697_v56 = vpop.f32.mrb[8].mxu1 }
 0x18a   : > { %v4757_v57 = vadd.f32 %v15343_v0, %v13629_v54  ;;  %v4748_v58 = vpop.f32.mrb[9].mxu0  ;;  %v5522_v61 = vadd.f32 %v13697_v56, %v15335_v59  ;;  %v5513_v62 = vpop.f32.mrb[9].mxu1 }
 0x18b   : > { %5872 = vrot.lane.b32.xlu1 %v5740_v51, %s14493_s23  ;;  %v4749_v63 = vadd.f32 %v15343_v0, %v4748_v58  ;;  %v13630_v1 = vpop.f32.mrb[10].mxu0  ;;  %v5514_v2 = vadd.f32 %v5513_v62, %v15335_v59  ;;  %v13698_v3 = vpop.f32.mrb[10].mxu1 }
 0x18c   : > { %v4981_v4 = vmax.f32 %v4757_v57, 0.0  ;;  %v4760_v5 = vadd.f32 %v15343_v0, %v13630_v1  ;;  %v4751_v6 = vpop.f32.mrb[11].mxu0  ;;  %v5746_v8 = vmax.f32 %v5522_v61, 0.0  ;;  %v5525_v9 = vadd.f32 %v13698_v3, %v15335_v59  ;;  %v5516_v10 = vpop.f32.mrb[11].mxu1  ;;  %5874 = vrot.lane.b32.xlu0 %v5741_v53, %s14493_s23  ;;  %v14330_v53 = vld [vmem:[%s15080_s10 + $0x400] sm:$0xff]  }
 0x18d   : > { %v4979_v11 = vmax.f32 %v4749_v63, 0.0  ;;  %v4752_v12 = vadd.f32 %v15343_v0, %v4751_v6  ;;  %v5517_v13 = vadd.f32 %v5516_v10, %v15335_v59  ;;  %v5744_v17 = vmax.f32 %v5514_v2, 0.0  ;;  %v14331_v1 = vld [vmem:[%s15080_s10 + $0x500] sm:$0xff]  }
 0x18e   : > { %5046 = vst.msk [vmem:[%s15350_s22 + $0x50] sm:$0xff] %vm5035_vm1, %v4981_v4  ;;  %13808 = vmatmul.mubr.msk.bf16.gmra.mrb[116].mxu0 %vm4585_vm0, %v14317_v52  ;;  %v4982_v14 = vmax.f32 %v4760_v5, 0.0  ;;  %v5747_v15 = vmax.f32 %v5525_v9, 0.0  ;;  %13876 = vmatmul.mubr.msk.bf16.gmra.mrb[116].mxu1 %vm4585_vm0, %v14316_v55 }
 0x18f   : > { %5884 = vrot.lane.b32.xlu1 %v5746_v8, %s14493_s23  ;;  %5044 = vst.msk [vmem:[%s15350_s22 + $0x40] sm:$0xff] %vm5035_vm1, %v4979_v11  ;;  %v4980_v16 = vmax.f32 %v4752_v12, 0.0  ;;  %13811 = vmatprep.mubr.msk.bf16.mxu0 %vm4585_vm0, %v14318_v60  ;;  %v5745_v19 = vmax.f32 %v5517_v13, 0.0  ;;  %v14333_v12 = vld [vmem:[%s15080_s10 + $0x408] sm:$0xff]  }
 0x190   : > { %5047 = vst.msk [vmem:[%s15350_s22 + $0x58] sm:$0xff] %vm5035_vm1, %v4982_v14  ;;  %13879 = vmatprep.mubr.msk.bf16.mxu1 %vm4585_vm0, %v14319_v7  ;;  %5886 = vrot.lane.b32.xlu0 %v5747_v15, %s14493_s23  ;;  %v14332_v15 = vld [vmem:[%s15080_s10 + $0x508] sm:$0xff]  }
 0x191   : > { %5045 = vst.msk [vmem:[%s15350_s22 + $0x48] sm:$0xff] %vm5035_vm1, %v4980_v16  ;;  %v13633_v20 = vpop.f32.mrb[12].mxu0  ;;  %v13701_v22 = vpop.f32.mrb[12].mxu1 }
 0x192   : > { %v4773_v23 = vadd.f32 %v15343_v0, %v13633_v20  ;;  %v4764_v24 = vpop.f32.mrb[13].mxu0  ;;  %v5538_v26 = vadd.f32 %v13701_v22, %v15335_v59  ;;  %v5529_v27 = vpop.f32.mrb[13].mxu1 }
 0x193   : > { %5880 = vrot.lane.b32.xlu1 %v5744_v17, %s14493_s23  ;;  %v4765_v28 = vadd.f32 %v15343_v0, %v4764_v24  ;;  %v13634_v29 = vpop.f32.mrb[14].mxu0  ;;  %v5530_v30 = vadd.f32 %v5529_v27, %v15335_v59  ;;  %v13702_v31 = vpop.f32.mrb[14].mxu1 }
 0x194   : > { %v4985_v32 = vmax.f32 %v4773_v23, 0.0  ;;  %v4776_v33 = vadd.f32 %v15343_v0, %v13634_v29  ;;  %v4767_v34 = vpop.f32.mrb[15].mxu0  ;;  %v5750_v36 = vmax.f32 %v5538_v26, 0.0  ;;  %v5541_v37 = vadd.f32 %v13702_v31, %v15335_v59  ;;  %v5532_v38 = vpop.f32.mrb[15].mxu1  ;;  %5882 = vrot.lane.b32.xlu0 %v5745_v19, %s14493_s23  ;;  %v14334_v19 = vld [vmem:[%s15080_s10 + $0x410] sm:$0xff]  }
 0x195   : > { %v4983_v39 = vmax.f32 %v4765_v28, 0.0  ;;  %v4768_v40 = vadd.f32 %v15343_v0, %v4767_v34  ;;  %v5533_v41 = vadd.f32 %v5532_v38, %v15335_v59  ;;  %v5748_v45 = vmax.f32 %v5530_v30, 0.0  ;;  %v14335_v29 = vld [vmem:[%s15080_s10 + $0x510] sm:$0xff]  }
 0x196   : > { %5050 = vst.msk [vmem:[%s15350_s22 + $0x70] sm:$0xff] %vm5035_vm1, %v4985_v32  ;;  %13812 = vmatmul.mubr.msk.bf16.gmra.mrb[120].mxu0 %vm4585_vm0, %v14321_v18  ;;  %v4986_v42 = vmax.f32 %v4776_v33, 0.0  ;;  %v5751_v43 = vmax.f32 %v5541_v37, 0.0  ;;  %13880 = vmatmul.mubr.msk.bf16.gmra.mrb[120].mxu1 %vm4585_vm0, %v14320_v21 }
 0x197   : > { %5892 = vrot.lane.b32.xlu1 %v5750_v36, %s14493_s23  ;;  %5048 = vst.msk [vmem:[%s15350_s22 + $0x60] sm:$0xff] %vm5035_vm1, %v4983_v39  ;;  %v4984_v44 = vmax.f32 %v4768_v40, 0.0  ;;  %13815 = vmatprep.mubr.msk.bf16.mxu0 %vm4585_vm0, %v14322_v25  ;;  %v5749_v47 = vmax.f32 %v5533_v41, 0.0 }
 0x198   : > { %5051 = vst.msk [vmem:[%s15350_s22 + $0x78] sm:$0xff] %vm5035_vm1, %v4986_v42  ;;  %13883 = vmatprep.mubr.msk.bf16.mxu1 %vm4585_vm0, %v14323_v35  ;;  %5894 = vrot.lane.b32.xlu0 %v5751_v43, %s14493_s23 }
 0x199   : > { %5049 = vst.msk [vmem:[%s15350_s22 + $0x68] sm:$0xff] %vm5035_vm1, %v4984_v44  ;;  %v13637_v48 = vpop.f32.mrb[16].mxu0  ;;  %v13705_v50 = vpop.f32.mrb[16].mxu1  ;;  %v14337_v44 = vld [vmem:[%s15080_s10 + $0x418] sm:$0xff]  }
 0x19a   : > { %v4789_v51 = vadd.f32 %v15343_v0, %v13637_v48  ;;  %v4780_v52 = vpop.f32.mrb[17].mxu0  ;;  %v5554_v54 = vadd.f32 %v13705_v50, %v15335_v59  ;;  %v5545_v55 = vpop.f32.mrb[17].mxu1  ;;  %v14336_v48 = vld [vmem:[%s15080_s10 + $0x518] sm:$0xff]  }
 0x19b   : > { %5888 = vrot.lane.b32.xlu1 %v5748_v45, %s14493_s23  ;;  %v4781_v56 = vadd.f32 %v15343_v0, %v4780_v52  ;;  %v13638_v57 = vpop.f32.mrb[18].mxu0  ;;  %v5546_v58 = vadd.f32 %v5545_v55, %v15335_v59  ;;  %v13706_v60 = vpop.f32.mrb[18].mxu1 }
 0x19c   : > { %v4989_v61 = vmax.f32 %v4789_v51, 0.0  ;;  %v4792_v62 = vadd.f32 %v15343_v0, %v13638_v57  ;;  %v4783_v63 = vpop.f32.mrb[19].mxu0  ;;  %v5754_v2 = vmax.f32 %v5554_v54, 0.0  ;;  %v5557_v3 = vadd.f32 %v13706_v60, %v15335_v59  ;;  %v5548_v4 = vpop.f32.mrb[19].mxu1  ;;  %5890 = vrot.lane.b32.xlu0 %v5749_v47, %s14493_s23  ;;  %v14339_v57 = vld [vmem:[%s15080_s10 + $0x520] sm:$0xff]  }
 0x19d   : > { %v4987_v5 = vmax.f32 %v4781_v56, 0.0  ;;  %v4784_v6 = vadd.f32 %v15343_v0, %v4783_v63  ;;  %v5549_v7 = vadd.f32 %v5548_v4, %v15335_v59  ;;  %v5752_v11 = vmax.f32 %v5546_v58, 0.0  ;;  %v14338_v56 = vld [vmem:[%s15080_s10 + $0x420] sm:$0xff]  }
 0x19e   : > { %5054 = vst.msk [vmem:[%s15350_s22 + $0x90] sm:$0xff] %vm5035_vm1, %v4989_v61  ;;  %13816 = vmatmul.mubr.msk.bf16.gmra.mrb[124].mxu0 %vm4585_vm0, %v14326_v46  ;;  %v4990_v8 = vmax.f32 %v4792_v62, 0.0  ;;  %v5755_v9 = vmax.f32 %v5557_v3, 0.0  ;;  %13884 = vmatmul.mubr.msk.bf16.gmra.mrb[124].mxu1 %vm4585_vm0, %v14324_v49 }
 0x19f   : > { %5900 = vrot.lane.b32.xlu1 %v5754_v2, %s14493_s23  ;;  %5052 = vst.msk [vmem:[%s15350_s22 + $0x80] sm:$0xff] %vm5035_vm1, %v4987_v5  ;;  %v4988_v10 = vmax.f32 %v4784_v6, 0.0  ;;  %13891 = vmatprep.mubr.msk.bf16.mxu0 %vm4585_vm0, %v14330_v53  ;;  %v5753_v13 = vmax.f32 %v5549_v7, 0.0 }
 0x1a0   : > { %5055 = vst.msk [vmem:[%s15350_s22 + $0x98] sm:$0xff] %vm5035_vm1, %v4990_v8  ;;  %13959 = vmatprep.mubr.msk.bf16.mxu1 %vm4585_vm0, %v14331_v1  ;;  %5902 = vrot.lane.b32.xlu0 %v5755_v9, %s14493_s23 }
 0x1a1   : > { %5053 = vst.msk [vmem:[%s15350_s22 + $0x88] sm:$0xff] %vm5035_vm1, %v4988_v10  ;;  %v13641_v14 = vpop.f32.mrb[20].mxu0  ;;  %v13709_v16 = vpop.f32.mrb[20].mxu1  ;;  %v14341_v10 = vld [vmem:[%s15080_s10 + $0x428] sm:$0xff]  }
 0x1a2   : > { %v4805_v17 = vadd.f32 %v15343_v0, %v13641_v14  ;;  %v4796_v18 = vpop.f32.mrb[21].mxu0  ;;  %v5570_v20 = vadd.f32 %v13709_v16, %v15335_v59  ;;  %v5561_v21 = vpop.f32.mrb[21].mxu1  ;;  %v14340_v14 = vld [vmem:[%s15080_s10 + $0x528] sm:$0xff]  }
 0x1a3   : > { %5896 = vrot.lane.b32.xlu1 %v5752_v11, %s14493_s23  ;;  %v4797_v22 = vadd.f32 %v15343_v0, %v4796_v18  ;;  %v13642_v23 = vpop.f32.mrb[22].mxu0  ;;  %v5562_v24 = vadd.f32 %v5561_v21, %v15335_v59  ;;  %v13710_v25 = vpop.f32.mrb[22].mxu1 }
 0x1a4   : > { %v4993_v26 = vmax.f32 %v4805_v17, 0.0  ;;  %v4808_v27 = vadd.f32 %v15343_v0, %v13642_v23  ;;  %v4799_v28 = vpop.f32.mrb[23].mxu0  ;;  %v5758_v30 = vmax.f32 %v5570_v20, 0.0  ;;  %v5573_v31 = vadd.f32 %v13710_v25, %v15335_v59  ;;  %v5564_v32 = vpop.f32.mrb[23].mxu1  ;;  %5898 = vrot.lane.b32.xlu0 %v5753_v13, %s14493_s23  ;;  %v14343_v23 = vld [vmem:[%s15080_s10 + $0x530] sm:$0xff]  }
 0x1a5   : > { %v4991_v33 = vmax.f32 %v4797_v22, 0.0  ;;  %v4800_v34 = vadd.f32 %v15343_v0, %v4799_v28  ;;  %v5565_v37 = vadd.f32 %v5564_v32, %v15335_v59  ;;  %v5756_v39 = vmax.f32 %v5562_v24, 0.0  ;;  %v14342_v22 = vld [vmem:[%s15080_s10 + $0x430] sm:$0xff]  }
 0x1a6   : > { %5058 = vst.msk [vmem:[%s15350_s22 + $0xb0] sm:$0xff] %vm5035_vm1, %v4993_v26  ;;  %13892 = vmatmul.mubr.msk.bf16.vlgmr.msra.gmra.mrb[128].mxu0 %vm4585_vm0, %v14333_v12  ;;  %v4994_v35 = vmax.f32 %v4808_v27, 0.0  ;;  %v5759_v36 = vmax.f32 %v5573_v31, 0.0  ;;  %13960 = vmatmul.mubr.msk.bf16.vlgmr.msra.gmra.mrb[128].mxu1 %vm4585_vm0, %v14332_v15 }
 0x1a7   : > { %5908 = vrot.lane.b32.xlu1 %v5758_v30, %s14493_s23  ;;  %5056 = vst.msk [vmem:[%s15350_s22 + $0xa0] sm:$0xff] %vm5035_vm1, %v4991_v33  ;;  %v4992_v38 = vmax.f32 %v4800_v34, 0.0  ;;  %13895 = vmatprep.mubr.msk.bf16.mxu0 %vm4585_vm0, %v14334_v19  ;;  %v5757_v45 = vmax.f32 %v5565_v37, 0.0 }
 0x1a8   : > { %5059 = vst.msk [vmem:[%s15350_s22 + $0xb8] sm:$0xff] %vm5035_vm1, %v4994_v35  ;;  %13963 = vmatprep.mubr.msk.bf16.mxu1 %vm4585_vm0, %v14335_v29  ;;  %5910 = vrot.lane.b32.xlu0 %v5759_v36, %s14493_s23 }
 0x1a9   : > { %5057 = vst.msk [vmem:[%s15350_s22 + $0xa8] sm:$0xff] %vm5035_vm1, %v4992_v38  ;;  %v13645_v40 = vpop.f32.mrb[24].mxu0  ;;  %v13713_v41 = vpop.f32.mrb[24].mxu1  ;;  %v14345_v38 = vld [vmem:[%s15080_s10 + $0x438] sm:$0xff]  }
 0x1aa   : > { %v4821_v42 = vadd.f32 %v15343_v0, %v13645_v40  ;;  %v4812_v43 = vpop.f32.mrb[25].mxu0  ;;  %v5586_v46 = vadd.f32 %v13713_v41, %v15335_v59  ;;  %v5577_v47 = vpop.f32.mrb[25].mxu1 }
 0x1ab   : > { %5904 = vrot.lane.b32.xlu1 %v5756_v39, %s14493_s23  ;;  %v4813_v49 = vadd.f32 %v15343_v0, %v4812_v43  ;;  %v13646_v50 = vpop.f32.mrb[26].mxu0  ;;  %v5578_v51 = vadd.f32 %v5577_v47, %v15335_v59  ;;  %v13714_v52 = vpop.f32.mrb[26].mxu1 }
 0x1ac   : > { %v4997_v53 = vmax.f32 %v4821_v42, 0.0  ;;  %v4824_v54 = vadd.f32 %v15343_v0, %v13646_v50  ;;  %v4815_v55 = vpop.f32.mrb[27].mxu0  ;;  %v5762_v58 = vmax.f32 %v5586_v46, 0.0  ;;  %v5589_v60 = vadd.f32 %v13714_v52, %v15335_v59  ;;  %v5580_v61 = vpop.f32.mrb[27].mxu1  ;;  %5906 = vrot.lane.b32.xlu0 %v5757_v45, %s14493_s23  ;;  %v14344_v42 = vld [vmem:[%s15080_s10 + $0x538] sm:$0xff]   ;;  %v14346_v50 = vld [vmem:[%s15080_s10 + $0x440] sm:$0xff]  }
 0x1ad   : > { %v4995_v62 = vmax.f32 %v4813_v49, 0.0  ;;  %v4816_v63 = vadd.f32 %v15343_v0, %v4815_v55  ;;  %v5581_v3 = vadd.f32 %v5580_v61, %v15335_v59  ;;  %v5760_v5 = vmax.f32 %v5578_v51, 0.0  ;;  %v14347_v51 = vld [vmem:[%s15080_s10 + $0x540] sm:$0xff]  }
 0x1ae   : > { %5062 = vst.msk [vmem:[%s15350_s22 + $0xd0] sm:$0xff] %vm5035_vm1, %v4997_v53  ;;  %13896 = vmatmul.mubr.msk.bf16.gmra.mrb[132].mxu0 %vm4585_vm0, %v14337_v44  ;;  %v4998_v1 = vmax.f32 %v4824_v54, 0.0  ;;  %v5763_v2 = vmax.f32 %v5589_v60, 0.0  ;;  %13964 = vmatmul.mubr.msk.bf16.gmra.mrb[132].mxu1 %vm4585_vm0, %v14336_v48 }
 0x1af   : > { %5916 = vrot.lane.b32.xlu1 %v5762_v58, %s14493_s23  ;;  %5060 = vst.msk [vmem:[%s15350_s22 + $0xc0] sm:$0xff] %vm5035_vm1, %v4995_v62  ;;  %v4996_v4 = vmax.f32 %v4816_v63, 0.0  ;;  %13899 = vmatprep.mubr.msk.bf16.mxu0 %vm4585_vm0, %v14338_v56  ;;  %v5761_v11 = vmax.f32 %v5581_v3, 0.0 }
 0x1b0   : > { %5063 = vst.msk [vmem:[%s15350_s22 + $0xd8] sm:$0xff] %vm5035_vm1, %v4998_v1  ;;  %13967 = vmatprep.mubr.msk.bf16.mxu1 %vm4585_vm0, %v14339_v57  ;;  %5918 = vrot.lane.b32.xlu0 %v5763_v2, %s14493_s23 }
 0x1b1   : > { %5061 = vst.msk [vmem:[%s15350_s22 + $0xc8] sm:$0xff] %vm5035_vm1, %v4996_v4  ;;  %v13649_v6 = vpop.f32.mrb[28].mxu0  ;;  %v13717_v7 = vpop.f32.mrb[28].mxu1  ;;  %v14349_v4 = vld [vmem:[%s15080_s10 + $0x448] sm:$0xff]  }
 0x1b2   : > { %v4837_v8 = vadd.f32 %v15343_v0, %v13649_v6  ;;  %v4828_v9 = vpop.f32.mrb[29].mxu0  ;;  %v5602_v12 = vadd.f32 %v13717_v7, %v15335_v59  ;;  %v5593_v13 = vpop.f32.mrb[29].mxu1 }
 0x1b3   : > { %5912 = vrot.lane.b32.xlu1 %v5760_v5, %s14493_s23  ;;  %v4829_v15 = vadd.f32 %v15343_v0, %v4828_v9  ;;  %v13650_v16 = vpop.f32.mrb[30].mxu0  ;;  %v5594_v17 = vadd.f32 %v5593_v13, %v15335_v59  ;;  %v13718_v18 = vpop.f32.mrb[30].mxu1 }
 0x1b4   : > { %v5001_v19 = vmax.f32 %v4837_v8, 0.0  ;;  %v4840_v20 = vadd.f32 %v15343_v0, %v13650_v16  ;;  %v4831_v21 = vpop.f32.mrb[31].mxu0  ;;  %v5766_v24 = vmax.f32 %v5602_v12, 0.0  ;;  %v5605_v25 = vadd.f32 %v13718_v18, %v15335_v59  ;;  %v5596_v26 = vpop.f32.mrb[31].mxu1  ;;  %5914 = vrot.lane.b32.xlu0 %v5761_v11, %s14493_s23  ;;  %v14348_v8 = vld [vmem:[%s15080_s10 + $0x548] sm:$0xff]   ;;  %v14350_v16 = vld [vmem:[%s15080_s10 + $0x450] sm:$0xff]  }
 0x1b5   : > { %v4999_v27 = vmax.f32 %v4829_v15, 0.0  ;;  %v4832_v28 = vadd.f32 %v15343_v0, %v4831_v21  ;;  %v5597_v31 = vadd.f32 %v5596_v26, %v15335_v59  ;;  %v5764_v33 = vmax.f32 %v5594_v17, 0.0  ;;  %v14351_v17 = vld [vmem:[%s15080_s10 + $0x550] sm:$0xff]  }
 0x1b6   : > { %5066 = vst.msk [vmem:[%s15350_s22 + $0xf0] sm:$0xff] %vm5035_vm1, %v5001_v19  ;;  %13900 = vmatmul.mubr.msk.bf16.gmra.mrb[136].mxu0 %vm4585_vm0, %v14341_v10  ;;  %v5002_v29 = vmax.f32 %v4840_v20, 0.0  ;;  %v5767_v30 = vmax.f32 %v5605_v25, 0.0  ;;  %13968 = vmatmul.mubr.msk.bf16.gmra.mrb[136].mxu1 %vm4585_vm0, %v14340_v14 }
 0x1b7   : > { %5924 = vrot.lane.b32.xlu1 %v5766_v24, %s14493_s23  ;;  %5064 = vst.msk [vmem:[%s15350_s22 + $0xe0] sm:$0xff] %vm5035_vm1, %v4999_v27  ;;  %v5000_v32 = vmax.f32 %v4832_v28, 0.0  ;;  %13903 = vmatprep.mubr.msk.bf16.mxu0 %vm4585_vm0, %v14342_v22  ;;  %v5765_v39 = vmax.f32 %v5597_v31, 0.0 }
 0x1b8   : > { %5067 = vst.msk [vmem:[%s15350_s22 + $0xf8] sm:$0xff] %vm5035_vm1, %v5002_v29  ;;  %13971 = vmatprep.mubr.msk.bf16.mxu1 %vm4585_vm0, %v14343_v23  ;;  %5926 = vrot.lane.b32.xlu0 %v5767_v30, %s14493_s23 }
 0x1b9   : > { %5065 = vst.msk [vmem:[%s15350_s22 + $0xe8] sm:$0xff] %vm5035_vm1, %v5000_v32  ;;  %v13653_v34 = vpop.f32.mrb[32].mxu0  ;;  %v13721_v35 = vpop.f32.mrb[32].mxu1  ;;  %v14353_v32 = vld [vmem:[%s15080_s10 + $0x458] sm:$0xff]  }
 0x1ba   : > { %v4853_v36 = vadd.f32 %v15343_v0, %v13653_v34  ;;  %v4844_v37 = vpop.f32.mrb[33].mxu0  ;;  %v5618_v40 = vadd.f32 %v13721_v35, %v15335_v59  ;;  %v5609_v41 = vpop.f32.mrb[33].mxu1 }
 0x1bb   : > { %5920 = vrot.lane.b32.xlu1 %v5764_v33, %s14493_s23  ;;  %v4845_v43 = vadd.f32 %v15343_v0, %v4844_v37  ;;  %v13654_v44 = vpop.f32.mrb[34].mxu0  ;;  %v5610_v45 = vadd.f32 %v5609_v41, %v15335_v59  ;;  %v13722_v46 = vpop.f32.mrb[34].mxu1 }
 0x1bc   : > { %v5005_v47 = vmax.f32 %v4853_v36, 0.0  ;;  %v4856_v48 = vadd.f32 %v15343_v0, %v13654_v44  ;;  %v4847_v49 = vpop.f32.mrb[35].mxu0  ;;  %v5770_v52 = vmax.f32 %v5618_v40, 0.0  ;;  %v5621_v53 = vadd.f32 %v13722_v46, %v15335_v59  ;;  %v5612_v54 = vpop.f32.mrb[35].mxu1  ;;  %5922 = vrot.lane.b32.xlu0 %v5765_v39, %s14493_s23  ;;  %v14352_v36 = vld [vmem:[%s15080_s10 + $0x558] sm:$0xff]   ;;  %v14354_v44 = vld [vmem:[%s15080_s10 + $0x460] sm:$0xff]  }
 0x1bd   : > { %v5003_v55 = vmax.f32 %v4845_v43, 0.0  ;;  %v4848_v56 = vadd.f32 %v15343_v0, %v4847_v49  ;;  %v5613_v60 = vadd.f32 %v5612_v54, %v15335_v59  ;;  %v5768_v62 = vmax.f32 %v5610_v45, 0.0  ;;  %v14355_v45 = vld [vmem:[%s15080_s10 + $0x560] sm:$0xff]  }
 0x1be   : > { %5070 = vst.msk [vmem:[%s15350_s22 + $0x110] sm:$0xff] %vm5035_vm1, %v5005_v47  ;;  %13904 = vmatmul.mubr.msk.bf16.gmra.mrb[140].mxu0 %vm4585_vm0, %v14345_v38  ;;  %v5006_v57 = vmax.f32 %v4856_v48, 0.0  ;;  %v5771_v58 = vmax.f32 %v5621_v53, 0.0  ;;  %13972 = vmatmul.mubr.msk.bf16.gmra.mrb[140].mxu1 %vm4585_vm0, %v14344_v42 }
 0x1bf   : > { %5932 = vrot.lane.b32.xlu1 %v5770_v52, %s14493_s23  ;;  %5068 = vst.msk [vmem:[%s15350_s22 + $0x100] sm:$0xff] %vm5035_vm1, %v5003_v55  ;;  %v5004_v61 = vmax.f32 %v4848_v56, 0.0  ;;  %13907 = vmatprep.mubr.msk.bf16.mxu0 %vm4585_vm0, %v14346_v50  ;;  %v5769_v5 = vmax.f32 %v5613_v60, 0.0 }
 0x1c0   : > { %5071 = vst.msk [vmem:[%s15350_s22 + $0x118] sm:$0xff] %vm5035_vm1, %v5006_v57  ;;  %13975 = vmatprep.mubr.msk.bf16.mxu1 %vm4585_vm0, %v14347_v51  ;;  %5934 = vrot.lane.b32.xlu0 %v5771_v58, %s14493_s23 }
 0x1c1   : > { %5069 = vst.msk [vmem:[%s15350_s22 + $0x108] sm:$0xff] %vm5035_vm1, %v5004_v61  ;;  %v13657_v63 = vpop.f32.mrb[36].mxu0  ;;  %v13725_v1 = vpop.f32.mrb[36].mxu1  ;;  %v14357_v61 = vld [vmem:[%s15080_s10 + $0x468] sm:$0xff]  }
 0x1c2   : > { %v4869_v2 = vadd.f32 %v15343_v0, %v13657_v63  ;;  %v4860_v3 = vpop.f32.mrb[37].mxu0  ;;  %v5634_v6 = vadd.f32 %v13725_v1, %v15335_v59  ;;  %v5625_v7 = vpop.f32.mrb[37].mxu1 }
 0x1c3   : > { %5928 = vrot.lane.b32.xlu1 %v5768_v62, %s14493_s23  ;;  %v4861_v9 = vadd.f32 %v15343_v0, %v4860_v3  ;;  %v13658_v10 = vpop.f32.mrb[38].mxu0  ;;  %v5626_v11 = vadd.f32 %v5625_v7, %v15335_v59  ;;  %v13726_v12 = vpop.f32.mrb[38].mxu1 }
 0x1c4   : > { %v5009_v13 = vmax.f32 %v4869_v2, 0.0  ;;  %v4872_v14 = vadd.f32 %v15343_v0, %v13658_v10  ;;  %v4863_v15 = vpop.f32.mrb[39].mxu0  ;;  %v5774_v18 = vmax.f32 %v5634_v6, 0.0  ;;  %v5637_v19 = vadd.f32 %v13726_v12, %v15335_v59  ;;  %v5628_v20 = vpop.f32.mrb[39].mxu1  ;;  %5930 = vrot.lane.b32.xlu0 %v5769_v5, %s14493_s23  ;;  %v14356_v2 = vld [vmem:[%s15080_s10 + $0x568] sm:$0xff]   ;;  %v14359_v12 = vld [vmem:[%s15080_s10 + $0x570] sm:$0xff]  }
 0x1c5   : > { %v5007_v21 = vmax.f32 %v4861_v9, 0.0  ;;  %v4864_v22 = vadd.f32 %v15343_v0, %v4863_v15  ;;  %v5629_v25 = vadd.f32 %v5628_v20, %v15335_v59  ;;  %v5772_v27 = vmax.f32 %v5626_v11, 0.0  ;;  %v14358_v11 = vld [vmem:[%s15080_s10 + $0x470] sm:$0xff]  }
 0x1c6   : > { %5074 = vst.msk [vmem:[%s15350_s22 + $0x130] sm:$0xff] %vm5035_vm1, %v5009_v13  ;;  %13908 = vmatmul.mubr.msk.bf16.gmra.mrb[144].mxu0 %vm4585_vm0, %v14349_v4  ;;  %v5010_v23 = vmax.f32 %v4872_v14, 0.0  ;;  %v5775_v24 = vmax.f32 %v5637_v19, 0.0  ;;  %13976 = vmatmul.mubr.msk.bf16.gmra.mrb[144].mxu1 %vm4585_vm0, %v14348_v8  ;;  %v15664_v8 = vld [vmem:[%s18786_s2] ss:$0 sm:$0xff] }
 0x1c7   : > { %5940 = vrot.lane.b32.xlu1 %v5774_v18, %s14493_s23  ;;  %5072 = vst.msk [vmem:[%s15350_s22 + $0x120] sm:$0xff] %vm5035_vm1, %v5007_v21  ;;  %v5008_v26 = vmax.f32 %v4864_v22, 0.0  ;;  %13911 = vmatprep.mubr.msk.bf16.mxu0 %vm4585_vm0, %v14350_v16  ;;  %v5773_v33 = vmax.f32 %v5629_v25, 0.0 }
 0x1c8   : > { %5075 = vst.msk [vmem:[%s15350_s22 + $0x138] sm:$0xff] %vm5035_vm1, %v5010_v23  ;;  %13979 = vmatprep.mubr.msk.bf16.mxu1 %vm4585_vm0, %v14351_v17  ;;  %5942 = vrot.lane.b32.xlu0 %v5775_v24, %s14493_s23 }
 0x1c9   : > { %5073 = vst.msk [vmem:[%s15350_s22 + $0x128] sm:$0xff] %vm5035_vm1, %v5008_v26  ;;  %v13661_v28 = vpop.f32.mrb[40].mxu0  ;;  %v13729_v29 = vpop.f32.mrb[40].mxu1  ;;  %v14361_v26 = vld [vmem:[%s15080_s10 + $0x478] sm:$0xff]  }
 0x1ca   : > { %v4885_v30 = vadd.f32 %v15343_v0, %v13661_v28  ;;  %v4876_v31 = vpop.f32.mrb[41].mxu0  ;;  %v5650_v34 = vadd.f32 %v13729_v29, %v15335_v59  ;;  %v5641_v35 = vpop.f32.mrb[41].mxu1 }
 0x1cb   : > { %5936 = vrot.lane.b32.xlu1 %v5772_v27, %s14493_s23  ;;  %v4877_v37 = vadd.f32 %v15343_v0, %v4876_v31  ;;  %v13662_v38 = vpop.f32.mrb[42].mxu0  ;;  %v5642_v39 = vadd.f32 %v5641_v35, %v15335_v59  ;;  %v13730_v40 = vpop.f32.mrb[42].mxu1 }
 0x1cc   : > { %v5013_v41 = vmax.f32 %v4885_v30, 0.0  ;;  %v4888_v42 = vadd.f32 %v15343_v0, %v13662_v38  ;;  %v4879_v43 = vpop.f32.mrb[43].mxu0  ;;  %v5778_v46 = vmax.f32 %v5650_v34, 0.0  ;;  %v5653_v47 = vadd.f32 %v13730_v40, %v15335_v59  ;;  %v5644_v48 = vpop.f32.mrb[43].mxu1  ;;  %5938 = vrot.lane.b32.xlu0 %v5773_v33, %s14493_s23  ;;  %v14360_v30 = vld [vmem:[%s15080_s10 + $0x578] sm:$0xff]   ;;  %v14362_v38 = vld [vmem:[%s15080_s10 + $0x480] sm:$0xff]  }
 0x1cd   : > { %v5011_v49 = vmax.f32 %v4877_v37, 0.0  ;;  %v4880_v50 = vadd.f32 %v15343_v0, %v4879_v43  ;;  %v5645_v53 = vadd.f32 %v5644_v48, %v15335_v59  ;;  %v5776_v55 = vmax.f32 %v5642_v39, 0.0  ;;  %v14363_v39 = vld [vmem:[%s15080_s10 + $0x580] sm:$0xff]  }
 0x1ce   : > { %5078 = vst.msk [vmem:[%s15350_s22 + $0x150] sm:$0xff] %vm5035_vm1, %v5013_v41  ;;  %13912 = vmatmul.mubr.msk.bf16.gmra.mrb[148].mxu0 %vm4585_vm0, %v14353_v32  ;;  %v5014_v51 = vmax.f32 %v4888_v42, 0.0  ;;  %v5779_v52 = vmax.f32 %v5653_v47, 0.0  ;;  %13980 = vmatmul.mubr.msk.bf16.gmra.mrb[148].mxu1 %vm4585_vm0, %v14352_v36 }
 0x1cf   : > { %5948 = vrot.lane.b32.xlu1 %v5778_v46, %s14493_s23  ;;  %5076 = vst.msk [vmem:[%s15350_s22 + $0x140] sm:$0xff] %vm5035_vm1, %v5011_v49  ;;  %v5012_v54 = vmax.f32 %v4880_v50, 0.0  ;;  %13915 = vmatprep.mubr.msk.bf16.mxu0 %vm4585_vm0, %v14354_v44  ;;  %v5777_v62 = vmax.f32 %v5645_v53, 0.0  ;;  %v15712_v49 = vpop.permute.xlu1 %6369 }
 0x1d0   : > { %5079 = vst.msk [vmem:[%s15350_s22 + $0x158] sm:$0xff] %vm5035_vm1, %v5014_v51  ;;  %13983 = vmatprep.mubr.msk.bf16.mxu1 %vm4585_vm0, %v14355_v45  ;;  %5950 = vrot.lane.b32.xlu0 %v5779_v52, %s14493_s23  ;;  %v15717_v52 = vpop.permute.xlu0 %7390 }
 0x1d1   : > { %5077 = vst.msk [vmem:[%s15350_s22 + $0x148] sm:$0xff] %vm5035_vm1, %v5012_v54  ;;  %v13665_v56 = vpop.f32.mrb[44].mxu0  ;;  %v13733_v57 = vpop.f32.mrb[44].mxu1 }
 0x1d2   : > { %v4901_v58 = vadd.f32 %v15343_v0, %v13665_v56  ;;  %v4892_v60 = vpop.f32.mrb[45].mxu0  ;;  %v5666_v63 = vadd.f32 %v13733_v57, %v15335_v59  ;;  %v5657_v1 = vpop.f32.mrb[45].mxu1  ;;  %v14365_v56 = vld [vmem:[%s15080_s10 + $0x488] sm:$0xff]  }
 0x1d3   : > { %5944 = vrot.lane.b32.xlu1 %v5776_v55, %s14493_s23  ;;  %v4893_v3 = vadd.f32 %v15343_v0, %v4892_v60  ;;  %v13666_v4 = vpop.f32.mrb[46].mxu0  ;;  %v5658_v5 = vadd.f32 %v5657_v1, %v15335_v59  ;;  %v13734_v6 = vpop.f32.mrb[46].mxu1 }
 0x1d4   : > { %v5017_v7 = vmax.f32 %v4901_v58, 0.0  ;;  %v4904_v9 = vadd.f32 %v15664_v8, %v13666_v4  ;;  %v4895_v10 = vpop.f32.mrb[47].mxu0  ;;  %v5782_v13 = vmax.f32 %v5666_v63, 0.0  ;;  %v5669_v0 = vadd.f32 %v13734_v6, %v15335_v59  ;;  %v5660_v14 = vpop.f32.mrb[47].mxu1  ;;  %5946 = vrot.lane.b32.xlu0 %v5777_v62, %s14493_s23  ;;  %v14366_v6 = vld [vmem:[%s15080_s10 + $0x490] sm:$0xff]  }
 0x1d5   : > { %v5015_v15 = vmax.f32 %v4893_v3, 0.0  ;;  %v4896_v16 = vadd.f32 %v15664_v8, %v4895_v10  ;;  %v5661_v19 = vadd.f32 %v5660_v14, %v15335_v59  ;;  %v5780_v21 = vmax.f32 %v5658_v5, 0.0 }
 0x1d6   : > { %5082 = vst.msk [vmem:[%s15350_s22 + $0x170] sm:$0xff] %vm5035_vm1, %v5017_v7  ;;  %13916 = vmatmul.mubr.msk.bf16.gmra.mrb[152].mxu0 %vm4585_vm0, %v14357_v61  ;;  %v5018_v17 = vmax.f32 %v4904_v9, 0.0  ;;  %v5783_v18 = vmax.f32 %v5669_v0, 0.0  ;;  %13984 = vmatmul.mubr.msk.bf16.gmra.mrb[152].mxu1 %vm4585_vm0, %v14356_v2  ;;  %v14364_v61 = vld [vmem:[%s15080_s10 + $0x588] sm:$0xff]   ;;  %v14367_v7 = vld [vmem:[%s15080_s10 + $0x590] sm:$0xff]  }
 0x1d7   : > { %5956 = vrot.lane.b32.xlu1 %v5782_v13, %s14493_s23  ;;  %5080 = vst.msk [vmem:[%s15350_s22 + $0x160] sm:$0xff] %vm5035_vm1, %v5015_v15  ;;  %v5016_v20 = vmax.f32 %v4896_v16, 0.0  ;;  %13919 = vmatprep.mubr.msk.bf16.mxu0 %vm4585_vm0, %v14358_v11  ;;  %v5781_v27 = vmax.f32 %v5661_v19, 0.0  ;;  %v15749_v19 = vpop.permute.xlu0 %9432 }
 0x1d8   : > { %5083 = vst.msk [vmem:[%s15350_s22 + $0x178] sm:$0xff] %vm5035_vm1, %v5018_v17  ;;  %13987 = vmatprep.mubr.msk.bf16.mxu1 %vm4585_vm0, %v14359_v12  ;;  %5958 = vrot.lane.b32.xlu0 %v5783_v18, %s14493_s23  ;;  %v15742_v17 = vpop.permute.xlu1 %8411  ;;  %18791 = vst [vmem:[#allocation4_spill] sm:$0xff] %v15749_v19 }
 0x1d9   : > { %5081 = vst.msk [vmem:[%s15350_s22 + $0x168] sm:$0xff] %vm5035_vm1, %v5016_v20  ;;  %v13669_v22 = vpop.f32.mrb[48].mxu0  ;;  %v13737_v23 = vpop.f32.mrb[48].mxu1  ;;  %18790 = vst [vmem:[#allocation3_spill] sm:$0xff] %v15742_v17 }
 0x1da   : > { %v4917_v24 = vadd.f32 %v15664_v8, %v13669_v22  ;;  %v4908_v25 = vpop.f32.mrb[49].mxu0  ;;  %v5682_v28 = vadd.f32 %v13737_v23, %v15335_v59  ;;  %v5673_v29 = vpop.f32.mrb[49].mxu1 }
 0x1db   : > { %5952 = vrot.lane.b32.xlu1 %v5780_v21, %s14493_s23  ;;  %v4909_v31 = vadd.f32 %v15664_v8, %v4908_v25  ;;  %v13670_v32 = vpop.f32.mrb[50].mxu0  ;;  %v5674_v33 = vadd.f32 %v5673_v29, %v15335_v59  ;;  %v13738_v34 = vpop.f32.mrb[50].mxu1 }
 0x1dc   : > { %v5021_v35 = vmax.f32 %v4917_v24, 0.0  ;;  %v4920_v36 = vadd.f32 %v15664_v8, %v13670_v32  ;;  %v4911_v37 = vpop.f32.mrb[51].mxu0  ;;  %v5786_v40 = vmax.f32 %v5682_v28, 0.0  ;;  %v5685_v41 = vadd.f32 %v13738_v34, %v15335_v59  ;;  %v5676_v42 = vpop.f32.mrb[51].mxu1  ;;  %5954 = vrot.lane.b32.xlu0 %v5781_v27, %s14493_s23  ;;  %v14369_v24 = vld [vmem:[%s15080_s10 + $0x498] sm:$0xff]  }
 0x1dd   : > { %v5019_v43 = vmax.f32 %v4909_v31, 0.0  ;;  %v4912_v44 = vadd.f32 %v15664_v8, %v4911_v37  ;;  %v5677_v47 = vadd.f32 %v5676_v42, %v15335_v59  ;;  %v5784_v50 = vmax.f32 %v5674_v33, 0.0  ;;  %v14368_v28 = vld [vmem:[%s15080_s10 + $0x598] sm:$0xff]   ;;  %v14371_v37 = vld [vmem:[%s15080_s10 + $0x4a0] sm:$0xff]  }
 0x1de   : > { %5086 = vst.msk [vmem:[%s15350_s22 + $0x190] sm:$0xff] %vm5035_vm1, %v5021_v35  ;;  %13920 = vmatmul.mubr.msk.bf16.gmra.mrb[156].mxu0 %vm4585_vm0, %v14361_v26  ;;  %v5022_v45 = vmax.f32 %v4920_v36, 0.0  ;;  %v5787_v46 = vmax.f32 %v5685_v41, 0.0  ;;  %13988 = vmatmul.mubr.msk.bf16.gmra.mrb[156].mxu1 %vm4585_vm0, %v14360_v30  ;;  %v14370_v36 = vld [vmem:[%s15080_s10 + $0x5a0] sm:$0xff]  }
 0x1df   : > { %5964 = vrot.lane.b32.xlu1 %v5786_v40, %s14493_s23  ;;  %5084 = vst.msk [vmem:[%s15350_s22 + $0x180] sm:$0xff] %vm5035_vm1, %v5019_v43  ;;  %v5020_v48 = vmax.f32 %v4912_v44, 0.0  ;;  %13923 = vmatprep.mubr.msk.bf16.mxu0 %vm4585_vm0, %v14362_v38  ;;  %v5785_v57 = vmax.f32 %v5677_v47, 0.0 }
 0x1e0   : > { %5087 = vst.msk [vmem:[%s15350_s22 + $0x198] sm:$0xff] %vm5035_vm1, %v5022_v45  ;;  %13991 = vmatprep.mubr.msk.bf16.mxu1 %vm4585_vm0, %v14363_v39  ;;  %5966 = vrot.lane.b32.xlu0 %v5787_v46, %s14493_s23 }
 0x1e1   : > { %5085 = vst.msk [vmem:[%s15350_s22 + $0x188] sm:$0xff] %vm5035_vm1, %v5020_v48  ;;  %v13673_v51 = vpop.f32.mrb[52].mxu0  ;;  %v13741_v53 = vpop.f32.mrb[52].mxu1 }
 0x1e2   : > { %v4933_v54 = vadd.f32 %v15664_v8, %v13673_v51  ;;  %v4924_v55 = vpop.f32.mrb[53].mxu0  ;;  %v5698_v58 = vadd.f32 %v13741_v53, %v15335_v59  ;;  %v5689_v60 = vpop.f32.mrb[53].mxu1 }
 0x1e3   : > { %5960 = vrot.lane.b32.xlu1 %v5784_v50, %s14493_s23  ;;  %v4925_v62 = vadd.f32 %v15664_v8, %v4924_v55  ;;  %v13674_v63 = vpop.f32.mrb[54].mxu0  ;;  %v5690_v1 = vadd.f32 %v5689_v60, %v15335_v59  ;;  %v13742_v2 = vpop.f32.mrb[54].mxu1  ;;  %v14373_v55 = vld [vmem:[%s15080_s10 + $0x4a8] sm:$0xff]  }
 0x1e4   : > { %v5025_v3 = vmax.f32 %v4933_v54, 0.0  ;;  %v4936_v4 = vadd.f32 %v15664_v8, %v13674_v63  ;;  %v4927_v5 = vpop.f32.mrb[55].mxu0  ;;  %v5790_v9 = vmax.f32 %v5698_v58, 0.0  ;;  %v5701_v10 = vadd.f32 %v13742_v2, %v15335_v59  ;;  %v5692_v11 = vpop.f32.mrb[55].mxu1  ;;  %5962 = vrot.lane.b32.xlu0 %v5785_v57, %s14493_s23  ;;  %v14372_v60 = vld [vmem:[%s15080_s10 + $0x5a8] sm:$0xff]  }
 0x1e5   : > { %v5023_v12 = vmax.f32 %v4925_v62, 0.0  ;;  %v4928_v13 = vadd.f32 %v15664_v8, %v4927_v5  ;;  %v5693_v15 = vadd.f32 %v5692_v11, %v15335_v59  ;;  %v5788_v18 = vmax.f32 %v5690_v1, 0.0 }
 0x1e6   : > { %5090 = vst.msk [vmem:[%s15350_s22 + $0x1b0] sm:$0xff] %vm5035_vm1, %v5025_v3  ;;  %13924 = vmatmul.mubr.msk.bf16.gmra.mrb[160].mxu0 %vm4585_vm0, %v14365_v56  ;;  %v5026_v0 = vmax.f32 %v4936_v4, 0.0  ;;  %v5791_v14 = vmax.f32 %v5701_v10, 0.0  ;;  %13992 = vmatmul.mubr.msk.bf16.gmra.mrb[160].mxu1 %vm4585_vm0, %v14364_v61  ;;  %v14374_v3 = vld [vmem:[%s15080_s10 + $0x4b0] sm:$0xff]  }
 0x1e7   : > { %5972 = vrot.lane.b32.xlu1 %v5790_v9, %s14493_s23  ;;  %5088 = vst.msk [vmem:[%s15350_s22 + $0x1a0] sm:$0xff] %vm5035_vm1, %v5023_v12  ;;  %v5024_v16 = vmax.f32 %v4928_v13, 0.0  ;;  %13927 = vmatprep.mubr.msk.bf16.mxu0 %vm4585_vm0, %v14366_v6  ;;  %v5789_v25 = vmax.f32 %v5693_v15, 0.0  ;;  %v14375_v4 = vld [vmem:[%s15080_s10 + $0x5b0] sm:$0xff]  }
 0x1e8   : > { %5091 = vst.msk [vmem:[%s15350_s22 + $0x1b8] sm:$0xff] %vm5035_vm1, %v5026_v0  ;;  %13995 = vmatprep.mubr.msk.bf16.mxu1 %vm4585_vm0, %v14367_v7  ;;  %5974 = vrot.lane.b32.xlu0 %v5791_v14, %s14493_s23 }
 0x1e9   : > { %5089 = vst.msk [vmem:[%s15350_s22 + $0x1a8] sm:$0xff] %vm5035_vm1, %v5024_v16  ;;  %v13677_v20 = vpop.f32.mrb[56].mxu0  ;;  %v13745_v21 = vpop.f32.mrb[56].mxu1 }
 0x1ea   : > { %v4949_v22 = vadd.f32 %v15664_v8, %v13677_v20  ;;  %v4940_v23 = vpop.f32.mrb[57].mxu0  ;;  %v5714_v26 = vadd.f32 %v13745_v21, %v15335_v59  ;;  %v5705_v27 = vpop.f32.mrb[57].mxu1 }
 0x1eb   : > { %5968 = vrot.lane.b32.xlu1 %v5788_v18, %s14493_s23  ;;  %v4941_v29 = vadd.f32 %v15664_v8, %v4940_v23  ;;  %v13678_v30 = vpop.f32.mrb[58].mxu0  ;;  %v5706_v31 = vadd.f32 %v5705_v27, %v15335_v59  ;;  %v13746_v32 = vpop.f32.mrb[58].mxu1 }
 0x1ec   : > { %v5029_v33 = vmax.f32 %v4949_v22, 0.0  ;;  %v4952_v34 = vadd.f32 %v15664_v8, %v13678_v30  ;;  %v4943_v35 = vpop.f32.mrb[59].mxu0  ;;  %v5794_v38 = vmax.f32 %v5714_v26, 0.0  ;;  %v5717_v39 = vadd.f32 %v13746_v32, %v15335_v59  ;;  %v5708_v40 = vpop.f32.mrb[59].mxu1  ;;  %5970 = vrot.lane.b32.xlu0 %v5789_v25, %s14493_s23  ;;  %v14376_v30 = vld [vmem:[%s15080_s10 + $0x5b8] sm:$0xff]  }
 0x1ed   : > { %v5027_v41 = vmax.f32 %v4941_v29, 0.0  ;;  %v4944_v42 = vadd.f32 %v15664_v8, %v4943_v35  ;;  %v5709_v45 = vadd.f32 %v5708_v40, %v15335_v59  ;;  %v5792_v47 = vmax.f32 %v5706_v31, 0.0 }
 0x1ee   : > { %5094 = vst.msk [vmem:[%s15350_s22 + $0x1d0] sm:$0xff] %vm5035_vm1, %v5029_v33  ;;  %13928 = vmatmul.mubr.msk.bf16.gmra.mrb[164].mxu0 %vm4585_vm0, %v14369_v24  ;;  %v5030_v43 = vmax.f32 %v4952_v34, 0.0  ;;  %v5795_v44 = vmax.f32 %v5717_v39, 0.0  ;;  %13996 = vmatmul.mubr.msk.bf16.gmra.mrb[164].mxu1 %vm4585_vm0, %v14368_v28  ;;  %v14377_v24 = vld [vmem:[%s15080_s10 + $0x4b8] sm:$0xff]   ;;  %v14378_v33 = vld [vmem:[%s15080_s10 + $0x4c0] sm:$0xff]  }
 0x1ef   : > { %5980 = vrot.lane.b32.xlu1 %v5794_v38, %s14493_s23  ;;  %5092 = vst.msk [vmem:[%s15350_s22 + $0x1c0] sm:$0xff] %vm5035_vm1, %v5027_v41  ;;  %v5028_v46 = vmax.f32 %v4944_v42, 0.0  ;;  %13999 = vmatprep.mubr.msk.bf16.mxu1 %vm4585_vm0, %v14370_v36  ;;  %v5793_v56 = vmax.f32 %v5709_v45, 0.0  ;;  %v14379_v34 = vld [vmem:[%s15080_s10 + $0x5c0] sm:$0xff]  }
 0x1f0   : > { %5095 = vst.msk [vmem:[%s15350_s22 + $0x1d8] sm:$0xff] %vm5035_vm1, %v5030_v43  ;;  %13931 = vmatprep.mubr.msk.bf16.mxu0 %vm4585_vm0, %v14371_v37  ;;  %5982 = vrot.lane.b32.xlu0 %v5795_v44, %s14493_s23 }
 0x1f1   : > { %v5869_v48 = vpop.permute.xlu1 %5868  ;;  %5093 = vst.msk [vmem:[%s15350_s22 + $0x1c8] sm:$0xff] %vm5035_vm1, %v5028_v46  ;;  %v13681_v50 = vpop.f32.mrb[60].mxu0 }
 0x1f2   : > { %6059 = vst.msk [vmem:[%s15350_s22 + $0x10] sm:$0xff] %vm6056_vm2, %v5869_v48  ;;  %v13749_v51 = vpop.f32.mrb[60].mxu1  ;;  %v5865_v53 = vpop.permute.xlu0 %5864  ;;  %v4965_v54 = vadd.f32 %v15664_v8, %v13681_v50  ;;  %v14381_v50 = vld [vmem:[%s15080_s10 + $0x4c8] sm:$0xff]  }
 0x1f3   : > { %v5730_v57 = vadd.f32 %v13749_v51, %v15335_v59  ;;  %6057 = vst.msk [vmem:[%s15350_s22] sm:$0xff] %vm6056_vm2, %v5865_v53  ;;  %v5721_v58 = vpop.f32.mrb[61].mxu1  ;;  %5976 = vrot.lane.b32.xlu1 %v5792_v47, %s14493_s23  ;;  %v4956_v61 = vpop.f32.mrb[61].mxu0 }
 0x1f4   : > { %v13750_v62 = vpop.f32.mrb[62].mxu1  ;;  %v5033_v63 = vmax.f32 %v4965_v54, 0.0  ;;  %v4957_v1 = vadd.f32 %v15664_v8, %v4956_v61  ;;  %v13682_v2 = vpop.f32.mrb[62].mxu0  ;;  %v5722_v6 = vadd.f32 %v5721_v58, %v15335_v59  ;;  %5978 = vrot.lane.b32.xlu0 %v5793_v56, %s14493_s23  ;;  %v14380_v56 = vld [vmem:[%s15080_s10 + $0x5c8] sm:$0xff]   ;;  %v14383_v61 = vld [vmem:[%s15080_s10 + $0x5d0] sm:$0xff]  }
 0x1f5   : > { %v5798_v5 = vmax.f32 %v5730_v57, 0.0  ;;  %v5733_v7 = vadd.f32 %v13750_v62, %v15335_v59  ;;  %v5724_v9 = vpop.f32.mrb[63].mxu1  ;;  %v5867_v10 = vpop.permute.xlu1 %5866  ;;  %v4968_v11 = vadd.f32 %v15664_v8, %v13682_v2 }
 0x1f6   : > { %6058 = vst.msk [vmem:[%s15350_s22 + $0x8] sm:$0xff] %vm6056_vm2, %v5867_v10  ;;  %v5871_v12 = vpop.permute.xlu0 %5870  ;;  %v5031_v13 = vmax.f32 %v4957_v1, 0.0  ;;  %13932 = vmatmul.mubr.msk.bf16.gmra.mrb[168].mxu0 %vm4585_vm0, %v14373_v55  ;;  %v4959_v0 = vpop.f32.mrb[63].mxu0  ;;  %v5725_v15 = vadd.f32 %v5724_v9, %v15335_v59  ;;  %14000 = vmatmul.mubr.msk.bf16.gmra.mrb[168].mxu1 %vm4585_vm0, %v14372_v60  ;;  %v5796_v20 = vmax.f32 %v5722_v6, 0.0  ;;  %v14382_v60 = vld [vmem:[%s15080_s10 + $0x4d0] sm:$0xff]  }
 0x1f7   : > { %5098 = vst.msk [vmem:[%s15350_s22 + $0x1f0] sm:$0xff] %vm5035_vm1, %v5033_v63  ;;  %v5799_v14 = vmax.f32 %v5733_v7, 0.0  ;;  %5988 = vrot.lane.b32.xlu1 %v5798_v5, %s14493_s23  ;;  %v5034_v16 = vmax.f32 %v4968_v11, 0.0  ;;  %v4960_v18 = vadd.f32 %v15664_v8, %v4959_v0  ;;  %13935 = vmatprep.mubr.msk.bf16.mxu0 %vm4585_vm0, %v14374_v3  ;;  %v14385_v0 = vld [vmem:[%s15080_s10 + $0x4d8] sm:$0xff]  }
 0x1f8   : > { %6060 = vst.msk [vmem:[%s15350_s22 + $0x18] sm:$0xff] %vm6056_vm2, %v5871_v12  ;;  %14003 = vmatprep.mubr.msk.bf16.mxu1 %vm4585_vm0, %v14375_v4  ;;  %v5797_v25 = vmax.f32 %v5725_v15, 0.0 }
 0x1f9   : > { %5096 = vst.msk [vmem:[%s15350_s22 + $0x1e0] sm:$0xff] %vm5035_vm1, %v5031_v13  ;;  %5099 = vst.msk [vmem:[%s15350_s22 + $0x1f8] sm:$0xff] %vm5035_vm1, %v5034_v16  ;;  %v5877_v59 = vpop.permute.xlu1 %5876  ;;  %5990 = vrot.lane.b32.xlu0 %v5799_v14, %s14493_s23  ;;  %v5032_v21 = vmax.f32 %v4960_v18, 0.0  ;;  %v13757_v22 = vpop.f32.mrb[64].mxu0 }
 0x1fa   : > { %6063 = vst.msk [vmem:[%s15350_s22 + $0x30] sm:$0xff] %vm6056_vm2, %v5877_v59  ;;  %v13825_v8 = vpop.f32.mrb[64].mxu1  ;;  %v6502_v23 = vpop.f32.mrb[65].mxu0  ;;  %v6511_v26 = vadd.f32 %v13757_v22, %v15712_v49  ;;  %v14386_v22 = vld [vmem:[%s15080_s10 + $0x4e0] sm:$0xff]  }
 0x1fb   : > { %5097 = vst.msk [vmem:[%s15350_s22 + $0x1e8] sm:$0xff] %vm5035_vm1, %v5032_v21  ;;  %v7532_v27 = vadd.f32 %v13825_v8, %v15717_v52  ;;  %v7523_v28 = vpop.f32.mrb[65].mxu1  ;;  %5984 = vrot.lane.b32.xlu1 %v5796_v20, %s14493_s23  ;;  %v5879_v29 = vpop.permute.xlu0 %5878  ;;  %v6503_v41 = vadd.f32 %v6502_v23, %v15712_v49  ;;  %v14384_v20 = vld [vmem:[%s15080_s10 + $0x5d8] sm:$0xff]   ;;  %v14387_v8 = vld [vmem:[%s15080_s10 + $0x5e0] sm:$0xff]  }
 0x1fc   : > { %6064 = vst.msk [vmem:[%s15350_s22 + $0x38] sm:$0xff] %vm6056_vm2, %v5879_v29  ;;  %v13758_v31 = vpop.f32.mrb[66].mxu0  ;;  %v13826_v32 = vpop.f32.mrb[66].mxu1  ;;  %v7524_v36 = vadd.f32 %v7523_v28, %v15717_v52  ;;  %v6759_v40 = vmax.f32 %v6511_v26, 0.0 }
 0x1fd   : > { %v7780_v35 = vmax.f32 %v7532_v27, 0.0  ;;  %v7526_v37 = vpop.f32.mrb[67].mxu1  ;;  %v5873_v38 = vpop.permute.xlu1 %5872  ;;  %5986 = vrot.lane.b32.xlu0 %v5797_v25, %s14493_s23  ;;  %v6514_v44 = vadd.f32 %v13758_v31, %v15712_v49  ;;  %v6757_v51 = vmax.f32 %v6503_v41, 0.0  ;;  %v7535_v53 = vadd.f32 %v13826_v32, %v15717_v52 }
 0x1fe   : > { %6061 = vst.msk [vmem:[%s15350_s22 + $0x20] sm:$0xff] %vm6056_vm2, %v5873_v38  ;;  %v6505_v39 = vpop.f32.mrb[67].mxu0  ;;  %13936 = vmatmul.mubr.msk.bf16.gmra.mrb[172].mxu0 %vm4585_vm0, %v14377_v24  ;;  %14004 = vmatmul.mubr.msk.bf16.gmra.mrb[172].mxu1 %vm4585_vm0, %v14376_v30  ;;  %v7778_v43 = vmax.f32 %v7524_v36, 0.0  ;;  %v7527_v5 = vadd.f32 %v7526_v37, %v15717_v52  ;;  %v14389_v37 = vld [vmem:[%s15080_s10 + $0x4e8] sm:$0xff]  }
 0x1ff   : > { %7910 = vrot.lane.b32.xlu1 %v7780_v35, %s14492_s30  ;;  %v5875_v42 = vpop.permute.xlu0 %5874  ;;  %13939 = vmatprep.mubr.msk.bf16.mxu0 %vm4585_vm0, %v14378_v33  ;;  %v6760_v62 = vmax.f32 %v6514_v44, 0.0  ;;  %v6506_v63 = vadd.f32 %v6505_v39, %v15712_v49  ;;  %v7781_v4 = vmax.f32 %v7535_v53, 0.0 }
 0x200   : > { %6062 = vst.msk [vmem:[%s15350_s22 + $0x28] sm:$0xff] %vm6056_vm2, %v5875_v42  ;;  %14007 = vmatprep.mubr.msk.bf16.mxu1 %vm4585_vm0, %v14379_v34  ;;  %v7779_v14 = vmax.f32 %v7527_v5, 0.0  ;;  %v14388_v42 = vld [vmem:[%s15080_s10 + $0x5e8] sm:$0xff]  }
 0x201   : > { %v5885_v45 = vpop.permute.xlu1 %5884  ;;  %6889 = vrot.lane.b32.xlu0 %v6759_v40, %s14494_s4  ;;  %v13761_v46 = vpop.f32.mrb[68].mxu0  ;;  %v6758_v7 = vmax.f32 %v6506_v63, 0.0 }
 0x202   : > { %6067 = vst.msk [vmem:[%s15350_s22 + $0x50] sm:$0xff] %vm6056_vm2, %v5885_v45  ;;  %v13829_v47 = vpop.f32.mrb[68].mxu1  ;;  %v6518_v48 = vpop.f32.mrb[69].mxu0  ;;  %v6527_v15 = vadd.f32 %v13761_v46, %v15712_v49  ;;  %v14390_v45 = vld [vmem:[%s15080_s10 + $0x4f0] sm:$0xff]  }
 0x203   : > { %v7539_v54 = vpop.f32.mrb[69].mxu1  ;;  %7906 = vrot.lane.b32.xlu1 %v7778_v43, %s14492_s30  ;;  %v5887_v55 = vpop.permute.xlu0 %5886  ;;  %v7548_v9 = vadd.f32 %v13829_v47, %v15717_v52  ;;  %v6519_v29 = vadd.f32 %v6518_v48, %v15712_v49  ;;  %v14391_v46 = vld [vmem:[%s15080_s10 + $0x5f0] sm:$0xff]  }
 0x204   : > { %6068 = vst.msk [vmem:[%s15350_s22 + $0x58] sm:$0xff] %vm6056_vm2, %v5887_v55  ;;  %v13762_v57 = vpop.f32.mrb[70].mxu0  ;;  %v15848_v58 = vpop.f32.mrb[70].mxu1  ;;  %v7540_v24 = vadd.f32 %v7539_v54, %v15717_v52  ;;  %v6763_v28 = vmax.f32 %v6527_v15, 0.0 }
 0x205   : > { %v15853_v1 = vpop.f32.mrb[71].mxu1  ;;  %v5881_v2 = vpop.permute.xlu1 %5880  ;;  %6885 = vrot.lane.b32.xlu0 %v6757_v51, %s14494_s4  ;;  %v7784_v23 = vmax.f32 %v7548_v9, 0.0  ;;  %v6530_v32 = vadd.f32 %v13762_v57, %v15712_v49  ;;  %v6761_v38 = vmax.f32 %v6519_v29, 0.0  ;;  %v7551_v39 = vadd.f32 %v15848_v58, %v15717_v52 }
 0x206   : > { %6065 = vst.msk [vmem:[%s15350_s22 + $0x40] sm:$0xff] %vm6056_vm2, %v5881_v2  ;;  %v15858_v3 = vpop.f32.mrb[71].mxu0  ;;  %13940 = vmatmul.mubr.msk.bf16.gmra.mrb[176].mxu0 %vm4585_vm0, %v14381_v50  ;;  %14008 = vmatmul.mubr.msk.bf16.gmra.mrb[176].mxu1 %vm4585_vm0, %v14380_v56  ;;  %v7782_v31 = vmax.f32 %v7540_v24, 0.0  ;;  %v7543_v55 = vadd.f32 %v15853_v1, %v15717_v52  ;;  %v14393_v1 = vld [vmem:[%s15080_s10 + $0x4f8] sm:$0xff]  }
 0x207   : > { %v5883_v6 = vpop.permute.xlu0 %5882  ;;  %6891 = vrot.lane.b32.xlu1 %v6760_v62, %s14494_s4  ;;  %13943 = vmatprep.mubr.msk.bf16.mxu0 %vm4585_vm0, %v14382_v60  ;;  %v6764_v47 = vmax.f32 %v6530_v32, 0.0  ;;  %v6522_v48 = vadd.f32 %v15858_v3, %v15712_v49  ;;  %v7785_v54 = vmax.f32 %v7551_v39, 0.0 }
 0x208   : > { %6066 = vst.msk [vmem:[%s15350_s22 + $0x48] sm:$0xff] %vm6056_vm2, %v5883_v6  ;;  %14011 = vmatprep.mubr.msk.bf16.mxu1 %vm4585_vm0, %v14383_v61  ;;  %v7783_v2 = vmax.f32 %v7543_v55, 0.0  ;;  %v14392_v6 = vld [vmem:[%s15080_s10 + $0x5f8] sm:$0xff]  }
 0x209   : > { %v5893_v10 = vpop.permute.xlu1 %5892  ;;  %7912 = vrot.lane.b32.xlu0 %v7781_v4, %s14492_s30  ;;  %v15870_v11 = vpop.f32.mrb[72].mxu0  ;;  %v6762_v57 = vmax.f32 %v6522_v48, 0.0 }
 0x20a   : > { %6071 = vst.msk [vmem:[%s15350_s22 + $0x70] sm:$0xff] %vm6056_vm2, %v5893_v10  ;;  %v15874_v12 = vpop.f32.mrb[72].mxu1  ;;  %v15876_v13 = vpop.f32.mrb[73].mxu0  ;;  %v6543_v3 = vadd.f32 %v15870_v11, %v15712_v49 }
 0x20b   : > { %v15880_v16 = vpop.f32.mrb[73].mxu1  ;;  %v5895_v18 = vpop.permute.xlu0 %5894  ;;  %6887 = vrot.lane.b32.xlu1 %v6758_v7, %s14494_s4  ;;  %v7564_v58 = vadd.f32 %v15874_v12, %v15717_v52 }
 0x20c   : > { %6072 = vst.msk [vmem:[%s15350_s22 + $0x78] sm:$0xff] %vm6056_vm2, %v5895_v18  ;;  %v15886_v59 = vpop.f32.mrb[74].mxu0  ;;  %v15888_v21 = vpop.f32.mrb[74].mxu1  ;;  %v7556_v12 = vadd.f32 %v15880_v16, %v15717_v52  ;;  %v6767_v15 = vmax.f32 %v6543_v3, 0.0  ;;  %v6535_v18 = vadd.f32 %v15876_v13, %v15712_v49 }
 0x20d   : > { %v15893_v25 = vpop.f32.mrb[75].mxu1  ;;  %v5889_v26 = vpop.permute.xlu1 %5888  ;;  %7908 = vrot.lane.b32.xlu0 %v7779_v14, %s14492_s30  ;;  %v7788_v10 = vmax.f32 %v7564_v58, 0.0 }
 0x20e   : > { %6069 = vst.msk [vmem:[%s15350_s22 + $0x60] sm:$0xff] %vm6056_vm2, %v5889_v26  ;;  %v15898_v27 = vpop.f32.mrb[75].mxu0  ;;  %13944 = vmatmul.mubr.msk.bf16.gmra.mrb[180].mxu0 %vm4585_vm0, %v14385_v0  ;;  %14012 = vmatmul.mubr.msk.bf16.gmra.mrb[180].mxu1 %vm4585_vm0, %v14384_v20  ;;  %v7786_v16 = vmax.f32 %v7556_v12, 0.0  ;;  %v6765_v26 = vmax.f32 %v6535_v18, 0.0 }
 0x20f   : > { %v5891_v30 = vpop.permute.xlu0 %5890  ;;  %7918 = vrot.lane.b32.xlu1 %v7784_v23, %s14492_s30  ;;  %13947 = vmatprep.mubr.msk.bf16.mxu0 %vm4585_vm0, %v14386_v22  ;;  %v6546_v22 = vadd.f32 %v15886_v59, %v15712_v49 }
 0x210   : > { %6070 = vst.msk [vmem:[%s15350_s22 + $0x68] sm:$0xff] %vm6056_vm2, %v5891_v30  ;;  %14015 = vmatprep.mubr.msk.bf16.mxu1 %vm4585_vm0, %v14387_v8 }
 0x211   : > { %v5901_v33 = vpop.permute.xlu1 %5900  ;;  %6897 = vrot.lane.b32.xlu0 %v6763_v28, %s14494_s4  ;;  %v15910_v34 = vpop.f32.mrb[76].mxu0  ;;  %v7567_v28 = vadd.f32 %v15888_v21, %v15717_v52  ;;  %v6768_v32 = vmax.f32 %v6546_v22, 0.0 }
 0x212   : > { %6075 = vst.msk [vmem:[%s15350_s22 + $0x90] sm:$0xff] %vm6056_vm2, %v5901_v33  ;;  %v15914_v35 = vpop.f32.mrb[76].mxu1  ;;  %v15916_v36 = vpop.f32.mrb[77].mxu0  ;;  %v6538_v33 = vadd.f32 %v15898_v27, %v15712_v49 }
 0x213   : > { %v15921_v40 = vpop.f32.mrb[77].mxu1  ;;  %v5903_v41 = vpop.permute.xlu0 %5902  ;;  %7914 = vrot.lane.b32.xlu1 %v7782_v31, %s14492_s30  ;;  %v7789_v39 = vmax.f32 %v7567_v28, 0.0 }
 0x214   : > { %6076 = vst.msk [vmem:[%s15350_s22 + $0x98] sm:$0xff] %vm6056_vm2, %v5903_v41  ;;  %v15927_v43 = vpop.f32.mrb[78].mxu0  ;;  %v15929_v44 = vpop.f32.mrb[78].mxu1  ;;  %v7559_v41 = vadd.f32 %v15893_v25, %v15717_v52  ;;  %v6766_v27 = vmax.f32 %v6538_v33, 0.0 }
 0x215   : > { %v15935_v50 = vpop.f32.mrb[79].mxu1  ;;  %v5897_v51 = vpop.permute.xlu1 %5896  ;;  %6893 = vrot.lane.b32.xlu0 %v6761_v38, %s14494_s4 }
 0x216   : > { %6073 = vst.msk [vmem:[%s15350_s22 + $0x80] sm:$0xff] %vm6056_vm2, %v5897_v51  ;;  %v15940_v53 = vpop.f32.mrb[79].mxu0  ;;  %13948 = vmatmul.mubr.msk.bf16.gmra.mrb[184].mxu0 %vm4585_vm0, %v14389_v37  ;;  %14016 = vmatmul.mubr.msk.bf16.gmra.mrb[184].mxu1 %vm4585_vm0, %v14388_v42  ;;  %v7787_v51 = vmax.f32 %v7559_v41, 0.0 }
 0x217   : > { %v5899_v56 = vpop.permute.xlu0 %5898  ;;  %6899 = vrot.lane.b32.xlu1 %v6764_v47, %s14494_s4  ;;  %13951 = vmatprep.mubr.msk.bf16.mxu0 %vm4585_vm0, %v14390_v45  ;;  %v7580_v45 = vadd.f32 %v15914_v35, %v15717_v52  ;;  %v6554_v28 = vadd.f32 %v15940_v53, %v15712_v49 }
 0x218   : > { %6074 = vst.msk [vmem:[%s15350_s22 + $0x88] sm:$0xff] %vm6056_vm2, %v5899_v56  ;;  %14019 = vmatprep.mubr.msk.bf16.mxu1 %vm4585_vm0, %v14391_v46 }
 0x219   : > { %v5909_v60 = vpop.permute.xlu1 %5908  ;;  %7920 = vrot.lane.b32.xlu0 %v7785_v54, %s14492_s30  ;;  %v15954_v61 = vpop.f32.mrb[80].mxu0  ;;  %v6559_v54 = vadd.f32 %v15910_v34, %v15712_v49  ;;  %v7792_v58 = vmax.f32 %v7580_v45, 0.0  ;;  %v6770_v53 = vmax.f32 %v6554_v28, 0.0 }
 0x21a   : > { %6079 = vst.msk [vmem:[%s15350_s22 + $0xb0] sm:$0xff] %vm6056_vm2, %v5909_v60  ;;  %v15958_v62 = vpop.f32.mrb[80].mxu1  ;;  %v15960_v63 = vpop.f32.mrb[81].mxu0  ;;  %v7572_v60 = vadd.f32 %v15921_v40, %v15717_v52 }
 0x21b   : > { %v15965_v4 = vpop.f32.mrb[81].mxu1  ;;  %v5911_v5 = vpop.permute.xlu0 %5910  ;;  %6895 = vrot.lane.b32.xlu1 %v6762_v57, %s14494_s4  ;;  %v6771_v3 = vmax.f32 %v6559_v54, 0.0  ;;  %v7596_v41 = vadd.f32 %v15958_v62, %v15717_v52 }
 0x21c   : > { %6080 = vst.msk [vmem:[%s15350_s22 + $0xb8] sm:$0xff] %vm6056_vm2, %v5911_v5  ;;  %v15971_v7 = vpop.f32.mrb[82].mxu0  ;;  %v15973_v9 = vpop.f32.mrb[82].mxu1  ;;  %v6551_v5 = vadd.f32 %v15916_v36, %v15712_v49  ;;  %v7790_v40 = vmax.f32 %v7572_v60, 0.0 }
 0x21d   : > { %v15977_v0 = vpop.f32.mrb[83].mxu1  ;;  %v5905_v11 = vpop.permute.xlu1 %5904  ;;  %7916 = vrot.lane.b32.xlu0 %v7783_v2, %s14492_s30  ;;  %v7796_v60 = vmax.f32 %v7596_v41, 0.0  ;;  %v7599_v28 = vadd.f32 %v15973_v9, %v15717_v52 }
 0x21e   : > { %6077 = vst.msk [vmem:[%s15350_s22 + $0xa0] sm:$0xff] %vm6056_vm2, %v5905_v11  ;;  %v15982_v14 = vpop.f32.mrb[83].mxu0  ;;  %13952 = vmatmul.mubr.msk.bf16.gmra.mrb[188].mxu0 %vm4585_vm0, %v14393_v1  ;;  %14020 = vmatmul.mubr.msk.bf16.gmra.mrb[188].mxu1 %vm4585_vm0, %v14392_v6  ;;  %v6769_v18 = vmax.f32 %v6551_v5, 0.0 }
 0x21f   : > { %v5907_v20 = vpop.permute.xlu0 %5906  ;;  %7926 = vrot.lane.b32.xlu1 %v7788_v10, %s14492_s30  ;;  %v6562_v10 = vadd.f32 %v15927_v43, %v15712_v49 }
 0x220   : > { %6078 = vst.msk [vmem:[%s15350_s22 + $0xa8] sm:$0xff] %vm6056_vm2, %v5907_v20  ;;  %v7583_v20 = vadd.f32 %v15929_v44, %v15717_v52 }
 0x221   : > { %v5917_v8 = vpop.permute.xlu1 %5916  ;;  %6905 = vrot.lane.b32.xlu0 %v6767_v15, %s14494_s4  ;;  %v15994_v23 = vpop.f32.mrb[84].mxu0 }
 0x222   : > { %6083 = vst.msk [vmem:[%s15350_s22 + $0xd0] sm:$0xff] %vm6056_vm2, %v5917_v8  ;;  %v15998_v13 = vpop.f32.mrb[84].mxu1  ;;  %v16000_v24 = vpop.f32.mrb[85].mxu0  ;;  %v7793_v33 = vmax.f32 %v7583_v20, 0.0 }
 0x223   : > { %v16004_v29 = vpop.f32.mrb[85].mxu1  ;;  %v5919_v30 = vpop.permute.xlu0 %5918  ;;  %7922 = vrot.lane.b32.xlu1 %v7786_v16, %s14492_s30 }
 0x224   : > { %6084 = vst.msk [vmem:[%s15350_s22 + $0xd8] sm:$0xff] %vm6056_vm2, %v5919_v30  ;;  %v16009_v59 = vpop.f32.mrb[86].mxu0  ;;  %v16011_v31 = vpop.f32.mrb[86].mxu1 }
 0x225   : > { %v16015_v37 = vpop.f32.mrb[87].mxu1  ;;  %v5913_v21 = vpop.permute.xlu1 %5912  ;;  %6901 = vrot.lane.b32.xlu0 %v6765_v26, %s14494_s4  ;;  %v6772_v26 = vmax.f32 %v6562_v10, 0.0 }
 0x226   : > { %6081 = vst.msk [vmem:[%s15350_s22 + $0xc0] sm:$0xff] %vm6056_vm2, %v5913_v21  ;;  %v16020_v38 = vpop.f32.mrb[87].mxu0  ;;  %v7575_v21 = vadd.f32 %v15935_v50, %v15717_v52 }
 0x227   : > { %v5915_v42 = vpop.permute.xlu0 %5914  ;;  %6907 = vrot.lane.b32.xlu1 %v6768_v32, %s14494_s4 }
 0x228   : > { %6082 = vst.msk [vmem:[%s15350_s22 + $0xc8] sm:$0xff] %vm6056_vm2, %v5915_v42 }
 0x229   : > { %v5925_v46 = vpop.permute.xlu1 %5924  ;;  %7928 = vrot.lane.b32.xlu0 %v7789_v39, %s14492_s30  ;;  %v16030_v47 = vpop.f32.mrb[88].mxu0 }
 0x22a   : > { %6087 = vst.msk [vmem:[%s15350_s22 + $0xf0] sm:$0xff] %vm6056_vm2, %v5925_v46  ;;  %v16034_v48 = vpop.f32.mrb[88].mxu1  ;;  %v16036_v25 = vpop.f32.mrb[89].mxu0  ;;  %v7791_v46 = vmax.f32 %v7575_v21, 0.0 }
 0x22b   : > { %v16040_v55 = vpop.f32.mrb[89].mxu1  ;;  %v5927_v56 = vpop.permute.xlu0 %5926  ;;  %6903 = vrot.lane.b32.xlu1 %v6766_v27, %s14494_s4 }
 0x22c   : > { %6088 = vst.msk [vmem:[%s15350_s22 + $0xf8] sm:$0xff] %vm6056_vm2, %v5927_v56  ;;  %v16045_v35 = vpop.f32.mrb[90].mxu0  ;;  %v16047_v57 = vpop.f32.mrb[90].mxu1  ;;  %v7620_v17 = vadd.f32 %v16040_v55, %v15717_v52 }
 0x22d   : > { %v16051_v1 = vpop.f32.mrb[91].mxu1  ;;  %v5921_v34 = vpop.permute.xlu1 %5920  ;;  %7924 = vrot.lane.b32.xlu0 %v7787_v51, %s14492_s30  ;;  %v6575_v51 = vadd.f32 %v15954_v61, %v15712_v49 }
 0x22e   : > { %6085 = vst.msk [vmem:[%s15350_s22 + $0xe0] sm:$0xff] %vm6056_vm2, %v5921_v34  ;;  %v16056_v2 = vpop.f32.mrb[91].mxu0  ;;  %v7588_v34 = vadd.f32 %v15965_v4, %v15717_v52  ;;  %v7802_v55 = vmax.f32 %v7620_v17, 0.0 }
 0x22f   : > { %v5923_v6 = vpop.permute.xlu0 %5922  ;;  %7934 = vrot.lane.b32.xlu1 %v7792_v58, %s14492_s30 }
 0x230   : > { %6086 = vst.msk [vmem:[%s15350_s22 + $0xe8] sm:$0xff] %vm6056_vm2, %v5923_v6  ;;  %v6775_v6 = vmax.f32 %v6575_v51, 0.0  ;;  %v7794_v4 = vmax.f32 %v7588_v34, 0.0  ;;  %v7591_v51 = vadd.f32 %v15977_v0, %v15717_v52 }
 0x231   : > { %v5933_v12 = vpop.permute.xlu1 %5932  ;;  %6913 = vrot.lane.b32.xlu0 %v6771_v3, %s14494_s4  ;;  %v16066_v11 = vpop.f32.mrb[92].mxu0 }
 0x232   : > { %6091 = vst.msk [vmem:[%s15350_s22 + $0x110] sm:$0xff] %vm6056_vm2, %v5933_v12  ;;  %v16070_v15 = vpop.f32.mrb[92].mxu1  ;;  %v16072_v36 = vpop.f32.mrb[93].mxu0  ;;  %v6578_v12 = vadd.f32 %v15971_v7, %v15712_v49 }
 0x233   : > { %v16076_v16 = vpop.f32.mrb[93].mxu1  ;;  %v5935_v22 = vpop.permute.xlu0 %5934  ;;  %7930 = vrot.lane.b32.xlu1 %v7790_v40, %s14492_s30  ;;  %v6567_v40 = vadd.f32 %v15960_v63, %v15712_v49 }
 0x234   : > { %6092 = vst.msk [vmem:[%s15350_s22 + $0x118] sm:$0xff] %vm6056_vm2, %v5935_v22  ;;  %v16081_v43 = vpop.f32.mrb[94].mxu0  ;;  %v16083_v8 = vpop.f32.mrb[94].mxu1 }
 0x235   : > { %v16087_v30 = vpop.f32.mrb[95].mxu1  ;;  %v5929_v44 = vpop.permute.xlu1 %5928  ;;  %6909 = vrot.lane.b32.xlu0 %v6769_v18, %s14494_s4 }
 0x236   : > { %6089 = vst.msk [vmem:[%s15350_s22 + $0x100] sm:$0xff] %vm6056_vm2, %v5929_v44  ;;  %v16092_v32 = vpop.f32.mrb[95].mxu0 }
 0x237   : > { %v5931_v39 = vpop.permute.xlu0 %5930  ;;  %6915 = vrot.lane.b32.xlu1 %v6772_v26, %s14494_s4  ;;  %v6773_v26 = vmax.f32 %v6567_v40, 0.0  ;;  %v7795_v40 = vmax.f32 %v7591_v51, 0.0  ;;  %v6594_v51 = vadd.f32 %v16009_v59, %v15712_v49 }
 0x238   : > { %6090 = vst.msk [vmem:[%s15350_s22 + $0x108] sm:$0xff] %vm6056_vm2, %v5931_v39  ;;  %v6776_v39 = vmax.f32 %v6578_v12, 0.0 }
 0x239   : > { %v5941_v42 = vpop.permute.xlu1 %5940  ;;  %7936 = vrot.lane.b32.xlu0 %v7793_v33, %s14492_s30  ;;  %v16102_v27 = vpop.f32.mrb[96].mxu0 }
 0x23a   : > { %6095 = vst.msk [vmem:[%s15350_s22 + $0x130] sm:$0xff] %vm6056_vm2, %v5941_v42  ;;  %v16106_v45 = vpop.f32.mrb[96].mxu1  ;;  %v16108_v50 = vpop.f32.mrb[97].mxu0 }
 0x23b   : > { %v16112_v54 = vpop.f32.mrb[97].mxu1  ;;  %v5943_v56 = vpop.permute.xlu0 %5942  ;;  %6911 = vrot.lane.b32.xlu1 %v6770_v53, %s14494_s4  ;;  %v6570_v53 = vadd.f32 %v15982_v14, %v15712_v49 }
 0x23c   : > { %6096 = vst.msk [vmem:[%s15350_s22 + $0x138] sm:$0xff] %vm6056_vm2, %v5943_v56  ;;  %v16117_v62 = vpop.f32.mrb[98].mxu0  ;;  %v16119_v58 = vpop.f32.mrb[98].mxu1 }
 0x23d   : > { %v16123_v3 = vpop.f32.mrb[99].mxu1  ;;  %v5937_v61 = vpop.permute.xlu1 %5936  ;;  %7932 = vrot.lane.b32.xlu0 %v7791_v46, %s14492_s30  ;;  %v7797_v46 = vmax.f32 %v7599_v28, 0.0  ;;  %v6774_v14 = vmax.f32 %v6570_v53, 0.0  ;;  %v7604_v28 = vadd.f32 %v16004_v29, %v15717_v52 }
 0x23e   : > { %6093 = vst.msk [vmem:[%s15350_s22 + $0x120] sm:$0xff] %vm6056_vm2, %v5937_v61  ;;  %v16128_v5 = vpop.f32.mrb[99].mxu0 }
 0x23f   : > { %v5939_v10 = vpop.permute.xlu0 %5938  ;;  %7942 = vrot.lane.b32.xlu1 %v7796_v60, %s14492_s30  ;;  %v7612_v60 = vadd.f32 %v15998_v13, %v15717_v52  ;;  %v7798_v29 = vmax.f32 %v7604_v28, 0.0  ;;  %v6780_v28 = vmax.f32 %v6594_v51, 0.0  ;;  %v7628_v51 = vadd.f32 %v16034_v48, %v15717_v52 }
 0x240   : > { %6094 = vst.msk [vmem:[%s15350_s22 + $0x128] sm:$0xff] %vm6056_vm2, %v5939_v10  ;;  %v6591_v10 = vadd.f32 %v15994_v23, %v15712_v49 }
 0x241   : > { %v5949_v18 = vpop.permute.xlu1 %5948  ;;  %6921 = vrot.lane.b32.xlu0 %v6775_v6, %s14494_s4  ;;  %v16138_v20 = vpop.f32.mrb[100].mxu0 }
 0x242   : > { %6099 = vst.msk [vmem:[%s15350_s22 + $0x150] sm:$0xff] %vm6056_vm2, %v5949_v18  ;;  %v16142_v22 = vpop.f32.mrb[100].mxu1  ;;  %v16144_v63 = vpop.f32.mrb[101].mxu0  ;;  %v6779_v53 = vmax.f32 %v6591_v10, 0.0 }
 0x243   : > { %v16148_v44 = vpop.f32.mrb[101].mxu1  ;;  %v5951_v33 = vpop.permute.xlu0 %5950  ;;  %7938 = vrot.lane.b32.xlu1 %v7794_v4, %s14492_s30 }
 0x244   : > { %6100 = vst.msk [vmem:[%s15350_s22 + $0x158] sm:$0xff] %vm6056_vm2, %v5951_v33  ;;  %v16153_v7 = vpop.f32.mrb[102].mxu0  ;;  %v16155_v21 = vpop.f32.mrb[102].mxu1 }
 0x245   : > { %v16159_v41 = vpop.f32.mrb[103].mxu1  ;;  %v5945_v9 = vpop.permute.xlu1 %5944  ;;  %6917 = vrot.lane.b32.xlu0 %v6773_v26, %s14494_s4  ;;  %v7800_v26 = vmax.f32 %v7612_v60, 0.0 }
 0x246   : > { %6097 = vst.msk [vmem:[%s15350_s22 + $0x140] sm:$0xff] %vm6056_vm2, %v5945_v9  ;;  %v16164_v42 = vpop.f32.mrb[103].mxu0  ;;  %v6583_v9 = vadd.f32 %v16000_v24, %v15712_v49 }
 0x247   : > { %v5947_v56 = vpop.permute.xlu0 %5946  ;;  %6923 = vrot.lane.b32.xlu1 %v6776_v39, %s14494_s4 }
 0x248   : > { %6098 = vst.msk [vmem:[%s15350_s22 + $0x148] sm:$0xff] %vm6056_vm2, %v5947_v56 }
 0x249   : > { %v5957_v34 = vpop.permute.xlu1 %5956  ;;  %7944 = vrot.lane.b32.xlu0 %v7797_v46, %s14492_s30  ;;  %v16174_v61 = vpop.f32.mrb[104].mxu0 }
 0x24a   : > { %6103 = vst.msk [vmem:[%s15350_s22 + $0x170] sm:$0xff] %vm6056_vm2, %v5957_v34  ;;  %v16178_v6 = vpop.f32.mrb[104].mxu1  ;;  %v16180_v0 = vpop.f32.mrb[105].mxu0  ;;  %v6777_v34 = vmax.f32 %v6583_v9, 0.0 }
 0x24b   : > { %v16184_v4 = vpop.f32.mrb[105].mxu1  ;;  %v5959_v12 = vpop.permute.xlu0 %5958  ;;  %6919 = vrot.lane.b32.xlu1 %v6774_v14, %s14494_s4 }
 0x24c   : > { %6104 = vst.msk [vmem:[%s15350_s22 + $0x178] sm:$0xff] %vm6056_vm2, %v5959_v12  ;;  %v16189_v13 = vpop.f32.mrb[106].mxu0  ;;  %v16191_v18 = vpop.f32.mrb[106].mxu1 }
 0x24d   : > { %v16195_v33 = vpop.f32.mrb[107].mxu1  ;;  %v5953_v23 = vpop.permute.xlu1 %5952  ;;  %7940 = vrot.lane.b32.xlu0 %v7795_v40, %s14492_s30  ;;  %v7615_v40 = vadd.f32 %v16011_v31, %v15717_v52 }
 0x24e   : > { %6101 = vst.msk [vmem:[%s15350_s22 + $0x160] sm:$0xff] %vm6056_vm2, %v5953_v23  ;;  %v16200_v39 = vpop.f32.mrb[107].mxu0  ;;  %v6586_v23 = vadd.f32 %v16020_v38, %v15712_v49 }
 0x24f   : > { %v5955_v46 = vpop.permute.xlu0 %5954  ;;  %7950 = vrot.lane.b32.xlu1 %v7800_v26, %s14492_s30 }
 0x250   : > { %6102 = vst.msk [vmem:[%s15350_s22 + $0x168] sm:$0xff] %vm6056_vm2, %v5955_v46  ;;  %v7801_v46 = vmax.f32 %v7615_v40, 0.0  ;;  %v6778_v38 = vmax.f32 %v6586_v23, 0.0 }
 0x251   : > { %v5965_v56 = vpop.permute.xlu1 %5964  ;;  %6929 = vrot.lane.b32.xlu0 %v6779_v53, %s14494_s4  ;;  %v16210_v14 = vpop.f32.mrb[108].mxu0 }
 0x252   : > { %6107 = vst.msk [vmem:[%s15350_s22 + $0x190] sm:$0xff] %vm6056_vm2, %v5965_v56  ;;  %v16214_v60 = vpop.f32.mrb[108].mxu1  ;;  %v16216_v24 = vpop.f32.mrb[109].mxu0 }
 0x253   : > { %v16220_v10 = vpop.f32.mrb[109].mxu1  ;;  %v5967_v12 = vpop.permute.xlu0 %5966  ;;  %7946 = vrot.lane.b32.xlu1 %v7798_v29, %s14492_s30  ;;  %v7607_v29 = vadd.f32 %v16015_v37, %v15717_v52 }
 0x254   : > { %6108 = vst.msk [vmem:[%s15350_s22 + $0x198] sm:$0xff] %vm6056_vm2, %v5967_v12  ;;  %v16225_v59 = vpop.f32.mrb[110].mxu0  ;;  %v16227_v26 = vpop.f32.mrb[110].mxu1 }
 0x255   : > { %v16231_v53 = vpop.f32.mrb[111].mxu1  ;;  %v5961_v31 = vpop.permute.xlu1 %5960  ;;  %6925 = vrot.lane.b32.xlu0 %v6777_v34, %s14494_s4 }
 0x256   : > { %6105 = vst.msk [vmem:[%s15350_s22 + $0x180] sm:$0xff] %vm6056_vm2, %v5961_v31  ;;  %v16236_v9 = vpop.f32.mrb[111].mxu0  ;;  %v7799_v31 = vmax.f32 %v7607_v29, 0.0 }
 0x257   : > { %v5963_v56 = vpop.permute.xlu0 %5962  ;;  %6931 = vrot.lane.b32.xlu1 %v6780_v28, %s14494_s4  ;;  %v6607_v28 = vadd.f32 %v16030_v47, %v15712_v49 }
 0x258   : > { %6106 = vst.msk [vmem:[%s15350_s22 + $0x188] sm:$0xff] %vm6056_vm2, %v5963_v56 }
 0x259   : > { %v5973_v12 = vpop.permute.xlu1 %5972  ;;  %7952 = vrot.lane.b32.xlu0 %v7801_v46, %s14492_s30  ;;  %v16246_v34 = vpop.f32.mrb[112].mxu0 }
 0x25a   : > { %6111 = vst.msk [vmem:[%s15350_s22 + $0x1b0] sm:$0xff] %vm6056_vm2, %v5973_v12  ;;  %v16250_v40 = vpop.f32.mrb[112].mxu1  ;;  %v16252_v37 = vpop.f32.mrb[113].mxu0  ;;  %v7804_v12 = vmax.f32 %v7628_v51, 0.0  ;;  %v6610_v51 = vadd.f32 %v16045_v35, %v15712_v49 }
 0x25b   : > { %v16256_v23 = vpop.f32.mrb[113].mxu1  ;;  %v5975_v56 = vpop.permute.xlu0 %5974  ;;  %6927 = vrot.lane.b32.xlu1 %v6778_v38, %s14494_s4  ;;  %v6783_v38 = vmax.f32 %v6607_v28, 0.0 }
 0x25c   : > { %6112 = vst.msk [vmem:[%s15350_s22 + $0x1b8] sm:$0xff] %vm6056_vm2, %v5975_v56  ;;  %v16261_v48 = vpop.f32.mrb[114].mxu0  ;;  %v16263_v46 = vpop.f32.mrb[114].mxu1  ;;  %v6599_v56 = vadd.f32 %v16036_v25, %v15712_v49 }
 0x25d   : > { %18792 = vst [vmem:[#allocation5_spill] sm:$0xff] %v16261_v48  ;;  %v16267_v29 = vpop.f32.mrb[115].mxu1  ;;  %v5969_v47 = vpop.permute.xlu1 %5968  ;;  %7948 = vrot.lane.b32.xlu0 %v7799_v31, %s14492_s30 }
 0x25e   : > { %18793 = vst [vmem:[#allocation6_spill] sm:$0xff] %v16267_v29  ;;  %6109 = vst.msk [vmem:[%s15350_s22 + $0x1a0] sm:$0xff] %vm6056_vm2, %v5969_v47  ;;  %v16272_v19 = vpop.f32.mrb[115].mxu0  ;;  %v6781_v47 = vmax.f32 %v6599_v56, 0.0 }
 0x25f   : > { %v5971_v48 = vpop.permute.xlu0 %5970  ;;  %7958 = vrot.lane.b32.xlu1 %v7804_v12, %s14492_s30 }
 0x260   : > { %6110 = vst.msk [vmem:[%s15350_s22 + $0x1a8] sm:$0xff] %vm6056_vm2, %v5971_v48  ;;  %v7631_v48 = vadd.f32 %v16047_v57, %v15717_v52 }
 0x261   : > { %v5981_v29 = vpop.permute.xlu1 %5980  ;;  %6937 = vrot.lane.b32.xlu0 %v6783_v38, %s14494_s4  ;;  %v16282_v31 = vpop.f32.mrb[116].mxu0  ;;  %v6784_v38 = vmax.f32 %v6610_v51, 0.0  ;;  %v7644_v51 = vadd.f32 %v16070_v15, %v15717_v52 }
 0x262   : > { %6115 = vst.msk [vmem:[%s15350_s22 + $0x1d0] sm:$0xff] %vm6056_vm2, %v5981_v29  ;;  %v16286_v28 = vpop.f32.mrb[116].mxu1  ;;  %v16288_v25 = vpop.f32.mrb[117].mxu0 }
 0x263   : > { %18794 = vst [vmem:[#allocation7_spill] sm:$0xff] %v16288_v25  ;;  %v16292_v17 = vpop.f32.mrb[117].mxu1  ;;  %v5983_v12 = vpop.permute.xlu0 %5982  ;;  %7954 = vrot.lane.b32.xlu1 %v7802_v55, %s14492_s30  ;;  %v6602_v25 = vadd.f32 %v16056_v2, %v15712_v49  ;;  %v7805_v55 = vmax.f32 %v7631_v48, 0.0 }
 0x264   : > { %18795 = vst [vmem:[#allocation8_spill] sm:$0xff] %v16292_v17  ;;  %6116 = vst.msk [vmem:[%s15350_s22 + $0x1d8] sm:$0xff] %vm6056_vm2, %v5983_v12  ;;  %v16297_v35 = vpop.f32.mrb[118].mxu0  ;;  %v16299_v29 = vpop.f32.mrb[118].mxu1  ;;  %v7623_v12 = vadd.f32 %v16051_v1, %v15717_v52 }
 0x265   : > { %18796 = vst [vmem:[#allocation9_spill] sm:$0xff] %v16297_v35  ;;  %v16303_v56 = vpop.f32.mrb[119].mxu1  ;;  %v5977_v57 = vpop.permute.xlu1 %5976  ;;  %6933 = vrot.lane.b32.xlu0 %v6781_v47, %s14494_s4  ;;  %v6782_v2 = vmax.f32 %v6602_v25, 0.0 }
 0x266   : > { %18797 = vst [vmem:[#allocation10_spill] sm:$0xff] %v16303_v56  ;;  %6113 = vst.msk [vmem:[%s15350_s22 + $0x1c0] sm:$0xff] %vm6056_vm2, %v5977_v57  ;;  %v16308_v17 = vpop.f32.mrb[119].mxu0  ;;  %v7803_v57 = vmax.f32 %v7623_v12, 0.0 }
 0x267   : > { %v5979_v35 = vpop.permute.xlu0 %5978  ;;  %6939 = vrot.lane.b32.xlu1 %v6784_v38, %s14494_s4 }
 0x268   : > { %6114 = vst.msk [vmem:[%s15350_s22 + $0x1c8] sm:$0xff] %vm6056_vm2, %v5979_v35  ;;  %v6623_v35 = vadd.f32 %v16066_v11, %v15712_v49 }
 0x269   : > { %v5989_v56 = vpop.permute.xlu1 %5988  ;;  %7960 = vrot.lane.b32.xlu0 %v7805_v55, %s14492_s30  ;;  %v16318_v47 = vpop.f32.mrb[120].mxu0  ;;  %v7808_v55 = vmax.f32 %v7644_v51, 0.0  ;;  %v6626_v51 = vadd.f32 %v16081_v43, %v15712_v49 }
 0x26a   : > { %18798 = vst [vmem:[#allocation11_spill] sm:$0xff] %v16318_v47  ;;  %6119 = vst.msk [vmem:[%s15350_s22 + $0x1f0] sm:$0xff] %vm6056_vm2, %v5989_v56  ;;  %v16322_v48 = vpop.f32.mrb[120].mxu1  ;;  %v16324_v1 = vpop.f32.mrb[121].mxu0 }
 0x26b   : > { %18799 = vst [vmem:[#allocation12_spill] sm:$0xff] %v16324_v1  ;;  %v16328_v25 = vpop.f32.mrb[121].mxu1  ;;  %v5991_v38 = vpop.permute.xlu0 %5990  ;;  %6935 = vrot.lane.b32.xlu1 %v6782_v2, %s14494_s4  ;;  %v7636_v1 = vadd.f32 %v16076_v16, %v15717_v52  ;;  %v6787_v2 = vmax.f32 %v6623_v35, 0.0 }
 0x26c   : > { %6120 = vst.msk [vmem:[%s15350_s22 + $0x1f8] sm:$0xff] %vm6056_vm2, %v5991_v38  ;;  %v16333_v15 = vpop.f32.mrb[122].mxu0  ;;  %v16335_v56 = vpop.f32.mrb[122].mxu1  ;;  %v6615_v38 = vadd.f32 %v16072_v36, %v15712_v49 }
 0x26d   : > { %18800 = vst [vmem:[#allocation13_spill] sm:$0xff] %v16333_v15  ;;  %v16339_v12 = vpop.f32.mrb[123].mxu1  ;;  %v5985_v47 = vpop.permute.xlu1 %5984  ;;  %7956 = vrot.lane.b32.xlu0 %v7803_v57, %s14492_s30  ;;  %v7806_v16 = vmax.f32 %v7636_v1, 0.0 }
 0x26e   : > { %18801 = vst [vmem:[#allocation14_spill] sm:$0xff] %v16339_v12  ;;  %6117 = vst.msk [vmem:[%s15350_s22 + $0x1e0] sm:$0xff] %vm6056_vm2, %v5985_v47  ;;  %v16344_v11 = vpop.f32.mrb[123].mxu0  ;;  %v6785_v35 = vmax.f32 %v6615_v38, 0.0 }
 0x26f   : > { %v5987_v15 = vpop.permute.xlu0 %5986  ;;  %7966 = vrot.lane.b32.xlu1 %v7808_v55, %s14492_s30 }
 0x270   : > { %6118 = vst.msk [vmem:[%s15350_s22 + $0x1e8] sm:$0xff] %vm6056_vm2, %v5987_v15  ;;  %v7647_v15 = vadd.f32 %v16083_v8, %v15717_v52 }
 0x271   : > { %v7911_v12 = vpop.permute.xlu1 %7910  ;;  %6945 = vrot.lane.b32.xlu0 %v6787_v2, %s14494_s4  ;;  %v16354_v47 = vpop.f32.mrb[124].mxu0 }
 0x272   : > { %18802 = vst [vmem:[#allocation15_spill] sm:$0xff] %v16354_v47  ;;  %v16356_v57 = vpop.f32.mrb[124].mxu1  ;;  %v16358_v36 = vpop.f32.mrb[125].mxu0  ;;  %v6788_v47 = vmax.f32 %v6626_v51, 0.0 }
 0x273   : > { %18803 = vst [vmem:[#allocation16_spill] sm:$0xff] %v16358_v36  ;;  %v16362_v1 = vpop.f32.mrb[125].mxu1  ;;  %v6890_v55 = vpop.permute.xlu0 %6889  ;;  %7962 = vrot.lane.b32.xlu1 %v7806_v16, %s14492_s30  ;;  %v6618_v36 = vadd.f32 %v16092_v32, %v15712_v49 }
 0x274   : > { %7080 = vst.msk [vmem:[%s15350_s22 + $0x10] sm:$0xff] %vm7077_vm3, %v6890_v55  ;;  %v16367_v43 = vpop.f32.mrb[126].mxu0  ;;  %v16369_v2 = vpop.f32.mrb[126].mxu1  ;;  %v7809_v55 = vmax.f32 %v7647_v15, 0.0 }
 0x275   : > { %18804 = vst [vmem:[#allocation17_spill] sm:$0xff] %v16367_v43  ;;  %18805 = vst [vmem:[#allocation18_spill] sm:$0xff] %v16369_v2  ;;  %v16373_v38 = vpop.f32.mrb[127].mxu1  ;;  %v7907_v8 = vpop.permute.xlu1 %7906  ;;  %6941 = vrot.lane.b32.xlu0 %v6785_v35, %s14494_s4  ;;  %v7639_v43 = vadd.f32 %v16087_v30, %v15717_v52  ;;  %v6786_v32 = vmax.f32 %v6618_v36, 0.0  ;;  %v6639_v36 = vadd.f32 %v16102_v27, %v15712_v49 }
 0x276   : > { %18806 = vst [vmem:[#allocation19_spill] sm:$0xff] %v16373_v38  ;;  %8101 = vst.msk [vmem:[%s15350_s22 + $0x10] sm:$0xff] %vm8098_vm4, %v7911_v12  ;;  %v16378_v16 = vpop.f32.mrb[127].mxu0  ;;  %v7660_v38 = vadd.f32 %v16106_v45, %v15717_v52 }
 0x277   : > { %6947 = vrot.lane.b32.xlu1 %v6788_v47, %s14494_s4  ;;  %v6886_v51 = vpop.permute.xlu0 %6885  ;;  %v7807_v35 = vmax.f32 %v7639_v43, 0.0  ;;  %v7652_v43 = vadd.f32 %v16112_v54, %v15717_v52 }
 0x278   : > { %7078 = vst.msk [vmem:[%s15350_s22] sm:$0xff] %vm7077_vm3, %v6886_v51 }
 0x279   : > { %v6892_v2 = vpop.permute.xlu1 %6891  ;;  %7968 = vrot.lane.b32.xlu0 %v7809_v55, %s14492_s30  ;;  %v16388_v12 = vpop.f32.mrb[128].mxu0  ;;  %8099 = vst.msk [vmem:[%s15350_s22] sm:$0xff] %vm8098_vm4, %v7907_v8  ;;  %v7812_v55 = vmax.f32 %v7660_v38, 0.0  ;;  %v7810_v54 = vmax.f32 %v7652_v43, 0.0  ;;  %v6642_v38 = vadd.f32 %v16117_v62, %v15712_v49 }
 0x27a   : > { %7081 = vst.msk [vmem:[%s15350_s22 + $0x18] sm:$0xff] %vm7077_vm3, %v6892_v2  ;;  %v16394_v30 = vpop.f32.mrb[128].mxu1  ;;  %v16396_v47 = vpop.f32.mrb[129].mxu0 }
 0x27b   : > { %18807 = vst [vmem:[#allocation20_spill] sm:$0xff] %v16396_v47  ;;  %v16400_v15 = vpop.f32.mrb[129].mxu1  ;;  %6943 = vrot.lane.b32.xlu1 %v6786_v32, %s14494_s4  ;;  %v7913_v45 = vpop.permute.xlu0 %7912  ;;  %v6791_v32 = vmax.f32 %v6639_v36, 0.0 }
 0x27c   : > { %18808 = vst [vmem:[#allocation21_spill] sm:$0xff] %v16400_v15  ;;  %8102 = vst.msk [vmem:[%s15350_s22 + $0x18] sm:$0xff] %vm8098_vm4, %v7913_v45  ;;  %v16405_v8 = vpop.f32.mrb[130].mxu0  ;;  %v16407_v2 = vpop.f32.mrb[130].mxu1  ;;  %v6631_v15 = vadd.f32 %v16108_v50, %v15712_v49 }
 0x27d   : > { %v16411_v51 = vpop.f32.mrb[131].mxu0  ;;  %v16413_v47 = vpop.f32.mrb[131].mxu1  ;;  %7964 = vrot.lane.b32.xlu0 %v7807_v35, %s14492_s30 }
 0x27e   : > { %18809 = vst [vmem:[#allocation22_spill] sm:$0xff] %v16413_v47  ;;  %v6888_v27 = vpop.permute.xlu1 %6887  ;;  %v6789_v50 = vmax.f32 %v6631_v15, 0.0 }
 0x27f   : > { %7079 = vst.msk [vmem:[%s15350_s22 + $0x8] sm:$0xff] %vm7077_vm3, %v6888_v27  ;;  %7974 = vrot.lane.b32.xlu1 %v7812_v55, %s14492_s30  ;;  %v7909_v45 = vpop.permute.xlu0 %7908  ;;  %v7663_v55 = vadd.f32 %v16119_v58, %v15717_v52 }
 0x280   : > { %8100 = vst.msk [vmem:[%s15350_s22 + $0x8] sm:$0xff] %vm8098_vm4, %v7909_v45 }
 0x281   : > { %6953 = vrot.lane.b32.xlu0 %v6791_v32, %s14494_s4  ;;  %v16426_v35 = vpop.f32.mrb[132].mxu0  ;;  %v16428_v47 = vpop.f32.mrb[132].mxu1  ;;  %v6792_v32 = vmax.f32 %v6642_v38, 0.0  ;;  %v7655_v38 = vadd.f32 %v16123_v3, %v15717_v52 }
 0x282   : > { %18810 = vst [vmem:[#allocation23_spill] sm:$0xff] %v16426_v35  ;;  %v7919_v36 = vpop.permute.xlu1 %7918  ;;  %v16432_v27 = vpop.f32.mrb[133].mxu0  ;;  %v6634_v35 = vadd.f32 %v16128_v5, %v15712_v49 }
 0x283   : > { %18811 = vst [vmem:[#allocation24_spill] sm:$0xff] %v16432_v27  ;;  %v16434_v45 = vpop.f32.mrb[133].mxu1  ;;  %7970 = vrot.lane.b32.xlu1 %v7810_v54, %s14492_s30  ;;  %v6898_v43 = vpop.permute.xlu0 %6897  ;;  %v7813_v27 = vmax.f32 %v7663_v55, 0.0  ;;  %v7811_v3 = vmax.f32 %v7655_v38, 0.0  ;;  %v7668_v38 = vadd.f32 %v16148_v44, %v15717_v52 }
 0x284   : > { %v16437_v62 = vpop.f32.mrb[134].mxu0  ;;  %7084 = vst.msk [vmem:[%s15350_s22 + $0x30] sm:$0xff] %vm7077_vm3, %v6898_v43  ;;  %v16443_v15 = vpop.f32.mrb[134].mxu1  ;;  %v6790_v43 = vmax.f32 %v6634_v35, 0.0 }
 0x285   : > { %18812 = vst [vmem:[#allocation25_spill] sm:$0xff] %v16437_v62  ;;  %18813 = vst [vmem:[#allocation26_spill] sm:$0xff] %v16443_v15  ;;  %v16445_v58 = vpop.f32.mrb[135].mxu0  ;;  %6949 = vrot.lane.b32.xlu0 %v6789_v50, %s14494_s4  ;;  %v16450_v54 = vpop.f32.mrb[135].mxu1  ;;  %v7676_v15 = vadd.f32 %v16142_v22, %v15717_v52 }
 0x286   : > { %8105 = vst.msk [vmem:[%s15350_s22 + $0x30] sm:$0xff] %vm8098_vm4, %v7919_v36  ;;  %v7915_v62 = vpop.permute.xlu1 %7914 }
 0x287   : > { %6955 = vrot.lane.b32.xlu1 %v6792_v32, %s14494_s4  ;;  %v6894_v5 = vpop.permute.xlu0 %6893  ;;  %v6655_v32 = vadd.f32 %v16138_v20, %v15712_v49 }
 0x288   : > { %7082 = vst.msk [vmem:[%s15350_s22 + $0x20] sm:$0xff] %vm7077_vm3, %v6894_v5 }
 0x289   : > { %7976 = vrot.lane.b32.xlu0 %v7813_v27, %s14492_s30  ;;  %v16460_v36 = vpop.f32.mrb[136].mxu0  ;;  %8103 = vst.msk [vmem:[%s15350_s22 + $0x20] sm:$0xff] %vm8098_vm4, %v7915_v62  ;;  %v16464_v55 = vpop.f32.mrb[136].mxu1  ;;  %v7816_v62 = vmax.f32 %v7676_v15, 0.0  ;;  %v7814_v15 = vmax.f32 %v7668_v38, 0.0 }
 0x28a   : > { %v6900_v50 = vpop.permute.xlu1 %6899  ;;  %v16470_v22 = vpop.f32.mrb[137].mxu0 }
 0x28b   : > { %7085 = vst.msk [vmem:[%s15350_s22 + $0x38] sm:$0xff] %vm7077_vm3, %v6900_v50  ;;  %18814 = vst [vmem:[#allocation27_spill] sm:$0xff] %v16470_v22  ;;  %v16472_v35 = vpop.f32.mrb[137].mxu1  ;;  %6951 = vrot.lane.b32.xlu1 %v6790_v43, %s14494_s4  ;;  %v7921_v27 = vpop.permute.xlu0 %7920  ;;  %v6795_v43 = vmax.f32 %v6655_v32, 0.0 }
 0x28c   : > { %18815 = vst [vmem:[#allocation28_spill] sm:$0xff] %v16472_v35  ;;  %v16475_v5 = vpop.f32.mrb[138].mxu0  ;;  %8106 = vst.msk [vmem:[%s15350_s22 + $0x38] sm:$0xff] %vm8098_vm4, %v7921_v27  ;;  %v16481_v20 = vpop.f32.mrb[138].mxu1  ;;  %v6658_v27 = vadd.f32 %v16153_v7, %v15712_v49 }
 0x28d   : > { %18816 = vst [vmem:[#allocation29_spill] sm:$0xff] %v16475_v5  ;;  %v16483_v50 = vpop.f32.mrb[139].mxu0  ;;  %7972 = vrot.lane.b32.xlu0 %v7811_v3, %s14492_s30  ;;  %v16486_v22 = vpop.f32.mrb[139].mxu1  ;;  %v6647_v5 = vadd.f32 %v16144_v63, %v15712_v49 }
 0x28e   : > { %18817 = vst [vmem:[#allocation30_spill] sm:$0xff] %v16486_v22  ;;  %v6896_v35 = vpop.permute.xlu1 %6895 }
 0x28f   : > { %7083 = vst.msk [vmem:[%s15350_s22 + $0x28] sm:$0xff] %vm7077_vm3, %v6896_v35  ;;  %7982 = vrot.lane.b32.xlu1 %v7816_v62, %s14492_s30  ;;  %v7917_v44 = vpop.permute.xlu0 %7916  ;;  %v6793_v63 = vmax.f32 %v6647_v5, 0.0  ;;  %v7679_v35 = vadd.f32 %v16155_v21, %v15717_v52 }
 0x290   : > { %8104 = vst.msk [vmem:[%s15350_s22 + $0x28] sm:$0xff] %vm8098_vm4, %v7917_v44 }
 0x291   : > { %6961 = vrot.lane.b32.xlu0 %v6795_v43, %s14494_s4  ;;  %v16498_v3 = vpop.f32.mrb[140].mxu0  ;;  %v16500_v22 = vpop.f32.mrb[140].mxu1  ;;  %v6796_v43 = vmax.f32 %v6658_v27, 0.0  ;;  %v7671_v27 = vadd.f32 %v16159_v41, %v15717_v52  ;;  %v14394_v41 = vld [vmem:[%s18785_s1 + $0x60] sm:$0xff]  }
 0x292   : > { %18818 = vst [vmem:[#allocation31_spill] sm:$0xff] %v16498_v3  ;;  %v7927_v32 = vpop.permute.xlu1 %7926  ;;  %v16504_v62 = vpop.f32.mrb[141].mxu0  ;;  %v6650_v3 = vadd.f32 %v16164_v42, %v15712_v49  ;;  %14023 = vmatprep.subr.bf16.mxu0 %v14394_v41 }
 0x293   : > { %18819 = vst [vmem:[#allocation32_spill] sm:$0xff] %v16504_v62  ;;  %v16506_v38 = vpop.f32.mrb[141].mxu1  ;;  %7978 = vrot.lane.b32.xlu1 %v7814_v15, %s14492_s30  ;;  %v6906_v7 = vpop.permute.xlu0 %6905  ;;  %14024 = vmatpush3.bf16.msra.mxu0 %v14394_v41 }
 0x294   : > { %v16509_v44 = vpop.f32.mrb[142].mxu0  ;;  %7088 = vst.msk [vmem:[%s15350_s22 + $0x50] sm:$0xff] %vm7077_vm3, %v6906_v7  ;;  %v16515_v5 = vpop.f32.mrb[142].mxu1  ;;  %v6794_v7 = vmax.f32 %v6650_v3, 0.0  ;;  %v7815_v3 = vmax.f32 %v7671_v27, 0.0  ;;  %v7684_v27 = vadd.f32 %v16184_v4, %v15717_v52 }
 0x295   : > { %18820 = vst [vmem:[#allocation33_spill] sm:$0xff] %v16509_v44  ;;  %18821 = vst [vmem:[#allocation34_spill] sm:$0xff] %v16515_v5  ;;  %v16517_v21 = vpop.f32.mrb[143].mxu0  ;;  %6957 = vrot.lane.b32.xlu0 %v6793_v63, %s14494_s4  ;;  %v16522_v15 = vpop.f32.mrb[143].mxu1  ;;  %v7817_v44 = vmax.f32 %v7679_v35, 0.0  ;;  %v7692_v5 = vadd.f32 %v16178_v6, %v15717_v52  ;;  %v6671_v6 = vadd.f32 %v16174_v61, %v15712_v49 }
 0x296   : > { %8109 = vst.msk [vmem:[%s15350_s22 + $0x50] sm:$0xff] %vm8098_vm4, %v7927_v32  ;;  %v7923_v62 = vpop.permute.xlu1 %7922  ;;  %v7818_v41 = vmax.f32 %v7684_v27, 0.0  ;;  %v7695_v27 = vadd.f32 %v16191_v18, %v15717_v52 }
 0x297   : > { %6963 = vrot.lane.b32.xlu1 %v6796_v43, %s14494_s4  ;;  %v6902_v42 = vpop.permute.xlu0 %6901  ;;  %v6799_v4 = vmax.f32 %v6671_v6, 0.0  ;;  %v14396_v6 = vld [vmem:[%s15080_s10 + $0x600] sm:$0xff]  }
 0x298   : > { %7086 = vst.msk [vmem:[%s15350_s22 + $0x40] sm:$0xff] %vm7077_vm3, %v6902_v42  ;;  %14027 = vmatprep.mubr.msk.bf16.mxu0 %vm4585_vm0, %v14396_v6 }
 0x299   : > { %7984 = vrot.lane.b32.xlu0 %v7817_v44, %s14492_s30  ;;  %v16532_v32 = vpop.f32.mrb[144].mxu0  ;;  %8107 = vst.msk [vmem:[%s15350_s22 + $0x40] sm:$0xff] %vm8098_vm4, %v7923_v62  ;;  %v16536_v35 = vpop.f32.mrb[144].mxu1 }
 0x29a   : > { %18822 = vst [vmem:[#allocation35_spill] sm:$0xff] %v16532_v32  ;;  %v6908_v63 = vpop.permute.xlu1 %6907  ;;  %v16545_v43 = vpop.f32.mrb[145].mxu0  ;;  %v7820_v32 = vmax.f32 %v7692_v5, 0.0  ;;  %v14395_v5 = vld [vmem:[%s18785_s1 + $0x68] sm:$0xff]  }
 0x29b   : > { %7089 = vst.msk [vmem:[%s15350_s22 + $0x58] sm:$0xff] %vm7077_vm3, %v6908_v63  ;;  %18823 = vst [vmem:[#allocation36_spill] sm:$0xff] %v16545_v43  ;;  %v16547_v44 = vpop.f32.mrb[145].mxu1  ;;  %6959 = vrot.lane.b32.xlu1 %v6794_v7, %s14494_s4  ;;  %v7929_v62 = vpop.permute.xlu0 %7928  ;;  %14025 = vmatprep.subr.bf16.mxu0 %v14395_v5 }
 0x29c   : > { %v16550_v42 = vpop.f32.mrb[146].mxu0  ;;  %8110 = vst.msk [vmem:[%s15350_s22 + $0x58] sm:$0xff] %vm8098_vm4, %v7929_v62  ;;  %v16556_v61 = vpop.f32.mrb[146].mxu1  ;;  %v6663_v62 = vadd.f32 %v16180_v0, %v15712_v49  ;;  %14026 = vmatpush3.bf16.msra.mxu0 %v14395_v5 }
 0x29d   : > { %18824 = vst [vmem:[#allocation37_spill] sm:$0xff] %v16550_v42  ;;  %18825 = vst [vmem:[#allocation38_spill] sm:$0xff] %v16556_v61  ;;  %v16558_v63 = vpop.f32.mrb[147].mxu0  ;;  %7980 = vrot.lane.b32.xlu0 %v7815_v3, %s14492_s30  ;;  %v16561_v7 = vpop.f32.mrb[147].mxu1  ;;  %v6674_v3 = vadd.f32 %v16189_v13, %v15712_v49 }
 0x29e   : > { %18826 = vst [vmem:[#allocation39_spill] sm:$0xff] %v16558_v63  ;;  %18827 = vst [vmem:[#allocation40_spill] sm:$0xff] %v16561_v7  ;;  %v6904_v43 = vpop.permute.xlu1 %6903 }
 0x29f   : > { %7087 = vst.msk [vmem:[%s15350_s22 + $0x48] sm:$0xff] %vm7077_vm3, %v6904_v43  ;;  %7990 = vrot.lane.b32.xlu1 %v7820_v32, %s14492_s30  ;;  %v7925_v63 = vpop.permute.xlu0 %7924  ;;  %v14397_v43 = vld [vmem:[%s15080_s10 + $0x608] sm:$0xff]   ;;  %v6797_v32 = vmax.f32 %v6663_v62, 0.0  ;;  %v6666_v62 = vadd.f32 %v16200_v39, %v15712_v49  ;;  %v7687_v39 = vadd.f32 %v16195_v33, %v15717_v52  ;;  %v14399_v33 = vld [vmem:[%s15080_s10 + $0x618] sm:$0xff]  }
 0x2a0   : > { %8108 = vst.msk [vmem:[%s15350_s22 + $0x48] sm:$0xff] %vm8098_vm4, %v7925_v63  ;;  %14028 = vmatmul.mubr.msk.bf16.vlgmr.msra.gmra.mrb[192].mxu0 %vm4585_vm0, %v14397_v43 }
 0x2a1   : > { %6969 = vrot.lane.b32.xlu0 %v6799_v4, %s14494_s4  ;;  %v16576_v7 = vpop.f32.mrb[148].mxu0  ;;  %v16579_v61 = vpop.f32.mrb[148].mxu1  ;;  %v6800_v4 = vmax.f32 %v6674_v3, 0.0  ;;  %v7821_v3 = vmax.f32 %v7695_v27, 0.0 }
 0x2a2   : > { %v7935_v0 = vpop.permute.xlu1 %7934  ;;  %v16584_v42 = vpop.f32.mrb[149].mxu0 }
 0x2a3   : > { %18828 = vst [vmem:[#allocation41_spill] sm:$0xff] %v16584_v42  ;;  %v16586_v13 = vpop.f32.mrb[149].mxu1  ;;  %7986 = vrot.lane.b32.xlu1 %v7818_v41, %s14492_s30  ;;  %v6914_v63 = vpop.permute.xlu0 %6913 }
 0x2a4   : > { %v16590_v5 = vpop.f32.mrb[150].mxu0  ;;  %7092 = vst.msk [vmem:[%s15350_s22 + $0x70] sm:$0xff] %vm7077_vm3, %v6914_v63  ;;  %v16597_v18 = vpop.f32.mrb[150].mxu1  ;;  %v6798_v63 = vmax.f32 %v6666_v62, 0.0  ;;  %v6687_v62 = vadd.f32 %v16210_v14, %v15712_v49  ;;  %v7700_v14 = vadd.f32 %v16220_v10, %v15717_v52 }
 0x2a5   : > { %v16599_v42 = vpop.f32.mrb[151].mxu0  ;;  %6965 = vrot.lane.b32.xlu0 %v6797_v32, %s14494_s4  ;;  %8113 = vst.msk [vmem:[%s15350_s22 + $0x70] sm:$0xff] %vm8098_vm4, %v7935_v0  ;;  %v16604_v41 = vpop.f32.mrb[151].mxu1  ;;  %v14398_v32 = vld [vmem:[%s15080_s10 + $0x610] sm:$0xff]  }
 0x2a6   : > { %18829 = vst [vmem:[#allocation42_spill] sm:$0xff] %v16599_v42  ;;  %18830 = vst [vmem:[#allocation43_spill] sm:$0xff] %v16604_v41  ;;  %v7931_v6 = vpop.permute.xlu1 %7930  ;;  %v7708_v42 = vadd.f32 %v16214_v60, %v15717_v52  ;;  %14031 = vmatprep.mubr.msk.bf16.mxu0 %vm4585_vm0, %v14398_v32 }
 0x2a7   : > { %6971 = vrot.lane.b32.xlu1 %v6800_v4, %s14494_s4  ;;  %v6910_v43 = vpop.permute.xlu0 %6909  ;;  %v7819_v4 = vmax.f32 %v7687_v39, 0.0 }
 0x2a8   : > { %7090 = vst.msk [vmem:[%s15350_s22 + $0x60] sm:$0xff] %vm7077_vm3, %v6910_v43  ;;  %14032 = vmatmul.mubr.msk.bf16.gmra.mrb[196].mxu0 %vm4585_vm0, %v14399_v33  ;;  %v7824_v39 = vmax.f32 %v7708_v42, 0.0  ;;  %v6679_v42 = vadd.f32 %v16216_v24, %v15712_v49  ;;  %v7822_v33 = vmax.f32 %v7700_v14, 0.0  ;;  %v14401_v24 = vld [vmem:[%s15080_s10 + $0x628] sm:$0xff]  }
 0x2a9   : > { %7992 = vrot.lane.b32.xlu0 %v7821_v3, %s14492_s30  ;;  %v16614_v0 = vpop.f32.mrb[152].mxu0  ;;  %8111 = vst.msk [vmem:[%s15350_s22 + $0x60] sm:$0xff] %vm8098_vm4, %v7931_v6  ;;  %v16619_v41 = vpop.f32.mrb[152].mxu1 }
 0x2aa   : > { %v6916_v27 = vpop.permute.xlu1 %6915  ;;  %v16626_v60 = vpop.f32.mrb[153].mxu0 }
 0x2ab   : > { %7093 = vst.msk [vmem:[%s15350_s22 + $0x78] sm:$0xff] %vm7077_vm3, %v6916_v27  ;;  %18831 = vst [vmem:[#allocation44_spill] sm:$0xff] %v16626_v60  ;;  %v16628_v43 = vpop.f32.mrb[153].mxu1  ;;  %6967 = vrot.lane.b32.xlu1 %v6798_v63, %s14494_s4  ;;  %v7937_v6 = vpop.permute.xlu0 %7936 }
 0x2ac   : > { %v16632_v3 = vpop.f32.mrb[154].mxu0  ;;  %8114 = vst.msk [vmem:[%s15350_s22 + $0x78] sm:$0xff] %vm8098_vm4, %v7937_v6  ;;  %v16639_v27 = vpop.f32.mrb[154].mxu1  ;;  %v6690_v6 = vadd.f32 %v16225_v59, %v15712_v49 }
 0x2ad   : > { %18832 = vst [vmem:[#allocation45_spill] sm:$0xff] %v16632_v3  ;;  %v16641_v60 = vpop.f32.mrb[155].mxu0  ;;  %7988 = vrot.lane.b32.xlu0 %v7819_v4, %s14492_s30  ;;  %v16644_v63 = vpop.f32.mrb[155].mxu1  ;;  %v6803_v3 = vmax.f32 %v6687_v62, 0.0  ;;  %v14400_v62 = vld [vmem:[%s15080_s10 + $0x620] sm:$0xff]  }
 0x2ae   : > { %18833 = vst [vmem:[#allocation46_spill] sm:$0xff] %v16641_v60  ;;  %18834 = vst [vmem:[#allocation47_spill] sm:$0xff] %v16644_v63  ;;  %v6912_v32 = vpop.permute.xlu1 %6911  ;;  %14035 = vmatprep.mubr.msk.bf16.mxu0 %vm4585_vm0, %v14400_v62 }
 0x2af   : > { %7091 = vst.msk [vmem:[%s15350_s22 + $0x68] sm:$0xff] %vm7077_vm3, %v6912_v32  ;;  %7998 = vrot.lane.b32.xlu1 %v7824_v39, %s14492_s30  ;;  %v7933_v10 = vpop.permute.xlu0 %7932  ;;  %v6801_v32 = vmax.f32 %v6679_v42, 0.0  ;;  %v7711_v39 = vadd.f32 %v16227_v26, %v15717_v52  ;;  %v6682_v42 = vadd.f32 %v16236_v9, %v15712_v49  ;;  %v7703_v9 = vadd.f32 %v16231_v53, %v15717_v52  ;;  %v14403_v53 = vld [vmem:[%s15080_s10 + $0x638] sm:$0xff]  }
 0x2b0   : > { %8112 = vst.msk [vmem:[%s15350_s22 + $0x68] sm:$0xff] %vm8098_vm4, %v7933_v10  ;;  %14036 = vmatmul.mubr.msk.bf16.gmra.mrb[200].mxu0 %vm4585_vm0, %v14401_v24 }
 0x2b1   : > { %6977 = vrot.lane.b32.xlu0 %v6803_v3, %s14494_s4  ;;  %v16656_v4 = vpop.f32.mrb[156].mxu0  ;;  %v16659_v60 = vpop.f32.mrb[156].mxu1 }
 0x2b2   : > { %18835 = vst [vmem:[#allocation48_spill] sm:$0xff] %v16656_v4  ;;  %v7943_v63 = vpop.permute.xlu1 %7942  ;;  %v16664_v14 = vpop.f32.mrb[157].mxu0  ;;  %v6804_v4 = vmax.f32 %v6690_v6, 0.0  ;;  %v7825_v6 = vmax.f32 %v7711_v39, 0.0 }
 0x2b3   : > { %18836 = vst [vmem:[#allocation49_spill] sm:$0xff] %v16664_v14  ;;  %v16666_v59 = vpop.f32.mrb[157].mxu1  ;;  %7994 = vrot.lane.b32.xlu1 %v7822_v33, %s14492_s30  ;;  %v6922_v3 = vpop.permute.xlu0 %6921 }
 0x2b4   : > { %v16670_v10 = vpop.f32.mrb[158].mxu0  ;;  %7096 = vst.msk [vmem:[%s15350_s22 + $0x90] sm:$0xff] %vm7077_vm3, %v6922_v3  ;;  %v16677_v26 = vpop.f32.mrb[158].mxu1  ;;  %v6802_v3 = vmax.f32 %v6682_v42, 0.0  ;;  %v6703_v42 = vadd.f32 %v16246_v34, %v15712_v49  ;;  %v7716_v34 = vadd.f32 %v16256_v23, %v15717_v52 }
 0x2b5   : > { %v16679_v14 = vpop.f32.mrb[159].mxu0  ;;  %6973 = vrot.lane.b32.xlu0 %v6801_v32, %s14494_s4  ;;  %8117 = vst.msk [vmem:[%s15350_s22 + $0x90] sm:$0xff] %vm8098_vm4, %v7943_v63  ;;  %v16684_v33 = vpop.f32.mrb[159].mxu1  ;;  %v14402_v32 = vld [vmem:[%s15080_s10 + $0x630] sm:$0xff]  }
 0x2b6   : > { %18837 = vst [vmem:[#allocation50_spill] sm:$0xff] %v16679_v14  ;;  %18838 = vst [vmem:[#allocation51_spill] sm:$0xff] %v16684_v33  ;;  %v7939_v62 = vpop.permute.xlu1 %7938  ;;  %v7724_v14 = vadd.f32 %v16250_v40, %v15717_v52  ;;  %14039 = vmatprep.mubr.msk.bf16.mxu0 %vm4585_vm0, %v14402_v32 }
 0x2b7   : > { %6979 = vrot.lane.b32.xlu1 %v6804_v4, %s14494_s4  ;;  %v6918_v24 = vpop.permute.xlu0 %6917  ;;  %v7823_v4 = vmax.f32 %v7703_v9, 0.0 }
 0x2b8   : > { %7094 = vst.msk [vmem:[%s15350_s22 + $0x80] sm:$0xff] %vm7077_vm3, %v6918_v24  ;;  %14040 = vmatmul.mubr.msk.bf16.gmra.mrb[204].mxu0 %vm4585_vm0, %v14403_v53  ;;  %v7828_v9 = vmax.f32 %v7724_v14, 0.0  ;;  %v6695_v14 = vadd.f32 %v16252_v37, %v15712_v49  ;;  %v7826_v53 = vmax.f32 %v7716_v34, 0.0  ;;  %v14405_v37 = vld [vmem:[%s15080_s10 + $0x648] sm:$0xff]  }
 0x2b9   : > { %8000 = vrot.lane.b32.xlu0 %v7825_v6, %s14492_s30  ;;  %v16694_v63 = vpop.f32.mrb[160].mxu0  ;;  %8115 = vst.msk [vmem:[%s15350_s22 + $0x80] sm:$0xff] %vm8098_vm4, %v7939_v62  ;;  %v16699_v33 = vpop.f32.mrb[160].mxu1 }
 0x2ba   : > { %v6924_v39 = vpop.permute.xlu1 %6923  ;;  %v16706_v40 = vpop.f32.mrb[161].mxu0 }
 0x2bb   : > { %7097 = vst.msk [vmem:[%s15350_s22 + $0x98] sm:$0xff] %vm7077_vm3, %v6924_v39  ;;  %18839 = vst [vmem:[#allocation52_spill] sm:$0xff] %v16706_v40  ;;  %v16708_v24 = vpop.f32.mrb[161].mxu1  ;;  %6975 = vrot.lane.b32.xlu1 %v6802_v3, %s14494_s4  ;;  %v7945_v62 = vpop.permute.xlu0 %7944 }
 0x2bc   : > { %v16712_v6 = vpop.f32.mrb[162].mxu0  ;;  %8118 = vst.msk [vmem:[%s15350_s22 + $0x98] sm:$0xff] %vm8098_vm4, %v7945_v62  ;;  %v16719_v39 = vpop.f32.mrb[162].mxu1  ;;  %v18844_v62 = vld [vmem:[#allocation5_spill] sm:$0xff] }
 0x2bd   : > { %18840 = vst [vmem:[#allocation53_spill] sm:$0xff] %v16712_v6  ;;  %18841 = vst [vmem:[#allocation54_spill] sm:$0xff] %v16719_v39  ;;  %v16721_v40 = vpop.f32.mrb[163].mxu0  ;;  %7996 = vrot.lane.b32.xlu0 %v7823_v4, %s14492_s30  ;;  %v16724_v3 = vpop.f32.mrb[163].mxu1  ;;  %v6807_v6 = vmax.f32 %v6703_v42, 0.0  ;;  %v6706_v39 = vadd.f32 %v18844_v62, %v15712_v49  ;;  %v14404_v42 = vld [vmem:[%s15080_s10 + $0x640] sm:$0xff]  }
 0x2be   : > { %18842 = vst [vmem:[#allocation55_spill] sm:$0xff] %v16721_v40  ;;  %18843 = vst [vmem:[#allocation56_spill] sm:$0xff] %v16724_v3  ;;  %v6920_v32 = vpop.permute.xlu1 %6919  ;;  %14043 = vmatprep.mubr.msk.bf16.mxu0 %vm4585_vm0, %v14404_v42 }
 0x2bf   : > { %7095 = vst.msk [vmem:[%s15350_s22 + $0x88] sm:$0xff] %vm7077_vm3, %v6920_v32  ;;  %8006 = vrot.lane.b32.xlu1 %v7828_v9, %s14492_s30  ;;  %v7941_v23 = vpop.permute.xlu0 %7940  ;;  %v6805_v32 = vmax.f32 %v6695_v14, 0.0  ;;  %v7727_v9 = vadd.f32 %v16263_v46, %v15717_v52  ;;  %v6698_v14 = vadd.f32 %v16272_v19, %v15712_v49 }
 0x2c0   : > { %8116 = vst.msk [vmem:[%s15350_s22 + $0x88] sm:$0xff] %vm8098_vm4, %v7941_v23  ;;  %14044 = vmatmul.mubr.msk.bf16.gmra.mrb[208].mxu0 %vm4585_vm0, %v14405_v37  ;;  %v18850_v37 = vld [vmem:[#allocation6_spill] sm:$0xff] }
 0x2c1   : > { %6985 = vrot.lane.b32.xlu0 %v6807_v6, %s14494_s4  ;;  %v16736_v4 = vpop.f32.mrb[164].mxu0  ;;  %v16739_v40 = vpop.f32.mrb[164].mxu1  ;;  %v7719_v19 = vadd.f32 %v18850_v37, %v15717_v52  ;;  %v14407_v37 = vld [vmem:[%s15080_s10 + $0x658] sm:$0xff]  }
 0x2c2   : > { %18845 = vst [vmem:[#allocation5_spill] sm:$0xff] %v16736_v4  ;;  %v7951_v3 = vpop.permute.xlu1 %7950  ;;  %v16744_v34 = vpop.f32.mrb[165].mxu0  ;;  %v6808_v4 = vmax.f32 %v6706_v39, 0.0  ;;  %v7829_v39 = vmax.f32 %v7727_v9, 0.0 }
 0x2c3   : > { %18846 = vst [vmem:[#allocation57_spill] sm:$0xff] %v16744_v34  ;;  %v16746_v62 = vpop.f32.mrb[165].mxu1  ;;  %8002 = vrot.lane.b32.xlu1 %v7826_v53, %s14492_s30  ;;  %v6930_v6 = vpop.permute.xlu0 %6929 }
 0x2c4   : > { %v16750_v23 = vpop.f32.mrb[166].mxu0  ;;  %7100 = vst.msk [vmem:[%s15350_s22 + $0xb0] sm:$0xff] %vm7077_vm3, %v6930_v6  ;;  %v16757_v46 = vpop.f32.mrb[166].mxu1 }
 0x2c5   : > { %18847 = vst [vmem:[#allocation58_spill] sm:$0xff] %v16757_v46  ;;  %v16759_v34 = vpop.f32.mrb[167].mxu0  ;;  %6981 = vrot.lane.b32.xlu0 %v6805_v32, %s14494_s4  ;;  %8121 = vst.msk [vmem:[%s15350_s22 + $0xb0] sm:$0xff] %vm8098_vm4, %v7951_v3  ;;  %v16764_v53 = vpop.f32.mrb[167].mxu1  ;;  %v6806_v46 = vmax.f32 %v6698_v14, 0.0  ;;  %v14406_v32 = vld [vmem:[%s15080_s10 + $0x650] sm:$0xff]   ;;  %v6719_v14 = vadd.f32 %v16282_v31, %v15712_v49 }
 0x2c6   : > { %18848 = vst [vmem:[#allocation59_spill] sm:$0xff] %v16759_v34  ;;  %18849 = vst [vmem:[#allocation60_spill] sm:$0xff] %v16764_v53  ;;  %v7947_v42 = vpop.permute.xlu1 %7946  ;;  %v7740_v34 = vadd.f32 %v16286_v28, %v15717_v52  ;;  %14047 = vmatprep.mubr.msk.bf16.mxu0 %vm4585_vm0, %v14406_v32  ;;  %v18855_v31 = vld [vmem:[#allocation8_spill] sm:$0xff] }
 0x2c7   : > { %6987 = vrot.lane.b32.xlu1 %v6808_v4, %s14494_s4  ;;  %v6926_v6 = vpop.permute.xlu0 %6925  ;;  %v7827_v4 = vmax.f32 %v7719_v19, 0.0 }
 0x2c8   : > { %7098 = vst.msk [vmem:[%s15350_s22 + $0xa0] sm:$0xff] %vm7077_vm3, %v6926_v6  ;;  %14048 = vmatmul.mubr.msk.bf16.gmra.mrb[212].mxu0 %vm4585_vm0, %v14407_v37  ;;  %v7832_v19 = vmax.f32 %v7740_v34, 0.0  ;;  %v18859_v37 = vld [vmem:[#allocation7_spill] sm:$0xff] }
 0x2c9   : > { %8008 = vrot.lane.b32.xlu0 %v7829_v39, %s14492_s30  ;;  %v16774_v3 = vpop.f32.mrb[168].mxu0  ;;  %8119 = vst.msk [vmem:[%s15350_s22 + $0xa0] sm:$0xff] %vm8098_vm4, %v7947_v42  ;;  %v16779_v53 = vpop.f32.mrb[168].mxu1  ;;  %v6711_v34 = vadd.f32 %v18859_v37, %v15712_v49  ;;  %v14409_v37 = vld [vmem:[%s15080_s10 + $0x668] sm:$0xff]  }
 0x2ca   : > { %18851 = vst [vmem:[#allocation6_spill] sm:$0xff] %v16774_v3  ;;  %v6932_v9 = vpop.permute.xlu1 %6931  ;;  %v16786_v28 = vpop.f32.mrb[169].mxu0  ;;  %v7732_v3 = vadd.f32 %v18855_v31, %v15717_v52 }
 0x2cb   : > { %7101 = vst.msk [vmem:[%s15350_s22 + $0xb8] sm:$0xff] %vm7077_vm3, %v6932_v9  ;;  %18852 = vst [vmem:[#allocation61_spill] sm:$0xff] %v16786_v28  ;;  %v16788_v6 = vpop.f32.mrb[169].mxu1  ;;  %6983 = vrot.lane.b32.xlu1 %v6806_v46, %s14494_s4  ;;  %v7953_v42 = vpop.permute.xlu0 %7952 }
 0x2cc   : > { %18853 = vst [vmem:[#allocation62_spill] sm:$0xff] %v16788_v6  ;;  %v16792_v39 = vpop.f32.mrb[170].mxu0  ;;  %8122 = vst.msk [vmem:[%s15350_s22 + $0xb8] sm:$0xff] %vm8098_vm4, %v7953_v42  ;;  %v16799_v9 = vpop.f32.mrb[170].mxu1  ;;  %v7830_v31 = vmax.f32 %v7732_v3, 0.0  ;;  %v7743_v3 = vadd.f32 %v16299_v29, %v15717_v52 }
 0x2cd   : > { %18854 = vst [vmem:[#allocation63_spill] sm:$0xff] %v16792_v39  ;;  %18856 = vst [vmem:[#allocation8_spill] sm:$0xff] %v16799_v9  ;;  %v16801_v28 = vpop.f32.mrb[171].mxu0  ;;  %8004 = vrot.lane.b32.xlu0 %v7827_v4, %s14492_s30  ;;  %v16804_v46 = vpop.f32.mrb[171].mxu1  ;;  %v6811_v39 = vmax.f32 %v6719_v14, 0.0  ;;  %v18860_v9 = vld [vmem:[#allocation9_spill] sm:$0xff] }
 0x2ce   : > { %18857 = vst [vmem:[#allocation64_spill] sm:$0xff] %v16801_v28  ;;  %18858 = vst [vmem:[#allocation65_spill] sm:$0xff] %v16804_v46  ;;  %v6928_v32 = vpop.permute.xlu1 %6927  ;;  %v6722_v6 = vadd.f32 %v18860_v9, %v15712_v49  ;;  %v14408_v14 = vld [vmem:[%s15080_s10 + $0x660] sm:$0xff]  }
 0x2cf   : > { %7099 = vst.msk [vmem:[%s15350_s22 + $0xa8] sm:$0xff] %vm7077_vm3, %v6928_v32  ;;  %8014 = vrot.lane.b32.xlu1 %v7832_v19, %s14492_s30  ;;  %v7949_v42 = vpop.permute.xlu0 %7948  ;;  %v6809_v32 = vmax.f32 %v6711_v34, 0.0  ;;  %14051 = vmatprep.mubr.msk.bf16.mxu0 %vm4585_vm0, %v14408_v14  ;;  %v6714_v34 = vadd.f32 %v16308_v17, %v15712_v49 }
 0x2d0   : > { %8120 = vst.msk [vmem:[%s15350_s22 + $0xa8] sm:$0xff] %vm8098_vm4, %v7949_v42  ;;  %14052 = vmatmul.mubr.msk.bf16.gmra.mrb[216].mxu0 %vm4585_vm0, %v14409_v37  ;;  %v18867_v37 = vld [vmem:[#allocation10_spill] sm:$0xff] }
 0x2d1   : > { %6993 = vrot.lane.b32.xlu0 %v6811_v39, %s14494_s4  ;;  %v16816_v4 = vpop.f32.mrb[172].mxu0  ;;  %v16819_v46 = vpop.f32.mrb[172].mxu1  ;;  %v7735_v17 = vadd.f32 %v18867_v37, %v15717_v52  ;;  %v14411_v37 = vld [vmem:[%s15080_s10 + $0x678] sm:$0xff]  }
 0x2d2   : > { %v7959_v28 = vpop.permute.xlu1 %7958  ;;  %18861 = vst [vmem:[#allocation7_spill] sm:$0xff] %v16819_v46  ;;  %v16824_v19 = vpop.f32.mrb[173].mxu0  ;;  %v6812_v46 = vmax.f32 %v6722_v6, 0.0  ;;  %v7833_v6 = vmax.f32 %v7743_v3, 0.0 }
 0x2d3   : > { %18862 = vst [vmem:[#allocation9_spill] sm:$0xff] %v16824_v19  ;;  %v16826_v9 = vpop.f32.mrb[173].mxu1  ;;  %8010 = vrot.lane.b32.xlu1 %v7830_v31, %s14492_s30  ;;  %v6938_v39 = vpop.permute.xlu0 %6937 }
 0x2d4   : > { %18863 = vst [vmem:[#allocation66_spill] sm:$0xff] %v16826_v9  ;;  %v16830_v42 = vpop.f32.mrb[174].mxu0  ;;  %7104 = vst.msk [vmem:[%s15350_s22 + $0xd0] sm:$0xff] %vm7077_vm3, %v6938_v39  ;;  %v16837_v29 = vpop.f32.mrb[174].mxu1 }
 0x2d5   : > { %18864 = vst [vmem:[#allocation67_spill] sm:$0xff] %v16837_v29  ;;  %v16839_v9 = vpop.f32.mrb[175].mxu0  ;;  %6989 = vrot.lane.b32.xlu0 %v6809_v32, %s14494_s4  ;;  %8125 = vst.msk [vmem:[%s15350_s22 + $0xd0] sm:$0xff] %vm8098_vm4, %v7959_v28  ;;  %v16844_v31 = vpop.f32.mrb[175].mxu1  ;;  %v6810_v29 = vmax.f32 %v6714_v34, 0.0  ;;  %v14410_v32 = vld [vmem:[%s15080_s10 + $0x670] sm:$0xff]  }
 0x2d6   : > { %18865 = vst [vmem:[#allocation68_spill] sm:$0xff] %v16839_v9  ;;  %18866 = vst [vmem:[#allocation69_spill] sm:$0xff] %v16844_v31  ;;  %v7955_v14 = vpop.permute.xlu1 %7954  ;;  %v7756_v9 = vadd.f32 %v16322_v48, %v15717_v52  ;;  %v18869_v34 = vld [vmem:[#allocation11_spill] sm:$0xff]  ;;  %14055 = vmatprep.mubr.msk.bf16.mxu0 %vm4585_vm0, %v14410_v32 }
 0x2d7   : > { %6995 = vrot.lane.b32.xlu1 %v6812_v46, %s14494_s4  ;;  %v6934_v39 = vpop.permute.xlu0 %6933  ;;  %v7831_v46 = vmax.f32 %v7735_v17, 0.0  ;;  %v6735_v19 = vadd.f32 %v18869_v34, %v15712_v49  ;;  %v7748_v34 = vadd.f32 %v16328_v25, %v15717_v52 }
 0x2d8   : > { %7102 = vst.msk [vmem:[%s15350_s22 + $0xc0] sm:$0xff] %vm7077_vm3, %v6934_v39  ;;  %14056 = vmatmul.mubr.msk.bf16.gmra.mrb[220].mxu0 %vm4585_vm0, %v14411_v37  ;;  %v7836_v17 = vmax.f32 %v7756_v9, 0.0  ;;  %v18875_v37 = vld [vmem:[#allocation12_spill] sm:$0xff] }
 0x2d9   : > { %8016 = vrot.lane.b32.xlu0 %v7833_v6, %s14492_s30  ;;  %v16854_v28 = vpop.f32.mrb[176].mxu0  ;;  %8123 = vst.msk [vmem:[%s15350_s22 + $0xc0] sm:$0xff] %vm8098_vm4, %v7955_v14  ;;  %v16859_v31 = vpop.f32.mrb[176].mxu1  ;;  %v6727_v9 = vadd.f32 %v18875_v37, %v15712_v49  ;;  %v14413_v37 = vld [vmem:[%s15080_s10 + $0x688] sm:$0xff]  }
 0x2da   : > { %v6940_v3 = vpop.permute.xlu1 %6939  ;;  %18868 = vst [vmem:[#allocation10_spill] sm:$0xff] %v16859_v31  ;;  %v16866_v48 = vpop.f32.mrb[177].mxu0 }
 0x2db   : > { %7105 = vst.msk [vmem:[%s15350_s22 + $0xd8] sm:$0xff] %vm7077_vm3, %v6940_v3  ;;  %18870 = vst [vmem:[#allocation11_spill] sm:$0xff] %v16866_v48  ;;  %v16868_v39 = vpop.f32.mrb[177].mxu1  ;;  %6991 = vrot.lane.b32.xlu1 %v6810_v29, %s14494_s4  ;;  %v7961_v14 = vpop.permute.xlu0 %7960 }
 0x2dc   : > { %18871 = vst [vmem:[#allocation70_spill] sm:$0xff] %v16868_v39  ;;  %v16872_v6 = vpop.f32.mrb[178].mxu0  ;;  %8126 = vst.msk [vmem:[%s15350_s22 + $0xd8] sm:$0xff] %vm8098_vm4, %v7961_v14  ;;  %v16879_v3 = vpop.f32.mrb[178].mxu1  ;;  %v6815_v39 = vmax.f32 %v6735_v19, 0.0  ;;  %v7834_v14 = vmax.f32 %v7748_v34, 0.0 }
 0x2dd   : > { %18872 = vst [vmem:[#allocation71_spill] sm:$0xff] %v16879_v3  ;;  %v16881_v31 = vpop.f32.mrb[179].mxu0  ;;  %8012 = vrot.lane.b32.xlu0 %v7831_v46, %s14492_s30  ;;  %v16884_v29 = vpop.f32.mrb[179].mxu1  ;;  %v18876_v3 = vld [vmem:[#allocation13_spill] sm:$0xff]  ;;  %v14412_v19 = vld [vmem:[%s15080_s10 + $0x680] sm:$0xff]  }
 0x2de   : > { %18873 = vst [vmem:[#allocation72_spill] sm:$0xff] %v16881_v31  ;;  %18874 = vst [vmem:[#allocation73_spill] sm:$0xff] %v16884_v29  ;;  %v6936_v32 = vpop.permute.xlu1 %6935  ;;  %v6738_v48 = vadd.f32 %v18876_v3, %v15712_v49  ;;  %14059 = vmatprep.mubr.msk.bf16.mxu0 %vm4585_vm0, %v14412_v19 }
 0x2df   : > { %7103 = vst.msk [vmem:[%s15350_s22 + $0xc8] sm:$0xff] %vm7077_vm3, %v6936_v32  ;;  %8022 = vrot.lane.b32.xlu1 %v7836_v17, %s14492_s30  ;;  %v7957_v25 = vpop.permute.xlu0 %7956  ;;  %v6813_v32 = vmax.f32 %v6727_v9, 0.0  ;;  %v7759_v17 = vadd.f32 %v16335_v56, %v15717_v52  ;;  %v6730_v9 = vadd.f32 %v16344_v11, %v15712_v49 }
 0x2e0   : > { %8124 = vst.msk [vmem:[%s15350_s22 + $0xc8] sm:$0xff] %vm8098_vm4, %v7957_v25  ;;  %14060 = vmatmul.mubr.msk.bf16.gmra.mrb[224].mxu0 %vm4585_vm0, %v14413_v37  ;;  %v18883_v37 = vld [vmem:[#allocation14_spill] sm:$0xff] }
 0x2e1   : > { %7001 = vrot.lane.b32.xlu0 %v6815_v39, %s14494_s4  ;;  %v16896_v46 = vpop.f32.mrb[180].mxu0  ;;  %v16899_v31 = vpop.f32.mrb[180].mxu1  ;;  %v7751_v11 = vadd.f32 %v18883_v37, %v15717_v52  ;;  %v14415_v37 = vld [vmem:[%s15080_s10 + $0x698] sm:$0xff]  }
 0x2e2   : > { %v7967_v29 = vpop.permute.xlu1 %7966  ;;  %18877 = vst [vmem:[#allocation12_spill] sm:$0xff] %v16899_v31  ;;  %v16904_v34 = vpop.f32.mrb[181].mxu0  ;;  %v6816_v31 = vmax.f32 %v6738_v48, 0.0  ;;  %v7837_v48 = vmax.f32 %v7759_v17, 0.0 }
 0x2e3   : > { %18878 = vst [vmem:[#allocation13_spill] sm:$0xff] %v16904_v34  ;;  %v16906_v3 = vpop.f32.mrb[181].mxu1  ;;  %8018 = vrot.lane.b32.xlu1 %v7834_v14, %s14492_s30  ;;  %v6946_v39 = vpop.permute.xlu0 %6945 }
 0x2e4   : > { %18879 = vst [vmem:[#allocation74_spill] sm:$0xff] %v16906_v3  ;;  %v16910_v25 = vpop.f32.mrb[182].mxu0  ;;  %7108 = vst.msk [vmem:[%s15350_s22 + $0xf0] sm:$0xff] %vm7077_vm3, %v6946_v39  ;;  %v16917_v56 = vpop.f32.mrb[182].mxu1 }
 0x2e5   : > { %18880 = vst [vmem:[#allocation75_spill] sm:$0xff] %v16917_v56  ;;  %v16919_v3 = vpop.f32.mrb[183].mxu0  ;;  %6997 = vrot.lane.b32.xlu0 %v6813_v32, %s14494_s4  ;;  %8129 = vst.msk [vmem:[%s15350_s22 + $0xf0] sm:$0xff] %vm8098_vm4, %v7967_v29  ;;  %v16924_v14 = vpop.f32.mrb[183].mxu1  ;;  %v6814_v56 = vmax.f32 %v6730_v9, 0.0  ;;  %v14414_v32 = vld [vmem:[%s15080_s10 + $0x690] sm:$0xff]  }
 0x2e6   : > { %18881 = vst [vmem:[#allocation76_spill] sm:$0xff] %v16919_v3  ;;  %18882 = vst [vmem:[#allocation77_spill] sm:$0xff] %v16924_v14  ;;  %v7963_v19 = vpop.permute.xlu1 %7962  ;;  %v7772_v3 = vadd.f32 %v16356_v57, %v15717_v52  ;;  %v18885_v9 = vld [vmem:[#allocation15_spill] sm:$0xff]  ;;  %14063 = vmatprep.mubr.msk.bf16.mxu0 %vm4585_vm0, %v14414_v32 }
 0x2e7   : > { %7003 = vrot.lane.b32.xlu1 %v6816_v31, %s14494_s4  ;;  %v6942_v39 = vpop.permute.xlu0 %6941  ;;  %v7835_v31 = vmax.f32 %v7751_v11, 0.0  ;;  %v6751_v34 = vadd.f32 %v18885_v9, %v15712_v49  ;;  %v7764_v9 = vadd.f32 %v16362_v1, %v15717_v52 }
 0x2e8   : > { %7106 = vst.msk [vmem:[%s15350_s22 + $0xe0] sm:$0xff] %vm7077_vm3, %v6942_v39  ;;  %14064 = vmatmul.mubr.msk.bf16.gmra.mrb[228].mxu0 %vm4585_vm0, %v14415_v37  ;;  %v7840_v11 = vmax.f32 %v7772_v3, 0.0  ;;  %v18892_v37 = vld [vmem:[#allocation16_spill] sm:$0xff] }
 0x2e9   : > { %8024 = vrot.lane.b32.xlu0 %v7837_v48, %s14492_s30  ;;  %v16934_v29 = vpop.f32.mrb[184].mxu0  ;;  %8127 = vst.msk [vmem:[%s15350_s22 + $0xe0] sm:$0xff] %vm8098_vm4, %v7963_v19  ;;  %v16939_v14 = vpop.f32.mrb[184].mxu1  ;;  %v6743_v3 = vadd.f32 %v18892_v37, %v15712_v49  ;;  %v14417_v37 = vld [vmem:[%s15080_s10 + $0x6a8] sm:$0xff]  }
 0x2ea   : > { %v6948_v17 = vpop.permute.xlu1 %6947  ;;  %18884 = vst [vmem:[#allocation14_spill] sm:$0xff] %v16939_v14  ;;  %v16946_v57 = vpop.f32.mrb[185].mxu0 }
 0x2eb   : > { %7109 = vst.msk [vmem:[%s15350_s22 + $0xf8] sm:$0xff] %vm7077_vm3, %v6948_v17  ;;  %18886 = vst [vmem:[#allocation15_spill] sm:$0xff] %v16946_v57  ;;  %v16948_v39 = vpop.f32.mrb[185].mxu1  ;;  %6999 = vrot.lane.b32.xlu1 %v6814_v56, %s14494_s4  ;;  %v7969_v19 = vpop.permute.xlu0 %7968 }
 0x2ec   : > { %18887 = vst [vmem:[#allocation78_spill] sm:$0xff] %v16948_v39  ;;  %v16952_v48 = vpop.f32.mrb[186].mxu0  ;;  %8130 = vst.msk [vmem:[%s15350_s22 + $0xf8] sm:$0xff] %vm8098_vm4, %v7969_v19  ;;  %v16959_v17 = vpop.f32.mrb[186].mxu1  ;;  %v6819_v39 = vmax.f32 %v6751_v34, 0.0  ;;  %v7838_v19 = vmax.f32 %v7764_v9, 0.0 }
 0x2ed   : > { %18888 = vst [vmem:[#allocation79_spill] sm:$0xff] %v16952_v48  ;;  %18889 = vst [vmem:[#allocation80_spill] sm:$0xff] %v16959_v17  ;;  %v16961_v14 = vpop.f32.mrb[187].mxu0  ;;  %8020 = vrot.lane.b32.xlu0 %v7835_v31, %s14492_s30  ;;  %v16964_v56 = vpop.f32.mrb[187].mxu1  ;;  %v18893_v17 = vld [vmem:[#allocation17_spill] sm:$0xff]  ;;  %v14416_v34 = vld [vmem:[%s15080_s10 + $0x6a0] sm:$0xff]  }
 0x2ee   : > { %18890 = vst [vmem:[#allocation81_spill] sm:$0xff] %v16961_v14  ;;  %18891 = vst [vmem:[#allocation82_spill] sm:$0xff] %v16964_v56  ;;  %v6944_v32 = vpop.permute.xlu1 %6943  ;;  %v6754_v57 = vadd.f32 %v18893_v17, %v15712_v49  ;;  %14067 = vmatprep.mubr.msk.bf16.mxu0 %vm4585_vm0, %v14416_v34 }
 0x2ef   : > { %7107 = vst.msk [vmem:[%s15350_s22 + $0xe8] sm:$0xff] %vm7077_vm3, %v6944_v32  ;;  %8030 = vrot.lane.b32.xlu1 %v7840_v11, %s14492_s30  ;;  %v7965_v1 = vpop.permute.xlu0 %7964  ;;  %v6817_v32 = vmax.f32 %v6743_v3, 0.0  ;;  %v18895_v11 = vld [vmem:[#allocation18_spill] sm:$0xff]  ;;  %v6746_v3 = vadd.f32 %v16378_v16, %v15712_v49  ;;  %v18900_v49 = vld [vmem:[#allocation19_spill] sm:$0xff] }
 0x2f0   : > { %8128 = vst.msk [vmem:[%s15350_s22 + $0xe8] sm:$0xff] %vm8098_vm4, %v7965_v1  ;;  %v7775_v9 = vadd.f32 %v18895_v11, %v15717_v52  ;;  %14068 = vmatmul.mubr.msk.bf16.gmra.mrb[232].mxu0 %vm4585_vm0, %v14417_v37  ;;  %v7767_v16 = vadd.f32 %v18900_v49, %v15717_v52  ;;  %v18902_v52 = vld [vmem:[#allocation3_spill] sm:$0xff] }
 0x2f1   : > { %7009 = vrot.lane.b32.xlu0 %v6819_v39, %s14494_s4  ;;  %v16976_v31 = vpop.f32.mrb[188].mxu0  ;;  %v16979_v14 = vpop.f32.mrb[188].mxu1 }
 0x2f2   : > { %v7975_v56 = vpop.permute.xlu1 %7974  ;;  %18894 = vst [vmem:[#allocation16_spill] sm:$0xff] %v16979_v14  ;;  %v16984_v48 = vpop.f32.mrb[189].mxu0  ;;  %v6820_v14 = vmax.f32 %v6754_v57, 0.0  ;;  %v7841_v34 = vmax.f32 %v7775_v9, 0.0  ;;  %v14419_v9 = vld [vmem:[%s15080_s10 + $0x6b8] sm:$0xff]  }
 0x2f3   : > { %v16986_v17 = vpop.f32.mrb[189].mxu1  ;;  %8026 = vrot.lane.b32.xlu1 %v7838_v19, %s14492_s30  ;;  %v6954_v39 = vpop.permute.xlu0 %6953 }
 0x2f4   : > { %18896 = vst [vmem:[#allocation17_spill] sm:$0xff] %v16986_v17  ;;  %v16990_v1 = vpop.f32.mrb[190].mxu0  ;;  %7112 = vst.msk [vmem:[%s15350_s22 + $0x110] sm:$0xff] %vm7077_vm3, %v6954_v39  ;;  %v16997_v11 = vpop.f32.mrb[190].mxu1  ;;  %v6818_v39 = vmax.f32 %v6746_v3, 0.0 }
 0x2f5   : > { %18897 = vst [vmem:[#allocation18_spill] sm:$0xff] %v16997_v11  ;;  %v16999_v17 = vpop.f32.mrb[191].mxu0  ;;  %7005 = vrot.lane.b32.xlu0 %v6817_v32, %s14494_s4  ;;  %8133 = vst.msk [vmem:[%s15350_s22 + $0x110] sm:$0xff] %vm8098_vm4, %v7975_v56  ;;  %v17004_v19 = vpop.f32.mrb[191].mxu1  ;;  %v18901_v11 = vld [vmem:[#allocation4_spill] sm:$0xff]  ;;  %v14418_v56 = vld [vmem:[%s15080_s10 + $0x6b0] sm:$0xff]  }
 0x2f6   : > { %18898 = vst [vmem:[#allocation83_spill] sm:$0xff] %v16999_v17  ;;  %18899 = vst [vmem:[#allocation84_spill] sm:$0xff] %v17004_v19  ;;  %v7971_v57 = vpop.permute.xlu1 %7970  ;;  %v9574_v17 = vadd.f32 %v16394_v30, %v18901_v11  ;;  %v7839_v19 = vmax.f32 %v7767_v16, 0.0  ;;  %14071 = vmatprep.mubr.msk.bf16.mxu0 %vm4585_vm0, %v14418_v56  ;;  %v18904_v16 = vld [vmem:[#allocation20_spill] sm:$0xff]  ;;  %v8556_v56 = vadd.f32 %v16405_v8, %v18902_v52 }
 0x2f7   : > { %7011 = vrot.lane.b32.xlu1 %v6820_v14, %s14494_s4  ;;  %v6950_v37 = vpop.permute.xlu0 %6949  ;;  %v8553_v14 = vadd.f32 %v16388_v12, %v18902_v52 }
 0x2f8   : > { %7110 = vst.msk [vmem:[%s15350_s22 + $0x100] sm:$0xff] %vm7077_vm3, %v6950_v37  ;;  %14072 = vmatmul.mubr.msk.bf16.gmra.mrb[236].mxu0 %vm4585_vm0, %v14419_v9  ;;  %v9822_v3 = vmax.f32 %v9574_v17, 0.0  ;;  %v8545_v37 = vadd.f32 %v18904_v16, %v18902_v52  ;;  %v14421_v9 = vld [vmem:[%s15080_s10 + $0x6c8] sm:$0xff]   ;;  %v8802_v8 = vmax.f32 %v8556_v56, 0.0  ;;  %v14423_v56 = vld [vmem:[%s15080_s10 + $0x6d8] sm:$0xff]  }
 0x2f9   : > { %8032 = vrot.lane.b32.xlu0 %v7841_v34, %s14492_s30  ;;  %8131 = vst.msk [vmem:[%s15350_s22 + $0x100] sm:$0xff] %vm8098_vm4, %v7971_v57  ;;  %v18903_v57 = vld [vmem:[#allocation21_spill] sm:$0xff]  ;;  %v8801_v49 = vmax.f32 %v8553_v14, 0.0 }
 0x2fa   : > { %v6956_v32 = vpop.permute.xlu1 %6955  ;;  %v9566_v34 = vadd.f32 %v18903_v57, %v18901_v11  ;;  %v8799_v14 = vmax.f32 %v8545_v37, 0.0  ;;  %v8548_v57 = vadd.f32 %v16411_v51, %v18902_v52  ;;  %v9590_v51 = vadd.f32 %v16428_v47, %v18901_v11 }
 0x2fb   : > { %7113 = vst.msk [vmem:[%s15350_s22 + $0x118] sm:$0xff] %vm7077_vm3, %v6956_v32  ;;  %7007 = vrot.lane.b32.xlu1 %v6818_v39, %s14494_s4  ;;  %v7977_v30 = vpop.permute.xlu0 %7976 }
 0x2fc   : > { %8134 = vst.msk [vmem:[%s15350_s22 + $0x118] sm:$0xff] %vm8098_vm4, %v7977_v30  ;;  %v9820_v17 = vmax.f32 %v9566_v34, 0.0  ;;  %v9577_v30 = vadd.f32 %v16407_v2, %v18901_v11  ;;  %v8800_v37 = vmax.f32 %v8548_v57, 0.0  ;;  %v18907_v57 = vld [vmem:[#allocation24_spill] sm:$0xff] }
 0x2fd   : > { %8028 = vrot.lane.b32.xlu0 %v7839_v19, %s14492_s30  ;;  %v14420_v19 = vld [vmem:[%s15080_s10 + $0x6c0] sm:$0xff]  }
 0x2fe   : > { %v6952_v12 = vpop.permute.xlu1 %6951  ;;  %14075 = vmatprep.mubr.msk.bf16.mxu0 %vm4585_vm0, %v14420_v19  ;;  %v9823_v34 = vmax.f32 %v9577_v30, 0.0  ;;  %v9582_v30 = vadd.f32 %v16434_v45, %v18901_v11  ;;  %v14424_v45 = vld [vmem:[%s15080_s10 + $0x6e0] sm:$0xff]  }
 0x2ff   : > { %7111 = vst.msk [vmem:[%s15350_s22 + $0x108] sm:$0xff] %vm7077_vm3, %v6952_v12  ;;  %9952 = vrot.lane.b32.xlu1 %v9822_v3, %s14490_s28  ;;  %v7973_v39 = vpop.permute.xlu0 %7972  ;;  %v18905_v12 = vld [vmem:[#allocation22_spill] sm:$0xff] }
 0x300   : > { %8132 = vst.msk [vmem:[%s15350_s22 + $0x108] sm:$0xff] %vm8098_vm4, %v7973_v39  ;;  %14076 = vmatmul.mubr.msk.bf16.gmra.mrb[240].mxu0 %vm4585_vm0, %v14421_v9  ;;  %v14422_v39 = vld [vmem:[%s15080_s10 + $0x6d0] sm:$0xff]  }
 0x301   : > { %8931 = vrot.lane.b32.xlu0 %v8801_v49, %s14491_s29  ;;  %v9569_v49 = vadd.f32 %v18905_v12, %v18901_v11  ;;  %14079 = vmatprep.mubr.msk.bf16.mxu0 %vm4585_vm0, %v14422_v39  ;;  %v9824_v12 = vmax.f32 %v9582_v30, 0.0  ;;  %v9585_v30 = vadd.f32 %v16450_v54, %v18901_v11  ;;  %v8585_v54 = vadd.f32 %v16460_v36, %v18902_v52 }
 0x302   : > { %v7983_v32 = vpop.permute.xlu1 %7982 }
 0x303   : > { %9948 = vrot.lane.b32.xlu1 %v9820_v17, %s14490_s28  ;;  %v6962_v3 = vpop.permute.xlu0 %6961  ;;  %v9821_v19 = vmax.f32 %v9569_v49, 0.0  ;;  %v18908_v49 = vld [vmem:[#allocation25_spill] sm:$0xff]  ;;  %v8809_v36 = vmax.f32 %v8585_v54, 0.0 }
 0x304   : > { %7116 = vst.msk [vmem:[%s15350_s22 + $0x130] sm:$0xff] %vm7077_vm3, %v6962_v3 }
 0x305   : > { %8927 = vrot.lane.b32.xlu0 %v8799_v14, %s14491_s29  ;;  %8137 = vst.msk [vmem:[%s15350_s22 + $0x130] sm:$0xff] %vm8098_vm4, %v7983_v32  ;;  %v18906_v32 = vld [vmem:[#allocation23_spill] sm:$0xff]  ;;  %v9826_v14 = vmax.f32 %v9590_v51, 0.0  ;;  %v14425_v51 = vld [vmem:[%s15080_s10 + $0x6e8] sm:$0xff]  }
 0x306   : > { %v7979_v2 = vpop.permute.xlu1 %7978  ;;  %v8569_v9 = vadd.f32 %v18906_v32, %v18902_v52 }
 0x307   : > { %8933 = vrot.lane.b32.xlu1 %v8802_v8, %s14491_s29  ;;  %v6958_v16 = vpop.permute.xlu0 %6957 }
 0x308   : > { %7114 = vst.msk [vmem:[%s15350_s22 + $0x120] sm:$0xff] %vm7077_vm3, %v6958_v16  ;;  %14080 = vmatmul.mubr.msk.bf16.gmra.mrb[244].mxu0 %vm4585_vm0, %v14423_v56  ;;  %v8805_v8 = vmax.f32 %v8569_v9, 0.0  ;;  %v8572_v16 = vadd.f32 %v18908_v49, %v18902_v52  ;;  %v8564_v9 = vadd.f32 %v16445_v58, %v18902_v52  ;;  %v9606_v58 = vadd.f32 %v16464_v55, %v18901_v11 }
 0x309   : > { %9954 = vrot.lane.b32.xlu0 %v9823_v34, %s14490_s28  ;;  %8135 = vst.msk [vmem:[%s15350_s22 + $0x120] sm:$0xff] %vm8098_vm4, %v7979_v2  ;;  %v8561_v2 = vadd.f32 %v18907_v57, %v18902_v52  ;;  %14083 = vmatprep.mubr.msk.bf16.mxu0 %vm4585_vm0, %v14424_v45  ;;  %v14426_v57 = vld [vmem:[%s15080_s10 + $0x6f0] sm:$0xff]  }
 0x30a   : > { %v6964_v17 = vpop.permute.xlu1 %6963  ;;  %v8806_v32 = vmax.f32 %v8572_v16, 0.0  ;;  %v9830_v49 = vmax.f32 %v9606_v58, 0.0  ;;  %v18910_v16 = vld [vmem:[#allocation28_spill] sm:$0xff] }
 0x30b   : > { %7117 = vst.msk [vmem:[%s15350_s22 + $0x138] sm:$0xff] %vm7077_vm3, %v6964_v17  ;;  %8929 = vrot.lane.b32.xlu1 %v8800_v37, %s14491_s29  ;;  %v7985_v47 = vpop.permute.xlu0 %7984  ;;  %v8803_v39 = vmax.f32 %v8561_v2, 0.0  ;;  %v18909_v17 = vld [vmem:[#allocation26_spill] sm:$0xff]  ;;  %v9598_v45 = vadd.f32 %v18910_v16, %v18901_v11 }
 0x30c   : > { %8138 = vst.msk [vmem:[%s15350_s22 + $0x138] sm:$0xff] %vm8098_vm4, %v7985_v47  ;;  %v9593_v56 = vadd.f32 %v18909_v17, %v18901_v11 }
 0x30d   : > { %9950 = vrot.lane.b32.xlu0 %v9821_v19, %s14490_s28 }
 0x30e   : > { %v6960_v3 = vpop.permute.xlu1 %6959 }
 0x30f   : > { %7115 = vst.msk [vmem:[%s15350_s22 + $0x128] sm:$0xff] %vm7077_vm3, %v6960_v3  ;;  %9960 = vrot.lane.b32.xlu1 %v9826_v14, %s14490_s28  ;;  %v7981_v34 = vpop.permute.xlu0 %7980  ;;  %v9827_v14 = vmax.f32 %v9593_v56, 0.0  ;;  %v9828_v56 = vmax.f32 %v9598_v45, 0.0 }
 0x310   : > { %8136 = vst.msk [vmem:[%s15350_s22 + $0x128] sm:$0xff] %vm8098_vm4, %v7981_v34  ;;  %14084 = vmatmul.mubr.msk.bf16.gmra.mrb[248].mxu0 %vm4585_vm0, %v14425_v51  ;;  %v14427_v34 = vld [vmem:[%s15080_s10 + $0x6f8] sm:$0xff]   ;;  %v18911_v51 = vld [vmem:[#allocation27_spill] sm:$0xff] }
 0x311   : > { %8939 = vrot.lane.b32.xlu0 %v8805_v8, %s14491_s29  ;;  %v8804_v8 = vmax.f32 %v8564_v9, 0.0  ;;  %14087 = vmatprep.mubr.msk.bf16.mxu0 %vm4585_vm0, %v14426_v57 }
 0x312   : > { %v7991_v37 = vpop.permute.xlu1 %7990 }
 0x313   : > { %9956 = vrot.lane.b32.xlu1 %v9824_v12, %s14490_s28  ;;  %v6970_v19 = vpop.permute.xlu0 %6969  ;;  %v9825_v12 = vmax.f32 %v9585_v30, 0.0 }
 0x314   : > { %7120 = vst.msk [vmem:[%s15350_s22 + $0x150] sm:$0xff] %vm7077_vm3, %v6970_v19  ;;  %v18912_v19 = vld [vmem:[#allocation29_spill] sm:$0xff] }
 0x315   : > { %8935 = vrot.lane.b32.xlu0 %v8803_v39, %s14491_s29  ;;  %8141 = vst.msk [vmem:[%s15350_s22 + $0x150] sm:$0xff] %vm8098_vm4, %v7991_v37  ;;  %v8577_v39 = vadd.f32 %v18911_v51, %v18902_v52 }
 0x316   : > { %v7987_v47 = vpop.permute.xlu1 %7986 }
 0x317   : > { %8941 = vrot.lane.b32.xlu1 %v8806_v32, %s14491_s29  ;;  %v6966_v3 = vpop.permute.xlu0 %6965  ;;  %v8588_v32 = vadd.f32 %v18912_v19, %v18902_v52 }
 0x318   : > { %7118 = vst.msk [vmem:[%s15350_s22 + $0x140] sm:$0xff] %vm7077_vm3, %v6966_v3  ;;  %14088 = vmatmul.mubr.msk.bf16.gmra.mrb[252].mxu0 %vm4585_vm0, %v14427_v34 }
 0x319   : > { %9962 = vrot.lane.b32.xlu0 %v9827_v14, %s14490_s28  ;;  %8139 = vst.msk [vmem:[%s15350_s22 + $0x140] sm:$0xff] %vm8098_vm4, %v7987_v47  ;;  %v8807_v47 = vmax.f32 %v8577_v39, 0.0  ;;  %v9609_v14 = vadd.f32 %v16481_v20, %v18901_v11  ;;  %v8810_v3 = vmax.f32 %v8588_v32, 0.0  ;;  %v18915_v39 = vld [vmem:[#allocation32_spill] sm:$0xff]  ;;  %v18916_v32 = vld [vmem:[#allocation33_spill] sm:$0xff] }
 0x31a   : > { %v6972_v2 = vpop.permute.xlu1 %6971 }
 0x31b   : > { %7121 = vst.msk [vmem:[%s15350_s22 + $0x158] sm:$0xff] %vm7077_vm3, %v6972_v2  ;;  %8937 = vrot.lane.b32.xlu1 %v8804_v8, %s14491_s29  ;;  %v7993_v55 = vpop.permute.xlu0 %7992  ;;  %v8580_v8 = vadd.f32 %v16483_v50, %v18902_v52  ;;  %v9831_v57 = vmax.f32 %v9609_v14, 0.0  ;;  %v18913_v2 = vld [vmem:[#allocation30_spill] sm:$0xff]  ;;  %v9622_v50 = vadd.f32 %v16500_v22, %v18901_v11  ;;  %v9614_v22 = vadd.f32 %v16506_v38, %v18901_v11 }
 0x31c   : > { %8142 = vst.msk [vmem:[%s15350_s22 + $0x158] sm:$0xff] %vm8098_vm4, %v7993_v55  ;;  %v9601_v20 = vadd.f32 %v18913_v2, %v18901_v11  ;;  %v8604_v38 = vadd.f32 %v18916_v32, %v18902_v52  ;;  %v18917_v14 = vld [vmem:[#allocation34_spill] sm:$0xff] }
 0x31d   : > { %9958 = vrot.lane.b32.xlu0 %v9825_v12, %s14490_s28  ;;  %v8808_v12 = vmax.f32 %v8580_v8, 0.0  ;;  %v9832_v19 = vmax.f32 %v9614_v22, 0.0  ;;  %v18919_v22 = vld [vmem:[#allocation36_spill] sm:$0xff]  ;;  %v18921_v32 = vld [vmem:[#allocation38_spill] sm:$0xff] }
 0x31e   : > { %v6968_v37 = vpop.permute.xlu1 %6967  ;;  %v9829_v55 = vmax.f32 %v9601_v20, 0.0  ;;  %v8814_v8 = vmax.f32 %v8604_v38, 0.0  ;;  %v9617_v20 = vadd.f32 %v16522_v15, %v18901_v11  ;;  %v9641_v38 = vadd.f32 %v18921_v32, %v18901_v11 }
 0x31f   : > { %7119 = vst.msk [vmem:[%s15350_s22 + $0x148] sm:$0xff] %vm7077_vm3, %v6968_v37  ;;  %9968 = vrot.lane.b32.xlu1 %v9830_v49, %s14490_s28  ;;  %v7989_v17 = vpop.permute.xlu0 %7988  ;;  %v18914_v49 = vld [vmem:[#allocation31_spill] sm:$0xff]  ;;  %v9834_v37 = vmax.f32 %v9622_v50, 0.0 }
 0x320   : > { %8140 = vst.msk [vmem:[%s15350_s22 + $0x148] sm:$0xff] %vm8098_vm4, %v7989_v17  ;;  %v8601_v16 = vadd.f32 %v18914_v49, %v18902_v52  ;;  %v8593_v17 = vadd.f32 %v18915_v39, %v18902_v52 }
 0x321   : > { %8947 = vrot.lane.b32.xlu0 %v8809_v36, %s14491_s29 }
 0x322   : > { %v7999_v9 = vpop.permute.xlu1 %7998  ;;  %v8813_v51 = vmax.f32 %v8601_v16, 0.0 }
 0x323   : > { %9964 = vrot.lane.b32.xlu1 %v9828_v56, %s14490_s28  ;;  %v6978_v30 = vpop.permute.xlu0 %6977 }
 0x324   : > { %7124 = vst.msk [vmem:[%s15350_s22 + $0x170] sm:$0xff] %vm7077_vm3, %v6978_v30  ;;  %v9625_v30 = vadd.f32 %v18917_v14, %v18901_v11  ;;  %v18922_v14 = vld [vmem:[#allocation39_spill] sm:$0xff] }
 0x325   : > { %8943 = vrot.lane.b32.xlu0 %v8807_v47, %s14491_s29  ;;  %8145 = vst.msk [vmem:[%s15350_s22 + $0x170] sm:$0xff] %vm8098_vm4, %v7999_v9  ;;  %v8811_v47 = vmax.f32 %v8593_v17, 0.0  ;;  %v18920_v17 = vld [vmem:[#allocation37_spill] sm:$0xff] }
 0x326   : > { %v7995_v58 = vpop.permute.xlu1 %7994  ;;  %v9835_v2 = vmax.f32 %v9625_v30, 0.0  ;;  %v8612_v30 = vadd.f32 %v18922_v14, %v18902_v52 }
 0x327   : > { %8949 = vrot.lane.b32.xlu1 %v8810_v3, %s14491_s29  ;;  %v6974_v34 = vpop.permute.xlu0 %6973 }
 0x328   : > { %7122 = vst.msk [vmem:[%s15350_s22 + $0x160] sm:$0xff] %vm7077_vm3, %v6974_v34 }
 0x329   : > { %9970 = vrot.lane.b32.xlu0 %v9831_v57, %s14490_s28  ;;  %8143 = vst.msk [vmem:[%s15350_s22 + $0x160] sm:$0xff] %vm8098_vm4, %v7995_v58  ;;  %v8596_v58 = vadd.f32 %v16517_v21, %v18902_v52  ;;  %v9638_v21 = vadd.f32 %v16536_v35, %v18901_v11  ;;  %v9630_v35 = vadd.f32 %v16547_v44, %v18901_v11 }
 0x32a   : > { %v6980_v54 = vpop.permute.xlu1 %6979  ;;  %v8620_v44 = vadd.f32 %v18920_v17, %v18902_v52  ;;  %v18925_v17 = vld [vmem:[#allocation42_spill] sm:$0xff] }
 0x32b   : > { %7125 = vst.msk [vmem:[%s15350_s22 + $0x178] sm:$0xff] %vm7077_vm3, %v6980_v54  ;;  %8945 = vrot.lane.b32.xlu1 %v8808_v12, %s14491_s29  ;;  %v8001_v45 = vpop.permute.xlu0 %8000  ;;  %v8812_v12 = vmax.f32 %v8596_v58, 0.0  ;;  %v9833_v54 = vmax.f32 %v9617_v20, 0.0  ;;  %v9838_v16 = vmax.f32 %v9638_v21, 0.0  ;;  %v9836_v39 = vmax.f32 %v9630_v35, 0.0  ;;  %v18923_v58 = vld [vmem:[#allocation40_spill] sm:$0xff] }
 0x32c   : > { %8146 = vst.msk [vmem:[%s15350_s22 + $0x178] sm:$0xff] %vm8098_vm4, %v8001_v45  ;;  %v8816_v20 = vmax.f32 %v8612_v30, 0.0  ;;  %v8649_v30 = vadd.f32 %v16614_v0, %v18902_v52 }
 0x32d   : > { %9966 = vrot.lane.b32.xlu0 %v9829_v55, %s14490_s28  ;;  %v18918_v55 = vld [vmem:[#allocation35_spill] sm:$0xff] }
 0x32e   : > { %v6976_v36 = vpop.permute.xlu1 %6975  ;;  %v8617_v15 = vadd.f32 %v18918_v55, %v18902_v52 }
 0x32f   : > { %7123 = vst.msk [vmem:[%s15350_s22 + $0x168] sm:$0xff] %vm7077_vm3, %v6976_v36  ;;  %9976 = vrot.lane.b32.xlu1 %v9834_v37, %s14490_s28  ;;  %v7997_v56 = vpop.permute.xlu0 %7996  ;;  %v8609_v36 = vadd.f32 %v18919_v22, %v18902_v52 }
 0x330   : > { %8144 = vst.msk [vmem:[%s15350_s22 + $0x168] sm:$0xff] %vm8098_vm4, %v7997_v56  ;;  %v8817_v37 = vmax.f32 %v8617_v15, 0.0 }
 0x331   : > { %8955 = vrot.lane.b32.xlu0 %v8813_v51, %s14491_s29 }
 0x332   : > { %v8007_v9 = vpop.permute.xlu1 %8006 }
 0x333   : > { %9972 = vrot.lane.b32.xlu1 %v9832_v19, %s14490_s28  ;;  %v6986_v3 = vpop.permute.xlu0 %6985  ;;  %v8815_v19 = vmax.f32 %v8609_v36, 0.0  ;;  %v9657_v36 = vadd.f32 %v16597_v18, %v18901_v11 }
 0x334   : > { %7128 = vst.msk [vmem:[%s15350_s22 + $0x190] sm:$0xff] %vm7077_vm3, %v6986_v3 }
 0x335   : > { %8951 = vrot.lane.b32.xlu0 %v8811_v47, %s14491_s29  ;;  %8149 = vst.msk [vmem:[%s15350_s22 + $0x190] sm:$0xff] %vm8098_vm4, %v8007_v9  ;;  %v8818_v47 = vmax.f32 %v8620_v44, 0.0  ;;  %v8628_v44 = vadd.f32 %v18925_v17, %v18902_v52 }
 0x336   : > { %v8003_v57 = vpop.permute.xlu1 %8002 }
 0x337   : > { %8957 = vrot.lane.b32.xlu1 %v8814_v8, %s14491_s29  ;;  %v6982_v34 = vpop.permute.xlu0 %6981  ;;  %v9839_v8 = vmax.f32 %v9641_v38, 0.0  ;;  %v8820_v38 = vmax.f32 %v8628_v44, 0.0 }
 0x338   : > { %7126 = vst.msk [vmem:[%s15350_s22 + $0x180] sm:$0xff] %vm7077_vm3, %v6982_v34  ;;  %v9654_v34 = vadd.f32 %v16579_v61, %v18901_v11  ;;  %v9646_v61 = vadd.f32 %v16586_v13, %v18901_v11  ;;  %v8636_v13 = vadd.f32 %v16590_v5, %v18902_v52 }
 0x339   : > { %9978 = vrot.lane.b32.xlu0 %v9835_v2, %s14490_s28  ;;  %8147 = vst.msk [vmem:[%s15350_s22 + $0x180] sm:$0xff] %vm8098_vm4, %v8003_v57  ;;  %v9633_v57 = vadd.f32 %v18923_v58, %v18901_v11 }
 0x33a   : > { %v6988_v50 = vpop.permute.xlu1 %6987  ;;  %v9842_v55 = vmax.f32 %v9654_v34, 0.0 }
 0x33b   : > { %7129 = vst.msk [vmem:[%s15350_s22 + $0x198] sm:$0xff] %vm7077_vm3, %v6988_v50  ;;  %8953 = vrot.lane.b32.xlu1 %v8812_v12, %s14491_s29  ;;  %v8009_v49 = vpop.permute.xlu0 %8008  ;;  %v9837_v21 = vmax.f32 %v9633_v57, 0.0  ;;  %v8633_v50 = vadd.f32 %v16576_v7, %v18902_v52  ;;  %v8825_v57 = vmax.f32 %v8649_v30, 0.0 }
 0x33c   : > { %8150 = vst.msk [vmem:[%s15350_s22 + $0x198] sm:$0xff] %vm8098_vm4, %v8009_v49 }
 0x33d   : > { %9974 = vrot.lane.b32.xlu0 %v9833_v54, %s14490_s28  ;;  %v8821_v49 = vmax.f32 %v8633_v50, 0.0 }
 0x33e   : > { %v6984_v45 = vpop.permute.xlu1 %6983 }
 0x33f   : > { %7127 = vst.msk [vmem:[%s15350_s22 + $0x188] sm:$0xff] %vm7077_vm3, %v6984_v45  ;;  %9984 = vrot.lane.b32.xlu1 %v9838_v16, %s14490_s28  ;;  %v8005_v51 = vpop.permute.xlu0 %8004  ;;  %v18924_v16 = vld [vmem:[#allocation41_spill] sm:$0xff]  ;;  %v9840_v45 = vmax.f32 %v9646_v61, 0.0 }
 0x340   : > { %8148 = vst.msk [vmem:[%s15350_s22 + $0x188] sm:$0xff] %vm8098_vm4, %v8005_v51  ;;  %v8625_v7 = vadd.f32 %v18924_v16, %v18902_v52 }
 0x341   : > { %8963 = vrot.lane.b32.xlu0 %v8817_v37, %s14491_s29 }
 0x342   : > { %v8015_v56 = vpop.permute.xlu1 %8014  ;;  %v8819_v22 = vmax.f32 %v8625_v7, 0.0 }
 0x343   : > { %9980 = vrot.lane.b32.xlu1 %v9836_v39, %s14490_s28  ;;  %v6994_v9 = vpop.permute.xlu0 %6993  ;;  %v8822_v39 = vmax.f32 %v8636_v13, 0.0 }
 0x344   : > { %7132 = vst.msk [vmem:[%s15350_s22 + $0x1b0] sm:$0xff] %vm7077_vm3, %v6994_v9  ;;  %v9670_v9 = vadd.f32 %v16619_v41, %v18901_v11  ;;  %v9662_v41 = vadd.f32 %v16628_v43, %v18901_v11 }
 0x345   : > { %8959 = vrot.lane.b32.xlu0 %v8815_v19, %s14491_s29  ;;  %8153 = vst.msk [vmem:[%s15350_s22 + $0x1b0] sm:$0xff] %vm8098_vm4, %v8015_v56  ;;  %v9843_v56 = vmax.f32 %v9657_v36, 0.0  ;;  %v18926_v19 = vld [vmem:[#allocation43_spill] sm:$0xff] }
 0x346   : > { %v8011_v3 = vpop.permute.xlu1 %8010  ;;  %v9649_v18 = vadd.f32 %v18926_v19, %v18901_v11  ;;  %v9844_v34 = vmax.f32 %v9662_v41, 0.0  ;;  %v18932_v19 = vld [vmem:[#allocation49_spill] sm:$0xff] }
 0x347   : > { %8965 = vrot.lane.b32.xlu1 %v8818_v47, %s14491_s29  ;;  %v6990_v2 = vpop.permute.xlu0 %6989 }
 0x348   : > { %7130 = vst.msk [vmem:[%s15350_s22 + $0x1a0] sm:$0xff] %vm7077_vm3, %v6990_v2  ;;  %v9841_v14 = vmax.f32 %v9649_v18, 0.0  ;;  %v18927_v2 = vld [vmem:[#allocation44_spill] sm:$0xff]  ;;  %v8657_v18 = vadd.f32 %v18932_v19, %v18902_v52 }
 0x349   : > { %9986 = vrot.lane.b32.xlu0 %v9839_v8, %s14490_s28  ;;  %8151 = vst.msk [vmem:[%s15350_s22 + $0x1a0] sm:$0xff] %vm8098_vm4, %v8011_v3  ;;  %v9846_v8 = vmax.f32 %v9670_v9, 0.0  ;;  %v8641_v0 = vadd.f32 %v18927_v2, %v18902_v52 }
 0x34a   : > { %v6996_v12 = vpop.permute.xlu1 %6995 }
 0x34b   : > { %7133 = vst.msk [vmem:[%s15350_s22 + $0x1b8] sm:$0xff] %vm7077_vm3, %v6996_v12  ;;  %8961 = vrot.lane.b32.xlu1 %v8816_v20, %s14491_s29  ;;  %v8017_v54 = vpop.permute.xlu0 %8016  ;;  %v18928_v12 = vld [vmem:[#allocation45_spill] sm:$0xff]  ;;  %v8823_v50 = vmax.f32 %v8641_v0, 0.0 }
 0x34c   : > { %8154 = vst.msk [vmem:[%s15350_s22 + $0x1b8] sm:$0xff] %vm8098_vm4, %v8017_v54  ;;  %v8652_v43 = vadd.f32 %v18928_v12, %v18902_v52  ;;  %v9673_v54 = vadd.f32 %v16639_v27, %v18901_v11 }
 0x34d   : > { %9982 = vrot.lane.b32.xlu0 %v9837_v21, %s14490_s28 }
 0x34e   : > { %v6992_v15 = vpop.permute.xlu1 %6991  ;;  %v8826_v61 = vmax.f32 %v8652_v43, 0.0  ;;  %v9847_v7 = vmax.f32 %v9673_v54, 0.0  ;;  %v8681_v43 = vadd.f32 %v16694_v63, %v18902_v52 }
 0x34f   : > { %7131 = vst.msk [vmem:[%s15350_s22 + $0x1a8] sm:$0xff] %vm7077_vm3, %v6992_v15  ;;  %9992 = vrot.lane.b32.xlu1 %v9842_v55, %s14490_s28  ;;  %v8013_v35 = vpop.permute.xlu0 %8012  ;;  %v18929_v15 = vld [vmem:[#allocation46_spill] sm:$0xff] }
 0x350   : > { %8152 = vst.msk [vmem:[%s15350_s22 + $0x1a8] sm:$0xff] %vm8098_vm4, %v8013_v35  ;;  %v18930_v35 = vld [vmem:[#allocation47_spill] sm:$0xff] }
 0x351   : > { %8971 = vrot.lane.b32.xlu0 %v8821_v49, %s14491_s29  ;;  %v8644_v49 = vadd.f32 %v18929_v15, %v18902_v52  ;;  %v9665_v27 = vadd.f32 %v18930_v35, %v18901_v11 }
 0x352   : > { %v8023_v37 = vpop.permute.xlu1 %8022 }
 0x353   : > { %9988 = vrot.lane.b32.xlu1 %v9840_v45, %s14490_s28  ;;  %v7002_v51 = vpop.permute.xlu0 %7001  ;;  %v8824_v13 = vmax.f32 %v8644_v49, 0.0  ;;  %v9845_v36 = vmax.f32 %v9665_v27, 0.0  ;;  %v18937_v27 = vld [vmem:[#allocation54_spill] sm:$0xff] }
 0x354   : > { %7136 = vst.msk [vmem:[%s15350_s22 + $0x1d0] sm:$0xff] %vm7077_vm3, %v7002_v51  ;;  %v18931_v51 = vld [vmem:[#allocation48_spill] sm:$0xff] }
 0x355   : > { %8967 = vrot.lane.b32.xlu0 %v8819_v22, %s14491_s29  ;;  %8157 = vst.msk [vmem:[%s15350_s22 + $0x1d0] sm:$0xff] %vm8098_vm4, %v8023_v37  ;;  %v9686_v37 = vadd.f32 %v16659_v60, %v18901_v11  ;;  %v9678_v60 = vadd.f32 %v16666_v59, %v18901_v11  ;;  %v8668_v59 = vadd.f32 %v16670_v10, %v18902_v52 }
 0x356   : > { %v8019_v5 = vpop.permute.xlu1 %8018 }
 0x357   : > { %8973 = vrot.lane.b32.xlu1 %v8822_v39, %s14491_s29  ;;  %v6998_v32 = vpop.permute.xlu0 %6997  ;;  %v8665_v39 = vadd.f32 %v18931_v51, %v18902_v52  ;;  %v9850_v44 = vmax.f32 %v9686_v37, 0.0 }
 0x358   : > { %7134 = vst.msk [vmem:[%s15350_s22 + $0x1c0] sm:$0xff] %vm7077_vm3, %v6998_v32 }
 0x359   : > { %9994 = vrot.lane.b32.xlu0 %v9843_v56, %s14490_s28  ;;  %8155 = vst.msk [vmem:[%s15350_s22 + $0x1c0] sm:$0xff] %vm8098_vm4, %v8019_v5  ;;  %v8829_v56 = vmax.f32 %v8665_v39, 0.0 }
 0x35a   : > { %v7004_v47 = vpop.permute.xlu1 %7003 }
 0x35b   : > { %7137 = vst.msk [vmem:[%s15350_s22 + $0x1d8] sm:$0xff] %vm7077_vm3, %v7004_v47  ;;  %8969 = vrot.lane.b32.xlu1 %v8820_v38, %s14491_s29  ;;  %v8025_v3 = vpop.permute.xlu0 %8024  ;;  %v9848_v38 = vmax.f32 %v9678_v60, 0.0  ;;  %v8827_v47 = vmax.f32 %v8657_v18, 0.0 }
 0x35c   : > { %8158 = vst.msk [vmem:[%s15350_s22 + $0x1d8] sm:$0xff] %vm8098_vm4, %v8025_v3  ;;  %v8830_v3 = vmax.f32 %v8668_v59, 0.0 }
 0x35d   : > { %9990 = vrot.lane.b32.xlu0 %v9841_v14, %s14490_s28  ;;  %v9689_v14 = vadd.f32 %v16677_v26, %v18901_v11  ;;  %v18934_v26 = vld [vmem:[#allocation51_spill] sm:$0xff] }
 0x35e   : > { %v7000_v58 = vpop.permute.xlu1 %6999 }
 0x35f   : > { %7135 = vst.msk [vmem:[%s15350_s22 + $0x1c8] sm:$0xff] %vm7077_vm3, %v7000_v58  ;;  %10000 = vrot.lane.b32.xlu1 %v9846_v8, %s14490_s28  ;;  %v8021_v20 = vpop.permute.xlu0 %8020  ;;  %v18933_v8 = vld [vmem:[#allocation50_spill] sm:$0xff]  ;;  %v9851_v58 = vmax.f32 %v9689_v14, 0.0 }
 0x360   : > { %8156 = vst.msk [vmem:[%s15350_s22 + $0x1c8] sm:$0xff] %vm8098_vm4, %v8021_v20  ;;  %v8660_v10 = vadd.f32 %v18933_v8, %v18902_v52  ;;  %v9702_v20 = vadd.f32 %v16699_v33, %v18901_v11  ;;  %v9694_v33 = vadd.f32 %v16708_v24, %v18901_v11 }
 0x361   : > { %8979 = vrot.lane.b32.xlu0 %v8825_v57, %s14491_s29  ;;  %v9681_v57 = vadd.f32 %v18934_v26, %v18901_v11 }
 0x362   : > { %v8031_v21 = vpop.permute.xlu1 %8030  ;;  %v8828_v0 = vmax.f32 %v8660_v10, 0.0  ;;  %v9852_v49 = vmax.f32 %v9694_v33, 0.0 }
 0x363   : > { %9996 = vrot.lane.b32.xlu1 %v9844_v34, %s14490_s28  ;;  %v7010_v55 = vpop.permute.xlu0 %7009  ;;  %v9849_v12 = vmax.f32 %v9681_v57, 0.0  ;;  %v18942_v57 = vld [vmem:[#allocation58_spill] sm:$0xff] }
 0x364   : > { %7140 = vst.msk [vmem:[%s15350_s22 + $0x1f0] sm:$0xff] %vm7077_vm3, %v7010_v55  ;;  %v8833_v55 = vmax.f32 %v8681_v43, 0.0 }
 0x365   : > { %8975 = vrot.lane.b32.xlu0 %v8823_v50, %s14491_s29  ;;  %8161 = vst.msk [vmem:[%s15350_s22 + $0x1f0] sm:$0xff] %vm8098_vm4, %v8031_v21  ;;  %v9854_v50 = vmax.f32 %v9702_v20, 0.0  ;;  %v18943_v20 = vld [vmem:[#allocation59_spill] sm:$0xff] }
 0x366   : > { %v8027_v16 = vpop.permute.xlu1 %8026 }
 0x367   : > { %8981 = vrot.lane.b32.xlu1 %v8826_v61, %s14491_s29  ;;  %v7006_v45 = vpop.permute.xlu0 %7005  ;;  %v18935_v61 = vld [vmem:[#allocation52_spill] sm:$0xff] }
 0x368   : > { %7138 = vst.msk [vmem:[%s15350_s22 + $0x1e0] sm:$0xff] %vm7077_vm3, %v7006_v45  ;;  %v8673_v63 = vadd.f32 %v18935_v61, %v18902_v52  ;;  %v9705_v45 = vadd.f32 %v18937_v27, %v18901_v11  ;;  %v18946_v27 = vld [vmem:[#allocation62_spill] sm:$0xff] }
 0x369   : > { %10002 = vrot.lane.b32.xlu0 %v9847_v7, %s14490_s28  ;;  %8159 = vst.msk [vmem:[%s15350_s22 + $0x1e0] sm:$0xff] %vm8098_vm4, %v8027_v16  ;;  %v18936_v16 = vld [vmem:[#allocation53_spill] sm:$0xff] }
 0x36a   : > { %v7012_v22 = vpop.permute.xlu1 %7011  ;;  %v8684_v24 = vadd.f32 %v18936_v16, %v18902_v52  ;;  %v8831_v35 = vmax.f32 %v8673_v63, 0.0  ;;  %v9855_v39 = vmax.f32 %v9705_v45, 0.0  ;;  %v9734_v63 = vadd.f32 %v16779_v53, %v18901_v11 }
 0x36b   : > { %7141 = vst.msk [vmem:[%s15350_s22 + $0x1f8] sm:$0xff] %vm7077_vm3, %v7012_v22  ;;  %8977 = vrot.lane.b32.xlu1 %v8824_v13, %s14491_s29  ;;  %v8033_v17 = vpop.permute.xlu0 %8032  ;;  %v18938_v22 = vld [vmem:[#allocation55_spill] sm:$0xff]  ;;  %v9726_v45 = vadd.f32 %v18946_v27, %v18901_v11 }
 0x36c   : > { %8162 = vst.msk [vmem:[%s15350_s22 + $0x1f8] sm:$0xff] %vm8098_vm4, %v8033_v17  ;;  %v8834_v37 = vmax.f32 %v8684_v24, 0.0  ;;  %v18939_v17 = vld [vmem:[#allocation56_spill] sm:$0xff]  ;;  %v18945_v24 = vld [vmem:[#allocation6_spill] sm:$0xff] }
 0x36d   : > { %9998 = vrot.lane.b32.xlu0 %v9845_v36, %s14490_s28  ;;  %v8676_v36 = vadd.f32 %v18938_v22, %v18902_v52  ;;  %v18947_v22 = vld [vmem:[#allocation61_spill] sm:$0xff] }
 0x36e   : > { %v7008_v5 = vpop.permute.xlu1 %7007 }
 0x36f   : > { %7139 = vst.msk [vmem:[%s15350_s22 + $0x1e8] sm:$0xff] %vm7077_vm3, %v7008_v5  ;;  %10008 = vrot.lane.b32.xlu1 %v9850_v44, %s14490_s28  ;;  %v8029_v32 = vpop.permute.xlu0 %8028  ;;  %v9697_v44 = vadd.f32 %v18939_v17, %v18901_v11  ;;  %v8832_v5 = vmax.f32 %v8676_v36, 0.0  ;;  %v8705_v36 = vadd.f32 %v18947_v22, %v18902_v52  ;;  %v9860_v17 = vmax.f32 %v9726_v45, 0.0 }
 0x370   : > { %8160 = vst.msk [vmem:[%s15350_s22 + $0x1e8] sm:$0xff] %vm8098_vm4, %v8029_v32  ;;  %v18940_v32 = vld [vmem:[#allocation5_spill] sm:$0xff] }
 0x371   : > { %8987 = vrot.lane.b32.xlu0 %v8829_v56, %s14491_s29  ;;  %v9718_v56 = vadd.f32 %v16739_v40, %v18901_v11  ;;  %v9853_v18 = vmax.f32 %v9697_v44, 0.0  ;;  %v9710_v40 = vadd.f32 %v16746_v62, %v18901_v11  ;;  %v14428_v62 = vld [vmem:[%s18785_s1 + $0x70] sm:$0xff]   ;;  %v18948_v44 = vld [vmem:[#allocation63_spill] sm:$0xff] }
 0x372   : > { %v9953_v9 = vpop.permute.xlu1 %9952  ;;  %14091 = vmatprep.subr.bf16.mxu1 %v14428_v62 }
 0x373   : > { %10004 = vrot.lane.b32.xlu1 %v9848_v38, %s14490_s28  ;;  %v8932_v30 = vpop.permute.xlu0 %8931  ;;  %v8697_v38 = vadd.f32 %v18940_v32, %v18902_v52  ;;  %v9856_v10 = vmax.f32 %v9710_v40, 0.0  ;;  %14092 = vmatpush3.bf16.msra.mxu1 %v14428_v62  ;;  %v14435_v62 = vld [vmem:[%s15080_s10 + $0x728] sm:$0xff]  }
 0x374   : > { %9122 = vst.msk [vmem:[%s15350_s22 + $0x10] sm:$0xff] %vm9119_vm5, %v8932_v30  ;;  %v18941_v30 = vld [vmem:[#allocation57_spill] sm:$0xff] }
 0x375   : > { %8983 = vrot.lane.b32.xlu0 %v8827_v47, %s14491_s29  ;;  %10143 = vst.msk [vmem:[%s15350_s22 + $0x10] sm:$0xff] %vm10140_vm6, %v9953_v9  ;;  %v9858_v9 = vmax.f32 %v9718_v56, 0.0  ;;  %v8837_v14 = vmax.f32 %v8697_v38, 0.0 }
 0x376   : > { %v9949_v41 = vpop.permute.xlu1 %9948 }
 0x377   : > { %8989 = vrot.lane.b32.xlu1 %v8830_v3, %s14491_s29  ;;  %v8928_v2 = vpop.permute.xlu0 %8927  ;;  %v8689_v3 = vadd.f32 %v18941_v30, %v18902_v52  ;;  %v8729_v30 = vadd.f32 %v16816_v4, %v18902_v52 }
 0x378   : > { %9120 = vst.msk [vmem:[%s15350_s22] sm:$0xff] %vm9119_vm5, %v8928_v2  ;;  %v9721_v2 = vadd.f32 %v18942_v57, %v18901_v11 }
 0x379   : > { %10010 = vrot.lane.b32.xlu0 %v9851_v58, %s14490_s28  ;;  %10141 = vst.msk [vmem:[%s15350_s22] sm:$0xff] %vm10140_vm6, %v9949_v41  ;;  %v8700_v41 = vadd.f32 %v16750_v23, %v18902_v52  ;;  %v8835_v26 = vmax.f32 %v8689_v3, 0.0  ;;  %v8845_v4 = vmax.f32 %v8729_v30, 0.0 }
 0x37a   : > { %v8934_v34 = vpop.permute.xlu1 %8933 }
 0x37b   : > { %9123 = vst.msk [vmem:[%s15350_s22 + $0x18] sm:$0xff] %vm9119_vm5, %v8934_v34  ;;  %8985 = vrot.lane.b32.xlu1 %v8828_v0, %s14491_s29  ;;  %v9955_v21 = vpop.permute.xlu0 %9954  ;;  %v8838_v23 = vmax.f32 %v8700_v41, 0.0  ;;  %v8692_v34 = vadd.f32 %v18943_v20, %v18902_v52  ;;  %v8732_v41 = vadd.f32 %v16830_v42, %v18902_v52 }
 0x37c   : > { %10144 = vst.msk [vmem:[%s15350_s22 + $0x18] sm:$0xff] %vm10140_vm6, %v9955_v21  ;;  %v9859_v21 = vmax.f32 %v9721_v2, 0.0 }
 0x37d   : > { %10006 = vrot.lane.b32.xlu0 %v9849_v12, %s14490_s28  ;;  %v14429_v12 = vld [vmem:[%s18785_s1 + $0x78] sm:$0xff]   ;;  %v8836_v61 = vmax.f32 %v8692_v34, 0.0  ;;  %v8846_v2 = vmax.f32 %v8732_v41, 0.0 }
 0x37e   : > { %v8930_v54 = vpop.permute.xlu1 %8929  ;;  %14093 = vmatprep.subr.bf16.mxu1 %v14429_v12 }
 0x37f   : > { %9121 = vst.msk [vmem:[%s15350_s22 + $0x8] sm:$0xff] %vm9119_vm5, %v8930_v54  ;;  %10016 = vrot.lane.b32.xlu1 %v9854_v50, %s14490_s28  ;;  %v9951_v15 = vpop.permute.xlu0 %9950  ;;  %v18944_v50 = vld [vmem:[#allocation60_spill] sm:$0xff]  ;;  %14094 = vmatpush3.bf16.msra.mxu1 %v14429_v12  ;;  %v8745_v12 = vadd.f32 %v16854_v28, %v18902_v52 }
 0x380   : > { %10142 = vst.msk [vmem:[%s15350_s22 + $0x8] sm:$0xff] %vm10140_vm6, %v9951_v15  ;;  %v9713_v33 = vadd.f32 %v18944_v50, %v18901_v11  ;;  %v14431_v15 = vld [vmem:[%s15080_s10 + $0x708] sm:$0xff]  }
 0x381   : > { %8995 = vrot.lane.b32.xlu0 %v8833_v55, %s14491_s29  ;;  %v14430_v55 = vld [vmem:[%s15080_s10 + $0x700] sm:$0xff]   ;;  %v8849_v28 = vmax.f32 %v8745_v12, 0.0 }
 0x382   : > { %v9961_v7 = vpop.permute.xlu1 %9960  ;;  %14095 = vmatprep.mubr.msk.bf16.mxu1 %vm4585_vm0, %v14430_v55  ;;  %v9857_v16 = vmax.f32 %v9713_v33, 0.0  ;;  %v8748_v33 = vadd.f32 %v16872_v6, %v18902_v52 }
 0x383   : > { %10012 = vrot.lane.b32.xlu1 %v9852_v49, %s14490_s28  ;;  %v8940_v13 = vpop.permute.xlu0 %8939  ;;  %14096 = vmatmul.mubr.msk.bf16.vlgmr.msra.gmra.mrb[192].mxu1 %vm4585_vm0, %v14431_v15  ;;  %v17520_v15 = vpop.f32.mrb[192].mxu0 }
 0x384   : > { %9126 = vst.msk [vmem:[%s15350_s22 + $0x30] sm:$0xff] %vm9119_vm5, %v8940_v13 }
 0x385   : > { %8991 = vrot.lane.b32.xlu0 %v8831_v35, %s14491_s29  ;;  %10147 = vst.msk [vmem:[%s15350_s22 + $0x30] sm:$0xff] %vm10140_vm6, %v9961_v7  ;;  %v8713_v7 = vadd.f32 %v18945_v24, %v18902_v52  ;;  %v9862_v35 = vmax.f32 %v9734_v63, 0.0  ;;  %v18954_v24 = vld [vmem:[#allocation72_spill] sm:$0xff] }
 0x386   : > { %v9957_v51 = vpop.permute.xlu1 %9956 }
 0x387   : > { %8997 = vrot.lane.b32.xlu1 %v8834_v37, %s14491_s29  ;;  %v8936_v60 = vpop.permute.xlu0 %8935  ;;  %v8841_v37 = vmax.f32 %v8713_v7, 0.0  ;;  %v8740_v7 = vadd.f32 %v18954_v24, %v18902_v52 }
 0x388   : > { %9124 = vst.msk [vmem:[%s15350_s22 + $0x20] sm:$0xff] %vm9119_vm5, %v8936_v60  ;;  %v8716_v60 = vadd.f32 %v18948_v44, %v18902_v52 }
 0x389   : > { %10018 = vrot.lane.b32.xlu0 %v9855_v39, %s14490_s28  ;;  %10145 = vst.msk [vmem:[%s15350_s22 + $0x20] sm:$0xff] %vm10140_vm6, %v9957_v51  ;;  %v14432_v39 = vld [vmem:[%s15080_s10 + $0x710] sm:$0xff]  }
 0x38a   : > { %v8942_v19 = vpop.permute.xlu1 %8941  ;;  %14099 = vmatprep.mubr.msk.bf16.mxu1 %vm4585_vm0, %v14432_v39  ;;  %v8848_v39 = vmax.f32 %v8740_v7, 0.0 }
 0x38b   : > { %9127 = vst.msk [vmem:[%s15350_s22 + $0x38] sm:$0xff] %vm9119_vm5, %v8942_v19  ;;  %8993 = vrot.lane.b32.xlu1 %v8832_v5, %s14491_s29  ;;  %v9963_v59 = vpop.permute.xlu0 %9962  ;;  %v14433_v5 = vld [vmem:[%s15080_s10 + $0x718] sm:$0xff]   ;;  %v8839_v19 = vmax.f32 %v8705_v36, 0.0 }
 0x38c   : > { %10148 = vst.msk [vmem:[%s15350_s22 + $0x38] sm:$0xff] %vm10140_vm6, %v9963_v59  ;;  %14100 = vmatmul.mubr.msk.bf16.gmra.mrb[196].mxu1 %vm4585_vm0, %v14433_v5  ;;  %v8842_v59 = vmax.f32 %v8716_v60, 0.0 }
 0x38d   : > { %10014 = vrot.lane.b32.xlu0 %v9853_v18, %s14490_s28  ;;  %v18949_v18 = vld [vmem:[#allocation65_spill] sm:$0xff] }
 0x38e   : > { %v8938_v47 = vpop.permute.xlu1 %8937  ;;  %v9729_v32 = vadd.f32 %v18949_v18, %v18901_v11 }
 0x38f   : > { %9125 = vst.msk [vmem:[%s15350_s22 + $0x28] sm:$0xff] %vm9119_vm5, %v8938_v47  ;;  %10024 = vrot.lane.b32.xlu1 %v9858_v9, %s14490_s28  ;;  %v9959_v8 = vpop.permute.xlu0 %9958  ;;  %v18950_v9 = vld [vmem:[#allocation64_spill] sm:$0xff] }
 0x390   : > { %10146 = vst.msk [vmem:[%s15350_s22 + $0x28] sm:$0xff] %vm10140_vm6, %v9959_v8  ;;  %v8708_v40 = vadd.f32 %v18950_v9, %v18902_v52  ;;  %v14434_v8 = vld [vmem:[%s15080_s10 + $0x720] sm:$0xff]   ;;  %v18956_v9 = vld [vmem:[#allocation76_spill] sm:$0xff] }
 0x391   : > { %9003 = vrot.lane.b32.xlu0 %v8837_v14, %s14491_s29  ;;  %v9861_v14 = vmax.f32 %v9729_v32, 0.0  ;;  %14103 = vmatprep.mubr.msk.bf16.mxu1 %vm4585_vm0, %v14434_v8  ;;  %v8777_v8 = vadd.f32 %v16934_v29, %v18902_v52 }
 0x392   : > { %v9969_v58 = vpop.permute.xlu1 %9968 }
 0x393   : > { %10020 = vrot.lane.b32.xlu1 %v9856_v10, %s14490_s28  ;;  %v8948_v0 = vpop.permute.xlu0 %8947  ;;  %v8840_v10 = vmax.f32 %v8708_v40, 0.0  ;;  %v8756_v40 = vadd.f32 %v18956_v9, %v18902_v52 }
 0x394   : > { %9130 = vst.msk [vmem:[%s15350_s22 + $0x50] sm:$0xff] %vm9119_vm5, %v8948_v0  ;;  %14104 = vmatmul.mubr.msk.bf16.gmra.mrb[200].mxu1 %vm4585_vm0, %v14435_v62  ;;  %v18952_v0 = vld [vmem:[#allocation68_spill] sm:$0xff] }
 0x395   : > { %8999 = vrot.lane.b32.xlu0 %v8835_v26, %s14491_s29  ;;  %10151 = vst.msk [vmem:[%s15350_s22 + $0x50] sm:$0xff] %vm10140_vm6, %v9969_v58  ;;  %v18951_v26 = vld [vmem:[#allocation9_spill] sm:$0xff] }
 0x396   : > { %v9965_v43 = vpop.permute.xlu1 %9964  ;;  %v8721_v57 = vadd.f32 %v18951_v26, %v18902_v52  ;;  %v18957_v26 = vld [vmem:[#allocation79_spill] sm:$0xff] }
 0x397   : > { %9005 = vrot.lane.b32.xlu1 %v8838_v23, %s14491_s29  ;;  %v8944_v54 = vpop.permute.xlu0 %8943  ;;  %v8724_v23 = vadd.f32 %v18952_v0, %v18902_v52 }
 0x398   : > { %9128 = vst.msk [vmem:[%s15350_s22 + $0x40] sm:$0xff] %vm9119_vm5, %v8944_v54  ;;  %v8843_v34 = vmax.f32 %v8721_v57, 0.0  ;;  %v14437_v54 = vld [vmem:[%s15080_s10 + $0x738] sm:$0xff]   ;;  %v8780_v57 = vadd.f32 %v18957_v26, %v18902_v52 }
 0x399   : > { %10026 = vrot.lane.b32.xlu0 %v9859_v21, %s14490_s28  ;;  %10149 = vst.msk [vmem:[%s15350_s22 + $0x40] sm:$0xff] %vm10140_vm6, %v9965_v43  ;;  %v14436_v21 = vld [vmem:[%s15080_s10 + $0x730] sm:$0xff]   ;;  %v8844_v50 = vmax.f32 %v8724_v23, 0.0  ;;  %v8857_v23 = vmax.f32 %v8777_v8, 0.0 }
 0x39a   : > { %v8950_v49 = vpop.permute.xlu1 %8949  ;;  %14107 = vmatprep.mubr.msk.bf16.mxu1 %vm4585_vm0, %v14436_v21 }
 0x39b   : > { %9131 = vst.msk [vmem:[%s15350_s22 + $0x58] sm:$0xff] %vm9119_vm5, %v8950_v49  ;;  %9001 = vrot.lane.b32.xlu1 %v8836_v61, %s14491_s29  ;;  %v9971_v53 = vpop.permute.xlu0 %9970  ;;  %v18953_v61 = vld [vmem:[#allocation11_spill] sm:$0xff]  ;;  %v17523_v49 = vpop.f32.mrb[193].mxu0 }
 0x39c   : > { %10152 = vst.msk [vmem:[%s15350_s22 + $0x58] sm:$0xff] %vm10140_vm6, %v9971_v53  ;;  %v8737_v63 = vadd.f32 %v18953_v61, %v18902_v52  ;;  %14108 = vmatmul.mubr.msk.bf16.gmra.mrb[204].mxu1 %vm4585_vm0, %v14437_v54  ;;  %v17530_v53 = vpop.f32.mrb[194].mxu0 }
 0x39d   : > { %10022 = vrot.lane.b32.xlu0 %v9857_v16, %s14490_s28  ;;  %v8850_v16 = vmax.f32 %v8748_v33, 0.0  ;;  %v17534_v27 = vpop.f32.mrb[195].mxu0  ;;  %v18959_v33 = vld [vmem:[#allocation81_spill] sm:$0xff] }
 0x39e   : > { %v8946_v13 = vpop.permute.xlu1 %8945  ;;  %v8847_v45 = vmax.f32 %v8737_v63, 0.0  ;;  %v8772_v54 = vadd.f32 %v18959_v33, %v18902_v52 }
 0x39f   : > { %9129 = vst.msk [vmem:[%s15350_s22 + $0x48] sm:$0xff] %vm9119_vm5, %v8946_v13  ;;  %10032 = vrot.lane.b32.xlu1 %v9862_v35, %s14490_s28  ;;  %v9967_v51 = vpop.permute.xlu0 %9966  ;;  %v8761_v13 = vadd.f32 %v16896_v46, %v18902_v52  ;;  %v14439_v46 = vld [vmem:[%s15080_s10 + $0x748] sm:$0xff]  }
 0x3a0   : > { %10150 = vst.msk [vmem:[%s15350_s22 + $0x48] sm:$0xff] %vm10140_vm6, %v9967_v51  ;;  %v14438_v51 = vld [vmem:[%s15080_s10 + $0x740] sm:$0xff]  }
 0x3a1   : > { %9011 = vrot.lane.b32.xlu0 %v8841_v37, %s14491_s29  ;;  %v17539_v37 = vpop.f32.mrb[196].mxu0  ;;  %14111 = vmatprep.mubr.msk.bf16.mxu1 %vm4585_vm0, %v14438_v51 }
 0x3a2   : > { %v9977_v56 = vpop.permute.xlu1 %9976  ;;  %v17541_v36 = vpop.f32.mrb[197].mxu0 }
 0x3a3   : > { %10028 = vrot.lane.b32.xlu1 %v9860_v17, %s14490_s28  ;;  %v8956_v38 = vpop.permute.xlu0 %8955  ;;  %v8764_v17 = vadd.f32 %v16910_v25, %v18902_v52  ;;  %v17549_v44 = vpop.f32.mrb[198].mxu0 }
 0x3a4   : > { %9134 = vst.msk [vmem:[%s15350_s22 + $0x70] sm:$0xff] %vm9119_vm5, %v8956_v38  ;;  %v17554_v5 = vpop.f32.mrb[199].mxu0  ;;  %14112 = vmatmul.mubr.msk.bf16.gmra.mrb[208].mxu1 %vm4585_vm0, %v14439_v46  ;;  %v8785_v46 = vadd.f32 %v16984_v48, %v18902_v52 }
 0x3a5   : > { %9007 = vrot.lane.b32.xlu0 %v8839_v19, %s14491_s29  ;;  %10155 = vst.msk [vmem:[%s15350_s22 + $0x70] sm:$0xff] %vm10140_vm6, %v9977_v56  ;;  %v8853_v56 = vmax.f32 %v8761_v13, 0.0  ;;  %v18955_v19 = vld [vmem:[#allocation13_spill] sm:$0xff]  ;;  %v17562_v25 = vpop.f32.mrb[200].mxu0  ;;  %v8796_v13 = vadd.f32 %v16990_v1, %v18902_v52 }
 0x3a6   : > { %v9973_v47 = vpop.permute.xlu1 %9972  ;;  %v8753_v18 = vadd.f32 %v18955_v19, %v18902_v52  ;;  %v17565_v38 = vpop.f32.mrb[201].mxu0 }
 0x3a7   : > { %9013 = vrot.lane.b32.xlu1 %v8842_v59, %s14491_s29  ;;  %v8952_v3 = vpop.permute.xlu0 %8951  ;;  %v8854_v59 = vmax.f32 %v8764_v17, 0.0  ;;  %v8862_v19 = vmax.f32 %v8796_v13, 0.0 }
 0x3a8   : > { %9132 = vst.msk [vmem:[%s15350_s22 + $0x60] sm:$0xff] %vm9119_vm5, %v8952_v3  ;;  %v8851_v3 = vmax.f32 %v8753_v18, 0.0  ;;  %v18960_v18 = vld [vmem:[#allocation83_spill] sm:$0xff] }
 0x3a9   : > { %10030 = vrot.lane.b32.xlu0 %v9861_v14, %s14490_s28  ;;  %10153 = vst.msk [vmem:[%s15350_s22 + $0x60] sm:$0xff] %vm10140_vm6, %v9973_v47  ;;  %v17572_v47 = vpop.f32.mrb[202].mxu0 }
 0x3aa   : > { %v8958_v58 = vpop.permute.xlu1 %8957  ;;  %v17574_v30 = vpop.f32.mrb[203].mxu0 }
 0x3ab   : > { %9135 = vst.msk [vmem:[%s15350_s22 + $0x78] sm:$0xff] %vm9119_vm5, %v8958_v58  ;;  %9009 = vrot.lane.b32.xlu1 %v8840_v10, %s14491_s29  ;;  %v9979_v42 = vpop.permute.xlu0 %9978  ;;  %v17581_v10 = vpop.f32.mrb[204].mxu0  ;;  %v14440_v58 = vld [vmem:[%s15080_s10 + $0x750] sm:$0xff]  }
 0x3ac   : > { %10156 = vst.msk [vmem:[%s15350_s22 + $0x78] sm:$0xff] %vm10140_vm6, %v9979_v42  ;;  %v17583_v62 = vpop.f32.mrb[205].mxu0  ;;  %v14441_v42 = vld [vmem:[%s15080_s10 + $0x758] sm:$0xff]   ;;  %14115 = vmatprep.mubr.msk.bf16.mxu1 %vm4585_vm0, %v14440_v58  ;;  %v14444_v58 = vld [vmem:[%s15080_s10 + $0x770] sm:$0xff]  }
 0x3ad   : > { %9019 = vrot.lane.b32.xlu0 %v8845_v4, %s14491_s29  ;;  %v8852_v4 = vmax.f32 %v8756_v40, 0.0  ;;  %v17591_v29 = vpop.f32.mrb[206].mxu0  ;;  %14116 = vmatmul.mubr.msk.bf16.gmra.mrb[212].mxu1 %vm4585_vm0, %v14441_v42  ;;  %v18961_v40 = vld [vmem:[#allocation8_spill] sm:$0xff] }
 0x3ae   : > { %v8954_v20 = vpop.permute.xlu1 %8953  ;;  %v17594_v0 = vpop.f32.mrb[207].mxu0 }
 0x3af   : > { %9133 = vst.msk [vmem:[%s15350_s22 + $0x68] sm:$0xff] %vm9119_vm5, %v8954_v20  ;;  %9021 = vrot.lane.b32.xlu1 %v8846_v2, %s14491_s29  ;;  %v9975_v43 = vpop.permute.xlu0 %9974  ;;  %v18958_v20 = vld [vmem:[#allocation15_spill] sm:$0xff]  ;;  %v17600_v12 = vpop.f32.mrb[208].mxu0 }
 0x3b0   : > { %10154 = vst.msk [vmem:[%s15350_s22 + $0x68] sm:$0xff] %vm10140_vm6, %v9975_v43  ;;  %v17603_v21 = vpop.f32.mrb[209].mxu0 }
 0x3b1   : > { %9015 = vrot.lane.b32.xlu0 %v8843_v34, %s14491_s29  ;;  %v8769_v34 = vadd.f32 %v18958_v20, %v18902_v52 }
 0x3b2   : > { %v9985_v55 = vpop.permute.xlu1 %9984 }
 0x3b3   : > { %9017 = vrot.lane.b32.xlu1 %v8844_v50, %s14491_s29  ;;  %v8964_v6 = vpop.permute.xlu0 %8963  ;;  %v8858_v50 = vmax.f32 %v8780_v57, 0.0  ;;  %v8855_v63 = vmax.f32 %v8769_v34, 0.0 }
 0x3b4   : > { %9138 = vst.msk [vmem:[%s15350_s22 + $0x90] sm:$0xff] %vm9119_vm5, %v8964_v6  ;;  %v8793_v6 = vadd.f32 %v16976_v31, %v18902_v52  ;;  %v14443_v31 = vld [vmem:[%s15080_s10 + $0x768] sm:$0xff]  }
 0x3b5   : > { %9027 = vrot.lane.b32.xlu0 %v8849_v28, %s14491_s29  ;;  %10159 = vst.msk [vmem:[%s15350_s22 + $0x90] sm:$0xff] %vm10140_vm6, %v9985_v55  ;;  %v17610_v55 = vpop.f32.mrb[210].mxu0 }
 0x3b6   : > { %v9981_v35 = vpop.permute.xlu1 %9980  ;;  %v17614_v61 = vpop.f32.mrb[211].mxu0  ;;  %v8861_v17 = vmax.f32 %v8793_v6, 0.0 }
 0x3b7   : > { %9029 = vrot.lane.b32.xlu1 %v8850_v16, %s14491_s29  ;;  %v8960_v22 = vpop.permute.xlu0 %8959  ;;  %v17619_v16 = vpop.f32.mrb[212].mxu0 }
 0x3b8   : > { %9136 = vst.msk [vmem:[%s15350_s22 + $0x80] sm:$0xff] %vm9119_vm5, %v8960_v22  ;;  %v17621_v7 = vpop.f32.mrb[213].mxu0 }
 0x3b9   : > { %9023 = vrot.lane.b32.xlu0 %v8847_v45, %s14491_s29  ;;  %10157 = vst.msk [vmem:[%s15350_s22 + $0x80] sm:$0xff] %vm10140_vm6, %v9981_v35  ;;  %v14442_v35 = vld [vmem:[%s15080_s10 + $0x760] sm:$0xff]   ;;  %v8856_v45 = vmax.f32 %v8772_v54, 0.0  ;;  %v17629_v22 = vpop.f32.mrb[214].mxu0 }
 0x3ba   : > { %v8966_v60 = vpop.permute.xlu1 %8965  ;;  %14119 = vmatprep.mubr.msk.bf16.mxu1 %vm4585_vm0, %v14442_v35 }
 0x3bb   : > { %9139 = vst.msk [vmem:[%s15350_s22 + $0x98] sm:$0xff] %vm9119_vm5, %v8966_v60  ;;  %9025 = vrot.lane.b32.xlu1 %v8848_v39, %s14491_s29  ;;  %v9987_v32 = vpop.permute.xlu0 %9986  ;;  %v17634_v39 = vpop.f32.mrb[215].mxu0  ;;  %14120 = vmatmul.mubr.msk.bf16.gmra.mrb[216].mxu1 %vm4585_vm0, %v14443_v31  ;;  %v18965_v31 = vld [vmem:[#allocation67_spill] sm:$0xff] }
 0x3bc   : > { %10160 = vst.msk [vmem:[%s15350_s22 + $0x98] sm:$0xff] %vm10140_vm6, %v9987_v32  ;;  %v17642_v1 = vpop.f32.mrb[216].mxu0  ;;  %v8788_v32 = vadd.f32 %v18960_v18, %v18902_v52  ;;  %14123 = vmatprep.mubr.msk.bf16.mxu1 %vm4585_vm0, %v14444_v58  ;;  %v14446_v18 = vld [vmem:[%s15080_s10 + $0x780] sm:$0xff]  }
 0x3bd   : > { %9035 = vrot.lane.b32.xlu0 %v8853_v56, %s14491_s29  ;;  %v17645_v56 = vpop.f32.mrb[217].mxu0 }
 0x3be   : > { %v8962_v14 = vpop.permute.xlu1 %8961  ;;  %v17652_v48 = vpop.f32.mrb[218].mxu0  ;;  %v8860_v57 = vmax.f32 %v8788_v32, 0.0 }
 0x3bf   : > { %9137 = vst.msk [vmem:[%s15350_s22 + $0x88] sm:$0xff] %vm9119_vm5, %v8962_v14  ;;  %9037 = vrot.lane.b32.xlu1 %v8854_v59, %s14491_s29  ;;  %v9983_v41 = vpop.permute.xlu0 %9982  ;;  %v17654_v9 = vpop.f32.mrb[219].mxu0  ;;  %v9737_v14 = vadd.f32 %v18961_v40, %v18901_v11 }
 0x3c0   : > { %10158 = vst.msk [vmem:[%s15350_s22 + $0x88] sm:$0xff] %vm10140_vm6, %v9983_v41  ;;  %v17661_v52 = vpop.f32.mrb[220].mxu0 }
 0x3c1   : > { %9031 = vrot.lane.b32.xlu0 %v8851_v3, %s14491_s29  ;;  %v8859_v3 = vmax.f32 %v8785_v46, 0.0  ;;  %v17663_v41 = vpop.f32.mrb[221].mxu0  ;;  %v9863_v34 = vmax.f32 %v9737_v14, 0.0 }
 0x3c2   : > { %v9993_v2 = vpop.permute.xlu1 %9992  ;;  %v17671_v42 = vpop.f32.mrb[222].mxu0 }
 0x3c3   : > { %9033 = vrot.lane.b32.xlu1 %v8852_v4, %s14491_s29  ;;  %v8972_v43 = vpop.permute.xlu0 %8971  ;;  %v18962_v4 = vld [vmem:[#allocation66_spill] sm:$0xff]  ;;  %v17674_v20 = vpop.f32.mrb[223].mxu0 }
 0x3c4   : > { %9142 = vst.msk [vmem:[%s15350_s22 + $0xb0] sm:$0xff] %vm9119_vm5, %v8972_v43  ;;  %v9742_v26 = vadd.f32 %v18962_v4, %v18901_v11  ;;  %v18963_v43 = vld [vmem:[#allocation69_spill] sm:$0xff]  ;;  %v17680_v33 = vpop.f32.mrb[224].mxu0 }
 0x3c5   : > { %9043 = vrot.lane.b32.xlu0 %v8857_v23, %s14491_s29  ;;  %10163 = vst.msk [vmem:[%s15350_s22 + $0xb0] sm:$0xff] %vm10140_vm6, %v9993_v2  ;;  %v14445_v2 = vld [vmem:[%s15080_s10 + $0x778] sm:$0xff]  }
 0x3c6   : > { %v9989_v28 = vpop.permute.xlu1 %9988  ;;  %14124 = vmatmul.mubr.msk.bf16.gmra.mrb[220].mxu1 %vm4585_vm0, %v14445_v2 }
 0x3c7   : > { %9045 = vrot.lane.b32.xlu1 %v8858_v50, %s14491_s29  ;;  %v8968_v24 = vpop.permute.xlu0 %8967  ;;  %v9745_v50 = vadd.f32 %v18963_v43, %v18901_v11  ;;  %14127 = vmatprep.mubr.msk.bf16.mxu1 %vm4585_vm0, %v14446_v18  ;;  %v18968_v43 = vld [vmem:[#allocation10_spill] sm:$0xff] }
 0x3c8   : > { %9140 = vst.msk [vmem:[%s15350_s22 + $0xa0] sm:$0xff] %vm9119_vm5, %v8968_v24  ;;  %v9864_v24 = vmax.f32 %v9742_v26, 0.0  ;;  %v18967_v26 = vld [vmem:[#allocation73_spill] sm:$0xff] }
 0x3c9   : > { %9039 = vrot.lane.b32.xlu0 %v8855_v63, %s14491_s29  ;;  %10161 = vst.msk [vmem:[%s15350_s22 + $0xa0] sm:$0xff] %vm10140_vm6, %v9989_v28  ;;  %v17683_v28 = vpop.f32.mrb[225].mxu0  ;;  %v18964_v63 = vld [vmem:[#allocation7_spill] sm:$0xff] }
 0x3ca   : > { %v8974_v51 = vpop.permute.xlu1 %8973  ;;  %v9750_v6 = vadd.f32 %v18964_v63, %v18901_v11  ;;  %v17690_v35 = vpop.f32.mrb[226].mxu0 }
 0x3cb   : > { %9143 = vst.msk [vmem:[%s15350_s22 + $0xb8] sm:$0xff] %vm9119_vm5, %v8974_v51  ;;  %9041 = vrot.lane.b32.xlu1 %v8856_v45, %s14491_s29  ;;  %v9995_v60 = vpop.permute.xlu0 %9994  ;;  %v17694_v13 = vpop.f32.mrb[227].mxu0  ;;  %v9753_v51 = vadd.f32 %v18965_v31, %v18901_v11 }
 0x3cc   : > { %10164 = vst.msk [vmem:[%s15350_s22 + $0xb8] sm:$0xff] %vm10140_vm6, %v9995_v60  ;;  %v17699_v46 = vpop.f32.mrb[228].mxu0  ;;  %v9866_v32 = vmax.f32 %v9750_v6, 0.0 }
 0x3cd   : > { %9051 = vrot.lane.b32.xlu0 %v8861_v17, %s14491_s29  ;;  %v9865_v17 = vmax.f32 %v9745_v50, 0.0  ;;  %v9867_v4 = vmax.f32 %v9753_v51, 0.0  ;;  %v9766_v50 = vadd.f32 %v18968_v43, %v18901_v11  ;;  %v18971_v43 = vld [vmem:[#allocation77_spill] sm:$0xff] }
 0x3ce   : > { %v8970_v59 = vpop.permute.xlu1 %8969 }
 0x3cf   : > { %9141 = vst.msk [vmem:[%s15350_s22 + $0xa8] sm:$0xff] %vm9119_vm5, %v8970_v59  ;;  %9053 = vrot.lane.b32.xlu1 %v8862_v19, %s14491_s29  ;;  %v9991_v8 = vpop.permute.xlu0 %9990  ;;  %v17701_v19 = vpop.f32.mrb[229].mxu0  ;;  %v18966_v59 = vld [vmem:[#allocation70_spill] sm:$0xff] }
 0x3d0   : > { %10162 = vst.msk [vmem:[%s15350_s22 + $0xa8] sm:$0xff] %vm10140_vm6, %v9991_v8  ;;  %v9758_v40 = vadd.f32 %v18966_v59, %v18901_v11  ;;  %v17709_v14 = vpop.f32.mrb[230].mxu0  ;;  %v9870_v59 = vmax.f32 %v9766_v50, 0.0  ;;  %v9777_v50 = vadd.f32 %v18971_v43, %v18901_v11 }
 0x3d1   : > { %9047 = vrot.lane.b32.xlu0 %v8859_v3, %s14491_s29  ;;  %v14447_v3 = vld [vmem:[%s15080_s10 + $0x788] sm:$0xff]   ;;  %v17714_v58 = vpop.f32.mrb[231].mxu0 }
 0x3d2   : > { %v10001_v23 = vpop.permute.xlu1 %10000  ;;  %v17722_v2 = vpop.f32.mrb[232].mxu0  ;;  %14128 = vmatmul.mubr.msk.bf16.gmra.mrb[224].mxu1 %vm4585_vm0, %v14447_v3 }
 0x3d3   : > { %9049 = vrot.lane.b32.xlu1 %v8860_v57, %s14491_s29  ;;  %v8980_v54 = vpop.permute.xlu0 %8979  ;;  %v9761_v57 = vadd.f32 %v18967_v26, %v18901_v11 }
 0x3d4   : > { %9146 = vst.msk [vmem:[%s15350_s22 + $0xd0] sm:$0xff] %vm9119_vm5, %v8980_v54  ;;  %v9868_v54 = vmax.f32 %v9758_v40, 0.0  ;;  %v18970_v40 = vld [vmem:[#allocation74_spill] sm:$0xff] }
 0x3d5   : > { %10034 = vrot.lane.b32.xlu0 %v9863_v34, %s14490_s28  ;;  %10167 = vst.msk [vmem:[%s15350_s22 + $0xd0] sm:$0xff] %vm10140_vm6, %v10001_v23  ;;  %v17725_v34 = vpop.f32.mrb[233].mxu0  ;;  %v9869_v51 = vmax.f32 %v9761_v57, 0.0  ;;  %v9774_v3 = vadd.f32 %v18970_v40, %v18901_v11 }
 0x3d6   : > { %v9997_v45 = vpop.permute.xlu1 %9996  ;;  %v17732_v63 = vpop.f32.mrb[234].mxu0 }
 0x3d7   : > { %10036 = vrot.lane.b32.xlu1 %v9864_v24, %s14490_s28  ;;  %v8976_v60 = vpop.permute.xlu0 %8975  ;;  %v17734_v24 = vpop.f32.mrb[235].mxu0  ;;  %v9872_v40 = vmax.f32 %v9774_v3, 0.0 }
 0x3d8   : > { %9144 = vst.msk [vmem:[%s15350_s22 + $0xc0] sm:$0xff] %vm9119_vm5, %v8976_v60 }
 0x3d9   : > { %10038 = vrot.lane.b32.xlu0 %v9865_v17, %s14490_s28  ;;  %10165 = vst.msk [vmem:[%s15350_s22 + $0xc0] sm:$0xff] %vm10140_vm6, %v9997_v45  ;;  %v18969_v45 = vld [vmem:[#allocation71_spill] sm:$0xff]  ;;  %v17741_v17 = vpop.f32.mrb[236].mxu0 }
 0x3da   : > { %v8982_v8 = vpop.permute.xlu1 %8981  ;;  %v9769_v31 = vadd.f32 %v18969_v45, %v18901_v11  ;;  %v17743_v18 = vpop.f32.mrb[237].mxu0 }
 0x3db   : > { %9147 = vst.msk [vmem:[%s15350_s22 + $0xd8] sm:$0xff] %vm9119_vm5, %v8982_v8  ;;  %10040 = vrot.lane.b32.xlu1 %v9866_v32, %s14490_s28  ;;  %v10003_v23 = vpop.permute.xlu0 %10002  ;;  %v14448_v32 = vld [vmem:[%s15080_s10 + $0x790] sm:$0xff]   ;;  %v17751_v8 = vpop.f32.mrb[238].mxu0 }
 0x3dc   : > { %10168 = vst.msk [vmem:[%s15350_s22 + $0xd8] sm:$0xff] %vm10140_vm6, %v10003_v23  ;;  %v17754_v57 = vpop.f32.mrb[239].mxu0  ;;  %14131 = vmatprep.mubr.msk.bf16.mxu1 %vm4585_vm0, %v14448_v32  ;;  %v9871_v23 = vmax.f32 %v9769_v31, 0.0 }
 0x3dd   : > { %10042 = vrot.lane.b32.xlu0 %v9867_v4, %s14490_s28  ;;  %v14449_v4 = vld [vmem:[%s15080_s10 + $0x798] sm:$0xff]  }
 0x3de   : > { %v8978_v6 = vpop.permute.xlu1 %8977  ;;  %14132 = vmatmul.mubr.msk.bf16.gmra.mrb[228].mxu1 %vm4585_vm0, %v14449_v4  ;;  %v18977_v4 = vld [vmem:[#allocation75_spill] sm:$0xff] }
 0x3df   : > { %9145 = vst.msk [vmem:[%s15350_s22 + $0xc8] sm:$0xff] %vm9119_vm5, %v8978_v6  ;;  %10044 = vrot.lane.b32.xlu1 %v9868_v54, %s14490_s28  ;;  %v9999_v60 = vpop.permute.xlu0 %9998  ;;  %v17760_v54 = vpop.f32.mrb[240].mxu0  ;;  %v9785_v43 = vadd.f32 %v18977_v4, %v18901_v11 }
 0x3e0   : > { %10166 = vst.msk [vmem:[%s15350_s22 + $0xc8] sm:$0xff] %vm10140_vm6, %v9999_v60  ;;  %18972 = vst [vmem:[#allocation19_spill] sm:$0xff] %v17760_v54  ;;  %v17763_v45 = vpop.f32.mrb[241].mxu0  ;;  %v9873_v54 = vmax.f32 %v9777_v50, 0.0  ;;  %v14451_v50 = vld [vmem:[%s15080_s10 + $0x7a8] sm:$0xff]  }
 0x3e1   : > { %10046 = vrot.lane.b32.xlu0 %v9869_v51, %s14490_s28  ;;  %18973 = vst [vmem:[#allocation4_spill] sm:$0xff] %v17763_v45  ;;  %v18974_v51 = vld [vmem:[#allocation12_spill] sm:$0xff]  ;;  %v17770_v31 = vpop.f32.mrb[242].mxu0 }
 0x3e2   : > { %v10009_v26 = vpop.permute.xlu1 %10008  ;;  %v9782_v60 = vadd.f32 %v18974_v51, %v18901_v11  ;;  %18975 = vst [vmem:[#allocation3_spill] sm:$0xff] %v17770_v31  ;;  %v14450_v51 = vld [vmem:[%s15080_s10 + $0x7a0] sm:$0xff]  }
 0x3e3   : > { %10048 = vrot.lane.b32.xlu1 %v9870_v59, %s14490_s28  ;;  %v8988_v6 = vpop.permute.xlu0 %8987  ;;  %v17774_v59 = vpop.f32.mrb[243].mxu0  ;;  %14135 = vmatprep.mubr.msk.bf16.mxu1 %vm4585_vm0, %v14450_v51 }
 0x3e4   : > { %9150 = vst.msk [vmem:[%s15350_s22 + $0xf0] sm:$0xff] %vm9119_vm5, %v8988_v6  ;;  %18976 = vst [vmem:[#allocation21_spill] sm:$0xff] %v17774_v59  ;;  %v17779_v3 = vpop.f32.mrb[244].mxu0  ;;  %v9874_v31 = vmax.f32 %v9782_v60, 0.0  ;;  %v18983_v60 = vld [vmem:[#allocation82_spill] sm:$0xff] }
 0x3e5   : > { %10050 = vrot.lane.b32.xlu0 %v9871_v23, %s14490_s28  ;;  %10171 = vst.msk [vmem:[%s15350_s22 + $0xf0] sm:$0xff] %vm10140_vm6, %v10009_v26  ;;  %18978 = vst [vmem:[#allocation20_spill] sm:$0xff] %v17779_v3  ;;  %v17781_v23 = vpop.f32.mrb[245].mxu0  ;;  %v18980_v26 = vld [vmem:[#allocation78_spill] sm:$0xff]  ;;  %v9875_v3 = vmax.f32 %v9785_v43, 0.0 }
 0x3e6   : > { %v10005_v32 = vpop.permute.xlu1 %10004  ;;  %18979 = vst [vmem:[#allocation22_spill] sm:$0xff] %v17781_v23  ;;  %v9790_v45 = vadd.f32 %v18980_v26, %v18901_v11  ;;  %v17789_v59 = vpop.f32.mrb[246].mxu0  ;;  %v9793_v23 = vadd.f32 %v18983_v60, %v18901_v11  ;;  %14136 = vmatmul.mubr.msk.bf16.gmra.mrb[232].mxu1 %vm4585_vm0, %v14451_v50  ;;  %v18986_v26 = vld [vmem:[#allocation14_spill] sm:$0xff]  ;;  %v18988_v50 = vld [vmem:[#allocation80_spill] sm:$0xff] }
 0x3e7   : > { %10052 = vrot.lane.b32.xlu1 %v9872_v40, %s14490_s28  ;;  %v8984_v6 = vpop.permute.xlu0 %8983  ;;  %18981 = vst [vmem:[#allocation23_spill] sm:$0xff] %v17789_v59  ;;  %v17794_v4 = vpop.f32.mrb[247].mxu0  ;;  %v9798_v51 = vadd.f32 %v18986_v26, %v18901_v11 }
 0x3e8   : > { %9148 = vst.msk [vmem:[%s15350_s22 + $0xe0] sm:$0xff] %vm9119_vm5, %v8984_v6  ;;  %18982 = vst [vmem:[#allocation24_spill] sm:$0xff] %v17794_v4  ;;  %v9876_v43 = vmax.f32 %v9790_v45, 0.0  ;;  %v9877_v59 = vmax.f32 %v9793_v23, 0.0 }
 0x3e9   : > { %10054 = vrot.lane.b32.xlu0 %v9873_v54, %s14490_s28  ;;  %10169 = vst.msk [vmem:[%s15350_s22 + $0xe0] sm:$0xff] %vm10140_vm6, %v10005_v32  ;;  %v17802_v54 = vpop.f32.mrb[248].mxu0 }
 0x3ea   : > { %v8990_v40 = vpop.permute.xlu1 %8989  ;;  %18984 = vst [vmem:[#allocation25_spill] sm:$0xff] %v17802_v54  ;;  %v17805_v32 = vpop.f32.mrb[249].mxu0  ;;  %v9801_v54 = vadd.f32 %v18988_v50, %v18901_v11 }
 0x3eb   : > { %9151 = vst.msk [vmem:[%s15350_s22 + $0xf8] sm:$0xff] %vm9119_vm5, %v8990_v40  ;;  %10056 = vrot.lane.b32.xlu1 %v9874_v31, %s14490_s28  ;;  %v10011_v6 = vpop.permute.xlu0 %10010  ;;  %18985 = vst [vmem:[#allocation26_spill] sm:$0xff] %v17805_v32  ;;  %v17812_v40 = vpop.f32.mrb[250].mxu0  ;;  %v9878_v32 = vmax.f32 %v9798_v51, 0.0  ;;  %v18994_v51 = vld [vmem:[#allocation84_spill] sm:$0xff] }
 0x3ec   : > { %10172 = vst.msk [vmem:[%s15350_s22 + $0xf8] sm:$0xff] %vm10140_vm6, %v10011_v6  ;;  %18987 = vst [vmem:[#allocation28_spill] sm:$0xff] %v17812_v40  ;;  %v17814_v60 = vpop.f32.mrb[251].mxu0  ;;  %v18991_v40 = vld [vmem:[#allocation17_spill] sm:$0xff] }
 0x3ed   : > { %10058 = vrot.lane.b32.xlu0 %v9875_v3, %s14490_s28  ;;  %v17821_v45 = vpop.f32.mrb[252].mxu0  ;;  %v14452_v3 = vld [vmem:[%s15080_s10 + $0x7b0] sm:$0xff]   ;;  %v9806_v4 = vadd.f32 %v18991_v40, %v18901_v11 }
 0x3ee   : > { %v8986_v31 = vpop.permute.xlu1 %8985  ;;  %18989 = vst [vmem:[#allocation27_spill] sm:$0xff] %v17821_v45  ;;  %v17823_v6 = vpop.f32.mrb[253].mxu0  ;;  %14139 = vmatprep.mubr.msk.bf16.mxu1 %vm4585_vm0, %v14452_v3  ;;  %v9879_v45 = vmax.f32 %v9801_v54, 0.0  ;;  %v18996_v3 = vld [vmem:[#allocation18_spill] sm:$0xff] }
 0x3ef   : > { %9149 = vst.msk [vmem:[%s15350_s22 + $0xe8] sm:$0xff] %vm9119_vm5, %v8986_v31  ;;  %10060 = vrot.lane.b32.xlu1 %v9876_v43, %s14490_s28  ;;  %v10007_v26 = vpop.permute.xlu0 %10006  ;;  %18990 = vst [vmem:[#allocation29_spill] sm:$0xff] %v17823_v6  ;;  %v17831_v23 = vpop.f32.mrb[254].mxu0  ;;  %v14453_v31 = vld [vmem:[%s15080_s10 + $0x7b8] sm:$0xff]   ;;  %v9809_v6 = vadd.f32 %v18994_v51, %v18901_v11 }
 0x3f0   : > { %10170 = vst.msk [vmem:[%s15350_s22 + $0xe8] sm:$0xff] %vm10140_vm6, %v10007_v26  ;;  %18992 = vst [vmem:[#allocation30_spill] sm:$0xff] %v17831_v23  ;;  %v17834_v50 = vpop.f32.mrb[255].mxu0  ;;  %14140 = vmatmul.mubr.msk.bf16.gmra.mrb[236].mxu1 %vm4585_vm0, %v14453_v31  ;;  %v9880_v23 = vmax.f32 %v9806_v4, 0.0  ;;  %v14454_v31 = vld [vmem:[%s15080_s10 + $0x7c0] sm:$0xff]  }
 0x3f1   : > { %10062 = vrot.lane.b32.xlu0 %v9877_v59, %s14490_s28  ;;  %18993 = vst [vmem:[#allocation31_spill] sm:$0xff] %v17834_v50  ;;  %v18995_v59 = vld [vmem:[#allocation16_spill] sm:$0xff]  ;;  %v9881_v51 = vmax.f32 %v9809_v6, 0.0  ;;  %14143 = vmatprep.mubr.msk.bf16.mxu1 %vm4585_vm0, %v14454_v31 }
 0x3f2   : > { %v10017_v43 = vpop.permute.xlu1 %10016  ;;  %v9814_v26 = vadd.f32 %v18995_v59, %v18901_v11 }
 0x3f3   : > { %10064 = vrot.lane.b32.xlu1 %v9878_v32, %s14490_s28  ;;  %v8996_v40 = vpop.permute.xlu0 %8995  ;;  %v9817_v32 = vadd.f32 %v18996_v3, %v18901_v11  ;;  %v14455_v11 = vld [vmem:[%s15080_s10 + $0x7c8] sm:$0xff]  }
 0x3f4   : > { %9154 = vst.msk [vmem:[%s15350_s22 + $0x110] sm:$0xff] %vm9119_vm5, %v8996_v40  ;;  %v9882_v59 = vmax.f32 %v9814_v26, 0.0 }
 0x3f5   : > { %10066 = vrot.lane.b32.xlu0 %v9879_v45, %s14490_s28  ;;  %10175 = vst.msk [vmem:[%s15350_s22 + $0x110] sm:$0xff] %vm10140_vm6, %v10017_v43  ;;  %v9883_v45 = vmax.f32 %v9817_v32, 0.0 }
 0x3f6   : > { %v10013_v54 = vpop.permute.xlu1 %10012 }
 0x3f7   : > { %10068 = vrot.lane.b32.xlu1 %v9880_v23, %s14490_s28  ;;  %v8992_v50 = vpop.permute.xlu0 %8991  ;;  %v13138_v23 = vld [vmem:[%s18786_s2] ss:$0 sm:$0xff] }
 0x3f8   : > { %9152 = vst.msk [vmem:[%s15350_s22 + $0x100] sm:$0xff] %vm9119_vm5, %v8992_v50  ;;  %14144 = vmatmul.mubr.msk.bf16.gmra.mrb[240].mxu1 %vm4585_vm0, %v14455_v11  ;;  %v14456_v50 = vld [vmem:[%s15080_s10 + $0x7d0] sm:$0xff]  }
 0x3f9   : > { %10070 = vrot.lane.b32.xlu0 %v9881_v51, %s14490_s28  ;;  %10173 = vst.msk [vmem:[%s15350_s22 + $0x100] sm:$0xff] %vm10140_vm6, %v10013_v54  ;;  %14147 = vmatprep.mubr.msk.bf16.mxu1 %vm4585_vm0, %v14456_v50  ;;  %v14457_v54 = vld [vmem:[%s15080_s10 + $0x7d8] sm:$0xff]   ;;  %v14458_v51 = vld [vmem:[%s15080_s10 + $0x7e0] sm:$0xff]  }
 0x3fa   : > { %v8998_v4 = vpop.permute.xlu1 %8997  ;;  %v14461_v50 = vld [vmem:[%s15080_s10 + $0x7f8] sm:$0xff]  }
 0x3fb   : > { %9155 = vst.msk [vmem:[%s15350_s22 + $0x118] sm:$0xff] %vm9119_vm5, %v8998_v4  ;;  %10072 = vrot.lane.b32.xlu1 %v9882_v59, %s14490_s28  ;;  %v10019_v6 = vpop.permute.xlu0 %10018  ;;  %v14459_v4 = vld [vmem:[%s15080_s10 + $0x7e8] sm:$0xff]  }
 0x3fc   : > { %10176 = vst.msk [vmem:[%s15350_s22 + $0x118] sm:$0xff] %vm10140_vm6, %v10019_v6  ;;  %v14460_v6 = vld [vmem:[%s15080_s10 + $0x7f0] sm:$0xff]  }
 0x3fd   : > { %10074 = vrot.lane.b32.xlu0 %v9883_v45, %s14490_s28 }
 0x3fe   : > { %v8994_v43 = vpop.permute.xlu1 %8993 }
 0x3ff   : > { %9153 = vst.msk [vmem:[%s15350_s22 + $0x108] sm:$0xff] %vm9119_vm5, %v8994_v43  ;;  %10453 = vrot.lane.b32.xlu1 %v13138_v23, %s14494_s4  ;;  %v10015_v40 = vpop.permute.xlu0 %10014 }
 0x400   : > { %10174 = vst.msk [vmem:[%s15350_s22 + $0x108] sm:$0xff] %vm10140_vm6, %v10015_v40  ;;  %14148 = vmatmul.mubr.msk.bf16.gmra.mrb[244].mxu1 %vm4585_vm0, %v14457_v54 }
 0x401   : > { %14151 = vmatprep.mubr.msk.bf16.mxu1 %vm4585_vm0, %v14458_v51 }
 0x402   : > { %v10025_v26 = vpop.permute.xlu1 %10024 }
 0x403   : > { %v9004_v3 = vpop.permute.xlu0 %9003 }
 0x404   : > { %9158 = vst.msk [vmem:[%s15350_s22 + $0x130] sm:$0xff] %vm9119_vm5, %v9004_v3 }
 0x405   : > { %10179 = vst.msk [vmem:[%s15350_s22 + $0x130] sm:$0xff] %vm10140_vm6, %v10025_v26 }
 0x406   : > { %v10021_v32 = vpop.permute.xlu1 %10020 }
 0x407   : > { %v9000_v31 = vpop.permute.xlu0 %8999 }
 0x408   : > { %9156 = vst.msk [vmem:[%s15350_s22 + $0x120] sm:$0xff] %vm9119_vm5, %v9000_v31  ;;  %14152 = vmatmul.mubr.msk.bf16.gmra.mrb[248].mxu1 %vm4585_vm0, %v14459_v4 }
 0x409   : > { %10177 = vst.msk [vmem:[%s15350_s22 + $0x120] sm:$0xff] %vm10140_vm6, %v10021_v32  ;;  %14155 = vmatprep.mubr.msk.bf16.mxu1 %vm4585_vm0, %v14460_v6 }
 0x40a   : > { %v9006_v59 = vpop.permute.xlu1 %9005 }
 0x40b   : > { %9159 = vst.msk [vmem:[%s15350_s22 + $0x138] sm:$0xff] %vm9119_vm5, %v9006_v59  ;;  %v10027_v11 = vpop.permute.xlu0 %10026 }
 0x40c   : > { %10180 = vst.msk [vmem:[%s15350_s22 + $0x138] sm:$0xff] %vm10140_vm6, %v10027_v11 }
 0x40e   : > { %v9002_v45 = vpop.permute.xlu1 %9001 }
 0x40f   : > { %9157 = vst.msk [vmem:[%s15350_s22 + $0x128] sm:$0xff] %vm9119_vm5, %v9002_v45  ;;  %v10023_v23 = vpop.permute.xlu0 %10022 }
 0x410   : > { %10178 = vst.msk [vmem:[%s15350_s22 + $0x128] sm:$0xff] %vm10140_vm6, %v10023_v23  ;;  %14156 = vmatmul.mubr.msk.bf16.gmra.mrb[252].mxu1 %vm4585_vm0, %v14461_v50 }
 0x412   : > { %v10033_v43 = vpop.permute.xlu1 %10032 }
 0x413   : > { %v9012_v40 = vpop.permute.xlu0 %9011 }
 0x414   : > { %9162 = vst.msk [vmem:[%s15350_s22 + $0x150] sm:$0xff] %vm9119_vm5, %v9012_v40 }
 0x415   : > { %10183 = vst.msk [vmem:[%s15350_s22 + $0x150] sm:$0xff] %vm10140_vm6, %v10033_v43 }
 0x416   : > { %v10029_v26 = vpop.permute.xlu1 %10028 }
 0x417   : > { %v9008_v54 = vpop.permute.xlu0 %9007 }
 0x418   : > { %9160 = vst.msk [vmem:[%s15350_s22 + $0x140] sm:$0xff] %vm9119_vm5, %v9008_v54 }
 0x419   : > { %10181 = vst.msk [vmem:[%s15350_s22 + $0x140] sm:$0xff] %vm10140_vm6, %v10029_v26 }
 0x41a   : > { %v9014_v3 = vpop.permute.xlu1 %9013 }
 0x41b   : > { %9163 = vst.msk [vmem:[%s15350_s22 + $0x158] sm:$0xff] %vm9119_vm5, %v9014_v3  ;;  %v10031_v32 = vpop.permute.xlu0 %10030 }
 0x41e   : > { %v9010_v51 = vpop.permute.xlu1 %9009 }
 0x41f   : > { %9161 = vst.msk [vmem:[%s15350_s22 + $0x148] sm:$0xff] %vm9119_vm5, %v9010_v51  ;;  %v9020_v31 = vpop.permute.xlu0 %9019 }
 0x420   : > { %10182 = vst.msk [vmem:[%s15350_s22 + $0x148] sm:$0xff] %vm10140_vm6, %v10031_v32 }
 0x421   : > { %9166 = vst.msk [vmem:[%s15350_s22 + $0x170] sm:$0xff] %vm9119_vm5, %v9020_v31 }
 0x422   : > { %v9022_v59 = vpop.permute.xlu1 %9021 }
 0x423   : > { %9167 = vst.msk [vmem:[%s15350_s22 + $0x178] sm:$0xff] %vm9119_vm5, %v9022_v59  ;;  %v9016_v4 = vpop.permute.xlu0 %9015 }
 0x424   : > { %9164 = vst.msk [vmem:[%s15350_s22 + $0x160] sm:$0xff] %vm9119_vm5, %v9016_v4 }
 0x426   : > { %v9018_v11 = vpop.permute.xlu1 %9017 }
 0x427   : > { %9165 = vst.msk [vmem:[%s15350_s22 + $0x168] sm:$0xff] %vm9119_vm5, %v9018_v11  ;;  %v9028_v45 = vpop.permute.xlu0 %9027 }
 0x428   : > { %9170 = vst.msk [vmem:[%s15350_s22 + $0x190] sm:$0xff] %vm9119_vm5, %v9028_v45 }
 0x42a   : > { %v9030_v6 = vpop.permute.xlu1 %9029 }
 0x42b   : > { %9171 = vst.msk [vmem:[%s15350_s22 + $0x198] sm:$0xff] %vm9119_vm5, %v9030_v6  ;;  %v9024_v23 = vpop.permute.xlu0 %9023 }
 0x42c   : > { %9168 = vst.msk [vmem:[%s15350_s22 + $0x180] sm:$0xff] %vm9119_vm5, %v9024_v23 }
 0x42e   : > { %v9026_v43 = vpop.permute.xlu1 %9025 }
 0x42f   : > { %9169 = vst.msk [vmem:[%s15350_s22 + $0x188] sm:$0xff] %vm9119_vm5, %v9026_v43  ;;  %v9036_v50 = vpop.permute.xlu0 %9035 }
 0x430   : > { %9174 = vst.msk [vmem:[%s15350_s22 + $0x1b0] sm:$0xff] %vm9119_vm5, %v9036_v50 }
 0x432   : > { %v9038_v40 = vpop.permute.xlu1 %9037 }
 0x433   : > { %9175 = vst.msk [vmem:[%s15350_s22 + $0x1b8] sm:$0xff] %vm9119_vm5, %v9038_v40  ;;  %v9032_v26 = vpop.permute.xlu0 %9031 }
 0x434   : > { %9172 = vst.msk [vmem:[%s15350_s22 + $0x1a0] sm:$0xff] %vm9119_vm5, %v9032_v26 }
 0x436   : > { %v9034_v54 = vpop.permute.xlu1 %9033 }
 0x437   : > { %9173 = vst.msk [vmem:[%s15350_s22 + $0x1a8] sm:$0xff] %vm9119_vm5, %v9034_v54  ;;  %v9044_v3 = vpop.permute.xlu0 %9043 }
 0x438   : > { %9178 = vst.msk [vmem:[%s15350_s22 + $0x1d0] sm:$0xff] %vm9119_vm5, %v9044_v3 }
 0x43a   : > { %v9046_v32 = vpop.permute.xlu1 %9045 }
 0x43b   : > { %9179 = vst.msk [vmem:[%s15350_s22 + $0x1d8] sm:$0xff] %vm9119_vm5, %v9046_v32  ;;  %v9040_v51 = vpop.permute.xlu0 %9039 }
 0x43c   : > { %9176 = vst.msk [vmem:[%s15350_s22 + $0x1c0] sm:$0xff] %vm9119_vm5, %v9040_v51 }
 0x43e   : > { %v9042_v31 = vpop.permute.xlu1 %9041 }
 0x43f   : > { %9177 = vst.msk [vmem:[%s15350_s22 + $0x1c8] sm:$0xff] %vm9119_vm5, %v9042_v31  ;;  %v9052_v59 = vpop.permute.xlu0 %9051 }
 0x440   : > { %9182 = vst.msk [vmem:[%s15350_s22 + $0x1f0] sm:$0xff] %vm9119_vm5, %v9052_v59 }
 0x442   : > { %v9054_v4 = vpop.permute.xlu1 %9053 }
 0x443   : > { %9183 = vst.msk [vmem:[%s15350_s22 + $0x1f8] sm:$0xff] %vm9119_vm5, %v9054_v4  ;;  %v9048_v11 = vpop.permute.xlu0 %9047 }
 0x444   : > { %9180 = vst.msk [vmem:[%s15350_s22 + $0x1e0] sm:$0xff] %vm9119_vm5, %v9048_v11 }
 0x446   : > { %v9050_v45 = vpop.permute.xlu1 %9049 }
 0x447   : > { %9181 = vst.msk [vmem:[%s15350_s22 + $0x1e8] sm:$0xff] %vm9119_vm5, %v9050_v45  ;;  %v10035_v6 = vpop.permute.xlu0 %10034 }
 0x448   : > { %10184 = vst.msk [vmem:[%s15350_s22 + $0x158] sm:$0xff] %vm10140_vm6, %v10035_v6 }
 0x44a   : > { %v10037_v23 = vpop.permute.xlu1 %10036 }
 0x44b   : > { %10185 = vst.msk [vmem:[%s15350_s22 + $0x160] sm:$0xff] %vm10140_vm6, %v10037_v23  ;;  %v10039_v43 = vpop.permute.xlu0 %10038 }
 0x44c   : > { %10186 = vst.msk [vmem:[%s15350_s22 + $0x168] sm:$0xff] %vm10140_vm6, %v10039_v43 }
 0x44e   : > { %v10041_v50 = vpop.permute.xlu1 %10040 }
 0x44f   : > { %10187 = vst.msk [vmem:[%s15350_s22 + $0x170] sm:$0xff] %vm10140_vm6, %v10041_v50  ;;  %v10043_v40 = vpop.permute.xlu0 %10042 }
 0x450   : > { %10188 = vst.msk [vmem:[%s15350_s22 + $0x178] sm:$0xff] %vm10140_vm6, %v10043_v40 }
 0x452   : > { %v10045_v26 = vpop.permute.xlu1 %10044 }
 0x453   : > { %10189 = vst.msk [vmem:[%s15350_s22 + $0x180] sm:$0xff] %vm10140_vm6, %v10045_v26  ;;  %v10047_v54 = vpop.permute.xlu0 %10046 }
 0x454   : > { %10190 = vst.msk [vmem:[%s15350_s22 + $0x188] sm:$0xff] %vm10140_vm6, %v10047_v54 }
 0x456   : > { %v10049_v3 = vpop.permute.xlu1 %10048 }
 0x457   : > { %10191 = vst.msk [vmem:[%s15350_s22 + $0x190] sm:$0xff] %vm10140_vm6, %v10049_v3  ;;  %v10051_v32 = vpop.permute.xlu0 %10050 }
 0x458   : > { %10192 = vst.msk [vmem:[%s15350_s22 + $0x198] sm:$0xff] %vm10140_vm6, %v10051_v32 }
 0x45a   : > { %v10053_v51 = vpop.permute.xlu1 %10052 }
 0x45b   : > { %10193 = vst.msk [vmem:[%s15350_s22 + $0x1a0] sm:$0xff] %vm10140_vm6, %v10053_v51  ;;  %v10055_v31 = vpop.permute.xlu0 %10054 }
 0x45c   : > { %10194 = vst.msk [vmem:[%s15350_s22 + $0x1a8] sm:$0xff] %vm10140_vm6, %v10055_v31 }
 0x45e   : > { %v10057_v59 = vpop.permute.xlu1 %10056 }
 0x45f   : > { %10195 = vst.msk [vmem:[%s15350_s22 + $0x1b0] sm:$0xff] %vm10140_vm6, %v10057_v59  ;;  %v10059_v4 = vpop.permute.xlu0 %10058 }
 0x460   : > { %10196 = vst.msk [vmem:[%s15350_s22 + $0x1b8] sm:$0xff] %vm10140_vm6, %v10059_v4 }
 0x462   : > { %v10061_v11 = vpop.permute.xlu1 %10060 }
 0x463   : > { %10197 = vst.msk [vmem:[%s15350_s22 + $0x1c0] sm:$0xff] %vm10140_vm6, %v10061_v11  ;;  %v10063_v45 = vpop.permute.xlu0 %10062 }
 0x464   : > { %10198 = vst.msk [vmem:[%s15350_s22 + $0x1c8] sm:$0xff] %vm10140_vm6, %v10063_v45 }
 0x466   : > { %v10065_v6 = vpop.permute.xlu1 %10064 }
 0x467   : > { %10199 = vst.msk [vmem:[%s15350_s22 + $0x1d0] sm:$0xff] %vm10140_vm6, %v10065_v6  ;;  %v10067_v23 = vpop.permute.xlu0 %10066 }
 0x468   : > { %10200 = vst.msk [vmem:[%s15350_s22 + $0x1d8] sm:$0xff] %vm10140_vm6, %v10067_v23 }
 0x46a   : > { %v10069_v43 = vpop.permute.xlu1 %10068 }
 0x46b   : > { %10201 = vst.msk [vmem:[%s15350_s22 + $0x1e0] sm:$0xff] %vm10140_vm6, %v10069_v43  ;;  %v10071_v50 = vpop.permute.xlu0 %10070 }
 0x46c   : > { %10202 = vst.msk [vmem:[%s15350_s22 + $0x1e8] sm:$0xff] %vm10140_vm6, %v10071_v50 }
 0x46e   : > { %v10073_v40 = vpop.permute.xlu1 %10072 }
 0x46f   : > { %10203 = vst.msk [vmem:[%s15350_s22 + $0x1f0] sm:$0xff] %vm10140_vm6, %v10073_v40  ;;  %v10075_v26 = vpop.permute.xlu0 %10074 }
 0x470   : > { %10204 = vst.msk [vmem:[%s15350_s22 + $0x1f8] sm:$0xff] %vm10140_vm6, %v10075_v26 }
 0x472   : > { %v17998_v54 = vpop.permute.xlu1 %10453 }
 0x473   : > { %v10590_v3 = vadd.f32 %v17534_v27, %v17998_v54  ;;  %v10587_v32 = vadd.f32 %v17523_v49, %v17998_v54  ;;  %v10598_v59 = vadd.f32 %v17530_v53, %v17998_v54  ;;  %v10595_v4 = vadd.f32 %v17520_v15, %v17998_v54 }
 0x474   : > { %v10606_v27 = vadd.f32 %v17554_v5, %v17998_v54  ;;  %v10603_v49 = vadd.f32 %v17541_v36, %v17998_v54  ;;  %v10614_v15 = vadd.f32 %v17549_v44, %v17998_v54  ;;  %v10611_v23 = vadd.f32 %v17539_v37, %v17998_v54 }
 0x475   : > { %v10842_v51 = vmax.f32 %v10590_v3, 0.0  ;;  %v10841_v31 = vmax.f32 %v10587_v32, 0.0  ;;  %v10844_v11 = vmax.f32 %v10598_v59, 0.0  ;;  %v10843_v45 = vmax.f32 %v10595_v4, 0.0 }
 0x476   : > { %v10846_v53 = vmax.f32 %v10606_v27, 0.0  ;;  %v10845_v6 = vmax.f32 %v10603_v49, 0.0  ;;  %v10848_v5 = vmax.f32 %v10614_v15, 0.0  ;;  %v10847_v43 = vmax.f32 %v10611_v23, 0.0 }
 0x477   : > { %10971 = vrot.lane.b32.xlu1 %v10842_v51, %s14489_s27  ;;  %10969 = vrot.lane.b32.xlu0 %v10841_v31, %s14489_s27  ;;  %v10622_v36 = vadd.f32 %v17574_v30, %v17998_v54  ;;  %v10619_v50 = vadd.f32 %v17565_v38, %v17998_v54  ;;  %v10630_v37 = vadd.f32 %v17572_v47, %v17998_v54 }
 0x478   : > { %v10627_v26 = vadd.f32 %v17562_v25, %v17998_v54  ;;  %v10638_v38 = vadd.f32 %v17594_v0, %v17998_v54  ;;  %v10635_v32 = vadd.f32 %v17583_v62, %v17998_v54  ;;  %v10646_v25 = vadd.f32 %v17591_v29, %v17998_v54 }
 0x479   : > { %v10850_v44 = vmax.f32 %v10622_v36, 0.0  ;;  %v10849_v40 = vmax.f32 %v10619_v50, 0.0  ;;  %v10852_v30 = vmax.f32 %v10630_v37, 0.0  ;;  %v10643_v31 = vadd.f32 %v17581_v10, %v17998_v54 }
 0x47a   : > { %v10851_v3 = vmax.f32 %v10627_v26, 0.0  ;;  %v10854_v47 = vmax.f32 %v10638_v38, 0.0  ;;  %v10853_v51 = vmax.f32 %v10635_v32, 0.0  ;;  %v10856_v0 = vmax.f32 %v10646_v25, 0.0 }
 0x47b   : > { %10975 = vrot.lane.b32.xlu1 %v10844_v11, %s14489_s27  ;;  %10973 = vrot.lane.b32.xlu0 %v10843_v45, %s14489_s27  ;;  %v10855_v59 = vmax.f32 %v10643_v31, 0.0  ;;  %v10654_v62 = vadd.f32 %v17614_v61, %v17998_v54  ;;  %v10651_v4 = vadd.f32 %v17603_v21, %v17998_v54  ;;  %v10662_v10 = vadd.f32 %v17610_v55, %v17998_v54 }
 0x47c   : > { %v10659_v45 = vadd.f32 %v17600_v12, %v17998_v54  ;;  %v10670_v21 = vadd.f32 %v17634_v39, %v17998_v54  ;;  %v10667_v49 = vadd.f32 %v17621_v7, %v17998_v54  ;;  %v10678_v12 = vadd.f32 %v17629_v22, %v17998_v54 }
 0x47d   : > { %v10858_v29 = vmax.f32 %v10654_v62, 0.0  ;;  %v10857_v11 = vmax.f32 %v10651_v4, 0.0  ;;  %v10860_v61 = vmax.f32 %v10662_v10, 0.0  ;;  %v10686_v7 = vadd.f32 %v17654_v9, %v17998_v54 }
 0x47e   : > { %v10859_v27 = vmax.f32 %v10659_v45, 0.0  ;;  %v10862_v55 = vmax.f32 %v10670_v21, 0.0  ;;  %v10864_v39 = vmax.f32 %v10678_v12, 0.0  ;;  %v10683_v23 = vadd.f32 %v17645_v56, %v17998_v54 }
 0x47f   : > { %10979 = vrot.lane.b32.xlu1 %v10846_v53, %s14489_s27  ;;  %10977 = vrot.lane.b32.xlu0 %v10845_v6, %s14489_s27  ;;  %v10861_v53 = vmax.f32 %v10667_v49, 0.0  ;;  %v10675_v6 = vadd.f32 %v17619_v16, %v17998_v54  ;;  %v10866_v22 = vmax.f32 %v10686_v7, 0.0  ;;  %v10694_v16 = vadd.f32 %v17652_v48, %v17998_v54 }
 0x480   : > { %v10702_v56 = vadd.f32 %v17674_v20, %v17998_v54  ;;  %v10699_v50 = vadd.f32 %v17663_v41, %v17998_v54  ;;  %v10710_v26 = vadd.f32 %v17671_v42, %v17998_v54  ;;  %v10707_v20 = vadd.f32 %v17661_v52, %v17998_v54 }
 0x481   : > { %v10863_v15 = vmax.f32 %v10675_v6, 0.0  ;;  %v10868_v9 = vmax.f32 %v10694_v16, 0.0  ;;  %v10715_v42 = vadd.f32 %v17683_v28, %v17998_v54  ;;  %v10723_v28 = vadd.f32 %v17680_v33, %v17998_v54 }
 0x482   : > { %v10869_v37 = vmax.f32 %v10699_v50, 0.0  ;;  %v10872_v38 = vmax.f32 %v10710_v26, 0.0  ;;  %v10871_v32 = vmax.f32 %v10707_v20, 0.0  ;;  %v10731_v33 = vadd.f32 %v17701_v19, %v17998_v54 }
 0x483   : > { %10983 = vrot.lane.b32.xlu1 %v10848_v5, %s14489_s27  ;;  %10981 = vrot.lane.b32.xlu0 %v10847_v43, %s14489_s27  ;;  %v10865_v5 = vmax.f32 %v10683_v23, 0.0  ;;  %v10691_v43 = vadd.f32 %v17642_v1, %v17998_v54  ;;  %v10875_v45 = vmax.f32 %v10723_v28, 0.0  ;;  %v10739_v19 = vadd.f32 %v17699_v46, %v17998_v54 }
 0x484   : > { %v10747_v46 = vadd.f32 %v17725_v34, %v17998_v54  ;;  %v10755_v34 = vadd.f32 %v17722_v2, %v17998_v54  ;;  %v10763_v2 = vadd.f32 %v17743_v18, %v17998_v54  ;;  %v10771_v18 = vadd.f32 %v17741_v17, %v17998_v54 }
 0x485   : > { %v10867_v36 = vmax.f32 %v10691_v43, 0.0  ;;  %v10879_v23 = vmax.f32 %v10739_v19, 0.0 }
 0x486   : > { %v10883_v20 = vmax.f32 %v10755_v34, 0.0 }
 0x487   : > { %10987 = vrot.lane.b32.xlu1 %v10850_v44, %s14489_s27  ;;  %10985 = vrot.lane.b32.xlu0 %v10849_v40, %s14489_s27  ;;  %v18086_v44 = vpop.f32.mrb[192].mxu1  ;;  %v10870_v40 = vmax.f32 %v10702_v56, 0.0 }
 0x488   : > { %v18090_v48 = vpop.f32.mrb[193].mxu1 }
 0x489   : > { %v18092_v1 = vpop.f32.mrb[194].mxu1 }
 0x48b   : > { %10991 = vrot.lane.b32.xlu1 %v10852_v30, %s14489_s27  ;;  %10989 = vrot.lane.b32.xlu0 %v10851_v3, %s14489_s27  ;;  %v18098_v30 = vpop.f32.mrb[195].mxu1 }
 0x48c   : > { %v18102_v41 = vpop.f32.mrb[196].mxu1 }
 0x48d   : > { %v18104_v3 = vpop.f32.mrb[197].mxu1 }
 0x48f   : > { %10995 = vrot.lane.b32.xlu1 %v10854_v47, %s14489_s27  ;;  %10993 = vrot.lane.b32.xlu0 %v10853_v51, %s14489_s27  ;;  %v10718_v47 = vadd.f32 %v17694_v13, %v17998_v54  ;;  %v18110_v51 = vpop.f32.mrb[198].mxu1  ;;  %v10726_v13 = vadd.f32 %v17690_v35, %v17998_v54  ;;  %v10734_v35 = vadd.f32 %v17714_v58, %v17998_v54 }
 0x490   : > { %v18112_v52 = vpop.f32.mrb[199].mxu1  ;;  %v10742_v58 = vadd.f32 %v17709_v14, %v17998_v54  ;;  %v10750_v14 = vadd.f32 %v17734_v24, %v17998_v54  ;;  %v10758_v24 = vadd.f32 %v17732_v63, %v17998_v54  ;;  %v10766_v63 = vadd.f32 %v17754_v57, %v17998_v54 }
 0x491   : > { %v18116_v25 = vpop.f32.mrb[200].mxu1  ;;  %v10876_v10 = vmax.f32 %v10726_v13, 0.0  ;;  %v10774_v57 = vadd.f32 %v17751_v8, %v17998_v54 }
 0x492   : > { %v18118_v31 = vpop.f32.mrb[201].mxu1  ;;  %v10880_v7 = vmax.f32 %v10742_v58, 0.0  ;;  %v10884_v26 = vmax.f32 %v10758_v24, 0.0  ;;  %v19000_v24 = vld [vmem:[#allocation19_spill] sm:$0xff] }
 0x493   : > { %10999 = vrot.lane.b32.xlu1 %v10856_v0, %s14489_s27  ;;  %10997 = vrot.lane.b32.xlu0 %v10855_v59, %s14489_s27  ;;  %v10874_v0 = vmax.f32 %v10718_v47, 0.0  ;;  %v10873_v59 = vmax.f32 %v10715_v42, 0.0  ;;  %v18124_v62 = vpop.f32.mrb[202].mxu1  ;;  %v10787_v34 = vadd.f32 %v19000_v24, %v17998_v54  ;;  %v19006_v24 = vld [vmem:[#allocation20_spill] sm:$0xff] }
 0x494   : > { %v18126_v4 = vpop.f32.mrb[203].mxu1 }
 0x497   : > { %11003 = vrot.lane.b32.xlu1 %v10858_v29, %s14489_s27  ;;  %11001 = vrot.lane.b32.xlu0 %v10857_v11, %s14489_s27  ;;  %v18130_v29 = vpop.f32.mrb[204].mxu1 }
 0x498   : > { %v18132_v11 = vpop.f32.mrb[205].mxu1 }
 0x49b   : > { %11007 = vrot.lane.b32.xlu1 %v10860_v61, %s14489_s27  ;;  %11005 = vrot.lane.b32.xlu0 %v10859_v27, %s14489_s27  ;;  %v18138_v61 = vpop.f32.mrb[206].mxu1 }
 0x49c   : > { %v18140_v27 = vpop.f32.mrb[207].mxu1 }
 0x49d   : > { %v18144_v21 = vpop.f32.mrb[208].mxu1 }
 0x49e   : > { %v18146_v49 = vpop.f32.mrb[209].mxu1 }
 0x49f   : > { %11011 = vrot.lane.b32.xlu1 %v10862_v55, %s14489_s27  ;;  %11009 = vrot.lane.b32.xlu0 %v10861_v53, %s14489_s27  ;;  %v10878_v55 = vmax.f32 %v10734_v35, 0.0  ;;  %v10877_v53 = vmax.f32 %v10731_v33, 0.0  ;;  %v18152_v12 = vpop.f32.mrb[210].mxu1  ;;  %v10888_v35 = vmax.f32 %v10774_v57, 0.0  ;;  %v10887_v33 = vmax.f32 %v10771_v18, 0.0  ;;  %v19001_v57 = vld [vmem:[#allocation24_spill] sm:$0xff] }
 0x4a0   : > { %v18154_v6 = vpop.f32.mrb[211].mxu1  ;;  %v10798_v18 = vadd.f32 %v19001_v57, %v17998_v54 }
 0x4a3   : > { %11015 = vrot.lane.b32.xlu1 %v10864_v39, %s14489_s27  ;;  %11013 = vrot.lane.b32.xlu0 %v10863_v15, %s14489_s27  ;;  %v18158_v39 = vpop.f32.mrb[212].mxu1 }
 0x4a4   : > { %v18160_v15 = vpop.f32.mrb[213].mxu1 }
 0x4a7   : > { %11019 = vrot.lane.b32.xlu1 %v10866_v22, %s14489_s27  ;;  %11017 = vrot.lane.b32.xlu0 %v10865_v5, %s14489_s27  ;;  %v18166_v22 = vpop.f32.mrb[214].mxu1 }
 0x4a8   : > { %v18168_v5 = vpop.f32.mrb[215].mxu1 }
 0x4a9   : > { %v18172_v16 = vpop.f32.mrb[216].mxu1 }
 0x4aa   : > { %v18174_v43 = vpop.f32.mrb[217].mxu1 }
 0x4ab   : > { %11023 = vrot.lane.b32.xlu1 %v10868_v9, %s14489_s27  ;;  %11021 = vrot.lane.b32.xlu0 %v10867_v36, %s14489_s27  ;;  %v10882_v9 = vmax.f32 %v10750_v14, 0.0  ;;  %v10881_v36 = vmax.f32 %v10747_v46, 0.0  ;;  %v18180_v56 = vpop.f32.mrb[218].mxu1 }
 0x4ac   : > { %v18182_v50 = vpop.f32.mrb[219].mxu1 }
 0x4af   : > { %11027 = vrot.lane.b32.xlu1 %v10870_v40, %s14489_s27  ;;  %11025 = vrot.lane.b32.xlu0 %v10869_v37, %s14489_s27  ;;  %v18186_v40 = vpop.f32.mrb[220].mxu1 }
 0x4b0   : > { %v18188_v37 = vpop.f32.mrb[221].mxu1 }
 0x4b3   : > { %11031 = vrot.lane.b32.xlu1 %v10872_v38, %s14489_s27  ;;  %11029 = vrot.lane.b32.xlu0 %v10871_v32, %s14489_s27  ;;  %v18194_v38 = vpop.f32.mrb[222].mxu1 }
 0x4b4   : > { %v18196_v32 = vpop.f32.mrb[223].mxu1 }
 0x4b5   : > { %v18200_v47 = vpop.f32.mrb[224].mxu1 }
 0x4b6   : > { %v18202_v42 = vpop.f32.mrb[225].mxu1 }
 0x4b7   : > { %11035 = vrot.lane.b32.xlu1 %v10874_v0, %s14489_s27  ;;  %11033 = vrot.lane.b32.xlu0 %v10873_v59, %s14489_s27  ;;  %v10886_v0 = vmax.f32 %v10766_v63, 0.0  ;;  %v10885_v59 = vmax.f32 %v10763_v2, 0.0  ;;  %v18208_v13 = vpop.f32.mrb[226].mxu1 }
 0x4b8   : > { %v18210_v28 = vpop.f32.mrb[227].mxu1 }
 0x4bb   : > { %11039 = vrot.lane.b32.xlu1 %v10876_v10, %s14489_s27  ;;  %11037 = vrot.lane.b32.xlu0 %v10875_v45, %s14489_s27  ;;  %v18214_v10 = vpop.f32.mrb[228].mxu1 }
 0x4bc   : > { %v18216_v45 = vpop.f32.mrb[229].mxu1 }
 0x4bd   : > { %v18222_v58 = vpop.f32.mrb[230].mxu1 }
 0x4be   : > { %v18224_v19 = vpop.f32.mrb[231].mxu1 }
 0x4bf   : > { %11043 = vrot.lane.b32.xlu1 %v10878_v55, %s14489_s27  ;;  %11041 = vrot.lane.b32.xlu0 %v10877_v53, %s14489_s27  ;;  %v18997_v55 = vld [vmem:[#allocation21_spill] sm:$0xff]  ;;  %v18998_v53 = vld [vmem:[#allocation4_spill] sm:$0xff] }
 0x4c0   : > { %v10782_v8 = vadd.f32 %v18997_v55, %v17998_v54  ;;  %v10779_v17 = vadd.f32 %v18998_v53, %v17998_v54 }
 0x4c2   : > { %v10890_v14 = vmax.f32 %v10782_v8, 0.0  ;;  %v10889_v46 = vmax.f32 %v10779_v17, 0.0 }
 0x4c3   : > { %11047 = vrot.lane.b32.xlu1 %v10880_v7, %s14489_s27  ;;  %11045 = vrot.lane.b32.xlu0 %v10879_v23, %s14489_s27  ;;  %v18228_v7 = vpop.f32.mrb[232].mxu1 }
 0x4c4   : > { %v18230_v23 = vpop.f32.mrb[233].mxu1 }
 0x4c7   : > { %11051 = vrot.lane.b32.xlu1 %v10882_v9, %s14489_s27  ;;  %11049 = vrot.lane.b32.xlu0 %v10881_v36, %s14489_s27  ;;  %v18999_v9 = vld [vmem:[#allocation3_spill] sm:$0xff] }
 0x4c8   : > { %v10790_v36 = vadd.f32 %v18999_v9, %v17998_v54  ;;  %v19005_v9 = vld [vmem:[#allocation23_spill] sm:$0xff] }
 0x4cb   : > { %11055 = vrot.lane.b32.xlu1 %v10884_v26, %s14489_s27  ;;  %11053 = vrot.lane.b32.xlu0 %v10883_v20, %s14489_s27  ;;  %v18236_v26 = vpop.f32.mrb[234].mxu1 }
 0x4cc   : > { %v18238_v20 = vpop.f32.mrb[235].mxu1 }
 0x4cd   : > { %v18242_v63 = vpop.f32.mrb[236].mxu1 }
 0x4ce   : > { %v18244_v2 = vpop.f32.mrb[237].mxu1 }
 0x4cf   : > { %11059 = vrot.lane.b32.xlu1 %v10886_v0, %s14489_s27  ;;  %11057 = vrot.lane.b32.xlu0 %v10885_v59, %s14489_s27  ;;  %v10892_v0 = vmax.f32 %v10790_v36, 0.0  ;;  %v10891_v59 = vmax.f32 %v10787_v34, 0.0  ;;  %v18250_v55 = vpop.f32.mrb[238].mxu1  ;;  %v10806_v36 = vadd.f32 %v19005_v9, %v17998_v54  ;;  %v10803_v34 = vadd.f32 %v19006_v24, %v17998_v54 }
 0x4d0   : > { %v18252_v8 = vpop.f32.mrb[239].mxu1  ;;  %v10814_v9 = vadd.f32 %v17814_v60, %v17998_v54  ;;  %v19015_v60 = vld [vmem:[#allocation28_spill] sm:$0xff] }
 0x4d1   : > { %v18256_v53 = vpop.f32.mrb[240].mxu1 }
 0x4d2   : > { %19003 = vst [vmem:[#allocation32_spill] sm:$0xff] %v18256_v53  ;;  %v18258_v17 = vpop.f32.mrb[241].mxu1  ;;  %v19010_v53 = vld [vmem:[#allocation26_spill] sm:$0xff] }
 0x4d3   : > { %11063 = vrot.lane.b32.xlu1 %v10888_v35, %s14489_s27  ;;  %11061 = vrot.lane.b32.xlu0 %v10887_v33, %s14489_s27  ;;  %v19002_v35 = vld [vmem:[#allocation22_spill] sm:$0xff]  ;;  %19004 = vst [vmem:[#allocation33_spill] sm:$0xff] %v18258_v17  ;;  %v18264_v57 = vpop.f32.mrb[242].mxu1  ;;  %v10811_v24 = vadd.f32 %v19010_v53, %v17998_v54  ;;  %v19016_v53 = vld [vmem:[#allocation25_spill] sm:$0xff] }
 0x4d4   : > { %v10795_v33 = vadd.f32 %v19002_v35, %v17998_v54  ;;  %19007 = vst [vmem:[#allocation34_spill] sm:$0xff] %v18264_v57  ;;  %v18266_v35 = vpop.f32.mrb[243].mxu1 }
 0x4d7   : > { %11067 = vrot.lane.b32.xlu1 %v10890_v14, %s14489_s27  ;;  %11065 = vrot.lane.b32.xlu0 %v10889_v46, %s14489_s27  ;;  %v10894_v14 = vmax.f32 %v10798_v18, 0.0  ;;  %v10893_v46 = vmax.f32 %v10795_v33, 0.0  ;;  %v10896_v18 = vmax.f32 %v10806_v36, 0.0  ;;  %v10895_v33 = vmax.f32 %v10803_v34, 0.0 }
 0x4d8   : > { %v10898_v36 = vmax.f32 %v10814_v9, 0.0  ;;  %v10897_v34 = vmax.f32 %v10811_v24, 0.0 }
 0x4db   : > { %11071 = vrot.lane.b32.xlu1 %v10892_v0, %s14489_s27  ;;  %11069 = vrot.lane.b32.xlu0 %v10891_v59, %s14489_s27  ;;  %v18270_v0 = vpop.f32.mrb[244].mxu1 }
 0x4dc   : > { %19008 = vst [vmem:[#allocation35_spill] sm:$0xff] %v18270_v0  ;;  %v18272_v59 = vpop.f32.mrb[245].mxu1  ;;  %v10822_v0 = vadd.f32 %v19015_v60, %v17998_v54 }
 0x4dd   : > { %19009 = vst [vmem:[#allocation36_spill] sm:$0xff] %v18272_v59  ;;  %v18278_v17 = vpop.f32.mrb[246].mxu1 }
 0x4de   : > { %19011 = vst [vmem:[#allocation37_spill] sm:$0xff] %v18278_v17  ;;  %v18280_v57 = vpop.f32.mrb[247].mxu1  ;;  %v10819_v17 = vadd.f32 %v19016_v53, %v17998_v54  ;;  %v10900_v60 = vmax.f32 %v10822_v0, 0.0  ;;  %v19021_v53 = vld [vmem:[#allocation29_spill] sm:$0xff] }
 0x4df   : > { %11075 = vrot.lane.b32.xlu1 %v10894_v14, %s14489_s27  ;;  %11073 = vrot.lane.b32.xlu0 %v10893_v46, %s14489_s27  ;;  %19012 = vst [vmem:[#allocation38_spill] sm:$0xff] %v18280_v57  ;;  %v18284_v14 = vpop.f32.mrb[248].mxu1 }
 0x4e0   : > { %19013 = vst [vmem:[#allocation39_spill] sm:$0xff] %v18284_v14  ;;  %v18286_v46 = vpop.f32.mrb[249].mxu1 }
 0x4e1   : > { %19014 = vst [vmem:[#allocation40_spill] sm:$0xff] %v18286_v46  ;;  %v18292_v59 = vpop.f32.mrb[250].mxu1  ;;  %v10899_v46 = vmax.f32 %v10819_v17, 0.0 }
 0x4e2   : > { %19017 = vst [vmem:[#allocation41_spill] sm:$0xff] %v18292_v59  ;;  %v18294_v57 = vpop.f32.mrb[251].mxu1  ;;  %v10827_v59 = vadd.f32 %v19021_v53, %v17998_v54 }
 0x4e3   : > { %11079 = vrot.lane.b32.xlu1 %v10896_v18, %s14489_s27  ;;  %11077 = vrot.lane.b32.xlu0 %v10895_v33, %s14489_s27  ;;  %19018 = vst [vmem:[#allocation42_spill] sm:$0xff] %v18294_v57  ;;  %v18298_v18 = vpop.f32.mrb[252].mxu1  ;;  %v19020_v33 = vld [vmem:[#allocation31_spill] sm:$0xff] }
 0x4e4   : > { %19019 = vst [vmem:[#allocation43_spill] sm:$0xff] %v18298_v18  ;;  %v10830_v9 = vadd.f32 %v19020_v33, %v17998_v54  ;;  %v10901_v53 = vmax.f32 %v10827_v59, 0.0 }
 0x4e6   : > { %v10902_v17 = vmax.f32 %v10830_v9, 0.0 }
 0x4e7   : > { %11083 = vrot.lane.b32.xlu1 %v10898_v36, %s14489_s27  ;;  %11081 = vrot.lane.b32.xlu0 %v10897_v34, %s14489_s27  ;;  %v18308_v36 = vpop.f32.mrb[253].mxu1 }
 0x4e8   : > { %19022 = vst [vmem:[#allocation44_spill] sm:$0xff] %v18308_v36  ;;  %v18312_v34 = vpop.f32.mrb[254].mxu1 }
 0x4e9   : > { %v10972_v24 = vpop.permute.xlu1 %10971  ;;  %v10970_v14 = vpop.permute.xlu0 %10969 }
 0x4ea   : > { %11163 = vst.msk [vmem:[%s15350_s22 + $0x8] sm:$0xff] %vm11161_vm7, %v10972_v24  ;;  %11162 = vst.msk [vmem:[%s15350_s22] sm:$0xff] %vm11161_vm7, %v10970_v14  ;;  %v18314_v0 = vpop.f32.mrb[255].mxu1  ;;  %v19023_v24 = vld [vmem:[#allocation30_spill] sm:$0xff]  ;;  %v19024_v14 = vld [vmem:[#allocation27_spill] sm:$0xff] }
 0x4eb   : > { %11087 = vrot.lane.b32.xlu1 %v10900_v60, %s14489_s27  ;;  %11085 = vrot.lane.b32.xlu0 %v10899_v46, %s14489_s27  ;;  %v10838_v57 = vadd.f32 %v19023_v24, %v17998_v54  ;;  %v10835_v36 = vadd.f32 %v19024_v14, %v17998_v54  ;;  %v13273_v54 = vld [vmem:[%s18786_s2] ss:$0 sm:$0xff] }
 0x4ed   : > { %v10976_v33 = vpop.permute.xlu1 %10975  ;;  %v10974_v18 = vpop.permute.xlu0 %10973  ;;  %v10904_v59 = vmax.f32 %v10838_v57, 0.0  ;;  %v10903_v60 = vmax.f32 %v10835_v36, 0.0 }
 0x4ee   : > { %11165 = vst.msk [vmem:[%s15350_s22 + $0x18] sm:$0xff] %vm11161_vm7, %v10976_v33  ;;  %11164 = vst.msk [vmem:[%s15350_s22 + $0x10] sm:$0xff] %vm11161_vm7, %v10974_v18 }
 0x4ef   : > { %11091 = vrot.lane.b32.xlu1 %v10902_v17, %s14489_s27  ;;  %11089 = vrot.lane.b32.xlu0 %v10901_v53, %s14489_s27 }
 0x4f1   : > { %v10980_v46 = vpop.permute.xlu1 %10979  ;;  %v10978_v9 = vpop.permute.xlu0 %10977 }
 0x4f2   : > { %11167 = vst.msk [vmem:[%s15350_s22 + $0x28] sm:$0xff] %vm11161_vm7, %v10980_v46  ;;  %11166 = vst.msk [vmem:[%s15350_s22 + $0x20] sm:$0xff] %vm11161_vm7, %v10978_v9 }
 0x4f3   : > { %11095 = vrot.lane.b32.xlu1 %v10904_v59, %s14489_s27  ;;  %11093 = vrot.lane.b32.xlu0 %v10903_v60, %s14489_s27 }
 0x4f5   : > { %v10984_v18 = vpop.permute.xlu1 %10983  ;;  %v10982_v17 = vpop.permute.xlu0 %10981 }
 0x4f6   : > { %11169 = vst.msk [vmem:[%s15350_s22 + $0x38] sm:$0xff] %vm11161_vm7, %v10984_v18  ;;  %11168 = vst.msk [vmem:[%s15350_s22 + $0x30] sm:$0xff] %vm11161_vm7, %v10982_v17 }
 0x4f7   : > { %11474 = vrot.lane.b32.xlu0 %v13273_v54, %s14493_s23 }
 0x4f9   : > { %v10988_v57 = vpop.permute.xlu1 %10987  ;;  %v10986_v36 = vpop.permute.xlu0 %10985 }
 0x4fa   : > { %11171 = vst.msk [vmem:[%s15350_s22 + $0x48] sm:$0xff] %vm11161_vm7, %v10988_v57  ;;  %11170 = vst.msk [vmem:[%s15350_s22 + $0x40] sm:$0xff] %vm11161_vm7, %v10986_v36 }
 0x4fd   : > { %v10992_v33 = vpop.permute.xlu1 %10991  ;;  %v10990_v53 = vpop.permute.xlu0 %10989 }
 0x4fe   : > { %11173 = vst.msk [vmem:[%s15350_s22 + $0x58] sm:$0xff] %vm11161_vm7, %v10992_v33  ;;  %11172 = vst.msk [vmem:[%s15350_s22 + $0x50] sm:$0xff] %vm11161_vm7, %v10990_v53 }
 0x501   : > { %v10996_v24 = vpop.permute.xlu1 %10995  ;;  %v10994_v14 = vpop.permute.xlu0 %10993 }
 0x502   : > { %11175 = vst.msk [vmem:[%s15350_s22 + $0x68] sm:$0xff] %vm11161_vm7, %v10996_v24  ;;  %11174 = vst.msk [vmem:[%s15350_s22 + $0x60] sm:$0xff] %vm11161_vm7, %v10994_v14 }
 0x505   : > { %v11000_v46 = vpop.permute.xlu1 %10999  ;;  %v10998_v9 = vpop.permute.xlu0 %10997 }
 0x506   : > { %11177 = vst.msk [vmem:[%s15350_s22 + $0x78] sm:$0xff] %vm11161_vm7, %v11000_v46  ;;  %11176 = vst.msk [vmem:[%s15350_s22 + $0x70] sm:$0xff] %vm11161_vm7, %v10998_v9 }
 0x509   : > { %v11004_v59 = vpop.permute.xlu1 %11003  ;;  %v11002_v60 = vpop.permute.xlu0 %11001 }
 0x50a   : > { %11179 = vst.msk [vmem:[%s15350_s22 + $0x88] sm:$0xff] %vm11161_vm7, %v11004_v59  ;;  %11178 = vst.msk [vmem:[%s15350_s22 + $0x80] sm:$0xff] %vm11161_vm7, %v11002_v60 }
 0x50d   : > { %v11008_v54 = vpop.permute.xlu1 %11007  ;;  %v11006_v18 = vpop.permute.xlu0 %11005 }
 0x50e   : > { %11181 = vst.msk [vmem:[%s15350_s22 + $0x98] sm:$0xff] %vm11161_vm7, %v11008_v54  ;;  %11180 = vst.msk [vmem:[%s15350_s22 + $0x90] sm:$0xff] %vm11161_vm7, %v11006_v18 }
 0x511   : > { %v11012_v17 = vpop.permute.xlu1 %11011  ;;  %v11010_v57 = vpop.permute.xlu0 %11009 }
 0x512   : > { %11183 = vst.msk [vmem:[%s15350_s22 + $0xa8] sm:$0xff] %vm11161_vm7, %v11012_v17  ;;  %11182 = vst.msk [vmem:[%s15350_s22 + $0xa0] sm:$0xff] %vm11161_vm7, %v11010_v57 }
 0x515   : > { %v11016_v36 = vpop.permute.xlu1 %11015  ;;  %v11014_v33 = vpop.permute.xlu0 %11013 }
 0x516   : > { %11185 = vst.msk [vmem:[%s15350_s22 + $0xb8] sm:$0xff] %vm11161_vm7, %v11016_v36  ;;  %11184 = vst.msk [vmem:[%s15350_s22 + $0xb0] sm:$0xff] %vm11161_vm7, %v11014_v33 }
 0x519   : > { %v11020_v53 = vpop.permute.xlu1 %11019  ;;  %v11018_v24 = vpop.permute.xlu0 %11017 }
 0x51a   : > { %11187 = vst.msk [vmem:[%s15350_s22 + $0xc8] sm:$0xff] %vm11161_vm7, %v11020_v53  ;;  %11186 = vst.msk [vmem:[%s15350_s22 + $0xc0] sm:$0xff] %vm11161_vm7, %v11018_v24 }
 0x51d   : > { %v11024_v14 = vpop.permute.xlu1 %11023  ;;  %v11022_v46 = vpop.permute.xlu0 %11021 }
 0x51e   : > { %11189 = vst.msk [vmem:[%s15350_s22 + $0xd8] sm:$0xff] %vm11161_vm7, %v11024_v14  ;;  %11188 = vst.msk [vmem:[%s15350_s22 + $0xd0] sm:$0xff] %vm11161_vm7, %v11022_v46 }
 0x521   : > { %v11028_v9 = vpop.permute.xlu1 %11027  ;;  %v11026_v59 = vpop.permute.xlu0 %11025 }
 0x522   : > { %11191 = vst.msk [vmem:[%s15350_s22 + $0xe8] sm:$0xff] %vm11161_vm7, %v11028_v9  ;;  %11190 = vst.msk [vmem:[%s15350_s22 + $0xe0] sm:$0xff] %vm11161_vm7, %v11026_v59 }
 0x525   : > { %v11032_v60 = vpop.permute.xlu1 %11031  ;;  %v11030_v54 = vpop.permute.xlu0 %11029 }
 0x526   : > { %11193 = vst.msk [vmem:[%s15350_s22 + $0xf8] sm:$0xff] %vm11161_vm7, %v11032_v60  ;;  %11192 = vst.msk [vmem:[%s15350_s22 + $0xf0] sm:$0xff] %vm11161_vm7, %v11030_v54 }
 0x529   : > { %v11036_v18 = vpop.permute.xlu1 %11035  ;;  %v11034_v17 = vpop.permute.xlu0 %11033 }
 0x52a   : > { %11195 = vst.msk [vmem:[%s15350_s22 + $0x108] sm:$0xff] %vm11161_vm7, %v11036_v18  ;;  %11194 = vst.msk [vmem:[%s15350_s22 + $0x100] sm:$0xff] %vm11161_vm7, %v11034_v17 }
 0x52d   : > { %v11040_v57 = vpop.permute.xlu1 %11039  ;;  %v11038_v36 = vpop.permute.xlu0 %11037 }
 0x52e   : > { %11197 = vst.msk [vmem:[%s15350_s22 + $0x118] sm:$0xff] %vm11161_vm7, %v11040_v57  ;;  %11196 = vst.msk [vmem:[%s15350_s22 + $0x110] sm:$0xff] %vm11161_vm7, %v11038_v36 }
 0x531   : > { %v11044_v33 = vpop.permute.xlu1 %11043  ;;  %v11042_v53 = vpop.permute.xlu0 %11041 }
 0x532   : > { %11199 = vst.msk [vmem:[%s15350_s22 + $0x128] sm:$0xff] %vm11161_vm7, %v11044_v33  ;;  %11198 = vst.msk [vmem:[%s15350_s22 + $0x120] sm:$0xff] %vm11161_vm7, %v11042_v53 }
 0x535   : > { %v11048_v24 = vpop.permute.xlu1 %11047  ;;  %v11046_v14 = vpop.permute.xlu0 %11045 }
 0x536   : > { %11201 = vst.msk [vmem:[%s15350_s22 + $0x138] sm:$0xff] %vm11161_vm7, %v11048_v24  ;;  %11200 = vst.msk [vmem:[%s15350_s22 + $0x130] sm:$0xff] %vm11161_vm7, %v11046_v14 }
 0x539   : > { %v11052_v46 = vpop.permute.xlu1 %11051  ;;  %v11050_v9 = vpop.permute.xlu0 %11049 }
 0x53a   : > { %11203 = vst.msk [vmem:[%s15350_s22 + $0x148] sm:$0xff] %vm11161_vm7, %v11052_v46  ;;  %11202 = vst.msk [vmem:[%s15350_s22 + $0x140] sm:$0xff] %vm11161_vm7, %v11050_v9 }
 0x53d   : > { %v11056_v59 = vpop.permute.xlu1 %11055  ;;  %v11054_v60 = vpop.permute.xlu0 %11053 }
 0x53e   : > { %11205 = vst.msk [vmem:[%s15350_s22 + $0x158] sm:$0xff] %vm11161_vm7, %v11056_v59  ;;  %11204 = vst.msk [vmem:[%s15350_s22 + $0x150] sm:$0xff] %vm11161_vm7, %v11054_v60 }
 0x541   : > { %v11060_v54 = vpop.permute.xlu1 %11059  ;;  %v11058_v18 = vpop.permute.xlu0 %11057 }
 0x542   : > { %11207 = vst.msk [vmem:[%s15350_s22 + $0x168] sm:$0xff] %vm11161_vm7, %v11060_v54  ;;  %11206 = vst.msk [vmem:[%s15350_s22 + $0x160] sm:$0xff] %vm11161_vm7, %v11058_v18 }
 0x545   : > { %v11064_v17 = vpop.permute.xlu1 %11063  ;;  %v11062_v57 = vpop.permute.xlu0 %11061 }
 0x546   : > { %11209 = vst.msk [vmem:[%s15350_s22 + $0x178] sm:$0xff] %vm11161_vm7, %v11064_v17  ;;  %11208 = vst.msk [vmem:[%s15350_s22 + $0x170] sm:$0xff] %vm11161_vm7, %v11062_v57 }
 0x549   : > { %v11068_v36 = vpop.permute.xlu1 %11067  ;;  %v11066_v33 = vpop.permute.xlu0 %11065 }
 0x54a   : > { %11211 = vst.msk [vmem:[%s15350_s22 + $0x188] sm:$0xff] %vm11161_vm7, %v11068_v36  ;;  %11210 = vst.msk [vmem:[%s15350_s22 + $0x180] sm:$0xff] %vm11161_vm7, %v11066_v33 }
 0x54d   : > { %v11072_v53 = vpop.permute.xlu1 %11071  ;;  %v11070_v24 = vpop.permute.xlu0 %11069 }
 0x54e   : > { %11213 = vst.msk [vmem:[%s15350_s22 + $0x198] sm:$0xff] %vm11161_vm7, %v11072_v53  ;;  %11212 = vst.msk [vmem:[%s15350_s22 + $0x190] sm:$0xff] %vm11161_vm7, %v11070_v24 }
 0x551   : > { %v11076_v14 = vpop.permute.xlu1 %11075  ;;  %v11074_v46 = vpop.permute.xlu0 %11073 }
 0x552   : > { %11215 = vst.msk [vmem:[%s15350_s22 + $0x1a8] sm:$0xff] %vm11161_vm7, %v11076_v14  ;;  %11214 = vst.msk [vmem:[%s15350_s22 + $0x1a0] sm:$0xff] %vm11161_vm7, %v11074_v46 }
 0x555   : > { %v11080_v9 = vpop.permute.xlu1 %11079  ;;  %v11078_v59 = vpop.permute.xlu0 %11077 }
 0x556   : > { %11217 = vst.msk [vmem:[%s15350_s22 + $0x1b8] sm:$0xff] %vm11161_vm7, %v11080_v9  ;;  %11216 = vst.msk [vmem:[%s15350_s22 + $0x1b0] sm:$0xff] %vm11161_vm7, %v11078_v59 }
 0x559   : > { %v11084_v60 = vpop.permute.xlu1 %11083  ;;  %v11082_v54 = vpop.permute.xlu0 %11081 }
 0x55a   : > { %11219 = vst.msk [vmem:[%s15350_s22 + $0x1c8] sm:$0xff] %vm11161_vm7, %v11084_v60  ;;  %11218 = vst.msk [vmem:[%s15350_s22 + $0x1c0] sm:$0xff] %vm11161_vm7, %v11082_v54 }
 0x55d   : > { %v11088_v18 = vpop.permute.xlu1 %11087  ;;  %v11086_v17 = vpop.permute.xlu0 %11085 }
 0x55e   : > { %11221 = vst.msk [vmem:[%s15350_s22 + $0x1d8] sm:$0xff] %vm11161_vm7, %v11088_v18  ;;  %11220 = vst.msk [vmem:[%s15350_s22 + $0x1d0] sm:$0xff] %vm11161_vm7, %v11086_v17 }
 0x561   : > { %v11092_v57 = vpop.permute.xlu1 %11091  ;;  %v11090_v36 = vpop.permute.xlu0 %11089 }
 0x562   : > { %11223 = vst.msk [vmem:[%s15350_s22 + $0x1e8] sm:$0xff] %vm11161_vm7, %v11092_v57  ;;  %11222 = vst.msk [vmem:[%s15350_s22 + $0x1e0] sm:$0xff] %vm11161_vm7, %v11090_v36 }
 0x565   : > { %v11096_v33 = vpop.permute.xlu1 %11095  ;;  %v11094_v53 = vpop.permute.xlu0 %11093 }
 0x566   : > { %11225 = vst.msk [vmem:[%s15350_s22 + $0x1f8] sm:$0xff] %vm11161_vm7, %v11096_v33  ;;  %11224 = vst.msk [vmem:[%s15350_s22 + $0x1f0] sm:$0xff] %vm11161_vm7, %v11094_v53 }
 0x569   : > { %v18452_v24 = vpop.permute.xlu0 %11474 }
 0x56a   : > { %v11611_v14 = vadd.f32 %v18098_v30, %v18452_v24  ;;  %v11608_v46 = vadd.f32 %v18090_v48, %v18452_v24  ;;  %v11619_v60 = vadd.f32 %v18092_v1, %v18452_v24  ;;  %v11616_v54 = vadd.f32 %v18086_v44, %v18452_v24 }
 0x56b   : > { %v11627_v30 = vadd.f32 %v18112_v52, %v18452_v24  ;;  %v11624_v48 = vadd.f32 %v18104_v3, %v18452_v24  ;;  %v11635_v44 = vadd.f32 %v18110_v51, %v18452_v24  ;;  %v11632_v36 = vadd.f32 %v18102_v41, %v18452_v24 }
 0x56c   : > { %v11863_v9 = vmax.f32 %v11611_v14, 0.0  ;;  %v11862_v59 = vmax.f32 %v11608_v46, 0.0  ;;  %v11865_v18 = vmax.f32 %v11619_v60, 0.0  ;;  %v11864_v17 = vmax.f32 %v11616_v54, 0.0 }
 0x56d   : > { %v11867_v1 = vmax.f32 %v11627_v30, 0.0  ;;  %v11866_v57 = vmax.f32 %v11624_v48, 0.0  ;;  %v11869_v52 = vmax.f32 %v11635_v44, 0.0  ;;  %v11868_v33 = vmax.f32 %v11632_v36, 0.0 }
 0x56e   : > { %11992 = vrot.lane.b32.xlu0 %v11863_v9, %s14488_s26  ;;  %11990 = vrot.lane.b32.xlu1 %v11862_v59, %s14488_s26  ;;  %v11643_v3 = vadd.f32 %v18126_v4, %v18452_v24  ;;  %v11640_v53 = vadd.f32 %v18118_v31, %v18452_v24  ;;  %v11651_v41 = vadd.f32 %v18124_v62, %v18452_v24 }
 0x56f   : > { %v11648_v46 = vadd.f32 %v18116_v25, %v18452_v24  ;;  %v11659_v31 = vadd.f32 %v18140_v27, %v18452_v24  ;;  %v11656_v59 = vadd.f32 %v18132_v11, %v18452_v24  ;;  %v11667_v25 = vadd.f32 %v18138_v61, %v18452_v24 }
 0x570   : > { %v11871_v51 = vmax.f32 %v11643_v3, 0.0  ;;  %v11870_v14 = vmax.f32 %v11640_v53, 0.0  ;;  %v11873_v4 = vmax.f32 %v11651_v41, 0.0  ;;  %v11664_v54 = vadd.f32 %v18130_v29, %v18452_v24 }
 0x571   : > { %v11872_v9 = vmax.f32 %v11648_v46, 0.0  ;;  %v11875_v62 = vmax.f32 %v11659_v31, 0.0  ;;  %v11874_v60 = vmax.f32 %v11656_v59, 0.0  ;;  %v11877_v27 = vmax.f32 %v11667_v25, 0.0 }
 0x572   : > { %11996 = vrot.lane.b32.xlu0 %v11865_v18, %s14488_s26  ;;  %11994 = vrot.lane.b32.xlu1 %v11864_v17, %s14488_s26  ;;  %v11876_v18 = vmax.f32 %v11664_v54, 0.0  ;;  %v11675_v11 = vadd.f32 %v18154_v6, %v18452_v24  ;;  %v11672_v17 = vadd.f32 %v18146_v49, %v18452_v24  ;;  %v11683_v29 = vadd.f32 %v18152_v12, %v18452_v24 }
 0x573   : > { %v11680_v48 = vadd.f32 %v18144_v21, %v18452_v24  ;;  %v11691_v49 = vadd.f32 %v18168_v5, %v18452_v24  ;;  %v11699_v21 = vadd.f32 %v18166_v22, %v18452_v24  ;;  %v11696_v36 = vadd.f32 %v18158_v39, %v18452_v24 }
 0x574   : > { %v11879_v61 = vmax.f32 %v11675_v11, 0.0  ;;  %v11878_v30 = vmax.f32 %v11672_v17, 0.0  ;;  %v11881_v6 = vmax.f32 %v11683_v29, 0.0  ;;  %v11715_v39 = vadd.f32 %v18180_v56, %v18452_v24 }
 0x575   : > { %v11883_v12 = vmax.f32 %v11691_v49, 0.0  ;;  %v11885_v5 = vmax.f32 %v11699_v21, 0.0  ;;  %v11712_v53 = vadd.f32 %v18172_v16, %v18452_v24  ;;  %v11731_v16 = vadd.f32 %v18194_v38, %v18452_v24 }
 0x576   : > { %12000 = vrot.lane.b32.xlu0 %v11867_v1, %s14488_s26  ;;  %11998 = vrot.lane.b32.xlu1 %v11866_v57, %s14488_s26  ;;  %v11880_v1 = vmax.f32 %v11680_v48, 0.0  ;;  %v11688_v57 = vadd.f32 %v18160_v15, %v18452_v24  ;;  %v11707_v15 = vadd.f32 %v18182_v50, %v18452_v24  ;;  %v11889_v50 = vmax.f32 %v11715_v39, 0.0  ;;  %v19030_v39 = vld [vmem:[#allocation37_spill] sm:$0xff] }
 0x577   : > { %v11728_v46 = vadd.f32 %v18186_v40, %v18452_v24  ;;  %v11747_v40 = vadd.f32 %v18208_v13, %v18452_v24  ;;  %v11744_v59 = vadd.f32 %v18200_v47, %v18452_v24  ;;  %v11763_v47 = vadd.f32 %v18222_v58, %v18452_v24 }
 0x578   : > { %v11882_v44 = vmax.f32 %v11688_v57, 0.0  ;;  %v11887_v22 = vmax.f32 %v11707_v15, 0.0  ;;  %v11760_v54 = vadd.f32 %v18214_v10, %v18452_v24  ;;  %v11779_v10 = vadd.f32 %v18236_v26, %v18452_v24  ;;  %v19029_v15 = vld [vmem:[#allocation36_spill] sm:$0xff] }
 0x579   : > { %v11776_v17 = vadd.f32 %v18228_v7, %v18452_v24  ;;  %v11795_v7 = vadd.f32 %v18250_v55, %v18452_v24  ;;  %v11792_v48 = vadd.f32 %v18242_v63, %v18452_v24  ;;  %v19026_v63 = vld [vmem:[#allocation34_spill] sm:$0xff] }
 0x57a   : > { %12004 = vrot.lane.b32.xlu0 %v11869_v52, %s14488_s26  ;;  %12002 = vrot.lane.b32.xlu1 %v11868_v33, %s14488_s26  ;;  %v11884_v52 = vmax.f32 %v11696_v36, 0.0  ;;  %v11704_v33 = vadd.f32 %v18174_v43, %v18452_v24  ;;  %v11723_v43 = vadd.f32 %v18196_v32, %v18452_v24  ;;  %v11893_v32 = vmax.f32 %v11731_v16, 0.0  ;;  %v19033_v16 = vld [vmem:[#allocation40_spill] sm:$0xff] }
 0x57c   : > { %v11886_v3 = vmax.f32 %v11704_v33, 0.0  ;;  %v11891_v56 = vmax.f32 %v11723_v43, 0.0  ;;  %v11816_v33 = vadd.f32 %v19029_v15, %v18452_v24 }
 0x57e   : > { %12008 = vrot.lane.b32.xlu0 %v11871_v51, %s14488_s26  ;;  %12006 = vrot.lane.b32.xlu1 %v11870_v14, %s14488_s26  ;;  %v11888_v51 = vmax.f32 %v11712_v53, 0.0  ;;  %v11720_v14 = vadd.f32 %v18188_v37, %v18452_v24  ;;  %v11739_v37 = vadd.f32 %v18210_v28, %v18452_v24  ;;  %v11897_v28 = vmax.f32 %v11747_v40, 0.0 }
 0x57f   : > { %v11827_v53 = vadd.f32 %v19030_v39, %v18452_v24  ;;  %v11851_v40 = vadd.f32 %v18314_v0, %v18452_v24 }
 0x580   : > { %v11890_v41 = vmax.f32 %v11720_v14, 0.0  ;;  %v11895_v38 = vmax.f32 %v11739_v37, 0.0  ;;  %v19034_v37 = vld [vmem:[#allocation41_spill] sm:$0xff] }
 0x581   : > { %v11917_v43 = vmax.f32 %v11827_v53, 0.0  ;;  %v11923_v0 = vmax.f32 %v11851_v40, 0.0 }
 0x582   : > { %12012 = vrot.lane.b32.xlu0 %v11873_v4, %s14488_s26  ;;  %12010 = vrot.lane.b32.xlu1 %v11872_v9, %s14488_s26  ;;  %v11892_v4 = vmax.f32 %v11728_v46, 0.0  ;;  %v11736_v9 = vadd.f32 %v18202_v42, %v18452_v24  ;;  %v11755_v42 = vadd.f32 %v18224_v19, %v18452_v24  ;;  %v11901_v19 = vmax.f32 %v11763_v47, 0.0 }
 0x583   : > { %v11832_v46 = vadd.f32 %v19033_v16, %v18452_v24 }
 0x584   : > { %v11894_v31 = vmax.f32 %v11736_v9, 0.0  ;;  %v11899_v13 = vmax.f32 %v11755_v42, 0.0  ;;  %v11843_v9 = vadd.f32 %v19034_v37, %v18452_v24 }
 0x586   : > { %12016 = vrot.lane.b32.xlu0 %v11875_v62, %s14488_s26  ;;  %12014 = vrot.lane.b32.xlu1 %v11874_v60, %s14488_s26  ;;  %v11896_v62 = vmax.f32 %v11744_v59, 0.0  ;;  %v11752_v60 = vadd.f32 %v18216_v45, %v18452_v24  ;;  %v11771_v45 = vadd.f32 %v18238_v20, %v18452_v24  ;;  %v11905_v20 = vmax.f32 %v11779_v10, 0.0 }
 0x588   : > { %v11898_v25 = vmax.f32 %v11752_v60, 0.0  ;;  %v11903_v58 = vmax.f32 %v11771_v45, 0.0  ;;  %v19036_v60 = vld [vmem:[#allocation44_spill] sm:$0xff] }
 0x58a   : > { %12020 = vrot.lane.b32.xlu0 %v11877_v27, %s14488_s26  ;;  %12018 = vrot.lane.b32.xlu1 %v11876_v18, %s14488_s26  ;;  %v11900_v27 = vmax.f32 %v11760_v54, 0.0  ;;  %v11768_v18 = vadd.f32 %v18230_v23, %v18452_v24  ;;  %v11787_v23 = vadd.f32 %v18252_v8, %v18452_v24  ;;  %v11909_v8 = vmax.f32 %v11795_v7, 0.0 }
 0x58c   : > { %v11902_v11 = vmax.f32 %v11768_v18, 0.0  ;;  %v11907_v26 = vmax.f32 %v11787_v23, 0.0 }
 0x58e   : > { %12024 = vrot.lane.b32.xlu0 %v11879_v61, %s14488_s26  ;;  %12022 = vrot.lane.b32.xlu1 %v11878_v30, %s14488_s26  ;;  %v11904_v61 = vmax.f32 %v11776_v17, 0.0  ;;  %v11784_v30 = vadd.f32 %v18244_v2, %v18452_v24  ;;  %v11803_v2 = vadd.f32 %v18266_v35, %v18452_v24 }
 0x590   : > { %v11906_v29 = vmax.f32 %v11784_v30, 0.0  ;;  %v11911_v55 = vmax.f32 %v11803_v2, 0.0 }
 0x592   : > { %12028 = vrot.lane.b32.xlu0 %v11881_v6, %s14488_s26  ;;  %12026 = vrot.lane.b32.xlu1 %v11880_v1, %s14488_s26  ;;  %v11908_v6 = vmax.f32 %v11792_v48, 0.0  ;;  %v19025_v1 = vld [vmem:[#allocation33_spill] sm:$0xff] }
 0x593   : > { %v11800_v49 = vadd.f32 %v19025_v1, %v18452_v24 }
 0x595   : > { %v11910_v57 = vmax.f32 %v11800_v49, 0.0 }
 0x596   : > { %12032 = vrot.lane.b32.xlu0 %v11883_v12, %s14488_s26  ;;  %12030 = vrot.lane.b32.xlu1 %v11882_v44, %s14488_s26  ;;  %v11811_v12 = vadd.f32 %v19026_v63, %v18452_v24  ;;  %v19027_v44 = vld [vmem:[#allocation32_spill] sm:$0xff] }
 0x597   : > { %v11808_v21 = vadd.f32 %v19027_v44, %v18452_v24 }
 0x598   : > { %v11913_v35 = vmax.f32 %v11811_v12, 0.0 }
 0x599   : > { %v11912_v36 = vmax.f32 %v11808_v21, 0.0 }
 0x59a   : > { %12036 = vrot.lane.b32.xlu0 %v11885_v5, %s14488_s26  ;;  %12034 = vrot.lane.b32.xlu1 %v11884_v52, %s14488_s26  ;;  %v19028_v5 = vld [vmem:[#allocation38_spill] sm:$0xff] }
 0x59b   : > { %v11819_v52 = vadd.f32 %v19028_v5, %v18452_v24 }
 0x59e   : > { %12040 = vrot.lane.b32.xlu0 %v11887_v22, %s14488_s26  ;;  %12038 = vrot.lane.b32.xlu1 %v11886_v3, %s14488_s26  ;;  %v11915_v22 = vmax.f32 %v11819_v52, 0.0  ;;  %v11914_v3 = vmax.f32 %v11816_v33, 0.0 }
 0x5a2   : > { %12044 = vrot.lane.b32.xlu0 %v11889_v50, %s14488_s26  ;;  %12042 = vrot.lane.b32.xlu1 %v11888_v51, %s14488_s26  ;;  %v19031_v50 = vld [vmem:[#allocation35_spill] sm:$0xff] }
 0x5a3   : > { %v11824_v51 = vadd.f32 %v19031_v50, %v18452_v24 }
 0x5a5   : > { %v11916_v14 = vmax.f32 %v11824_v51, 0.0 }
 0x5a6   : > { %12048 = vrot.lane.b32.xlu0 %v11891_v56, %s14488_s26  ;;  %12046 = vrot.lane.b32.xlu1 %v11890_v41, %s14488_s26  ;;  %v19032_v56 = vld [vmem:[#allocation42_spill] sm:$0xff] }
 0x5a7   : > { %v11835_v41 = vadd.f32 %v19032_v56, %v18452_v24 }
 0x5aa   : > { %12052 = vrot.lane.b32.xlu0 %v11893_v32, %s14488_s26  ;;  %12050 = vrot.lane.b32.xlu1 %v11892_v4, %s14488_s26  ;;  %v11919_v32 = vmax.f32 %v11835_v41, 0.0  ;;  %v11918_v4 = vmax.f32 %v11832_v46, 0.0 }
 0x5ae   : > { %12056 = vrot.lane.b32.xlu0 %v11895_v38, %s14488_s26  ;;  %12054 = vrot.lane.b32.xlu1 %v11894_v31, %s14488_s26  ;;  %v19035_v38 = vld [vmem:[#allocation39_spill] sm:$0xff] }
 0x5af   : > { %v11840_v31 = vadd.f32 %v19035_v38, %v18452_v24 }
 0x5b1   : > { %v11920_v42 = vmax.f32 %v11840_v31, 0.0 }
 0x5b2   : > { %12060 = vrot.lane.b32.xlu0 %v11897_v28, %s14488_s26  ;;  %12058 = vrot.lane.b32.xlu1 %v11896_v62, %s14488_s26  ;;  %v11921_v62 = vmax.f32 %v11843_v9, 0.0 }
 0x5b6   : > { %12064 = vrot.lane.b32.xlu0 %v11899_v13, %s14488_s26  ;;  %12062 = vrot.lane.b32.xlu1 %v11898_v25, %s14488_s26  ;;  %v11848_v13 = vadd.f32 %v19036_v60, %v18452_v24 }
 0x5b8   : > { %v11922_v54 = vmax.f32 %v11848_v13, 0.0 }
 0x5ba   : > { %12068 = vrot.lane.b32.xlu0 %v11901_v19, %s14488_s26  ;;  %12066 = vrot.lane.b32.xlu1 %v11900_v27, %s14488_s26  ;;  %v11859_v19 = vadd.f32 %v18312_v34, %v18452_v24  ;;  %v19037_v27 = vld [vmem:[#allocation43_spill] sm:$0xff] }
 0x5bb   : > { %v11856_v45 = vadd.f32 %v19037_v27, %v18452_v24 }
 0x5bd   : > { %v11924_v34 = vmax.f32 %v11856_v45, 0.0 }
 0x5be   : > { %12072 = vrot.lane.b32.xlu0 %v11903_v58, %s14488_s26  ;;  %12070 = vrot.lane.b32.xlu1 %v11902_v11, %s14488_s26  ;;  %v11925_v11 = vmax.f32 %v11859_v19, 0.0 }
 0x5c2   : > { %12076 = vrot.lane.b32.xlu0 %v11905_v20, %s14488_s26  ;;  %12074 = vrot.lane.b32.xlu1 %v11904_v61, %s14488_s26 }
 0x5c6   : > { %12080 = vrot.lane.b32.xlu0 %v11907_v26, %s14488_s26  ;;  %12078 = vrot.lane.b32.xlu1 %v11906_v29, %s14488_s26 }
 0x5ca   : > { %12084 = vrot.lane.b32.xlu0 %v11909_v8, %s14488_s26  ;;  %12082 = vrot.lane.b32.xlu1 %v11908_v6, %s14488_s26 }
 0x5ce   : > { %12088 = vrot.lane.b32.xlu0 %v11911_v55, %s14488_s26  ;;  %12086 = vrot.lane.b32.xlu1 %v11910_v57, %s14488_s26 }
 0x5d2   : > { %12092 = vrot.lane.b32.xlu0 %v11913_v35, %s14488_s26  ;;  %12090 = vrot.lane.b32.xlu1 %v11912_v36, %s14488_s26 }
 0x5d6   : > { %12096 = vrot.lane.b32.xlu0 %v11915_v22, %s14488_s26  ;;  %12094 = vrot.lane.b32.xlu1 %v11914_v3, %s14488_s26 }
 0x5da   : > { %12100 = vrot.lane.b32.xlu0 %v11917_v43, %s14488_s26  ;;  %12098 = vrot.lane.b32.xlu1 %v11916_v14, %s14488_s26 }
 0x5de   : > { %12104 = vrot.lane.b32.xlu0 %v11919_v32, %s14488_s26  ;;  %12102 = vrot.lane.b32.xlu1 %v11918_v4, %s14488_s26 }
 0x5e0   : > { %v11993_v59 = vpop.permute.xlu0 %11992  ;;  %v11991_v28 = vpop.permute.xlu1 %11990 }
 0x5e1   : > { %12184 = vst.msk [vmem:[%s15350_s22 + $0x8] sm:$0xff] %vm12182_vm8, %v11993_v59  ;;  %12183 = vst.msk [vmem:[%s15350_s22] sm:$0xff] %vm12182_vm8, %v11991_v28 }
 0x5e2   : > { %12108 = vrot.lane.b32.xlu0 %v11921_v62, %s14488_s26  ;;  %12106 = vrot.lane.b32.xlu1 %v11920_v42, %s14488_s26 }
 0x5e4   : > { %v11997_v25 = vpop.permute.xlu0 %11996  ;;  %v11995_v47 = vpop.permute.xlu1 %11994 }
 0x5e5   : > { %12186 = vst.msk [vmem:[%s15350_s22 + $0x18] sm:$0xff] %vm12182_vm8, %v11997_v25  ;;  %12185 = vst.msk [vmem:[%s15350_s22 + $0x10] sm:$0xff] %vm12182_vm8, %v11995_v47 }
 0x5e6   : > { %12112 = vrot.lane.b32.xlu0 %v11923_v0, %s14488_s26  ;;  %12110 = vrot.lane.b32.xlu1 %v11922_v54, %s14488_s26 }
 0x5e8   : > { %v12001_v18 = vpop.permute.xlu0 %12000  ;;  %v11999_v58 = vpop.permute.xlu1 %11998 }
 0x5e9   : > { %12188 = vst.msk [vmem:[%s15350_s22 + $0x28] sm:$0xff] %vm12182_vm8, %v12001_v18  ;;  %12187 = vst.msk [vmem:[%s15350_s22 + $0x20] sm:$0xff] %vm12182_vm8, %v11999_v58 }
 0x5ea   : > { %12116 = vrot.lane.b32.xlu0 %v11925_v11, %s14488_s26  ;;  %12114 = vrot.lane.b32.xlu1 %v11924_v34, %s14488_s26 }
 0x5ec   : > { %v12005_v24 = vpop.permute.xlu0 %12004  ;;  %v12003_v10 = vpop.permute.xlu1 %12002 }
 0x5ed   : > { %12190 = vst.msk [vmem:[%s15350_s22 + $0x38] sm:$0xff] %vm12182_vm8, %v12005_v24  ;;  %12189 = vst.msk [vmem:[%s15350_s22 + $0x30] sm:$0xff] %vm12182_vm8, %v12003_v10 }
 0x5f0   : > { %v12009_v17 = vpop.permute.xlu0 %12008  ;;  %v12007_v20 = vpop.permute.xlu1 %12006 }
 0x5f1   : > { %12192 = vst.msk [vmem:[%s15350_s22 + $0x48] sm:$0xff] %vm12182_vm8, %v12009_v17  ;;  %12191 = vst.msk [vmem:[%s15350_s22 + $0x40] sm:$0xff] %vm12182_vm8, %v12007_v20 }
 0x5f4   : > { %v12013_v61 = vpop.permute.xlu0 %12012  ;;  %v12011_v23 = vpop.permute.xlu1 %12010 }
 0x5f5   : > { %12194 = vst.msk [vmem:[%s15350_s22 + $0x58] sm:$0xff] %vm12182_vm8, %v12013_v61  ;;  %12193 = vst.msk [vmem:[%s15350_s22 + $0x50] sm:$0xff] %vm12182_vm8, %v12011_v23 }
 0x5f8   : > { %v12017_v30 = vpop.permute.xlu0 %12016  ;;  %v12015_v26 = vpop.permute.xlu1 %12014 }
 0x5f9   : > { %12196 = vst.msk [vmem:[%s15350_s22 + $0x68] sm:$0xff] %vm12182_vm8, %v12017_v30  ;;  %12195 = vst.msk [vmem:[%s15350_s22 + $0x60] sm:$0xff] %vm12182_vm8, %v12015_v26 }
 0x5fc   : > { %v12021_v29 = vpop.permute.xlu0 %12020  ;;  %v12019_v7 = vpop.permute.xlu1 %12018 }
 0x5fd   : > { %12198 = vst.msk [vmem:[%s15350_s22 + $0x78] sm:$0xff] %vm12182_vm8, %v12021_v29  ;;  %12197 = vst.msk [vmem:[%s15350_s22 + $0x70] sm:$0xff] %vm12182_vm8, %v12019_v7 }
 0x600   : > { %v12025_v48 = vpop.permute.xlu0 %12024  ;;  %v12023_v8 = vpop.permute.xlu1 %12022 }
 0x601   : > { %12200 = vst.msk [vmem:[%s15350_s22 + $0x88] sm:$0xff] %vm12182_vm8, %v12025_v48  ;;  %12199 = vst.msk [vmem:[%s15350_s22 + $0x80] sm:$0xff] %vm12182_vm8, %v12023_v8 }
 0x604   : > { %v12029_v6 = vpop.permute.xlu0 %12028  ;;  %v12027_v2 = vpop.permute.xlu1 %12026 }
 0x605   : > { %12202 = vst.msk [vmem:[%s15350_s22 + $0x98] sm:$0xff] %vm12182_vm8, %v12029_v6  ;;  %12201 = vst.msk [vmem:[%s15350_s22 + $0x90] sm:$0xff] %vm12182_vm8, %v12027_v2 }
 0x608   : > { %v12033_v1 = vpop.permute.xlu0 %12032  ;;  %v12031_v49 = vpop.permute.xlu1 %12030 }
 0x609   : > { %12204 = vst.msk [vmem:[%s15350_s22 + $0xa8] sm:$0xff] %vm12182_vm8, %v12033_v1  ;;  %12203 = vst.msk [vmem:[%s15350_s22 + $0xa0] sm:$0xff] %vm12182_vm8, %v12031_v49 }
 0x60c   : > { %v12037_v55 = vpop.permute.xlu0 %12036  ;;  %v12035_v57 = vpop.permute.xlu1 %12034 }
 0x60d   : > { %12206 = vst.msk [vmem:[%s15350_s22 + $0xb8] sm:$0xff] %vm12182_vm8, %v12037_v55  ;;  %12205 = vst.msk [vmem:[%s15350_s22 + $0xb0] sm:$0xff] %vm12182_vm8, %v12035_v57 }
 0x610   : > { %v12041_v63 = vpop.permute.xlu0 %12040  ;;  %v12039_v12 = vpop.permute.xlu1 %12038 }
 0x611   : > { %12208 = vst.msk [vmem:[%s15350_s22 + $0xc8] sm:$0xff] %vm12182_vm8, %v12041_v63  ;;  %12207 = vst.msk [vmem:[%s15350_s22 + $0xc0] sm:$0xff] %vm12182_vm8, %v12039_v12 }
 0x614   : > { %v12045_v44 = vpop.permute.xlu0 %12044  ;;  %v12043_v21 = vpop.permute.xlu1 %12042 }
 0x615   : > { %12210 = vst.msk [vmem:[%s15350_s22 + $0xd8] sm:$0xff] %vm12182_vm8, %v12045_v44  ;;  %12209 = vst.msk [vmem:[%s15350_s22 + $0xd0] sm:$0xff] %vm12182_vm8, %v12043_v21 }
 0x618   : > { %v12049_v35 = vpop.permute.xlu0 %12048  ;;  %v12047_v36 = vpop.permute.xlu1 %12046 }
 0x619   : > { %12212 = vst.msk [vmem:[%s15350_s22 + $0xe8] sm:$0xff] %vm12182_vm8, %v12049_v35  ;;  %12211 = vst.msk [vmem:[%s15350_s22 + $0xe0] sm:$0xff] %vm12182_vm8, %v12047_v36 }
 0x61c   : > { %v12053_v5 = vpop.permute.xlu0 %12052  ;;  %v12051_v52 = vpop.permute.xlu1 %12050 }
 0x61d   : > { %12214 = vst.msk [vmem:[%s15350_s22 + $0xf8] sm:$0xff] %vm12182_vm8, %v12053_v5  ;;  %12213 = vst.msk [vmem:[%s15350_s22 + $0xf0] sm:$0xff] %vm12182_vm8, %v12051_v52 }
 0x620   : > { %v12057_v15 = vpop.permute.xlu0 %12056  ;;  %v12055_v33 = vpop.permute.xlu1 %12054 }
 0x621   : > { %12216 = vst.msk [vmem:[%s15350_s22 + $0x108] sm:$0xff] %vm12182_vm8, %v12057_v15  ;;  %12215 = vst.msk [vmem:[%s15350_s22 + $0x100] sm:$0xff] %vm12182_vm8, %v12055_v33 }
 0x624   : > { %v12061_v22 = vpop.permute.xlu0 %12060  ;;  %v12059_v3 = vpop.permute.xlu1 %12058 }
 0x625   : > { %12218 = vst.msk [vmem:[%s15350_s22 + $0x118] sm:$0xff] %vm12182_vm8, %v12061_v22  ;;  %12217 = vst.msk [vmem:[%s15350_s22 + $0x110] sm:$0xff] %vm12182_vm8, %v12059_v3 }
 0x628   : > { %v12065_v39 = vpop.permute.xlu0 %12064  ;;  %v12063_v53 = vpop.permute.xlu1 %12062 }
 0x629   : > { %12220 = vst.msk [vmem:[%s15350_s22 + $0x128] sm:$0xff] %vm12182_vm8, %v12065_v39  ;;  %12219 = vst.msk [vmem:[%s15350_s22 + $0x120] sm:$0xff] %vm12182_vm8, %v12063_v53 }
 0x62c   : > { %v12069_v50 = vpop.permute.xlu0 %12068  ;;  %v12067_v51 = vpop.permute.xlu1 %12066 }
 0x62d   : > { %12222 = vst.msk [vmem:[%s15350_s22 + $0x138] sm:$0xff] %vm12182_vm8, %v12069_v50  ;;  %12221 = vst.msk [vmem:[%s15350_s22 + $0x130] sm:$0xff] %vm12182_vm8, %v12067_v51 }
 0x630   : > { %v12073_v43 = vpop.permute.xlu0 %12072  ;;  %v12071_v14 = vpop.permute.xlu1 %12070 }
 0x631   : > { %12224 = vst.msk [vmem:[%s15350_s22 + $0x148] sm:$0xff] %vm12182_vm8, %v12073_v43  ;;  %12223 = vst.msk [vmem:[%s15350_s22 + $0x140] sm:$0xff] %vm12182_vm8, %v12071_v14 }
 0x634   : > { %v12077_v56 = vpop.permute.xlu0 %12076  ;;  %v12075_v41 = vpop.permute.xlu1 %12074 }
 0x635   : > { %12226 = vst.msk [vmem:[%s15350_s22 + $0x158] sm:$0xff] %vm12182_vm8, %v12077_v56  ;;  %12225 = vst.msk [vmem:[%s15350_s22 + $0x150] sm:$0xff] %vm12182_vm8, %v12075_v41 }
 0x638   : > { %v12081_v16 = vpop.permute.xlu0 %12080  ;;  %v12079_v46 = vpop.permute.xlu1 %12078 }
 0x639   : > { %12228 = vst.msk [vmem:[%s15350_s22 + $0x168] sm:$0xff] %vm12182_vm8, %v12081_v16  ;;  %12227 = vst.msk [vmem:[%s15350_s22 + $0x160] sm:$0xff] %vm12182_vm8, %v12079_v46 }
 0x63c   : > { %v12085_v32 = vpop.permute.xlu0 %12084  ;;  %v12083_v4 = vpop.permute.xlu1 %12082 }
 0x63d   : > { %12230 = vst.msk [vmem:[%s15350_s22 + $0x178] sm:$0xff] %vm12182_vm8, %v12085_v32  ;;  %12229 = vst.msk [vmem:[%s15350_s22 + $0x170] sm:$0xff] %vm12182_vm8, %v12083_v4 }
 0x640   : > { %v12089_v37 = vpop.permute.xlu0 %12088  ;;  %v12087_v9 = vpop.permute.xlu1 %12086 }
 0x641   : > { %12232 = vst.msk [vmem:[%s15350_s22 + $0x188] sm:$0xff] %vm12182_vm8, %v12089_v37  ;;  %12231 = vst.msk [vmem:[%s15350_s22 + $0x180] sm:$0xff] %vm12182_vm8, %v12087_v9 }
 0x644   : > { %v12093_v38 = vpop.permute.xlu0 %12092  ;;  %v12091_v31 = vpop.permute.xlu1 %12090 }
 0x645   : > { %12234 = vst.msk [vmem:[%s15350_s22 + $0x198] sm:$0xff] %vm12182_vm8, %v12093_v38  ;;  %12233 = vst.msk [vmem:[%s15350_s22 + $0x190] sm:$0xff] %vm12182_vm8, %v12091_v31 }
 0x648   : > { %v12097_v40 = vpop.permute.xlu0 %12096  ;;  %v12095_v59 = vpop.permute.xlu1 %12094 }
 0x649   : > { %12236 = vst.msk [vmem:[%s15350_s22 + $0x1a8] sm:$0xff] %vm12182_vm8, %v12097_v40  ;;  %12235 = vst.msk [vmem:[%s15350_s22 + $0x1a0] sm:$0xff] %vm12182_vm8, %v12095_v59 }
 0x64c   : > { %v12101_v28 = vpop.permute.xlu0 %12100  ;;  %v12099_v62 = vpop.permute.xlu1 %12098 }
 0x64d   : > { %12238 = vst.msk [vmem:[%s15350_s22 + $0x1b8] sm:$0xff] %vm12182_vm8, %v12101_v28  ;;  %12237 = vst.msk [vmem:[%s15350_s22 + $0x1b0] sm:$0xff] %vm12182_vm8, %v12099_v62 }
 0x650   : > { %v12105_v42 = vpop.permute.xlu0 %12104  ;;  %v12103_v60 = vpop.permute.xlu1 %12102 }
 0x651   : > { %12240 = vst.msk [vmem:[%s15350_s22 + $0x1c8] sm:$0xff] %vm12182_vm8, %v12105_v42  ;;  %12239 = vst.msk [vmem:[%s15350_s22 + $0x1c0] sm:$0xff] %vm12182_vm8, %v12103_v60 }
 0x654   : > { %v12109_v13 = vpop.permute.xlu0 %12108  ;;  %v12107_v0 = vpop.permute.xlu1 %12106 }
 0x655   : > { %12242 = vst.msk [vmem:[%s15350_s22 + $0x1d8] sm:$0xff] %vm12182_vm8, %v12109_v13  ;;  %12241 = vst.msk [vmem:[%s15350_s22 + $0x1d0] sm:$0xff] %vm12182_vm8, %v12107_v0 }
 0x658   : > { %v12113_v25 = vpop.permute.xlu0 %12112  ;;  %v12111_v47 = vpop.permute.xlu1 %12110 }
 0x659   : > { %12244 = vst.msk [vmem:[%s15350_s22 + $0x1e8] sm:$0xff] %vm12182_vm8, %v12113_v25  ;;  %12243 = vst.msk [vmem:[%s15350_s22 + $0x1e0] sm:$0xff] %vm12182_vm8, %v12111_v47 }
 0x65c   : > { %v12117_v54 = vpop.permute.xlu0 %12116  ;;  %v12115_v19 = vpop.permute.xlu1 %12114 }
 0x65d   : > { %12246 = vst.msk [vmem:[%s15350_s22 + $0x1f8] sm:$0xff] %vm12182_vm8, %v12117_v54  ;;  %12245 = vst.msk [vmem:[%s15350_s22 + $0x1f0] sm:$0xff] %vm12182_vm8, %v12115_v19 }
 0x65e PF: > { %p10_p9 = scmp.ge.s32.totalorder %s14532_s16, 4   ;;  %s19038_s12 = smov %s14482_s13 }
 0x65f   : > { %s19039_s13 = smov %s14541_s19  ;;  %s19040_s14 = smov %s14532_s16 }
 0x660   :  { %12 = sbr.rel (!%p10_p9) target bundleno = 2 (0x2), region = 137 }

</bundles_post_ra>
